<compile_context>
chip_gen: v6e
topology: v6e:2x2x1
jax: 0.10.0
libtpu: 0.0.40
codegen_flags: <defaults>
</compile_context>

<pallas_src>
import functools
import math

import jax
import jax.numpy as jnp
from jax.experimental import pallas as pl
from jax.experimental.pallas import tpu as pltpu

_ACT_DTYPE = jnp.bfloat16           # inter-layer activation dtype (MXU-native)


def _round_up(x, m):
    return (x + m - 1) // m * m


def _pick_vmem_limit():
    """v5e/v6e have 128 MiB VMEM -> use 64 MiB scoped; v7x has 64 MiB -> 32."""
    try:
        cap = int(pltpu.get_tpu_info().vmem_capacity_bytes)
        return max(32 * 1024 * 1024, min(64 * 1024 * 1024, cap // 2))
    except Exception:  # pragma: no cover - conservative fallback
        return 32 * 1024 * 1024


_VMEM_LIMIT = _pick_vmem_limit()


# ----------------------------------------------------------------------------
# Pallas kernels
# ----------------------------------------------------------------------------
def _matmul_affine_kernel(x_ref, w_ref, scale_ref, bias_ref, o_ref, *, relu6):
    """o = clip((x @ w) * scale + bias, 0, 6)   (clip only if relu6)."""
    acc = jnp.dot(x_ref[...], w_ref[...], preferred_element_type=jnp.float32)
    y = acc * scale_ref[...] + bias_ref[...]
    if relu6:
        y = jnp.minimum(jnp.maximum(y, 0.0), 6.0)
    o_ref[...] = y.astype(o_ref.dtype)


def _depthwise_to_scratch(tap_fn, dww_ref, dws_ref, dwb_ref, dw_ref, Ho, Wo, C):
    """9-tap depthwise accumulate (f32) + BN + ReLU6, stored bf16 in scratch.

    tap_fn(kh, kw) returns a (1, Ho, Wo, C) bf16 slice; only the live tap is
    widened to f32 (no whole-block upcast)."""
    w = dww_ref[...]                                   # (9, C) f32, loaded once
    acc = jnp.zeros((1, Ho, Wo, C), jnp.float32)
    for kh in range(3):
        for kw in range(3):
            tap = tap_fn(kh, kw).astype(jnp.float32)
            acc = acc + tap * w[kh * 3 + kw, :]
    y = acc * dws_ref[0, :] + dwb_ref[0, :]
    y = jnp.minimum(jnp.maximum(y, 0.0), 6.0).astype(dw_ref.dtype)
    # Row-wise store into the (Ho*Wo, C) scratch (avoids an in-kernel reshape).
    for h in range(Ho):
        dw_ref[h * Wo:(h + 1) * Wo, :] = y[0, h]


def _pointwise_from_scratch(dw_ref, pww_ref, pws_ref, pwb_ref, o_ref):
    """1x1 conv (MXU) on the VMEM-resident depthwise result + BN + ReLU6."""
    acc = jnp.dot(dw_ref[...], pww_ref[...], preferred_element_type=jnp.float32)
    y = acc * pws_ref[...] + pwb_ref[...]
    y = jnp.minimum(jnp.maximum(y, 0.0), 6.0)
    o_ref[0, :, :] = y.astype(o_ref.dtype)


def _fused_block_s1_kernel(x_ref, dww_ref, dws_ref, dwb_ref,
                           pww_ref, pws_ref, pwb_ref, o_ref, dw_ref):
    """Fused depthwise(3x3, s=1) + BN + ReLU6 + pointwise(1x1) + BN + ReLU6."""
    _, Hp, Wp, C = x_ref.shape
    Ho, Wo = Hp - 2, Wp - 2

    @pl.when(pl.program_id(1) == 0)       # depthwise computed once per image
    def _():
        x = x_ref[...]                    # bf16, single resident copy
        _depthwise_to_scratch(
            lambda kh, kw: x[:, kh:kh + Ho, kw:kw + Wo, :],
            dww_ref, dws_ref, dwb_ref, dw_ref, Ho, Wo, C)

    _pointwise_from_scratch(dw_ref, pww_ref, pws_ref, pwb_ref, o_ref)


def _fused_block_s2_kernel(xee_ref, xeo_ref, xoe_ref, xoo_ref,
                           dww_ref, dws_ref, dwb_ref,
                           pww_ref, pws_ref, pwb_ref, o_ref, dw_ref):
    """Fused depthwise(3x3, s=2, via 4 even/odd phase tensors, no overcompute)
    + BN + ReLU6 + pointwise(1x1) + BN + ReLU6."""
    _, Ho, Wo, C = xoo_ref.shape

    @pl.when(pl.program_id(1) == 0)
    def _():
        phases = ((xee_ref[...], xeo_ref[...]),
                  (xoe_ref[...], xoo_ref[...]))      # bf16, loaded once

        def tap(kh, kw):
            ph = phases[kh % 2][kw % 2]
            dh, dw = kh // 2, kw // 2
            return ph[:, dh:dh + Ho, dw:dw + Wo, :]

        _depthwise_to_scratch(tap, dww_ref, dws_ref, dwb_ref, dw_ref, Ho, Wo, C)

    _pointwise_from_scratch(dw_ref, pww_ref, pws_ref, pwb_ref, o_ref)


# ----------------------------------------------------------------------------
# Pallas wrappers
# ----------------------------------------------------------------------------
def matmul_affine(x2d, w, scale, bias, *, relu6, out_dtype=_ACT_DTYPE):
    """(M,K) @ (K,Cout) on the MXU (bf16 in, f32 acc), per-channel affine,
    optional ReLU6.  Tiled over (M rows, Cout) with parallel grid axes."""
    M, K = x2d.shape
    Kw, Cout = w.shape
    assert K == Kw
    xb = x2d.astype(jnp.bfloat16)
    wb = w.astype(jnp.bfloat16)
    scale2d = scale.reshape(1, Cout).astype(jnp.float32)
    bias2d = bias.reshape(1, Cout).astype(jnp.float32)

    TM = 512
    if M > TM:
        Mp, tm = _round_up(M, TM), TM
    else:
        Mp = _round_up(M, 8)            # keep sublane dim unmasked
        tm = Mp
    if Mp != M:
        xb = jnp.pad(xb, ((0, Mp - M), (0, 0)))

    tn = 256 if (Cout % 256 == 0 and Cout > 256) else Cout

    grid = (Mp // tm, Cout // tn)
    kernel = functools.partial(_matmul_affine_kernel, relu6=relu6)
    flops = 2 * Mp * K * Cout
    bytes_accessed = int((Mp * K + K * Cout) * 2
                         + Mp * Cout * jnp.dtype(out_dtype).itemsize
                         + 2 * Cout * 4)

    out = pl.pallas_call(
        kernel,
        out_shape=jax.ShapeDtypeStruct((Mp, Cout), out_dtype),
        grid=grid,
        in_specs=[
            pl.BlockSpec((tm, K), lambda i, j: (i, 0)),
            pl.BlockSpec((K, tn), lambda i, j: (0, j)),
            pl.BlockSpec((1, tn), lambda i, j: (0, j)),
            pl.BlockSpec((1, tn), lambda i, j: (0, j)),
        ],
        out_specs=pl.BlockSpec((tm, tn), lambda i, j: (i, j)),
        compiler_params=pltpu.CompilerParams(
            dimension_semantics=("parallel", "parallel"),
            vmem_limit_bytes=_VMEM_LIMIT),
        cost_estimate=pl.CostEstimate(flops=flops, transcendentals=0,
                                      bytes_accessed=bytes_accessed),
    )(xb, wb, scale2d, bias2d)

    if Mp != M:
        out = out[:M]
    return out


def fused_dw_pw_block(x, dw_w, dw_scale, dw_bias, pw_w, pw_scale, pw_bias,
                      stride):
    """One MobileNet block = depthwise 3x3 (pad=1, stride 1|2) + BN + ReLU6 +
    pointwise 1x1 + BN + ReLU6, fused into a single pallas_call.  The depthwise
    result lives only in a VMEM scratch tile."""
    N, H, W, C = x.shape
    Cout = pw_w.shape[1]
    assert C % 128 == 0 and Cout % 128 == 0

    xb = x.astype(_ACT_DTYPE)
    xp = jnp.pad(xb, ((0, 0), (1, 1), (1, 1), (0, 0)))
    dww = dw_w.astype(jnp.float32)
    dws = dw_scale.reshape(1, C).astype(jnp.float32)
    dwb = dw_bias.reshape(1, C).astype(jnp.float32)
    pww = pw_w.astype(jnp.bfloat16)
    pws = pw_scale.reshape(1, Cout).astype(jnp.float32)
    pwb = pw_bias.reshape(1, Cout).astype(jnp.float32)

    Ho = (H - 1) // stride + 1
    Wo = (W - 1) // stride + 1
    M = Ho * Wo
    tn = Cout if Cout <= 256 else 256
    grid = (N, Cout // tn)

    cparams = pltpu.CompilerParams(
        dimension_semantics=("parallel", "arbitrary"),
        vmem_limit_bytes=_VMEM_LIMIT)
    flops = 2 * N * M * C * (9 + Cout)
    bytes_accessed = int(N * (H + 2) * (W + 2) * C * 2 + C * Cout * 2
                         + N * M * Cout * 2 + 9 * C * 4 + 2 * (C + Cout) * 4)
    cost = pl.CostEstimate(flops=flops, transcendentals=0,
                           bytes_accessed=bytes_accessed)

    w_specs = [
        pl.BlockSpec((9, C), lambda n, j: (0, 0)),
        pl.BlockSpec((1, C), lambda n, j: (0, 0)),
        pl.BlockSpec((1, C), lambda n, j: (0, 0)),
        pl.BlockSpec((C, tn), lambda n, j: (0, j)),
        pl.BlockSpec((1, tn), lambda n, j: (0, j)),
        pl.BlockSpec((1, tn), lambda n, j: (0, j)),
    ]
    out_spec = pl.BlockSpec((1, M, tn), lambda n, j: (n, 0, j))
    scratch = [pltpu.VMEM((M, C), _ACT_DTYPE)]
    out_shape = jax.ShapeDtypeStruct((N, M, Cout), _ACT_DTYPE)

    if stride == 1:
        out = pl.pallas_call(
            _fused_block_s1_kernel,
            out_shape=out_shape, grid=grid,
            in_specs=[pl.BlockSpec((1, H + 2, W + 2, C),
                                   lambda n, j: (n, 0, 0, 0))] + w_specs,
            out_specs=out_spec, scratch_shapes=scratch,
            compiler_params=cparams, cost_estimate=cost,
        )(xp, dww, dws, dwb, pww, pws, pwb)
    else:
        # Even/odd phase decomposition: every tap inside the kernel is a
        # unit-stride slice -> no 4x overcompute + subsample.
        # TODO(synk): build the phases in-kernel with strided pl.ds loads.
        xee = xp[:, 0::2, 0::2, :][:, :Ho + 1, :Wo + 1, :]
        xeo = xp[:, 0::2, 1::2, :][:, :Ho + 1, :Wo, :]
        xoe = xp[:, 1::2, 0::2, :][:, :Ho, :Wo + 1, :]
        xoo = xp[:, 1::2, 1::2, :][:, :Ho, :Wo, :]
        out = pl.pallas_call(
            _fused_block_s2_kernel,
            out_shape=out_shape, grid=grid,
            in_specs=[
                pl.BlockSpec((1, Ho + 1, Wo + 1, C), lambda n, j: (n, 0, 0, 0)),
                pl.BlockSpec((1, Ho + 1, Wo, C), lambda n, j: (n, 0, 0, 0)),
                pl.BlockSpec((1, Ho, Wo + 1, C), lambda n, j: (n, 0, 0, 0)),
                pl.BlockSpec((1, Ho, Wo, C), lambda n, j: (n, 0, 0, 0)),
            ] + w_specs,
            out_specs=out_spec, scratch_shapes=scratch,
            compiler_params=cparams, cost_estimate=cost,
        )(xee, xeo, xoe, xoo, dww, dws, dwb, pww, pws, pwb)

    return out.reshape(N, Ho, Wo, Cout)


def conv3x3_bn_relu6(x, w_hwio, scale, bias, stride):
    """Standard 3x3 conv (pad=1) + BN + ReLU6 via bf16 im2col + fused matmul.
    Used only for the stem; its Cout is pre-padded to 128 lanes."""
    N, H, W, Cin = x.shape
    Cout = w_hwio.shape[-1]
    xp = jnp.pad(x.astype(_ACT_DTYPE), ((0, 0), (1, 1), (1, 1), (0, 0)))
    Ho = (H + 2 - 3) // stride + 1
    Wo = (W + 2 - 3) // stride + 1
    # TODO(synk): build the im2col patches inside the kernel (DMA padded rows
    # into VMEM) instead of materializing (N, Ho, Wo, 9*Cin) in HBM.
    cols = []
    for kh in range(3):
        for kw in range(3):
            cols.append(xp[:, kh:kh + stride * (Ho - 1) + 1:stride,
                           kw:kw + stride * (Wo - 1) + 1:stride, :])
    patches = jnp.concatenate(cols, axis=-1)               # (N, Ho, Wo, 9*Cin)
    K = 9 * Cin
    x2d = patches.reshape(N * Ho * Wo, K)
    wm = w_hwio.reshape(K, Cout)                            # (kh,kw,cin) order
    Kp = _round_up(K, 32)
    if Kp != K:
        x2d = jnp.pad(x2d, ((0, 0), (0, Kp - K)))
        wm = jnp.pad(wm, ((0, Kp - K), (0, 0)))
    out2d = matmul_affine(x2d, wm, scale, bias, relu6=True, out_dtype=_ACT_DTYPE)
    return out2d.reshape(N, Ho, Wo, Cout)


# ----------------------------------------------------------------------------
# Model: parameters + forward
# ----------------------------------------------------------------------------
_DW_CFG = [
    (32, 64, 1), (64, 128, 2), (128, 128, 1), (128, 256, 2), (256, 256, 1),
    (256, 512, 2), (512, 512, 1), (512, 512, 1), (512, 512, 1), (512, 512, 1),
    (512, 512, 1), (512, 1024, 2), (1024, 1024, 1),
]

_BN_SCALE = 1.0 / math.sqrt(1.0 + 1e-5)   # gamma=1, running_var=1, eps=1e-5


def init_params(key, num_classes=2):
    """Weights are built with channel dims zero-padded up to 128 lanes (stem
    Cout 32->128, block-1 64->128).  Padded channels contribute exactly zero
    through every layer (padded pw rows/cols are 0, padded BN scale=1 bias=0)."""

    def xavier(k, shape, fan_in, fan_out):
        std = math.sqrt(2.0 / (fan_in + fan_out))
        return std * jax.random.normal(k, shape, dtype=jnp.float32)

    def bn_affine(c_real, c_pad):
        scale = jnp.concatenate(
            [jnp.full((c_real,), _BN_SCALE, jnp.float32),
             jnp.ones((c_pad - c_real,), jnp.float32)])
        return scale, jnp.zeros((c_pad,), jnp.float32)

    keys = iter(jax.random.split(key, 2 + 2 * len(_DW_CFG)))
    params = {}

    # stem: Conv2d(3, 32, k=3, s=2, p=1), weight HWIO, Cout padded to 128.
    stem_pad = 128
    w = xavier(next(keys), (3, 3, 3, 32), fan_in=3 * 9, fan_out=32 * 9)
    w = jnp.pad(w, ((0, 0), (0, 0), (0, 0), (0, stem_pad - 32)))
    s, b = bn_affine(32, stem_pad)
    params["stem"] = dict(w=w, scale=s, bias=b)

    blocks = []
    for cin, cout, _ in _DW_CFG:
        cin_p, cout_p = max(cin, 128), max(cout, 128)
        dw_w = xavier(next(keys), (9, cin), fan_in=9, fan_out=9)
        dw_w = jnp.pad(dw_w, ((0, 0), (0, cin_p - cin)))
        dw_s, dw_b = bn_affine(cin, cin_p)
        pw_w = xavier(next(keys), (cin, cout), fan_in=cin, fan_out=cout)
        pw_w = jnp.pad(pw_w, ((0, cin_p - cin), (0, cout_p - cout)))
        pw_s, pw_b = bn_affine(cout, cout_p)
        blocks.append(dict(dw_w=dw_w, dw_scale=dw_s, dw_bias=dw_b,
                           pw_w=pw_w, pw_scale=pw_s, pw_bias=pw_b))
    params["blocks"] = blocks

    fc_std = 1.0 / math.sqrt(1024.0)
    params["fc"] = dict(
        w=fc_std * jax.random.normal(next(keys), (1024, num_classes),
                                     jnp.float32),
        b=jnp.zeros((num_classes,), jnp.float32),
    )
    return params


def mobilenetv1_forward(params, x_nchw):
    """x_nchw: (N, 3, H, W) float32, PyTorch layout. Returns (N, num_classes)."""
    x = jnp.transpose(x_nchw, (0, 2, 3, 1))                        # -> NHWC

    p = params["stem"]
    x = conv3x3_bn_relu6(x, p["w"], p["scale"], p["bias"], stride=2)

    for (_, _, stride), p in zip(_DW_CFG, params["blocks"]):
        x = fused_dw_pw_block(x, p["dw_w"], p["dw_scale"], p["dw_bias"],
                              p["pw_w"], p["pw_scale"], p["pw_bias"], stride)

    # AdaptiveAvgPool2d(1) + flatten (reduce in f32)
    feat = jnp.mean(x.astype(jnp.float32), axis=(1, 2))            # (N, 1024)

    # Linear(1024, num_classes): fused matmul kernel; pad Cout to 128 lanes for
    # dense vector stores, then slice back.
    fc = params["fc"]
    num_classes = fc["w"].shape[1]
    c_pad = _round_up(max(num_classes, 128), 128)
    w_pad = jnp.pad(fc["w"], ((0, 0), (0, c_pad - num_classes)))
    b_pad = jnp.pad(fc["b"], ((0, c_pad - num_classes),))
    logits = matmul_affine(feat, w_pad, jnp.ones((c_pad,), jnp.float32),
                           b_pad, relu6=False, out_dtype=jnp.float32)
    return logits[:, :num_classes]


# ----------------------------------------------------------------------------
if __name__ == "__main__":
    key = jax.random.PRNGKey(0)
    pkey, xkey = jax.random.split(key)

    params = init_params(pkey, num_classes=2)
    # PyTorch-style NCHW input; small shape consistent with the module.
    x = jax.random.normal(xkey, (2, 3, 16, 16), dtype=jnp.float32)

    forward = jax.jit(mobilenetv1_forward)
    logits = jax.block_until_ready(forward(params, x))

    assert logits.shape == (2, 2), logits.shape
    assert bool(jnp.all(jnp.isfinite(logits)))
    print("KERNEL_OK")
</pallas_src>

<mosaic_0001>
module attributes {stable_mosaic.version = 11 : i64} {
  func.func @_matmul_affine_kernel(%arg0: i32, %arg1: i32, %arg2: memref<128x32xbf16, #tpu.memory_space<vmem>>, %arg3: memref<32x128xbf16, #tpu.memory_space<vmem>>, %arg4: memref<1x128xf32, #tpu.memory_space<vmem>>, %arg5: memref<1x128xf32, #tpu.memory_space<vmem>>, %arg6: memref<128x128xbf16, #tpu.memory_space<vmem>>) attributes {dimension_semantics = [#tpu.dimension_semantics<parallel>, #tpu.dimension_semantics<parallel>], iteration_bounds = array<i64: 1, 1>, scalar_prefetch = 0 : i64, scratch_operands = 0 : i64, tpu.core_type = #tpu.core_type<tc>, window_params = [{transform_indices = @transform_0, window_bounds = array<i64: 128, 32>}, {transform_indices = @transform_1, window_bounds = array<i64: 32, 128>}, {transform_indices = @transform_2, window_bounds = array<i64: 1, 128>}, {transform_indices = @transform_3, window_bounds = array<i64: 1, 128>}, {transform_indices = @transform_4, window_bounds = array<i64: 128, 128>}]} {
    %c0 = arith.constant 0 : index
    %c0_0 = arith.constant 0 : index
    %0 = vector.load %arg2[%c0, %c0_0] : memref<128x32xbf16, #tpu.memory_space<vmem>>, vector<128x32xbf16>
    %c0_1 = arith.constant 0 : index
    %c0_2 = arith.constant 0 : index
    %1 = vector.load %arg3[%c0_1, %c0_2] : memref<32x128xbf16, #tpu.memory_space<vmem>>, vector<32x128xbf16>
    %cst = arith.constant dense<0.000000e+00> : vector<128x128xf32>
    %2 = tpu.matmul %0, %1, %cst {dimension_numbers = #tpu.dot_dimension_numbers<[1], [0], [0], [1], [0, 0, 1, 1], [], []>} : vector<128x32xbf16>, vector<32x128xbf16>, vector<128x128xf32> -> vector<128x128xf32>
    %c0_3 = arith.constant 0 : index
    %c0_4 = arith.constant 0 : index
    %3 = vector.load %arg4[%c0_3, %c0_4] : memref<1x128xf32, #tpu.memory_space<vmem>>, vector<1x128xf32>
    %4 = vector.broadcast %3 : vector<1x128xf32> to vector<128x128xf32>
    %5 = arith.mulf %2, %4 : vector<128x128xf32>
    %c0_5 = arith.constant 0 : index
    %c0_6 = arith.constant 0 : index
    %6 = vector.load %arg5[%c0_5, %c0_6] : memref<1x128xf32, #tpu.memory_space<vmem>>, vector<1x128xf32>
    %7 = vector.broadcast %6 : vector<1x128xf32> to vector<128x128xf32>
    %8 = arith.addf %5, %7 : vector<128x128xf32>
    %cst_7 = arith.constant 0.000000e+00 : f32
    %9 = vector.broadcast %cst_7 : f32 to vector<128x128xf32>
    %10 = arith.maximumf %8, %9 : vector<128x128xf32>
    %cst_8 = arith.constant 6.000000e+00 : f32
    %11 = vector.broadcast %cst_8 : f32 to vector<128x128xf32>
    %12 = arith.minimumf %10, %11 : vector<128x128xf32>
    %13 = arith.truncf %12 : vector<128x128xf32> to vector<128x128xbf16>
    %c0_9 = arith.constant 0 : index
    %c0_10 = arith.constant 0 : index
    %14 = vector.load %arg6[%c0_9, %c0_10] : memref<128x128xbf16, #tpu.memory_space<vmem>>, vector<128x128xbf16>
    tpu.vector_store %arg6[%c0_9, %c0_10], %13 {strides = array<i32>} : memref<128x128xbf16, #tpu.memory_space<vmem>>, vector<128x128xbf16>,
    return
  }
  func.func @transform_0(%arg0: i32, %arg1: i32) -> (i32, i32) {
    %c0_i32 = arith.constant 0 : i32
    %c0_i32_0 = arith.constant 0 : i32
    return %arg0, %c0_i32 : i32, i32
  }
  func.func @transform_1(%arg0: i32, %arg1: i32) -> (i32, i32) {
    %c0_i32 = arith.constant 0 : i32
    %c0_i32_0 = arith.constant 0 : i32
    return %c0_i32, %arg1 : i32, i32
  }
  func.func @transform_2(%arg0: i32, %arg1: i32) -> (i32, i32) {
    %c0_i32 = arith.constant 0 : i32
    %c0_i32_0 = arith.constant 0 : i32
    return %c0_i32, %arg1 : i32, i32
  }
  func.func @transform_3(%arg0: i32, %arg1: i32) -> (i32, i32) {
    %c0_i32 = arith.constant 0 : i32
    %c0_i32_0 = arith.constant 0 : i32
    return %c0_i32, %arg1 : i32, i32
  }
  func.func @transform_4(%arg0: i32, %arg1: i32) -> (i32, i32) {
    %c0_i32 = arith.constant 0 : i32
    return %arg0, %arg1 : i32, i32
  }
}

module attributes {stable_mosaic.version = 11 : i64} {
  func.func @_fused_block_s1_kernel(%arg0: i32, %arg1: i32, %arg2: memref<1x10x10x128xbf16, #tpu.memory_space<vmem>>, %arg3: memref<9x128xf32, #tpu.memory_space<vmem>>, %arg4: memref<1x128xf32, #tpu.memory_space<vmem>>, %arg5: memref<1x128xf32, #tpu.memory_space<vmem>>, %arg6: memref<128x128xbf16, #tpu.memory_space<vmem>>, %arg7: memref<1x128xf32, #tpu.memory_space<vmem>>, %arg8: memref<1x128xf32, #tpu.memory_space<vmem>>, %arg9: memref<1x64x128xbf16, #tpu.memory_space<vmem>>, %arg10: memref<64x128xbf16, #tpu.memory_space<vmem>>) attributes {dimension_semantics = [#tpu.dimension_semantics<parallel>, #tpu.dimension_semantics<arbitrary>], iteration_bounds = array<i64: 2, 1>, scalar_prefetch = 0 : i64, scratch_operands = 1 : i64, tpu.core_type = #tpu.core_type<tc>, window_params = [{transform_indices = @transform_0, window_bounds = array<i64: 1, 10, 10, 128>}, {pipeline_mode = #tpu.pipeline_mode<synchronous>, transform_indices = @transform_1, window_bounds = array<i64: 9, 128>}, {pipeline_mode = #tpu.pipeline_mode<synchronous>, transform_indices = @transform_2, window_bounds = array<i64: 1, 128>}, {pipeline_mode = #tpu.pipeline_mode<synchronous>, transform_indices = @transform_3, window_bounds = array<i64: 1, 128>}, {transform_indices = @transform_4, window_bounds = array<i64: 128, 128>}, {transform_indices = @transform_5, window_bounds = array<i64: 1, 128>}, {transform_indices = @transform_6, window_bounds = array<i64: 1, 128>}, {transform_indices = @transform_7, window_bounds = array<i64: 1, 64, 128>}]} {
    %c0_i32 = arith.constant 0 : i32
    %0 = arith.cmpi eq, %arg1, %c0_i32 : i32
    %1 = arith.extui %0 : i1 to i32
    %c0_i32_0 = arith.constant 0 : i32
    %2 = arith.cmpi ne, %1, %c0_i32_0 : i32
    scf.if %2 {
      %c0_13 = arith.constant 0 : index
      %c0_14 = arith.constant 0 : index
      %c0_15 = arith.constant 0 : index
      %c0_16 = arith.constant 0 : index
      %20 = vector.load %arg2[%c0_13, %c0_14, %c0_15, %c0_16] : memref<1x10x10x128xbf16, #tpu.memory_space<vmem>>, vector<1x10x10x128xbf16>
      %c0_17 = arith.constant 0 : index
      %c0_18 = arith.constant 0 : index
      %21 = vector.load %arg3[%c0_17, %c0_18] : memref<9x128xf32, #tpu.memory_space<vmem>>, vector<9x128xf32>
      %cst_19 = arith.constant 0.000000e+00 : f32
      %22 = vector.broadcast %cst_19 : f32 to vector<1x8x8x128xf32>
      %23 = vector.extract_strided_slice %20 {offsets = [0, 0, 0, 0], sizes = [1, 8, 8, 128], strides = [1, 1, 1, 1]} : vector<1x10x10x128xbf16> to vector<1x8x8x128xbf16>
      %24 = arith.extf %23 : vector<1x8x8x128xbf16> to vector<1x8x8x128xf32>
      %25 = vector.extract_strided_slice %21 {offsets = [0, 0], sizes = [1, 128], strides = [1, 1]} : vector<9x128xf32> to vector<1x128xf32>
      %26 = vector.shape_cast %25 : vector<1x128xf32> to vector<128xf32>
      %27 = vector.shape_cast %26 : vector<128xf32> to vector<1x1x1x128xf32>
      %28 = vector.broadcast %27 : vector<1x1x1x128xf32> to vector<1x8x8x128xf32>
      %29 = arith.mulf %24, %28 : vector<1x8x8x128xf32>
      %30 = arith.addf %22, %29 : vector<1x8x8x128xf32>
      %31 = vector.extract_strided_slice %20 {offsets = [0, 0, 1, 0], sizes = [1, 8, 8, 128], strides = [1, 1, 1, 1]} : vector<1x10x10x128xbf16> to vector<1x8x8x128xbf16>
      %32 = arith.extf %31 : vector<1x8x8x128xbf16> to vector<1x8x8x128xf32>
      %33 = vector.extract_strided_slice %21 {offsets = [1, 0], sizes = [1, 128], strides = [1, 1]} : vector<9x128xf32> to vector<1x128xf32>
      %34 = vector.shape_cast %33 : vector<1x128xf32> to vector<128xf32>
      %35 = vector.shape_cast %34 : vector<128xf32> to vector<1x1x1x128xf32>
      %36 = vector.broadcast %35 : vector<1x1x1x128xf32> to vector<1x8x8x128xf32>
      %37 = arith.mulf %32, %36 : vector<1x8x8x128xf32>
      %38 = arith.addf %30, %37 : vector<1x8x8x128xf32>
      %39 = vector.extract_strided_slice %20 {offsets = [0, 0, 2, 0], sizes = [1, 8, 8, 128], strides = [1, 1, 1, 1]} : vector<1x10x10x128xbf16> to vector<1x8x8x128xbf16>
      %40 = arith.extf %39 : vector<1x8x8x128xbf16> to vector<1x8x8x128xf32>
      %41 = vector.extract_strided_slice %21 {offsets = [2, 0], sizes = [1, 128], strides = [1, 1]} : vector<9x128xf32> to vector<1x128xf32>
      %42 = vector.shape_cast %41 : vector<1x128xf32> to vector<128xf32>
      %43 = vector.shape_cast %42 : vector<128xf32> to vector<1x1x1x128xf32>
      %44 = vector.broadcast %43 : vector<1x1x1x128xf32> to vector<1x8x8x128xf32>
      %45 = arith.mulf %40, %44 : vector<1x8x8x128xf32>
      %46 = arith.addf %38, %45 : vector<1x8x8x128xf32>
      %47 = vector.extract_strided_slice %20 {offsets = [0, 1, 0, 0], sizes = [1, 8, 8, 128], strides = [1, 1, 1, 1]} : vector<1x10x10x128xbf16> to vector<1x8x8x128xbf16>
      %48 = arith.extf %47 : vector<1x8x8x128xbf16> to vector<1x8x8x128xf32>
      %49 = vector.extract_strided_slice %21 {offsets = [3, 0], sizes = [1, 128], strides = [1, 1]} : vector<9x128xf32> to vector<1x128xf32>
      %50 = vector.shape_cast %49 : vector<1x128xf32> to vector<128xf32>
      %51 = vector.shape_cast %50 : vector<128xf32> to vector<1x1x1x128xf32>
      %52 = vector.broadcast %51 : vector<1x1x1x128xf32> to vector<1x8x8x128xf32>
      %53 = arith.mulf %48, %52 : vector<1x8x8x128xf32>
      %54 = arith.addf %46, %53 : vector<1x8x8x128xf32>
      %55 = vector.extract_strided_slice %20 {offsets = [0, 1, 1, 0], sizes = [1, 8, 8, 128], strides = [1, 1, 1, 1]} : vector<1x10x10x128xbf16> to vector<1x8x8x128xbf16>
      %56 = arith.extf %55 : vector<1x8x8x128xbf16> to vector<1x8x8x128xf32>
      %57 = vector.extract_strided_slice %21 {offsets = [4, 0], sizes = [1, 128], strides = [1, 1]} : vector<9x128xf32> to vector<1x128xf32>
      %58 = vector.shape_cast %57 : vector<1x128xf32> to vector<128xf32>
      %59 = vector.shape_cast %58 : vector<128xf32> to vector<1x1x1x128xf32>
      %60 = vector.broadcast %59 : vector<1x1x1x128xf32> to vector<1x8x8x128xf32>
      %61 = arith.mulf %56, %60 : vector<1x8x8x128xf32>
      %62 = arith.addf %54, %61 : vector<1x8x8x128xf32>
      %63 = vector.extract_strided_slice %20 {offsets = [0, 1, 2, 0], sizes = [1, 8, 8, 128], strides = [1, 1, 1, 1]} : vector<1x10x10x128xbf16> to vector<1x8x8x128xbf16>
      %64 = arith.extf %63 : vector<1x8x8x128xbf16> to vector<1x8x8x128xf32>
      %65 = vector.extract_strided_slice %21 {offsets = [5, 0], sizes = [1, 128], strides = [1, 1]} : vector<9x128xf32> to vector<1x128xf32>
      %66 = vector.shape_cast %65 : vector<1x128xf32> to vector<128xf32>
      %67 = vector.shape_cast %66 : vector<128xf32> to vector<1x1x1x128xf32>
      %68 = vector.broadcast %67 : vector<1x1x1x128xf32> to vector<1x8x8x128xf32>
      %69 = arith.mulf %64, %68 : vector<1x8x8x128xf32>
      %70 = arith.addf %62, %69 : vector<1x8x8x128xf32>
      %71 = vector.extract_strided_slice %20 {offsets = [0, 2, 0, 0], sizes = [1, 8, 8, 128], strides = [1, 1, 1, 1]} : vector<1x10x10x128xbf16> to vector<1x8x8x128xbf16>
      %72 = arith.extf %71 : vector<1x8x8x128xbf16> to vector<1x8x8x128xf32>
      %73 = vector.extract_strided_slice %21 {offsets = [6, 0], sizes = [1, 128], strides = [1, 1]} : vector<9x128xf32> to vector<1x128xf32>
      %74 = vector.shape_cast %73 : vector<1x128xf32> to vector<128xf32>
      %75 = vector.shape_cast %74 : vector<128xf32> to vector<1x1x1x128xf32>
      %76 = vector.broadcast %75 : vector<1x1x1x128xf32> to vector<1x8x8x128xf32>
      %77 = arith.mulf %72, %76 : vector<1x8x8x128xf32>
      %78 = arith.addf %70, %77 : vector<1x8x8x128xf32>
      %79 = vector.extract_strided_slice %20 {offsets = [0, 2, 1, 0], sizes = [1, 8, 8, 128], strides = [1, 1, 1, 1]} : vector<1x10x10x128xbf16> to vector<1x8x8x128xbf16>
      %80 = arith.extf %79 : vector<1x8x8x128xbf16> to vector<1x8x8x128xf32>
      %81 = vector.extract_strided_slice %21 {offsets = [7, 0], sizes = [1, 128], strides = [1, 1]} : vector<9x128xf32> to vector<1x128xf32>
      %82 = vector.shape_cast %81 : vector<1x128xf32> to vector<128xf32>
      %83 = vector.shape_cast %82 : vector<128xf32> to vector<1x1x1x128xf32>
      %84 = vector.broadcast %83 : vector<1x1x1x128xf32> to vector<1x8x8x128xf32>
      %85 = arith.mulf %80, %84 : vector<1x8x8x128xf32>
      %86 = arith.addf %78, %85 : vector<1x8x8x128xf32>
      %87 = vector.extract_strided_slice %20 {offsets = [0, 2, 2, 0], sizes = [1, 8, 8, 128], strides = [1, 1, 1, 1]} : vector<1x10x10x128xbf16> to vector<1x8x8x128xbf16>
      %88 = arith.extf %87 : vector<1x8x8x128xbf16> to vector<1x8x8x128xf32>
      %89 = vector.extract_strided_slice %21 {offsets = [8, 0], sizes = [1, 128], strides = [1, 1]} : vector<9x128xf32> to vector<1x128xf32>
      %90 = vector.shape_cast %89 : vector<1x128xf32> to vector<128xf32>
      %91 = vector.shape_cast %90 : vector<128xf32> to vector<1x1x1x128xf32>
      %92 = vector.broadcast %91 : vector<1x1x1x128xf32> to vector<1x8x8x128xf32>
      %93 = arith.mulf %88, %92 : vector<1x8x8x128xf32>
      %94 = arith.addf %86, %93 : vector<1x8x8x128xf32>
      %c0_20 = arith.constant 0 : index
      %c0_21 = arith.constant 0 : index
      %95 = vector.load %arg4[%c0_20, %c0_21] : memref<1x128xf32, #tpu.memory_space<vmem>>, vector<1x128xf32>
      %96 = vector.shape_cast %95 : vector<1x128xf32> to vector<128xf32>
      %97 = vector.shape_cast %96 : vector<128xf32> to vector<1x1x1x128xf32>
      %98 = vector.broadcast %97 : vector<1x1x1x128xf32> to vector<1x8x8x128xf32>
      %99 = arith.mulf %94, %98 : vector<1x8x8x128xf32>
      %c0_22 = arith.constant 0 : index
      %c0_23 = arith.constant 0 : index
      %100 = vector.load %arg5[%c0_22, %c0_23] : memref<1x128xf32, #tpu.memory_space<vmem>>, vector<1x128xf32>
      %101 = vector.shape_cast %100 : vector<1x128xf32> to vector<128xf32>
      %102 = vector.shape_cast %101 : vector<128xf32> to vector<1x1x1x128xf32>
      %103 = vector.broadcast %102 : vector<1x1x1x128xf32> to vector<1x8x8x128xf32>
      %104 = arith.addf %99, %103 : vector<1x8x8x128xf32>
      %cst_24 = arith.constant 0.000000e+00 : f32
      %105 = vector.broadcast %cst_24 : f32 to vector<1x8x8x128xf32>
      %106 = arith.maximumf %104, %105 : vector<1x8x8x128xf32>
      %cst_25 = arith.constant 6.000000e+00 : f32
      %107 = vector.broadcast %cst_25 : f32 to vector<1x8x8x128xf32>
      %108 = arith.minimumf %106, %107 : vector<1x8x8x128xf32>
      %109 = arith.truncf %108 : vector<1x8x8x128xf32> to vector<1x8x8x128xbf16>
      %110 = vector.extract_strided_slice %109 {offsets = [0, 0, 0, 0], sizes = [1, 1, 8, 128], strides = [1, 1, 1, 1]} : vector<1x8x8x128xbf16> to vector<1x1x8x128xbf16>
      %111 = vector.shape_cast %110 : vector<1x1x8x128xbf16> to vector<8x128xbf16>
      %c0_26 = arith.constant 0 : index
      %c0_27 = arith.constant 0 : index
      %112 = vector.load %arg10[%c0_26, %c0_27] : memref<64x128xbf16, #tpu.memory_space<vmem>>, vector<8x128xbf16>
      tpu.vector_store %arg10[%c0_26, %c0_27], %111 {strides = array<i32>} : memref<64x128xbf16, #tpu.memory_space<vmem>>, vector<8x128xbf16>,
      %113 = vector.extract_strided_slice %109 {offsets = [0, 1, 0, 0], sizes = [1, 1, 8, 128], strides = [1, 1, 1, 1]} : vector<1x8x8x128xbf16> to vector<1x1x8x128xbf16>
      %114 = vector.shape_cast %113 : vector<1x1x8x128xbf16> to vector<8x128xbf16>
      %c8 = arith.constant 8 : index
      %c0_28 = arith.constant 0 : index
      %115 = vector.load %arg10[%c8, %c0_28] : memref<64x128xbf16, #tpu.memory_space<vmem>>, vector<8x128xbf16>
      tpu.vector_store %arg10[%c8, %c0_28], %114 {strides = array<i32>} : memref<64x128xbf16, #tpu.memory_space<vmem>>, vector<8x128xbf16>,
      %116 = vector.extract_strided_slice %109 {offsets = [0, 2, 0, 0], sizes = [1, 1, 8, 128], strides = [1, 1, 1, 1]} : vector<1x8x8x128xbf16> to vector<1x1x8x128xbf16>
      %117 = vector.shape_cast %116 : vector<1x1x8x128xbf16> to vector<8x128xbf16>
      %c16 = arith.constant 16 : index
      %c0_29 = arith.constant 0 : index
      %118 = vector.load %arg10[%c16, %c0_29] : memref<64x128xbf16, #tpu.memory_space<vmem>>, vector<8x128xbf16>
      tpu.vector_store %arg10[%c16, %c0_29], %117 {strides = array<i32>} : memref<64x128xbf16, #tpu.memory_space<vmem>>, vector<8x128xbf16>,
      %119 = vector.extract_strided_slice %109 {offsets = [0, 3, 0, 0], sizes = [1, 1, 8, 128], strides = [1, 1, 1, 1]} : vector<1x8x8x128xbf16> to vector<1x1x8x128xbf16>
      %120 = vector.shape_cast %119 : vector<1x1x8x128xbf16> to vector<8x128xbf16>
      %c24 = arith.constant 24 : index
      %c0_30 = arith.constant 0 : index
      %121 = vector.load %arg10[%c24, %c0_30] : memref<64x128xbf16, #tpu.memory_space<vmem>>, vector<8x128xbf16>
      tpu.vector_store %arg10[%c24, %c0_30], %120 {strides = array<i32>} : memref<64x128xbf16, #tpu.memory_space<vmem>>, vector<8x128xbf16>,
      %122 = vector.extract_strided_slice %109 {offsets = [0, 4, 0, 0], sizes = [1, 1, 8, 128], strides = [1, 1, 1, 1]} : vector<1x8x8x128xbf16> to vector<1x1x8x128xbf16>
      %123 = vector.shape_cast %122 : vector<1x1x8x128xbf16> to vector<8x128xbf16>
      %c32 = arith.constant 32 : index
      %c0_31 = arith.constant 0 : index
      %124 = vector.load %arg10[%c32, %c0_31] : memref<64x128xbf16, #tpu.memory_space<vmem>>, vector<8x128xbf16>
      tpu.vector_store %arg10[%c32, %c0_31], %123 {strides = array<i32>} : memref<64x128xbf16, #tpu.memory_space<vmem>>, vector<8x128xbf16>,
      %125 = vector.extract_strided_slice %109 {offsets = [0, 5, 0, 0], sizes = [1, 1, 8, 128], strides = [1, 1, 1, 1]} : vector<1x8x8x128xbf16> to vector<1x1x8x128xbf16>
      %126 = vector.shape_cast %125 : vector<1x1x8x128xbf16> to vector<8x128xbf16>
      %c40 = arith.constant 40 : index
      %c0_32 = arith.constant 0 : index
      %127 = vector.load %arg10[%c40, %c0_32] : memref<64x128xbf16, #tpu.memory_space<vmem>>, vector<8x128xbf16>
      tpu.vector_store %arg10[%c40, %c0_32], %126 {strides = array<i32>} : memref<64x128xbf16, #tpu.memory_space<vmem>>, vector<8x128xbf16>,
      %128 = vector.extract_strided_slice %109 {offsets = [0, 6, 0, 0], sizes = [1, 1, 8, 128], strides = [1, 1, 1, 1]} : vector<1x8x8x128xbf16> to vector<1x1x8x128xbf16>
      %129 = vector.shape_cast %128 : vector<1x1x8x128xbf16> to vector<8x128xbf16>
      %c48 = arith.constant 48 : index
      %c0_33 = arith.constant 0 : index
      %130 = vector.load %arg10[%c48, %c0_33] : memref<64x128xbf16, #tpu.memory_space<vmem>>, vector<8x128xbf16>
      tpu.vector_store %arg10[%c48, %c0_33], %129 {strides = array<i32>} : memref<64x128xbf16, #tpu.memory_space<vmem>>, vector<8x128xbf16>,
      %131 = vector.extract_strided_slice %109 {offsets = [0, 7, 0, 0], sizes = [1, 1, 8, 128], strides = [1, 1, 1, 1]} : vector<1x8x8x128xbf16> to vector<1x1x8x128xbf16>
      %132 = vector.shape_cast %131 : vector<1x1x8x128xbf16> to vector<8x128xbf16>
      %c56 = arith.constant 56 : index
      %c0_34 = arith.constant 0 : index
      %133 = vector.load %arg10[%c56, %c0_34] : memref<64x128xbf16, #tpu.memory_space<vmem>>, vector<8x128xbf16>
      tpu.vector_store %arg10[%c56, %c0_34], %132 {strides = array<i32>} : memref<64x128xbf16, #tpu.memory_space<vmem>>, vector<8x128xbf16>,
    } else {
    }
    %c0 = arith.constant 0 : index
    %c0_1 = arith.constant 0 : index
    %3 = vector.load %arg10[%c0, %c0_1] : memref<64x128xbf16, #tpu.memory_space<vmem>>, vector<64x128xbf16>
    %c0_2 = arith.constant 0 : index
    %c0_3 = arith.constant 0 : index
    %4 = vector.load %arg6[%c0_2, %c0_3] : memref<128x128xbf16, #tpu.memory_space<vmem>>, vector<128x128xbf16>
    %cst = arith.constant dense<0.000000e+00> : vector<64x128xf32>
    %5 = tpu.matmul %3, %4, %cst {dimension_numbers = #tpu.dot_dimension_numbers<[1], [0], [0], [1], [0, 0, 1, 1], [], []>} : vector<64x128xbf16>, vector<128x128xbf16>, vector<64x128xf32> -> vector<64x128xf32>
    %c0_4 = arith.constant 0 : index
    %c0_5 = arith.constant 0 : index
    %6 = vector.load %arg7[%c0_4, %c0_5] : memref<1x128xf32, #tpu.memory_space<vmem>>, vector<1x128xf32>
    %7 = vector.broadcast %6 : vector<1x128xf32> to vector<64x128xf32>
    %8 = arith.mulf %5, %7 : vector<64x128xf32>
    %c0_6 = arith.constant 0 : index
    %c0_7 = arith.constant 0 : index
    %9 = vector.load %arg8[%c0_6, %c0_7] : memref<1x128xf32, #tpu.memory_space<vmem>>, vector<1x128xf32>
    %10 = vector.broadcast %9 : vector<1x128xf32> to vector<64x128xf32>
    %11 = arith.addf %8, %10 : vector<64x128xf32>
    %cst_8 = arith.constant 0.000000e+00 : f32
    %12 = vector.broadcast %cst_8 : f32 to vector<64x128xf32>
    %13 = arith.maximumf %11, %12 : vector<64x128xf32>
    %cst_9 = arith.constant 6.000000e+00 : f32
    %14 = vector.broadcast %cst_9 : f32 to vector<64x128xf32>
    %15 = arith.minimumf %13, %14 : vector<64x128xf32>
    %16 = arith.truncf %15 : vector<64x128xf32> to vector<64x128xbf16>
    %c0_10 = arith.constant 0 : index
    %c0_11 = arith.constant 0 : index
    %c0_12 = arith.constant 0 : index
    %17 = vector.load %arg9[%c0_10, %c0_11, %c0_12] : memref<1x64x128xbf16, #tpu.memory_space<vmem>>, vector<1x64x128xbf16>
    %18 = vector.shape_cast %17 : vector<1x64x128xbf16> to vector<64x128xbf16>
    %19 = vector.shape_cast %16 : vector<64x128xbf16> to vector<1x64x128xbf16>
    tpu.vector_store %arg9[%c0_10, %c0_11, %c0_12], %19 {strides = array<i32>} : memref<1x64x128xbf16, #tpu.memory_space<vmem>>, vector<1x64x128xbf16>,
    return
  }
  func.func @transform_0(%arg0: i32, %arg1: i32) -> (i32, i32, i32, i32) {
    %c0_i32 = arith.constant 0 : i32
    %c0_i32_0 = arith.constant 0 : i32
    %c0_i32_1 = arith.constant 0 : i32
    %c0_i32_2 = arith.constant 0 : i32
    return %arg0, %c0_i32, %c0_i32_0, %c0_i32_1 : i32, i32, i32, i32
  }
  func.func @transform_1(%arg0: i32, %arg1: i32) -> (i32, i32) {
    %c0_i32 = arith.constant 0 : i32
    %c0_i32_0 = arith.constant 0 : i32
    %c0_i32_1 = arith.constant 0 : i32
    return %c0_i32, %c0_i32_0 : i32, i32
  }
  func.func @transform_2(%arg0: i32, %arg1: i32) -> (i32, i32) {
    %c0_i32 = arith.constant 0 : i32
    %c0_i32_0 = arith.constant 0 : i32
    %c0_i32_1 = arith.constant 0 : i32
    return %c0_i32, %c0_i32_0 : i32, i32
  }
  func.func @transform_3(%arg0: i32, %arg1: i32) -> (i32, i32) {
    %c0_i32 = arith.constant 0 : i32
    %c0_i32_0 = arith.constant 0 : i32
    %c0_i32_1 = arith.constant 0 : i32
    return %c0_i32, %c0_i32_0 : i32, i32
  }
  func.func @transform_4(%arg0: i32, %arg1: i32) -> (i32, i32) {
    %c0_i32 = arith.constant 0 : i32
    %c0_i32_0 = arith.constant 0 : i32
    return %c0_i32, %arg1 : i32, i32
  }
  func.func @transform_5(%arg0: i32, %arg1: i32) -> (i32, i32) {
    %c0_i32 = arith.constant 0 : i32
    %c0_i32_0 = arith.constant 0 : i32
    return %c0_i32, %arg1 : i32, i32
  }
  func.func @transform_6(%arg0: i32, %arg1: i32) -> (i32, i32) {
    %c0_i32 = arith.constant 0 : i32
    %c0_i32_0 = arith.constant 0 : i32
    return %c0_i32, %arg1 : i32, i32
  }
  func.func @transform_7(%arg0: i32, %arg1: i32) -> (i32, i32, i32) {
    %c0_i32 = arith.constant 0 : i32
    %c0_i32_0 = arith.constant 0 : i32
    return %arg0, %c0_i32, %arg1 : i32, i32, i32
  }
}

module attributes {stable_mosaic.version = 11 : i64} {
  func.func @_fused_block_s2_kernel(%arg0: i32, %arg1: i32, %arg2: memref<1x5x5x128xbf16, #tpu.memory_space<vmem>>, %arg3: memref<1x5x4x128xbf16, #tpu.memory_space<vmem>>, %arg4: memref<1x4x5x128xbf16, #tpu.memory_space<vmem>>, %arg5: memref<1x4x4x128xbf16, #tpu.memory_space<vmem>>, %arg6: memref<9x128xf32, #tpu.memory_space<vmem>>, %arg7: memref<1x128xf32, #tpu.memory_space<vmem>>, %arg8: memref<1x128xf32, #tpu.memory_space<vmem>>, %arg9: memref<128x128xbf16, #tpu.memory_space<vmem>>, %arg10: memref<1x128xf32, #tpu.memory_space<vmem>>, %arg11: memref<1x128xf32, #tpu.memory_space<vmem>>, %arg12: memref<1x16x128xbf16, #tpu.memory_space<vmem>>, %arg13: memref<16x128xbf16, #tpu.memory_space<vmem>>) attributes {dimension_semantics = [#tpu.dimension_semantics<parallel>, #tpu.dimension_semantics<arbitrary>], iteration_bounds = array<i64: 2, 1>, scalar_prefetch = 0 : i64, scratch_operands = 1 : i64, tpu.core_type = #tpu.core_type<tc>, window_params = [{transform_indices = @transform_0, window_bounds = array<i64: 1, 5, 5, 128>}, {transform_indices = @transform_1, window_bounds = array<i64: 1, 5, 4, 128>}, {transform_indices = @transform_2, window_bounds = array<i64: 1, 4, 5, 128>}, {transform_indices = @transform_3, window_bounds = array<i64: 1, 4, 4, 128>}, {pipeline_mode = #tpu.pipeline_mode<synchronous>, transform_indices = @transform_4, window_bounds = array<i64: 9, 128>}, {pipeline_mode = #tpu.pipeline_mode<synchronous>, transform_indices = @transform_5, window_bounds = array<i64: 1, 128>}, {pipeline_mode = #tpu.pipeline_mode<synchronous>, transform_indices = @transform_6, window_bounds = array<i64: 1, 128>}, {transform_indices = @transform_7, window_bounds = array<i64: 128, 128>}, {transform_indices = @transform_8, window_bounds = array<i64: 1, 128>}, {transform_indices = @transform_9, window_bounds = array<i64: 1, 128>}, {transform_indices = @transform_10, window_bounds = array<i64: 1, 16, 128>}]} {
    %c0_i32 = arith.constant 0 : i32
    %0 = arith.cmpi eq, %arg1, %c0_i32 : i32
    %1 = arith.extui %0 : i1 to i32
    %c0_i32_0 = arith.constant 0 : i32
    %2 = arith.cmpi ne, %1, %c0_i32_0 : i32
    scf.if %2 {
      %c0_13 = arith.constant 0 : index
      %c0_14 = arith.constant 0 : index
      %c0_15 = arith.constant 0 : index
      %c0_16 = arith.constant 0 : index
      %20 = vector.load %arg2[%c0_13, %c0_14, %c0_15, %c0_16] : memref<1x5x5x128xbf16, #tpu.memory_space<vmem>>, vector<1x5x5x128xbf16>
      %c0_17 = arith.constant 0 : index
      %c0_18 = arith.constant 0 : index
      %c0_19 = arith.constant 0 : index
      %c0_20 = arith.constant 0 : index
      %21 = vector.load %arg3[%c0_17, %c0_18, %c0_19, %c0_20] : memref<1x5x4x128xbf16, #tpu.memory_space<vmem>>, vector<1x5x4x128xbf16>
      %c0_21 = arith.constant 0 : index
      %c0_22 = arith.constant 0 : index
      %c0_23 = arith.constant 0 : index
      %c0_24 = arith.constant 0 : index
      %22 = vector.load %arg4[%c0_21, %c0_22, %c0_23, %c0_24] : memref<1x4x5x128xbf16, #tpu.memory_space<vmem>>, vector<1x4x5x128xbf16>
      %c0_25 = arith.constant 0 : index
      %c0_26 = arith.constant 0 : index
      %c0_27 = arith.constant 0 : index
      %c0_28 = arith.constant 0 : index
      %23 = vector.load %arg5[%c0_25, %c0_26, %c0_27, %c0_28] : memref<1x4x4x128xbf16, #tpu.memory_space<vmem>>, vector<1x4x4x128xbf16>
      %c0_29 = arith.constant 0 : index
      %c0_30 = arith.constant 0 : index
      %24 = vector.load %arg6[%c0_29, %c0_30] : memref<9x128xf32, #tpu.memory_space<vmem>>, vector<9x128xf32>
      %cst_31 = arith.constant 0.000000e+00 : f32
      %25 = vector.broadcast %cst_31 : f32 to vector<1x4x4x128xf32>
      %26 = vector.extract_strided_slice %20 {offsets = [0, 0, 0, 0], sizes = [1, 4, 4, 128], strides = [1, 1, 1, 1]} : vector<1x5x5x128xbf16> to vector<1x4x4x128xbf16>
      %27 = arith.extf %26 : vector<1x4x4x128xbf16> to vector<1x4x4x128xf32>
      %28 = vector.extract_strided_slice %24 {offsets = [0, 0], sizes = [1, 128], strides = [1, 1]} : vector<9x128xf32> to vector<1x128xf32>
      %29 = vector.shape_cast %28 : vector<1x128xf32> to vector<128xf32>
      %30 = vector.shape_cast %29 : vector<128xf32> to vector<1x1x1x128xf32>
      %31 = vector.broadcast %30 : vector<1x1x1x128xf32> to vector<1x4x4x128xf32>
      %32 = arith.mulf %27, %31 : vector<1x4x4x128xf32>
      %33 = arith.addf %25, %32 : vector<1x4x4x128xf32>
      %34 = vector.extract_strided_slice %21 {offsets = [0, 0, 0, 0], sizes = [1, 4, 4, 128], strides = [1, 1, 1, 1]} : vector<1x5x4x128xbf16> to vector<1x4x4x128xbf16>
      %35 = arith.extf %34 : vector<1x4x4x128xbf16> to vector<1x4x4x128xf32>
      %36 = vector.extract_strided_slice %24 {offsets = [1, 0], sizes = [1, 128], strides = [1, 1]} : vector<9x128xf32> to vector<1x128xf32>
      %37 = vector.shape_cast %36 : vector<1x128xf32> to vector<128xf32>
      %38 = vector.shape_cast %37 : vector<128xf32> to vector<1x1x1x128xf32>
      %39 = vector.broadcast %38 : vector<1x1x1x128xf32> to vector<1x4x4x128xf32>
      %40 = arith.mulf %35, %39 : vector<1x4x4x128xf32>
      %41 = arith.addf %33, %40 : vector<1x4x4x128xf32>
      %42 = vector.extract_strided_slice %20 {offsets = [0, 0, 1, 0], sizes = [1, 4, 4, 128], strides = [1, 1, 1, 1]} : vector<1x5x5x128xbf16> to vector<1x4x4x128xbf16>
      %43 = arith.extf %42 : vector<1x4x4x128xbf16> to vector<1x4x4x128xf32>
      %44 = vector.extract_strided_slice %24 {offsets = [2, 0], sizes = [1, 128], strides = [1, 1]} : vector<9x128xf32> to vector<1x128xf32>
      %45 = vector.shape_cast %44 : vector<1x128xf32> to vector<128xf32>
      %46 = vector.shape_cast %45 : vector<128xf32> to vector<1x1x1x128xf32>
      %47 = vector.broadcast %46 : vector<1x1x1x128xf32> to vector<1x4x4x128xf32>
      %48 = arith.mulf %43, %47 : vector<1x4x4x128xf32>
      %49 = arith.addf %41, %48 : vector<1x4x4x128xf32>
      %50 = vector.extract_strided_slice %22 {offsets = [0, 0, 0, 0], sizes = [1, 4, 4, 128], strides = [1, 1, 1, 1]} : vector<1x4x5x128xbf16> to vector<1x4x4x128xbf16>
      %51 = arith.extf %50 : vector<1x4x4x128xbf16> to vector<1x4x4x128xf32>
      %52 = vector.extract_strided_slice %24 {offsets = [3, 0], sizes = [1, 128], strides = [1, 1]} : vector<9x128xf32> to vector<1x128xf32>
      %53 = vector.shape_cast %52 : vector<1x128xf32> to vector<128xf32>
      %54 = vector.shape_cast %53 : vector<128xf32> to vector<1x1x1x128xf32>
      %55 = vector.broadcast %54 : vector<1x1x1x128xf32> to vector<1x4x4x128xf32>
      %56 = arith.mulf %51, %55 : vector<1x4x4x128xf32>
      %57 = arith.addf %49, %56 : vector<1x4x4x128xf32>
      %58 = arith.extf %23 : vector<1x4x4x128xbf16> to vector<1x4x4x128xf32>
      %59 = vector.extract_strided_slice %24 {offsets = [4, 0], sizes = [1, 128], strides = [1, 1]} : vector<9x128xf32> to vector<1x128xf32>
      %60 = vector.shape_cast %59 : vector<1x128xf32> to vector<128xf32>
      %61 = vector.shape_cast %60 : vector<128xf32> to vector<1x1x1x128xf32>
      %62 = vector.broadcast %61 : vector<1x1x1x128xf32> to vector<1x4x4x128xf32>
      %63 = arith.mulf %58, %62 : vector<1x4x4x128xf32>
      %64 = arith.addf %57, %63 : vector<1x4x4x128xf32>
      %65 = vector.extract_strided_slice %22 {offsets = [0, 0, 1, 0], sizes = [1, 4, 4, 128], strides = [1, 1, 1, 1]} : vector<1x4x5x128xbf16> to vector<1x4x4x128xbf16>
      %66 = arith.extf %65 : vector<1x4x4x128xbf16> to vector<1x4x4x128xf32>
      %67 = vector.extract_strided_slice %24 {offsets = [5, 0], sizes = [1, 128], strides = [1, 1]} : vector<9x128xf32> to vector<1x128xf32>
      %68 = vector.shape_cast %67 : vector<1x128xf32> to vector<128xf32>
      %69 = vector.shape_cast %68 : vector<128xf32> to vector<1x1x1x128xf32>
      %70 = vector.broadcast %69 : vector<1x1x1x128xf32> to vector<1x4x4x128xf32>
      %71 = arith.mulf %66, %70 : vector<1x4x4x128xf32>
      %72 = arith.addf %64, %71 : vector<1x4x4x128xf32>
      %73 = vector.extract_strided_slice %20 {offsets = [0, 1, 0, 0], sizes = [1, 4, 4, 128], strides = [1, 1, 1, 1]} : vector<1x5x5x128xbf16> to vector<1x4x4x128xbf16>
      %74 = arith.extf %73 : vector<1x4x4x128xbf16> to vector<1x4x4x128xf32>
      %75 = vector.extract_strided_slice %24 {offsets = [6, 0], sizes = [1, 128], strides = [1, 1]} : vector<9x128xf32> to vector<1x128xf32>
      %76 = vector.shape_cast %75 : vector<1x128xf32> to vector<128xf32>
      %77 = vector.shape_cast %76 : vector<128xf32> to vector<1x1x1x128xf32>
      %78 = vector.broadcast %77 : vector<1x1x1x128xf32> to vector<1x4x4x128xf32>
      %79 = arith.mulf %74, %78 : vector<1x4x4x128xf32>
      %80 = arith.addf %72, %79 : vector<1x4x4x128xf32>
      %81 = vector.extract_strided_slice %21 {offsets = [0, 1, 0, 0], sizes = [1, 4, 4, 128], strides = [1, 1, 1, 1]} : vector<1x5x4x128xbf16> to vector<1x4x4x128xbf16>
      %82 = arith.extf %81 : vector<1x4x4x128xbf16> to vector<1x4x4x128xf32>
      %83 = vector.extract_strided_slice %24 {offsets = [7, 0], sizes = [1, 128], strides = [1, 1]} : vector<9x128xf32> to vector<1x128xf32>
      %84 = vector.shape_cast %83 : vector<1x128xf32> to vector<128xf32>
      %85 = vector.shape_cast %84 : vector<128xf32> to vector<1x1x1x128xf32>
      %86 = vector.broadcast %85 : vector<1x1x1x128xf32> to vector<1x4x4x128xf32>
      %87 = arith.mulf %82, %86 : vector<1x4x4x128xf32>
      %88 = arith.addf %80, %87 : vector<1x4x4x128xf32>
      %89 = vector.extract_strided_slice %20 {offsets = [0, 1, 1, 0], sizes = [1, 4, 4, 128], strides = [1, 1, 1, 1]} : vector<1x5x5x128xbf16> to vector<1x4x4x128xbf16>
      %90 = arith.extf %89 : vector<1x4x4x128xbf16> to vector<1x4x4x128xf32>
      %91 = vector.extract_strided_slice %24 {offsets = [8, 0], sizes = [1, 128], strides = [1, 1]} : vector<9x128xf32> to vector<1x128xf32>
      %92 = vector.shape_cast %91 : vector<1x128xf32> to vector<128xf32>
      %93 = vector.shape_cast %92 : vector<128xf32> to vector<1x1x1x128xf32>
      %94 = vector.broadcast %93 : vector<1x1x1x128xf32> to vector<1x4x4x128xf32>
      %95 = arith.mulf %90, %94 : vector<1x4x4x128xf32>
      %96 = arith.addf %88, %95 : vector<1x4x4x128xf32>
      %c0_32 = arith.constant 0 : index
      %c0_33 = arith.constant 0 : index
      %97 = vector.load %arg7[%c0_32, %c0_33] : memref<1x128xf32, #tpu.memory_space<vmem>>, vector<1x128xf32>
      %98 = vector.shape_cast %97 : vector<1x128xf32> to vector<128xf32>
      %99 = vector.shape_cast %98 : vector<128xf32> to vector<1x1x1x128xf32>
      %100 = vector.broadcast %99 : vector<1x1x1x128xf32> to vector<1x4x4x128xf32>
      %101 = arith.mulf %96, %100 : vector<1x4x4x128xf32>
      %c0_34 = arith.constant 0 : index
      %c0_35 = arith.constant 0 : index
      %102 = vector.load %arg8[%c0_34, %c0_35] : memref<1x128xf32, #tpu.memory_space<vmem>>, vector<1x128xf32>
      %103 = vector.shape_cast %102 : vector<1x128xf32> to vector<128xf32>
      %104 = vector.shape_cast %103 : vector<128xf32> to vector<1x1x1x128xf32>
      %105 = vector.broadcast %104 : vector<1x1x1x128xf32> to vector<1x4x4x128xf32>
      %106 = arith.addf %101, %105 : vector<1x4x4x128xf32>
      %cst_36 = arith.constant 0.000000e+00 : f32
      %107 = vector.broadcast %cst_36 : f32 to vector<1x4x4x128xf32>
      %108 = arith.maximumf %106, %107 : vector<1x4x4x128xf32>
      %cst_37 = arith.constant 6.000000e+00 : f32
      %109 = vector.broadcast %cst_37 : f32 to vector<1x4x4x128xf32>
      %110 = arith.minimumf %108, %109 : vector<1x4x4x128xf32>
      %111 = arith.truncf %110 : vector<1x4x4x128xf32> to vector<1x4x4x128xbf16>
      %112 = vector.extract_strided_slice %111 {offsets = [0, 0, 0, 0], sizes = [1, 1, 4, 128], strides = [1, 1, 1, 1]} : vector<1x4x4x128xbf16> to vector<1x1x4x128xbf16>
      %113 = vector.shape_cast %112 : vector<1x1x4x128xbf16> to vector<4x128xbf16>
      %c0_38 = arith.constant 0 : index
      %c0_39 = arith.constant 0 : index
      %114 = vector.load %arg13[%c0_38, %c0_39] : memref<16x128xbf16, #tpu.memory_space<vmem>>, vector<4x128xbf16>
      tpu.vector_store %arg13[%c0_38, %c0_39], %113 {strides = array<i32>} : memref<16x128xbf16, #tpu.memory_space<vmem>>, vector<4x128xbf16>,
      %115 = vector.extract_strided_slice %111 {offsets = [0, 1, 0, 0], sizes = [1, 1, 4, 128], strides = [1, 1, 1, 1]} : vector<1x4x4x128xbf16> to vector<1x1x4x128xbf16>
      %116 = vector.shape_cast %115 : vector<1x1x4x128xbf16> to vector<4x128xbf16>
      %c4 = arith.constant 4 : index
      %c0_40 = arith.constant 0 : index
      %117 = vector.load %arg13[%c4, %c0_40] : memref<16x128xbf16, #tpu.memory_space<vmem>>, vector<4x128xbf16>
      tpu.vector_store %arg13[%c4, %c0_40], %116 {strides = array<i32>} : memref<16x128xbf16, #tpu.memory_space<vmem>>, vector<4x128xbf16>,
      %118 = vector.extract_strided_slice %111 {offsets = [0, 2, 0, 0], sizes = [1, 1, 4, 128], strides = [1, 1, 1, 1]} : vector<1x4x4x128xbf16> to vector<1x1x4x128xbf16>
      %119 = vector.shape_cast %118 : vector<1x1x4x128xbf16> to vector<4x128xbf16>
      %c8 = arith.constant 8 : index
      %c0_41 = arith.constant 0 : index
      %120 = vector.load %arg13[%c8, %c0_41] : memref<16x128xbf16, #tpu.memory_space<vmem>>, vector<4x128xbf16>
      tpu.vector_store %arg13[%c8, %c0_41], %119 {strides = array<i32>} : memref<16x128xbf16, #tpu.memory_space<vmem>>, vector<4x128xbf16>,
      %121 = vector.extract_strided_slice %111 {offsets = [0, 3, 0, 0], sizes = [1, 1, 4, 128], strides = [1, 1, 1, 1]} : vector<1x4x4x128xbf16> to vector<1x1x4x128xbf16>
      %122 = vector.shape_cast %121 : vector<1x1x4x128xbf16> to vector<4x128xbf16>
      %c12 = arith.constant 12 : index
      %c0_42 = arith.constant 0 : index
      %123 = vector.load %arg13[%c12, %c0_42] : memref<16x128xbf16, #tpu.memory_space<vmem>>, vector<4x128xbf16>
      tpu.vector_store %arg13[%c12, %c0_42], %122 {strides = array<i32>} : memref<16x128xbf16, #tpu.memory_space<vmem>>, vector<4x128xbf16>,
    } else {
    }
    %c0 = arith.constant 0 : index
    %c0_1 = arith.constant 0 : index
    %3 = vector.load %arg13[%c0, %c0_1] : memref<16x128xbf16, #tpu.memory_space<vmem>>, vector<16x128xbf16>
    %c0_2 = arith.constant 0 : index
    %c0_3 = arith.constant 0 : index
    %4 = vector.load %arg9[%c0_2, %c0_3] : memref<128x128xbf16, #tpu.memory_space<vmem>>, vector<128x128xbf16>
    %cst = arith.constant dense<0.000000e+00> : vector<16x128xf32>
    %5 = tpu.matmul %3, %4, %cst {dimension_numbers = #tpu.dot_dimension_numbers<[1], [0], [0], [1], [0, 0, 1, 1], [], []>} : vector<16x128xbf16>, vector<128x128xbf16>, vector<16x128xf32> -> vector<16x128xf32>
    %c0_4 = arith.constant 0 : index
    %c0_5 = arith.constant 0 : index
    %6 = vector.load %arg10[%c0_4, %c0_5] : memref<1x128xf32, #tpu.memory_space<vmem>>, vector<1x128xf32>
    %7 = vector.broadcast %6 : vector<1x128xf32> to vector<16x128xf32>
    %8 = arith.mulf %5, %7 : vector<16x128xf32>
    %c0_6 = arith.constant 0 : index
    %c0_7 = arith.constant 0 : index
    %9 = vector.load %arg11[%c0_6, %c0_7] : memref<1x128xf32, #tpu.memory_space<vmem>>, vector<1x128xf32>
    %10 = vector.broadcast %9 : vector<1x128xf32> to vector<16x128xf32>
    %11 = arith.addf %8, %10 : vector<16x128xf32>
    %cst_8 = arith.constant 0.000000e+00 : f32
    %12 = vector.broadcast %cst_8 : f32 to vector<16x128xf32>
    %13 = arith.maximumf %11, %12 : vector<16x128xf32>
    %cst_9 = arith.constant 6.000000e+00 : f32
    %14 = vector.broadcast %cst_9 : f32 to vector<16x128xf32>
    %15 = arith.minimumf %13, %14 : vector<16x128xf32>
    %16 = arith.truncf %15 : vector<16x128xf32> to vector<16x128xbf16>
    %c0_10 = arith.constant 0 : index
    %c0_11 = arith.constant 0 : index
    %c0_12 = arith.constant 0 : index
    %17 = vector.load %arg12[%c0_10, %c0_11, %c0_12] : memref<1x16x128xbf16, #tpu.memory_space<vmem>>, vector<1x16x128xbf16>
    %18 = vector.shape_cast %17 : vector<1x16x128xbf16> to vector<16x128xbf16>
    %19 = vector.shape_cast %16 : vector<16x128xbf16> to vector<1x16x128xbf16>
    tpu.vector_store %arg12[%c0_10, %c0_11, %c0_12], %19 {strides = array<i32>} : memref<1x16x128xbf16, #tpu.memory_space<vmem>>, vector<1x16x128xbf16>,
    return
  }
  func.func @transform_0(%arg0: i32, %arg1: i32) -> (i32, i32, i32, i32) {
    %c0_i32 = arith.constant 0 : i32
    %c0_i32_0 = arith.constant 0 : i32
    %c0_i32_1 = arith.constant 0 : i32
    %c0_i32_2 = arith.constant 0 : i32
    return %arg0, %c0_i32, %c0_i32_0, %c0_i32_1 : i32, i32, i32, i32
  }
  func.func @transform_1(%arg0: i32, %arg1: i32) -> (i32, i32, i32, i32) {
    %c0_i32 = arith.constant 0 : i32
    %c0_i32_0 = arith.constant 0 : i32
    %c0_i32_1 = arith.constant 0 : i32
    %c0_i32_2 = arith.constant 0 : i32
    return %arg0, %c0_i32, %c0_i32_0, %c0_i32_1 : i32, i32, i32, i32
  }
  func.func @transform_2(%arg0: i32, %arg1: i32) -> (i32, i32, i32, i32) {
    %c0_i32 = arith.constant 0 : i32
    %c0_i32_0 = arith.constant 0 : i32
    %c0_i32_1 = arith.constant 0 : i32
    %c0_i32_2 = arith.constant 0 : i32
    return %arg0, %c0_i32, %c0_i32_0, %c0_i32_1 : i32, i32, i32, i32
  }
  func.func @transform_3(%arg0: i32, %arg1: i32) -> (i32, i32, i32, i32) {
    %c0_i32 = arith.constant 0 : i32
    %c0_i32_0 = arith.constant 0 : i32
    %c0_i32_1 = arith.constant 0 : i32
    %c0_i32_2 = arith.constant 0 : i32
    return %arg0, %c0_i32, %c0_i32_0, %c0_i32_1 : i32, i32, i32, i32
  }
  func.func @transform_4(%arg0: i32, %arg1: i32) -> (i32, i32) {
    %c0_i32 = arith.constant 0 : i32
    %c0_i32_0 = arith.constant 0 : i32
    %c0_i32_1 = arith.constant 0 : i32
    return %c0_i32, %c0_i32_0 : i32, i32
  }
  func.func @transform_5(%arg0: i32, %arg1: i32) -> (i32, i32) {
    %c0_i32 = arith.constant 0 : i32
    %c0_i32_0 = arith.constant 0 : i32
    %c0_i32_1 = arith.constant 0 : i32
    return %c0_i32, %c0_i32_0 : i32, i32
  }
  func.func @transform_6(%arg0: i32, %arg1: i32) -> (i32, i32) {
    %c0_i32 = arith.constant 0 : i32
    %c0_i32_0 = arith.constant 0 : i32
    %c0_i32_1 = arith.constant 0 : i32
    return %c0_i32, %c0_i32_0 : i32, i32
  }
  func.func @transform_7(%arg0: i32, %arg1: i32) -> (i32, i32) {
    %c0_i32 = arith.constant 0 : i32
    %c0_i32_0 = arith.constant 0 : i32
    return %c0_i32, %arg1 : i32, i32
  }
  func.func @transform_8(%arg0: i32, %arg1: i32) -> (i32, i32) {
    %c0_i32 = arith.constant 0 : i32
    %c0_i32_0 = arith.constant 0 : i32
    return %c0_i32, %arg1 : i32, i32
  }
  func.func @transform_9(%arg0: i32, %arg1: i32) -> (i32, i32) {
    %c0_i32 = arith.constant 0 : i32
    %c0_i32_0 = arith.constant 0 : i32
    return %c0_i32, %arg1 : i32, i32
  }
  func.func @transform_10(%arg0: i32, %arg1: i32) -> (i32, i32, i32) {
    %c0_i32 = arith.constant 0 : i32
    %c0_i32_0 = arith.constant 0 : i32
    return %arg0, %c0_i32, %arg1 : i32, i32, i32
  }
}

module attributes {stable_mosaic.version = 11 : i64} {
  func.func @_fused_block_s1_kernel(%arg0: i32, %arg1: i32, %arg2: memref<1x6x6x128xbf16, #tpu.memory_space<vmem>>, %arg3: memref<9x128xf32, #tpu.memory_space<vmem>>, %arg4: memref<1x128xf32, #tpu.memory_space<vmem>>, %arg5: memref<1x128xf32, #tpu.memory_space<vmem>>, %arg6: memref<128x128xbf16, #tpu.memory_space<vmem>>, %arg7: memref<1x128xf32, #tpu.memory_space<vmem>>, %arg8: memref<1x128xf32, #tpu.memory_space<vmem>>, %arg9: memref<1x16x128xbf16, #tpu.memory_space<vmem>>, %arg10: memref<16x128xbf16, #tpu.memory_space<vmem>>) attributes {dimension_semantics = [#tpu.dimension_semantics<parallel>, #tpu.dimension_semantics<arbitrary>], iteration_bounds = array<i64: 2, 1>, scalar_prefetch = 0 : i64, scratch_operands = 1 : i64, tpu.core_type = #tpu.core_type<tc>, window_params = [{transform_indices = @transform_0, window_bounds = array<i64: 1, 6, 6, 128>}, {pipeline_mode = #tpu.pipeline_mode<synchronous>, transform_indices = @transform_1, window_bounds = array<i64: 9, 128>}, {pipeline_mode = #tpu.pipeline_mode<synchronous>, transform_indices = @transform_2, window_bounds = array<i64: 1, 128>}, {pipeline_mode = #tpu.pipeline_mode<synchronous>, transform_indices = @transform_3, window_bounds = array<i64: 1, 128>}, {transform_indices = @transform_4, window_bounds = array<i64: 128, 128>}, {transform_indices = @transform_5, window_bounds = array<i64: 1, 128>}, {transform_indices = @transform_6, window_bounds = array<i64: 1, 128>}, {transform_indices = @transform_7, window_bounds = array<i64: 1, 16, 128>}]} {
    %c0_i32 = arith.constant 0 : i32
    %0 = arith.cmpi eq, %arg1, %c0_i32 : i32
    %1 = arith.extui %0 : i1 to i32
    %c0_i32_0 = arith.constant 0 : i32
    %2 = arith.cmpi ne, %1, %c0_i32_0 : i32
    scf.if %2 {
      %c0_13 = arith.constant 0 : index
      %c0_14 = arith.constant 0 : index
      %c0_15 = arith.constant 0 : index
      %c0_16 = arith.constant 0 : index
      %20 = vector.load %arg2[%c0_13, %c0_14, %c0_15, %c0_16] : memref<1x6x6x128xbf16, #tpu.memory_space<vmem>>, vector<1x6x6x128xbf16>
      %c0_17 = arith.constant 0 : index
      %c0_18 = arith.constant 0 : index
      %21 = vector.load %arg3[%c0_17, %c0_18] : memref<9x128xf32, #tpu.memory_space<vmem>>, vector<9x128xf32>
      %cst_19 = arith.constant 0.000000e+00 : f32
      %22 = vector.broadcast %cst_19 : f32 to vector<1x4x4x128xf32>
      %23 = vector.extract_strided_slice %20 {offsets = [0, 0, 0, 0], sizes = [1, 4, 4, 128], strides = [1, 1, 1, 1]} : vector<1x6x6x128xbf16> to vector<1x4x4x128xbf16>
      %24 = arith.extf %23 : vector<1x4x4x128xbf16> to vector<1x4x4x128xf32>
      %25 = vector.extract_strided_slice %21 {offsets = [0, 0], sizes = [1, 128], strides = [1, 1]} : vector<9x128xf32> to vector<1x128xf32>
      %26 = vector.shape_cast %25 : vector<1x128xf32> to vector<128xf32>
      %27 = vector.shape_cast %26 : vector<128xf32> to vector<1x1x1x128xf32>
      %28 = vector.broadcast %27 : vector<1x1x1x128xf32> to vector<1x4x4x128xf32>
      %29 = arith.mulf %24, %28 : vector<1x4x4x128xf32>
      %30 = arith.addf %22, %29 : vector<1x4x4x128xf32>
      %31 = vector.extract_strided_slice %20 {offsets = [0, 0, 1, 0], sizes = [1, 4, 4, 128], strides = [1, 1, 1, 1]} : vector<1x6x6x128xbf16> to vector<1x4x4x128xbf16>
      %32 = arith.extf %31 : vector<1x4x4x128xbf16> to vector<1x4x4x128xf32>
      %33 = vector.extract_strided_slice %21 {offsets = [1, 0], sizes = [1, 128], strides = [1, 1]} : vector<9x128xf32> to vector<1x128xf32>
      %34 = vector.shape_cast %33 : vector<1x128xf32> to vector<128xf32>
      %35 = vector.shape_cast %34 : vector<128xf32> to vector<1x1x1x128xf32>
      %36 = vector.broadcast %35 : vector<1x1x1x128xf32> to vector<1x4x4x128xf32>
      %37 = arith.mulf %32, %36 : vector<1x4x4x128xf32>
      %38 = arith.addf %30, %37 : vector<1x4x4x128xf32>
      %39 = vector.extract_strided_slice %20 {offsets = [0, 0, 2, 0], sizes = [1, 4, 4, 128], strides = [1, 1, 1, 1]} : vector<1x6x6x128xbf16> to vector<1x4x4x128xbf16>
      %40 = arith.extf %39 : vector<1x4x4x128xbf16> to vector<1x4x4x128xf32>
      %41 = vector.extract_strided_slice %21 {offsets = [2, 0], sizes = [1, 128], strides = [1, 1]} : vector<9x128xf32> to vector<1x128xf32>
      %42 = vector.shape_cast %41 : vector<1x128xf32> to vector<128xf32>
      %43 = vector.shape_cast %42 : vector<128xf32> to vector<1x1x1x128xf32>
      %44 = vector.broadcast %43 : vector<1x1x1x128xf32> to vector<1x4x4x128xf32>
      %45 = arith.mulf %40, %44 : vector<1x4x4x128xf32>
      %46 = arith.addf %38, %45 : vector<1x4x4x128xf32>
      %47 = vector.extract_strided_slice %20 {offsets = [0, 1, 0, 0], sizes = [1, 4, 4, 128], strides = [1, 1, 1, 1]} : vector<1x6x6x128xbf16> to vector<1x4x4x128xbf16>
      %48 = arith.extf %47 : vector<1x4x4x128xbf16> to vector<1x4x4x128xf32>
      %49 = vector.extract_strided_slice %21 {offsets = [3, 0], sizes = [1, 128], strides = [1, 1]} : vector<9x128xf32> to vector<1x128xf32>
      %50 = vector.shape_cast %49 : vector<1x128xf32> to vector<128xf32>
      %51 = vector.shape_cast %50 : vector<128xf32> to vector<1x1x1x128xf32>
      %52 = vector.broadcast %51 : vector<1x1x1x128xf32> to vector<1x4x4x128xf32>
      %53 = arith.mulf %48, %52 : vector<1x4x4x128xf32>
      %54 = arith.addf %46, %53 : vector<1x4x4x128xf32>
      %55 = vector.extract_strided_slice %20 {offsets = [0, 1, 1, 0], sizes = [1, 4, 4, 128], strides = [1, 1, 1, 1]} : vector<1x6x6x128xbf16> to vector<1x4x4x128xbf16>
      %56 = arith.extf %55 : vector<1x4x4x128xbf16> to vector<1x4x4x128xf32>
      %57 = vector.extract_strided_slice %21 {offsets = [4, 0], sizes = [1, 128], strides = [1, 1]} : vector<9x128xf32> to vector<1x128xf32>
      %58 = vector.shape_cast %57 : vector<1x128xf32> to vector<128xf32>
      %59 = vector.shape_cast %58 : vector<128xf32> to vector<1x1x1x128xf32>
      %60 = vector.broadcast %59 : vector<1x1x1x128xf32> to vector<1x4x4x128xf32>
      %61 = arith.mulf %56, %60 : vector<1x4x4x128xf32>
      %62 = arith.addf %54, %61 : vector<1x4x4x128xf32>
      %63 = vector.extract_strided_slice %20 {offsets = [0, 1, 2, 0], sizes = [1, 4, 4, 128], strides = [1, 1, 1, 1]} : vector<1x6x6x128xbf16> to vector<1x4x4x128xbf16>
      %64 = arith.extf %63 : vector<1x4x4x128xbf16> to vector<1x4x4x128xf32>
      %65 = vector.extract_strided_slice %21 {offsets = [5, 0], sizes = [1, 128], strides = [1, 1]} : vector<9x128xf32> to vector<1x128xf32>
      %66 = vector.shape_cast %65 : vector<1x128xf32> to vector<128xf32>
      %67 = vector.shape_cast %66 : vector<128xf32> to vector<1x1x1x128xf32>
      %68 = vector.broadcast %67 : vector<1x1x1x128xf32> to vector<1x4x4x128xf32>
      %69 = arith.mulf %64, %68 : vector<1x4x4x128xf32>
      %70 = arith.addf %62, %69 : vector<1x4x4x128xf32>
      %71 = vector.extract_strided_slice %20 {offsets = [0, 2, 0, 0], sizes = [1, 4, 4, 128], strides = [1, 1, 1, 1]} : vector<1x6x6x128xbf16> to vector<1x4x4x128xbf16>
      %72 = arith.extf %71 : vector<1x4x4x128xbf16> to vector<1x4x4x128xf32>
      %73 = vector.extract_strided_slice %21 {offsets = [6, 0], sizes = [1, 128], strides = [1, 1]} : vector<9x128xf32> to vector<1x128xf32>
      %74 = vector.shape_cast %73 : vector<1x128xf32> to vector<128xf32>
      %75 = vector.shape_cast %74 : vector<128xf32> to vector<1x1x1x128xf32>
      %76 = vector.broadcast %75 : vector<1x1x1x128xf32> to vector<1x4x4x128xf32>
      %77 = arith.mulf %72, %76 : vector<1x4x4x128xf32>
      %78 = arith.addf %70, %77 : vector<1x4x4x128xf32>
      %79 = vector.extract_strided_slice %20 {offsets = [0, 2, 1, 0], sizes = [1, 4, 4, 128], strides = [1, 1, 1, 1]} : vector<1x6x6x128xbf16> to vector<1x4x4x128xbf16>
      %80 = arith.extf %79 : vector<1x4x4x128xbf16> to vector<1x4x4x128xf32>
      %81 = vector.extract_strided_slice %21 {offsets = [7, 0], sizes = [1, 128], strides = [1, 1]} : vector<9x128xf32> to vector<1x128xf32>
      %82 = vector.shape_cast %81 : vector<1x128xf32> to vector<128xf32>
      %83 = vector.shape_cast %82 : vector<128xf32> to vector<1x1x1x128xf32>
      %84 = vector.broadcast %83 : vector<1x1x1x128xf32> to vector<1x4x4x128xf32>
      %85 = arith.mulf %80, %84 : vector<1x4x4x128xf32>
      %86 = arith.addf %78, %85 : vector<1x4x4x128xf32>
      %87 = vector.extract_strided_slice %20 {offsets = [0, 2, 2, 0], sizes = [1, 4, 4, 128], strides = [1, 1, 1, 1]} : vector<1x6x6x128xbf16> to vector<1x4x4x128xbf16>
      %88 = arith.extf %87 : vector<1x4x4x128xbf16> to vector<1x4x4x128xf32>
      %89 = vector.extract_strided_slice %21 {offsets = [8, 0], sizes = [1, 128], strides = [1, 1]} : vector<9x128xf32> to vector<1x128xf32>
      %90 = vector.shape_cast %89 : vector<1x128xf32> to vector<128xf32>
      %91 = vector.shape_cast %90 : vector<128xf32> to vector<1x1x1x128xf32>
      %92 = vector.broadcast %91 : vector<1x1x1x128xf32> to vector<1x4x4x128xf32>
      %93 = arith.mulf %88, %92 : vector<1x4x4x128xf32>
      %94 = arith.addf %86, %93 : vector<1x4x4x128xf32>
      %c0_20 = arith.constant 0 : index
      %c0_21 = arith.constant 0 : index
      %95 = vector.load %arg4[%c0_20, %c0_21] : memref<1x128xf32, #tpu.memory_space<vmem>>, vector<1x128xf32>
      %96 = vector.shape_cast %95 : vector<1x128xf32> to vector<128xf32>
      %97 = vector.shape_cast %96 : vector<128xf32> to vector<1x1x1x128xf32>
      %98 = vector.broadcast %97 : vector<1x1x1x128xf32> to vector<1x4x4x128xf32>
      %99 = arith.mulf %94, %98 : vector<1x4x4x128xf32>
      %c0_22 = arith.constant 0 : index
      %c0_23 = arith.constant 0 : index
      %100 = vector.load %arg5[%c0_22, %c0_23] : memref<1x128xf32, #tpu.memory_space<vmem>>, vector<1x128xf32>
      %101 = vector.shape_cast %100 : vector<1x128xf32> to vector<128xf32>
      %102 = vector.shape_cast %101 : vector<128xf32> to vector<1x1x1x128xf32>
      %103 = vector.broadcast %102 : vector<1x1x1x128xf32> to vector<1x4x4x128xf32>
      %104 = arith.addf %99, %103 : vector<1x4x4x128xf32>
      %cst_24 = arith.constant 0.000000e+00 : f32
      %105 = vector.broadcast %cst_24 : f32 to vector<1x4x4x128xf32>
      %106 = arith.maximumf %104, %105 : vector<1x4x4x128xf32>
      %cst_25 = arith.constant 6.000000e+00 : f32
      %107 = vector.broadcast %cst_25 : f32 to vector<1x4x4x128xf32>
      %108 = arith.minimumf %106, %107 : vector<1x4x4x128xf32>
      %109 = arith.truncf %108 : vector<1x4x4x128xf32> to vector<1x4x4x128xbf16>
      %110 = vector.extract_strided_slice %109 {offsets = [0, 0, 0, 0], sizes = [1, 1, 4, 128], strides = [1, 1, 1, 1]} : vector<1x4x4x128xbf16> to vector<1x1x4x128xbf16>
      %111 = vector.shape_cast %110 : vector<1x1x4x128xbf16> to vector<4x128xbf16>
      %c0_26 = arith.constant 0 : index
      %c0_27 = arith.constant 0 : index
      %112 = vector.load %arg10[%c0_26, %c0_27] : memref<16x128xbf16, #tpu.memory_space<vmem>>, vector<4x128xbf16>
      tpu.vector_store %arg10[%c0_26, %c0_27], %111 {strides = array<i32>} : memref<16x128xbf16, #tpu.memory_space<vmem>>, vector<4x128xbf16>,
      %113 = vector.extract_strided_slice %109 {offsets = [0, 1, 0, 0], sizes = [1, 1, 4, 128], strides = [1, 1, 1, 1]} : vector<1x4x4x128xbf16> to vector<1x1x4x128xbf16>
      %114 = vector.shape_cast %113 : vector<1x1x4x128xbf16> to vector<4x128xbf16>
      %c4 = arith.constant 4 : index
      %c0_28 = arith.constant 0 : index
      %115 = vector.load %arg10[%c4, %c0_28] : memref<16x128xbf16, #tpu.memory_space<vmem>>, vector<4x128xbf16>
      tpu.vector_store %arg10[%c4, %c0_28], %114 {strides = array<i32>} : memref<16x128xbf16, #tpu.memory_space<vmem>>, vector<4x128xbf16>,
      %116 = vector.extract_strided_slice %109 {offsets = [0, 2, 0, 0], sizes = [1, 1, 4, 128], strides = [1, 1, 1, 1]} : vector<1x4x4x128xbf16> to vector<1x1x4x128xbf16>
      %117 = vector.shape_cast %116 : vector<1x1x4x128xbf16> to vector<4x128xbf16>
      %c8 = arith.constant 8 : index
      %c0_29 = arith.constant 0 : index
      %118 = vector.load %arg10[%c8, %c0_29] : memref<16x128xbf16, #tpu.memory_space<vmem>>, vector<4x128xbf16>
      tpu.vector_store %arg10[%c8, %c0_29], %117 {strides = array<i32>} : memref<16x128xbf16, #tpu.memory_space<vmem>>, vector<4x128xbf16>,
      %119 = vector.extract_strided_slice %109 {offsets = [0, 3, 0, 0], sizes = [1, 1, 4, 128], strides = [1, 1, 1, 1]} : vector<1x4x4x128xbf16> to vector<1x1x4x128xbf16>
      %120 = vector.shape_cast %119 : vector<1x1x4x128xbf16> to vector<4x128xbf16>
      %c12 = arith.constant 12 : index
      %c0_30 = arith.constant 0 : index
      %121 = vector.load %arg10[%c12, %c0_30] : memref<16x128xbf16, #tpu.memory_space<vmem>>, vector<4x128xbf16>
      tpu.vector_store %arg10[%c12, %c0_30], %120 {strides = array<i32>} : memref<16x128xbf16, #tpu.memory_space<vmem>>, vector<4x128xbf16>,
    } else {
    }
    %c0 = arith.constant 0 : index
    %c0_1 = arith.constant 0 : index
    %3 = vector.load %arg10[%c0, %c0_1] : memref<16x128xbf16, #tpu.memory_space<vmem>>, vector<16x128xbf16>
    %c0_2 = arith.constant 0 : index
    %c0_3 = arith.constant 0 : index
    %4 = vector.load %arg6[%c0_2, %c0_3] : memref<128x128xbf16, #tpu.memory_space<vmem>>, vector<128x128xbf16>
    %cst = arith.constant dense<0.000000e+00> : vector<16x128xf32>
    %5 = tpu.matmul %3, %4, %cst {dimension_numbers = #tpu.dot_dimension_numbers<[1], [0], [0], [1], [0, 0, 1, 1], [], []>} : vector<16x128xbf16>, vector<128x128xbf16>, vector<16x128xf32> -> vector<16x128xf32>
    %c0_4 = arith.constant 0 : index
    %c0_5 = arith.constant 0 : index
    %6 = vector.load %arg7[%c0_4, %c0_5] : memref<1x128xf32, #tpu.memory_space<vmem>>, vector<1x128xf32>
    %7 = vector.broadcast %6 : vector<1x128xf32> to vector<16x128xf32>
    %8 = arith.mulf %5, %7 : vector<16x128xf32>
    %c0_6 = arith.constant 0 : index
    %c0_7 = arith.constant 0 : index
    %9 = vector.load %arg8[%c0_6, %c0_7] : memref<1x128xf32, #tpu.memory_space<vmem>>, vector<1x128xf32>
    %10 = vector.broadcast %9 : vector<1x128xf32> to vector<16x128xf32>
    %11 = arith.addf %8, %10 : vector<16x128xf32>
    %cst_8 = arith.constant 0.000000e+00 : f32
    %12 = vector.broadcast %cst_8 : f32 to vector<16x128xf32>
    %13 = arith.maximumf %11, %12 : vector<16x128xf32>
    %cst_9 = arith.constant 6.000000e+00 : f32
    %14 = vector.broadcast %cst_9 : f32 to vector<16x128xf32>
    %15 = arith.minimumf %13, %14 : vector<16x128xf32>
    %16 = arith.truncf %15 : vector<16x128xf32> to vector<16x128xbf16>
    %c0_10 = arith.constant 0 : index
    %c0_11 = arith.constant 0 : index
    %c0_12 = arith.constant 0 : index
    %17 = vector.load %arg9[%c0_10, %c0_11, %c0_12] : memref<1x16x128xbf16, #tpu.memory_space<vmem>>, vector<1x16x128xbf16>
    %18 = vector.shape_cast %17 : vector<1x16x128xbf16> to vector<16x128xbf16>
    %19 = vector.shape_cast %16 : vector<16x128xbf16> to vector<1x16x128xbf16>
    tpu.vector_store %arg9[%c0_10, %c0_11, %c0_12], %19 {strides = array<i32>} : memref<1x16x128xbf16, #tpu.memory_space<vmem>>, vector<1x16x128xbf16>,
    return
  }
  func.func @transform_0(%arg0: i32, %arg1: i32) -> (i32, i32, i32, i32) {
    %c0_i32 = arith.constant 0 : i32
    %c0_i32_0 = arith.constant 0 : i32
    %c0_i32_1 = arith.constant 0 : i32
    %c0_i32_2 = arith.constant 0 : i32
    return %arg0, %c0_i32, %c0_i32_0, %c0_i32_1 : i32, i32, i32, i32
  }
  func.func @transform_1(%arg0: i32, %arg1: i32) -> (i32, i32) {
    %c0_i32 = arith.constant 0 : i32
    %c0_i32_0 = arith.constant 0 : i32
    %c0_i32_1 = arith.constant 0 : i32
    return %c0_i32, %c0_i32_0 : i32, i32
  }
  func.func @transform_2(%arg0: i32, %arg1: i32) -> (i32, i32) {
    %c0_i32 = arith.constant 0 : i32
    %c0_i32_0 = arith.constant 0 : i32
    %c0_i32_1 = arith.constant 0 : i32
    return %c0_i32, %c0_i32_0 : i32, i32
  }
  func.func @transform_3(%arg0: i32, %arg1: i32) -> (i32, i32) {
    %c0_i32 = arith.constant 0 : i32
    %c0_i32_0 = arith.constant 0 : i32
    %c0_i32_1 = arith.constant 0 : i32
    return %c0_i32, %c0_i32_0 : i32, i32
  }
  func.func @transform_4(%arg0: i32, %arg1: i32) -> (i32, i32) {
    %c0_i32 = arith.constant 0 : i32
    %c0_i32_0 = arith.constant 0 : i32
    return %c0_i32, %arg1 : i32, i32
  }
  func.func @transform_5(%arg0: i32, %arg1: i32) -> (i32, i32) {
    %c0_i32 = arith.constant 0 : i32
    %c0_i32_0 = arith.constant 0 : i32
    return %c0_i32, %arg1 : i32, i32
  }
  func.func @transform_6(%arg0: i32, %arg1: i32) -> (i32, i32) {
    %c0_i32 = arith.constant 0 : i32
    %c0_i32_0 = arith.constant 0 : i32
    return %c0_i32, %arg1 : i32, i32
  }
  func.func @transform_7(%arg0: i32, %arg1: i32) -> (i32, i32, i32) {
    %c0_i32 = arith.constant 0 : i32
    %c0_i32_0 = arith.constant 0 : i32
    return %arg0, %c0_i32, %arg1 : i32, i32, i32
  }
}

module attributes {stable_mosaic.version = 11 : i64} {
  func.func @_fused_block_s2_kernel(%arg0: i32, %arg1: i32, %arg2: memref<1x3x3x128xbf16, #tpu.memory_space<vmem>>, %arg3: memref<1x3x2x128xbf16, #tpu.memory_space<vmem>>, %arg4: memref<1x2x3x128xbf16, #tpu.memory_space<vmem>>, %arg5: memref<1x2x2x128xbf16, #tpu.memory_space<vmem>>, %arg6: memref<9x128xf32, #tpu.memory_space<vmem>>, %arg7: memref<1x128xf32, #tpu.memory_space<vmem>>, %arg8: memref<1x128xf32, #tpu.memory_space<vmem>>, %arg9: memref<128x256xbf16, #tpu.memory_space<vmem>>, %arg10: memref<1x256xf32, #tpu.memory_space<vmem>>, %arg11: memref<1x256xf32, #tpu.memory_space<vmem>>, %arg12: memref<1x4x256xbf16, #tpu.memory_space<vmem>>, %arg13: memref<4x128xbf16, #tpu.memory_space<vmem>>) attributes {dimension_semantics = [#tpu.dimension_semantics<parallel>, #tpu.dimension_semantics<arbitrary>], iteration_bounds = array<i64: 2, 1>, scalar_prefetch = 0 : i64, scratch_operands = 1 : i64, tpu.core_type = #tpu.core_type<tc>, window_params = [{transform_indices = @transform_0, window_bounds = array<i64: 1, 3, 3, 128>}, {transform_indices = @transform_1, window_bounds = array<i64: 1, 3, 2, 128>}, {transform_indices = @transform_2, window_bounds = array<i64: 1, 2, 3, 128>}, {transform_indices = @transform_3, window_bounds = array<i64: 1, 2, 2, 128>}, {pipeline_mode = #tpu.pipeline_mode<synchronous>, transform_indices = @transform_4, window_bounds = array<i64: 9, 128>}, {pipeline_mode = #tpu.pipeline_mode<synchronous>, transform_indices = @transform_5, window_bounds = array<i64: 1, 128>}, {pipeline_mode = #tpu.pipeline_mode<synchronous>, transform_indices = @transform_6, window_bounds = array<i64: 1, 128>}, {transform_indices = @transform_7, window_bounds = array<i64: 128, 256>}, {transform_indices = @transform_8, window_bounds = array<i64: 1, 256>}, {transform_indices = @transform_9, window_bounds = array<i64: 1, 256>}, {transform_indices = @transform_10, window_bounds = array<i64: 1, 4, 256>}]} {
    %c0_i32 = arith.constant 0 : i32
    %0 = arith.cmpi eq, %arg1, %c0_i32 : i32
    %1 = arith.extui %0 : i1 to i32
    %c0_i32_0 = arith.constant 0 : i32
    %2 = arith.cmpi ne, %1, %c0_i32_0 : i32
    scf.if %2 {
      %c0_13 = arith.constant 0 : index
      %c0_14 = arith.constant 0 : index
      %c0_15 = arith.constant 0 : index
      %c0_16 = arith.constant 0 : index
      %20 = vector.load %arg2[%c0_13, %c0_14, %c0_15, %c0_16] : memref<1x3x3x128xbf16, #tpu.memory_space<vmem>>, vector<1x3x3x128xbf16>
      %c0_17 = arith.constant 0 : index
      %c0_18 = arith.constant 0 : index
      %c0_19 = arith.constant 0 : index
      %c0_20 = arith.constant 0 : index
      %21 = vector.load %arg3[%c0_17, %c0_18, %c0_19, %c0_20] : memref<1x3x2x128xbf16, #tpu.memory_space<vmem>>, vector<1x3x2x128xbf16>
      %c0_21 = arith.constant 0 : index
      %c0_22 = arith.constant 0 : index
      %c0_23 = arith.constant 0 : index
      %c0_24 = arith.constant 0 : index
      %22 = vector.load %arg4[%c0_21, %c0_22, %c0_23, %c0_24] : memref<1x2x3x128xbf16, #tpu.memory_space<vmem>>, vector<1x2x3x128xbf16>
      %c0_25 = arith.constant 0 : index
      %c0_26 = arith.constant 0 : index
      %c0_27 = arith.constant 0 : index
      %c0_28 = arith.constant 0 : index
      %23 = vector.load %arg5[%c0_25, %c0_26, %c0_27, %c0_28] : memref<1x2x2x128xbf16, #tpu.memory_space<vmem>>, vector<1x2x2x128xbf16>
      %c0_29 = arith.constant 0 : index
      %c0_30 = arith.constant 0 : index
      %24 = vector.load %arg6[%c0_29, %c0_30] : memref<9x128xf32, #tpu.memory_space<vmem>>, vector<9x128xf32>
      %cst_31 = arith.constant 0.000000e+00 : f32
      %25 = vector.broadcast %cst_31 : f32 to vector<1x2x2x128xf32>
      %26 = vector.extract_strided_slice %20 {offsets = [0, 0, 0, 0], sizes = [1, 2, 2, 128], strides = [1, 1, 1, 1]} : vector<1x3x3x128xbf16> to vector<1x2x2x128xbf16>
      %27 = arith.extf %26 : vector<1x2x2x128xbf16> to vector<1x2x2x128xf32>
      %28 = vector.extract_strided_slice %24 {offsets = [0, 0], sizes = [1, 128], strides = [1, 1]} : vector<9x128xf32> to vector<1x128xf32>
      %29 = vector.shape_cast %28 : vector<1x128xf32> to vector<128xf32>
      %30 = vector.shape_cast %29 : vector<128xf32> to vector<1x1x1x128xf32>
      %31 = vector.broadcast %30 : vector<1x1x1x128xf32> to vector<1x2x2x128xf32>
      %32 = arith.mulf %27, %31 : vector<1x2x2x128xf32>
      %33 = arith.addf %25, %32 : vector<1x2x2x128xf32>
      %34 = vector.extract_strided_slice %21 {offsets = [0, 0, 0, 0], sizes = [1, 2, 2, 128], strides = [1, 1, 1, 1]} : vector<1x3x2x128xbf16> to vector<1x2x2x128xbf16>
      %35 = arith.extf %34 : vector<1x2x2x128xbf16> to vector<1x2x2x128xf32>
      %36 = vector.extract_strided_slice %24 {offsets = [1, 0], sizes = [1, 128], strides = [1, 1]} : vector<9x128xf32> to vector<1x128xf32>
      %37 = vector.shape_cast %36 : vector<1x128xf32> to vector<128xf32>
      %38 = vector.shape_cast %37 : vector<128xf32> to vector<1x1x1x128xf32>
      %39 = vector.broadcast %38 : vector<1x1x1x128xf32> to vector<1x2x2x128xf32>
      %40 = arith.mulf %35, %39 : vector<1x2x2x128xf32>
      %41 = arith.addf %33, %40 : vector<1x2x2x128xf32>
      %42 = vector.extract_strided_slice %20 {offsets = [0, 0, 1, 0], sizes = [1, 2, 2, 128], strides = [1, 1, 1, 1]} : vector<1x3x3x128xbf16> to vector<1x2x2x128xbf16>
      %43 = arith.extf %42 : vector<1x2x2x128xbf16> to vector<1x2x2x128xf32>
      %44 = vector.extract_strided_slice %24 {offsets = [2, 0], sizes = [1, 128], strides = [1, 1]} : vector<9x128xf32> to vector<1x128xf32>
      %45 = vector.shape_cast %44 : vector<1x128xf32> to vector<128xf32>
      %46 = vector.shape_cast %45 : vector<128xf32> to vector<1x1x1x128xf32>
      %47 = vector.broadcast %46 : vector<1x1x1x128xf32> to vector<1x2x2x128xf32>
      %48 = arith.mulf %43, %47 : vector<1x2x2x128xf32>
      %49 = arith.addf %41, %48 : vector<1x2x2x128xf32>
      %50 = vector.extract_strided_slice %22 {offsets = [0, 0, 0, 0], sizes = [1, 2, 2, 128], strides = [1, 1, 1, 1]} : vector<1x2x3x128xbf16> to vector<1x2x2x128xbf16>
      %51 = arith.extf %50 : vector<1x2x2x128xbf16> to vector<1x2x2x128xf32>
      %52 = vector.extract_strided_slice %24 {offsets = [3, 0], sizes = [1, 128], strides = [1, 1]} : vector<9x128xf32> to vector<1x128xf32>
      %53 = vector.shape_cast %52 : vector<1x128xf32> to vector<128xf32>
      %54 = vector.shape_cast %53 : vector<128xf32> to vector<1x1x1x128xf32>
      %55 = vector.broadcast %54 : vector<1x1x1x128xf32> to vector<1x2x2x128xf32>
      %56 = arith.mulf %51, %55 : vector<1x2x2x128xf32>
      %57 = arith.addf %49, %56 : vector<1x2x2x128xf32>
      %58 = arith.extf %23 : vector<1x2x2x128xbf16> to vector<1x2x2x128xf32>
      %59 = vector.extract_strided_slice %24 {offsets = [4, 0], sizes = [1, 128], strides = [1, 1]} : vector<9x128xf32> to vector<1x128xf32>
      %60 = vector.shape_cast %59 : vector<1x128xf32> to vector<128xf32>
      %61 = vector.shape_cast %60 : vector<128xf32> to vector<1x1x1x128xf32>
      %62 = vector.broadcast %61 : vector<1x1x1x128xf32> to vector<1x2x2x128xf32>
      %63 = arith.mulf %58, %62 : vector<1x2x2x128xf32>
      %64 = arith.addf %57, %63 : vector<1x2x2x128xf32>
      %65 = vector.extract_strided_slice %22 {offsets = [0, 0, 1, 0], sizes = [1, 2, 2, 128], strides = [1, 1, 1, 1]} : vector<1x2x3x128xbf16> to vector<1x2x2x128xbf16>
      %66 = arith.extf %65 : vector<1x2x2x128xbf16> to vector<1x2x2x128xf32>
      %67 = vector.extract_strided_slice %24 {offsets = [5, 0], sizes = [1, 128], strides = [1, 1]} : vector<9x128xf32> to vector<1x128xf32>
      %68 = vector.shape_cast %67 : vector<1x128xf32> to vector<128xf32>
      %69 = vector.shape_cast %68 : vector<128xf32> to vector<1x1x1x128xf32>
      %70 = vector.broadcast %69 : vector<1x1x1x128xf32> to vector<1x2x2x128xf32>
      %71 = arith.mulf %66, %70 : vector<1x2x2x128xf32>
      %72 = arith.addf %64, %71 : vector<1x2x2x128xf32>
      %73 = vector.extract_strided_slice %20 {offsets = [0, 1, 0, 0], sizes = [1, 2, 2, 128], strides = [1, 1, 1, 1]} : vector<1x3x3x128xbf16> to vector<1x2x2x128xbf16>
      %74 = arith.extf %73 : vector<1x2x2x128xbf16> to vector<1x2x2x128xf32>
      %75 = vector.extract_strided_slice %24 {offsets = [6, 0], sizes = [1, 128], strides = [1, 1]} : vector<9x128xf32> to vector<1x128xf32>
      %76 = vector.shape_cast %75 : vector<1x128xf32> to vector<128xf32>
      %77 = vector.shape_cast %76 : vector<128xf32> to vector<1x1x1x128xf32>
      %78 = vector.broadcast %77 : vector<1x1x1x128xf32> to vector<1x2x2x128xf32>
      %79 = arith.mulf %74, %78 : vector<1x2x2x128xf32>
      %80 = arith.addf %72, %79 : vector<1x2x2x128xf32>
      %81 = vector.extract_strided_slice %21 {offsets = [0, 1, 0, 0], sizes = [1, 2, 2, 128], strides = [1, 1, 1, 1]} : vector<1x3x2x128xbf16> to vector<1x2x2x128xbf16>
      %82 = arith.extf %81 : vector<1x2x2x128xbf16> to vector<1x2x2x128xf32>
      %83 = vector.extract_strided_slice %24 {offsets = [7, 0], sizes = [1, 128], strides = [1, 1]} : vector<9x128xf32> to vector<1x128xf32>
      %84 = vector.shape_cast %83 : vector<1x128xf32> to vector<128xf32>
      %85 = vector.shape_cast %84 : vector<128xf32> to vector<1x1x1x128xf32>
      %86 = vector.broadcast %85 : vector<1x1x1x128xf32> to vector<1x2x2x128xf32>
      %87 = arith.mulf %82, %86 : vector<1x2x2x128xf32>
      %88 = arith.addf %80, %87 : vector<1x2x2x128xf32>
      %89 = vector.extract_strided_slice %20 {offsets = [0, 1, 1, 0], sizes = [1, 2, 2, 128], strides = [1, 1, 1, 1]} : vector<1x3x3x128xbf16> to vector<1x2x2x128xbf16>
      %90 = arith.extf %89 : vector<1x2x2x128xbf16> to vector<1x2x2x128xf32>
      %91 = vector.extract_strided_slice %24 {offsets = [8, 0], sizes = [1, 128], strides = [1, 1]} : vector<9x128xf32> to vector<1x128xf32>
      %92 = vector.shape_cast %91 : vector<1x128xf32> to vector<128xf32>
      %93 = vector.shape_cast %92 : vector<128xf32> to vector<1x1x1x128xf32>
      %94 = vector.broadcast %93 : vector<1x1x1x128xf32> to vector<1x2x2x128xf32>
      %95 = arith.mulf %90, %94 : vector<1x2x2x128xf32>
      %96 = arith.addf %88, %95 : vector<1x2x2x128xf32>
      %c0_32 = arith.constant 0 : index
      %c0_33 = arith.constant 0 : index
      %97 = vector.load %arg7[%c0_32, %c0_33] : memref<1x128xf32, #tpu.memory_space<vmem>>, vector<1x128xf32>
      %98 = vector.shape_cast %97 : vector<1x128xf32> to vector<128xf32>
      %99 = vector.shape_cast %98 : vector<128xf32> to vector<1x1x1x128xf32>
      %100 = vector.broadcast %99 : vector<1x1x1x128xf32> to vector<1x2x2x128xf32>
      %101 = arith.mulf %96, %100 : vector<1x2x2x128xf32>
      %c0_34 = arith.constant 0 : index
      %c0_35 = arith.constant 0 : index
      %102 = vector.load %arg8[%c0_34, %c0_35] : memref<1x128xf32, #tpu.memory_space<vmem>>, vector<1x128xf32>
      %103 = vector.shape_cast %102 : vector<1x128xf32> to vector<128xf32>
      %104 = vector.shape_cast %103 : vector<128xf32> to vector<1x1x1x128xf32>
      %105 = vector.broadcast %104 : vector<1x1x1x128xf32> to vector<1x2x2x128xf32>
      %106 = arith.addf %101, %105 : vector<1x2x2x128xf32>
      %cst_36 = arith.constant 0.000000e+00 : f32
      %107 = vector.broadcast %cst_36 : f32 to vector<1x2x2x128xf32>
      %108 = arith.maximumf %106, %107 : vector<1x2x2x128xf32>
      %cst_37 = arith.constant 6.000000e+00 : f32
      %109 = vector.broadcast %cst_37 : f32 to vector<1x2x2x128xf32>
      %110 = arith.minimumf %108, %109 : vector<1x2x2x128xf32>
      %111 = arith.truncf %110 : vector<1x2x2x128xf32> to vector<1x2x2x128xbf16>
      %112 = vector.extract_strided_slice %111 {offsets = [0, 0, 0, 0], sizes = [1, 1, 2, 128], strides = [1, 1, 1, 1]} : vector<1x2x2x128xbf16> to vector<1x1x2x128xbf16>
      %113 = vector.shape_cast %112 : vector<1x1x2x128xbf16> to vector<2x128xbf16>
      %c0_38 = arith.constant 0 : index
      %c0_39 = arith.constant 0 : index
      %114 = vector.load %arg13[%c0_38, %c0_39] : memref<4x128xbf16, #tpu.memory_space<vmem>>, vector<2x128xbf16>
      tpu.vector_store %arg13[%c0_38, %c0_39], %113 {strides = array<i32>} : memref<4x128xbf16, #tpu.memory_space<vmem>>, vector<2x128xbf16>,
      %115 = vector.extract_strided_slice %111 {offsets = [0, 1, 0, 0], sizes = [1, 1, 2, 128], strides = [1, 1, 1, 1]} : vector<1x2x2x128xbf16> to vector<1x1x2x128xbf16>
      %116 = vector.shape_cast %115 : vector<1x1x2x128xbf16> to vector<2x128xbf16>
      %c2 = arith.constant 2 : index
      %c0_40 = arith.constant 0 : index
      %117 = vector.load %arg13[%c2, %c0_40] : memref<4x128xbf16, #tpu.memory_space<vmem>>, vector<2x128xbf16>
      tpu.vector_store %arg13[%c2, %c0_40], %116 {strides = array<i32>} : memref<4x128xbf16, #tpu.memory_space<vmem>>, vector<2x128xbf16>,
    } else {
    }
    %c0 = arith.constant 0 : index
    %c0_1 = arith.constant 0 : index
    %3 = vector.load %arg13[%c0, %c0_1] : memref<4x128xbf16, #tpu.memory_space<vmem>>, vector<4x128xbf16>
    %c0_2 = arith.constant 0 : index
    %c0_3 = arith.constant 0 : index
    %4 = vector.load %arg9[%c0_2, %c0_3] : memref<128x256xbf16, #tpu.memory_space<vmem>>, vector<128x256xbf16>
    %cst = arith.constant dense<0.000000e+00> : vector<4x256xf32>
    %5 = tpu.matmul %3, %4, %cst {dimension_numbers = #tpu.dot_dimension_numbers<[1], [0], [0], [1], [0, 0, 1, 1], [], []>} : vector<4x128xbf16>, vector<128x256xbf16>, vector<4x256xf32> -> vector<4x256xf32>
    %c0_4 = arith.constant 0 : index
    %c0_5 = arith.constant 0 : index
    %6 = vector.load %arg10[%c0_4, %c0_5] : memref<1x256xf32, #tpu.memory_space<vmem>>, vector<1x256xf32>
    %7 = vector.broadcast %6 : vector<1x256xf32> to vector<4x256xf32>
    %8 = arith.mulf %5, %7 : vector<4x256xf32>
    %c0_6 = arith.constant 0 : index
    %c0_7 = arith.constant 0 : index
    %9 = vector.load %arg11[%c0_6, %c0_7] : memref<1x256xf32, #tpu.memory_space<vmem>>, vector<1x256xf32>
    %10 = vector.broadcast %9 : vector<1x256xf32> to vector<4x256xf32>
    %11 = arith.addf %8, %10 : vector<4x256xf32>
    %cst_8 = arith.constant 0.000000e+00 : f32
    %12 = vector.broadcast %cst_8 : f32 to vector<4x256xf32>
    %13 = arith.maximumf %11, %12 : vector<4x256xf32>
    %cst_9 = arith.constant 6.000000e+00 : f32
    %14 = vector.broadcast %cst_9 : f32 to vector<4x256xf32>
    %15 = arith.minimumf %13, %14 : vector<4x256xf32>
    %16 = arith.truncf %15 : vector<4x256xf32> to vector<4x256xbf16>
    %c0_10 = arith.constant 0 : index
    %c0_11 = arith.constant 0 : index
    %c0_12 = arith.constant 0 : index
    %17 = vector.load %arg12[%c0_10, %c0_11, %c0_12] : memref<1x4x256xbf16, #tpu.memory_space<vmem>>, vector<1x4x256xbf16>
    %18 = vector.shape_cast %17 : vector<1x4x256xbf16> to vector<4x256xbf16>
    %19 = vector.shape_cast %16 : vector<4x256xbf16> to vector<1x4x256xbf16>
    tpu.vector_store %arg12[%c0_10, %c0_11, %c0_12], %19 {strides = array<i32>} : memref<1x4x256xbf16, #tpu.memory_space<vmem>>, vector<1x4x256xbf16>,
    return
  }
  func.func @transform_0(%arg0: i32, %arg1: i32) -> (i32, i32, i32, i32) {
    %c0_i32 = arith.constant 0 : i32
    %c0_i32_0 = arith.constant 0 : i32
    %c0_i32_1 = arith.constant 0 : i32
    %c0_i32_2 = arith.constant 0 : i32
    return %arg0, %c0_i32, %c0_i32_0, %c0_i32_1 : i32, i32, i32, i32
  }
  func.func @transform_1(%arg0: i32, %arg1: i32) -> (i32, i32, i32, i32) {
    %c0_i32 = arith.constant 0 : i32
    %c0_i32_0 = arith.constant 0 : i32
    %c0_i32_1 = arith.constant 0 : i32
    %c0_i32_2 = arith.constant 0 : i32
    return %arg0, %c0_i32, %c0_i32_0, %c0_i32_1 : i32, i32, i32, i32
  }
  func.func @transform_2(%arg0: i32, %arg1: i32) -> (i32, i32, i32, i32) {
    %c0_i32 = arith.constant 0 : i32
    %c0_i32_0 = arith.constant 0 : i32
    %c0_i32_1 = arith.constant 0 : i32
    %c0_i32_2 = arith.constant 0 : i32
    return %arg0, %c0_i32, %c0_i32_0, %c0_i32_1 : i32, i32, i32, i32
  }
  func.func @transform_3(%arg0: i32, %arg1: i32) -> (i32, i32, i32, i32) {
    %c0_i32 = arith.constant 0 : i32
    %c0_i32_0 = arith.constant 0 : i32
    %c0_i32_1 = arith.constant 0 : i32
    %c0_i32_2 = arith.constant 0 : i32
    return %arg0, %c0_i32, %c0_i32_0, %c0_i32_1 : i32, i32, i32, i32
  }
  func.func @transform_4(%arg0: i32, %arg1: i32) -> (i32, i32) {
    %c0_i32 = arith.constant 0 : i32
    %c0_i32_0 = arith.constant 0 : i32
    %c0_i32_1 = arith.constant 0 : i32
    return %c0_i32, %c0_i32_0 : i32, i32
  }
  func.func @transform_5(%arg0: i32, %arg1: i32) -> (i32, i32) {
    %c0_i32 = arith.constant 0 : i32
    %c0_i32_0 = arith.constant 0 : i32
    %c0_i32_1 = arith.constant 0 : i32
    return %c0_i32, %c0_i32_0 : i32, i32
  }
  func.func @transform_6(%arg0: i32, %arg1: i32) -> (i32, i32) {
    %c0_i32 = arith.constant 0 : i32
    %c0_i32_0 = arith.constant 0 : i32
    %c0_i32_1 = arith.constant 0 : i32
    return %c0_i32, %c0_i32_0 : i32, i32
  }
  func.func @transform_7(%arg0: i32, %arg1: i32) -> (i32, i32) {
    %c0_i32 = arith.constant 0 : i32
    %c0_i32_0 = arith.constant 0 : i32
    return %c0_i32, %arg1 : i32, i32
  }
  func.func @transform_8(%arg0: i32, %arg1: i32) -> (i32, i32) {
    %c0_i32 = arith.constant 0 : i32
    %c0_i32_0 = arith.constant 0 : i32
    return %c0_i32, %arg1 : i32, i32
  }
  func.func @transform_9(%arg0: i32, %arg1: i32) -> (i32, i32) {
    %c0_i32 = arith.constant 0 : i32
    %c0_i32_0 = arith.constant 0 : i32
    return %c0_i32, %arg1 : i32, i32
  }
  func.func @transform_10(%arg0: i32, %arg1: i32) -> (i32, i32, i32) {
    %c0_i32 = arith.constant 0 : i32
    %c0_i32_0 = arith.constant 0 : i32
    return %arg0, %c0_i32, %arg1 : i32, i32, i32
  }
}

module attributes {stable_mosaic.version = 11 : i64} {
  func.func @_fused_block_s1_kernel(%arg0: i32, %arg1: i32, %arg2: memref<1x4x4x256xbf16, #tpu.memory_space<vmem>>, %arg3: memref<9x256xf32, #tpu.memory_space<vmem>>, %arg4: memref<1x256xf32, #tpu.memory_space<vmem>>, %arg5: memref<1x256xf32, #tpu.memory_space<vmem>>, %arg6: memref<256x256xbf16, #tpu.memory_space<vmem>>, %arg7: memref<1x256xf32, #tpu.memory_space<vmem>>, %arg8: memref<1x256xf32, #tpu.memory_space<vmem>>, %arg9: memref<1x4x256xbf16, #tpu.memory_space<vmem>>, %arg10: memref<4x256xbf16, #tpu.memory_space<vmem>>) attributes {dimension_semantics = [#tpu.dimension_semantics<parallel>, #tpu.dimension_semantics<arbitrary>], iteration_bounds = array<i64: 2, 1>, scalar_prefetch = 0 : i64, scratch_operands = 1 : i64, tpu.core_type = #tpu.core_type<tc>, window_params = [{transform_indices = @transform_0, window_bounds = array<i64: 1, 4, 4, 256>}, {pipeline_mode = #tpu.pipeline_mode<synchronous>, transform_indices = @transform_1, window_bounds = array<i64: 9, 256>}, {pipeline_mode = #tpu.pipeline_mode<synchronous>, transform_indices = @transform_2, window_bounds = array<i64: 1, 256>}, {pipeline_mode = #tpu.pipeline_mode<synchronous>, transform_indices = @transform_3, window_bounds = array<i64: 1, 256>}, {transform_indices = @transform_4, window_bounds = array<i64: 256, 256>}, {transform_indices = @transform_5, window_bounds = array<i64: 1, 256>}, {transform_indices = @transform_6, window_bounds = array<i64: 1, 256>}, {transform_indices = @transform_7, window_bounds = array<i64: 1, 4, 256>}]} {
    %c0_i32 = arith.constant 0 : i32
    %0 = arith.cmpi eq, %arg1, %c0_i32 : i32
    %1 = arith.extui %0 : i1 to i32
    %c0_i32_0 = arith.constant 0 : i32
    %2 = arith.cmpi ne, %1, %c0_i32_0 : i32
    scf.if %2 {
      %c0_13 = arith.constant 0 : index
      %c0_14 = arith.constant 0 : index
      %c0_15 = arith.constant 0 : index
      %c0_16 = arith.constant 0 : index
      %20 = vector.load %arg2[%c0_13, %c0_14, %c0_15, %c0_16] : memref<1x4x4x256xbf16, #tpu.memory_space<vmem>>, vector<1x4x4x256xbf16>
      %c0_17 = arith.constant 0 : index
      %c0_18 = arith.constant 0 : index
      %21 = vector.load %arg3[%c0_17, %c0_18] : memref<9x256xf32, #tpu.memory_space<vmem>>, vector<9x256xf32>
      %cst_19 = arith.constant 0.000000e+00 : f32
      %22 = vector.broadcast %cst_19 : f32 to vector<1x2x2x256xf32>
      %23 = vector.extract_strided_slice %20 {offsets = [0, 0, 0, 0], sizes = [1, 2, 2, 256], strides = [1, 1, 1, 1]} : vector<1x4x4x256xbf16> to vector<1x2x2x256xbf16>
      %24 = arith.extf %23 : vector<1x2x2x256xbf16> to vector<1x2x2x256xf32>
      %25 = vector.extract_strided_slice %21 {offsets = [0, 0], sizes = [1, 256], strides = [1, 1]} : vector<9x256xf32> to vector<1x256xf32>
      %26 = vector.shape_cast %25 : vector<1x256xf32> to vector<256xf32>
      %27 = vector.shape_cast %26 : vector<256xf32> to vector<1x1x1x256xf32>
      %28 = vector.broadcast %27 : vector<1x1x1x256xf32> to vector<1x2x2x256xf32>
      %29 = arith.mulf %24, %28 : vector<1x2x2x256xf32>
      %30 = arith.addf %22, %29 : vector<1x2x2x256xf32>
      %31 = vector.extract_strided_slice %20 {offsets = [0, 0, 1, 0], sizes = [1, 2, 2, 256], strides = [1, 1, 1, 1]} : vector<1x4x4x256xbf16> to vector<1x2x2x256xbf16>
      %32 = arith.extf %31 : vector<1x2x2x256xbf16> to vector<1x2x2x256xf32>
      %33 = vector.extract_strided_slice %21 {offsets = [1, 0], sizes = [1, 256], strides = [1, 1]} : vector<9x256xf32> to vector<1x256xf32>
      %34 = vector.shape_cast %33 : vector<1x256xf32> to vector<256xf32>
      %35 = vector.shape_cast %34 : vector<256xf32> to vector<1x1x1x256xf32>
      %36 = vector.broadcast %35 : vector<1x1x1x256xf32> to vector<1x2x2x256xf32>
      %37 = arith.mulf %32, %36 : vector<1x2x2x256xf32>
      %38 = arith.addf %30, %37 : vector<1x2x2x256xf32>
      %39 = vector.extract_strided_slice %20 {offsets = [0, 0, 2, 0], sizes = [1, 2, 2, 256], strides = [1, 1, 1, 1]} : vector<1x4x4x256xbf16> to vector<1x2x2x256xbf16>
      %40 = arith.extf %39 : vector<1x2x2x256xbf16> to vector<1x2x2x256xf32>
      %41 = vector.extract_strided_slice %21 {offsets = [2, 0], sizes = [1, 256], strides = [1, 1]} : vector<9x256xf32> to vector<1x256xf32>
      %42 = vector.shape_cast %41 : vector<1x256xf32> to vector<256xf32>
      %43 = vector.shape_cast %42 : vector<256xf32> to vector<1x1x1x256xf32>
      %44 = vector.broadcast %43 : vector<1x1x1x256xf32> to vector<1x2x2x256xf32>
      %45 = arith.mulf %40, %44 : vector<1x2x2x256xf32>
      %46 = arith.addf %38, %45 : vector<1x2x2x256xf32>
      %47 = vector.extract_strided_slice %20 {offsets = [0, 1, 0, 0], sizes = [1, 2, 2, 256], strides = [1, 1, 1, 1]} : vector<1x4x4x256xbf16> to vector<1x2x2x256xbf16>
      %48 = arith.extf %47 : vector<1x2x2x256xbf16> to vector<1x2x2x256xf32>
      %49 = vector.extract_strided_slice %21 {offsets = [3, 0], sizes = [1, 256], strides = [1, 1]} : vector<9x256xf32> to vector<1x256xf32>
      %50 = vector.shape_cast %49 : vector<1x256xf32> to vector<256xf32>
      %51 = vector.shape_cast %50 : vector<256xf32> to vector<1x1x1x256xf32>
      %52 = vector.broadcast %51 : vector<1x1x1x256xf32> to vector<1x2x2x256xf32>
      %53 = arith.mulf %48, %52 : vector<1x2x2x256xf32>
      %54 = arith.addf %46, %53 : vector<1x2x2x256xf32>
      %55 = vector.extract_strided_slice %20 {offsets = [0, 1, 1, 0], sizes = [1, 2, 2, 256], strides = [1, 1, 1, 1]} : vector<1x4x4x256xbf16> to vector<1x2x2x256xbf16>
      %56 = arith.extf %55 : vector<1x2x2x256xbf16> to vector<1x2x2x256xf32>
      %57 = vector.extract_strided_slice %21 {offsets = [4, 0], sizes = [1, 256], strides = [1, 1]} : vector<9x256xf32> to vector<1x256xf32>
      %58 = vector.shape_cast %57 : vector<1x256xf32> to vector<256xf32>
      %59 = vector.shape_cast %58 : vector<256xf32> to vector<1x1x1x256xf32>
      %60 = vector.broadcast %59 : vector<1x1x1x256xf32> to vector<1x2x2x256xf32>
      %61 = arith.mulf %56, %60 : vector<1x2x2x256xf32>
      %62 = arith.addf %54, %61 : vector<1x2x2x256xf32>
      %63 = vector.extract_strided_slice %20 {offsets = [0, 1, 2, 0], sizes = [1, 2, 2, 256], strides = [1, 1, 1, 1]} : vector<1x4x4x256xbf16> to vector<1x2x2x256xbf16>
      %64 = arith.extf %63 : vector<1x2x2x256xbf16> to vector<1x2x2x256xf32>
      %65 = vector.extract_strided_slice %21 {offsets = [5, 0], sizes = [1, 256], strides = [1, 1]} : vector<9x256xf32> to vector<1x256xf32>
      %66 = vector.shape_cast %65 : vector<1x256xf32> to vector<256xf32>
      %67 = vector.shape_cast %66 : vector<256xf32> to vector<1x1x1x256xf32>
      %68 = vector.broadcast %67 : vector<1x1x1x256xf32> to vector<1x2x2x256xf32>
      %69 = arith.mulf %64, %68 : vector<1x2x2x256xf32>
      %70 = arith.addf %62, %69 : vector<1x2x2x256xf32>
      %71 = vector.extract_strided_slice %20 {offsets = [0, 2, 0, 0], sizes = [1, 2, 2, 256], strides = [1, 1, 1, 1]} : vector<1x4x4x256xbf16> to vector<1x2x2x256xbf16>
      %72 = arith.extf %71 : vector<1x2x2x256xbf16> to vector<1x2x2x256xf32>
      %73 = vector.extract_strided_slice %21 {offsets = [6, 0], sizes = [1, 256], strides = [1, 1]} : vector<9x256xf32> to vector<1x256xf32>
      %74 = vector.shape_cast %73 : vector<1x256xf32> to vector<256xf32>
      %75 = vector.shape_cast %74 : vector<256xf32> to vector<1x1x1x256xf32>
      %76 = vector.broadcast %75 : vector<1x1x1x256xf32> to vector<1x2x2x256xf32>
      %77 = arith.mulf %72, %76 : vector<1x2x2x256xf32>
      %78 = arith.addf %70, %77 : vector<1x2x2x256xf32>
      %79 = vector.extract_strided_slice %20 {offsets = [0, 2, 1, 0], sizes = [1, 2, 2, 256], strides = [1, 1, 1, 1]} : vector<1x4x4x256xbf16> to vector<1x2x2x256xbf16>
      %80 = arith.extf %79 : vector<1x2x2x256xbf16> to vector<1x2x2x256xf32>
      %81 = vector.extract_strided_slice %21 {offsets = [7, 0], sizes = [1, 256], strides = [1, 1]} : vector<9x256xf32> to vector<1x256xf32>
      %82 = vector.shape_cast %81 : vector<1x256xf32> to vector<256xf32>
      %83 = vector.shape_cast %82 : vector<256xf32> to vector<1x1x1x256xf32>
      %84 = vector.broadcast %83 : vector<1x1x1x256xf32> to vector<1x2x2x256xf32>
      %85 = arith.mulf %80, %84 : vector<1x2x2x256xf32>
      %86 = arith.addf %78, %85 : vector<1x2x2x256xf32>
      %87 = vector.extract_strided_slice %20 {offsets = [0, 2, 2, 0], sizes = [1, 2, 2, 256], strides = [1, 1, 1, 1]} : vector<1x4x4x256xbf16> to vector<1x2x2x256xbf16>
      %88 = arith.extf %87 : vector<1x2x2x256xbf16> to vector<1x2x2x256xf32>
      %89 = vector.extract_strided_slice %21 {offsets = [8, 0], sizes = [1, 256], strides = [1, 1]} : vector<9x256xf32> to vector<1x256xf32>
      %90 = vector.shape_cast %89 : vector<1x256xf32> to vector<256xf32>
      %91 = vector.shape_cast %90 : vector<256xf32> to vector<1x1x1x256xf32>
      %92 = vector.broadcast %91 : vector<1x1x1x256xf32> to vector<1x2x2x256xf32>
      %93 = arith.mulf %88, %92 : vector<1x2x2x256xf32>
      %94 = arith.addf %86, %93 : vector<1x2x2x256xf32>
      %c0_20 = arith.constant 0 : index
      %c0_21 = arith.constant 0 : index
      %95 = vector.load %arg4[%c0_20, %c0_21] : memref<1x256xf32, #tpu.memory_space<vmem>>, vector<1x256xf32>
      %96 = vector.shape_cast %95 : vector<1x256xf32> to vector<256xf32>
      %97 = vector.shape_cast %96 : vector<256xf32> to vector<1x1x1x256xf32>
      %98 = vector.broadcast %97 : vector<1x1x1x256xf32> to vector<1x2x2x256xf32>
      %99 = arith.mulf %94, %98 : vector<1x2x2x256xf32>
      %c0_22 = arith.constant 0 : index
      %c0_23 = arith.constant 0 : index
      %100 = vector.load %arg5[%c0_22, %c0_23] : memref<1x256xf32, #tpu.memory_space<vmem>>, vector<1x256xf32>
      %101 = vector.shape_cast %100 : vector<1x256xf32> to vector<256xf32>
      %102 = vector.shape_cast %101 : vector<256xf32> to vector<1x1x1x256xf32>
      %103 = vector.broadcast %102 : vector<1x1x1x256xf32> to vector<1x2x2x256xf32>
      %104 = arith.addf %99, %103 : vector<1x2x2x256xf32>
      %cst_24 = arith.constant 0.000000e+00 : f32
      %105 = vector.broadcast %cst_24 : f32 to vector<1x2x2x256xf32>
      %106 = arith.maximumf %104, %105 : vector<1x2x2x256xf32>
      %cst_25 = arith.constant 6.000000e+00 : f32
      %107 = vector.broadcast %cst_25 : f32 to vector<1x2x2x256xf32>
      %108 = arith.minimumf %106, %107 : vector<1x2x2x256xf32>
      %109 = arith.truncf %108 : vector<1x2x2x256xf32> to vector<1x2x2x256xbf16>
      %110 = vector.extract_strided_slice %109 {offsets = [0, 0, 0, 0], sizes = [1, 1, 2, 256], strides = [1, 1, 1, 1]} : vector<1x2x2x256xbf16> to vector<1x1x2x256xbf16>
      %111 = vector.shape_cast %110 : vector<1x1x2x256xbf16> to vector<2x256xbf16>
      %c0_26 = arith.constant 0 : index
      %c0_27 = arith.constant 0 : index
      %112 = vector.load %arg10[%c0_26, %c0_27] : memref<4x256xbf16, #tpu.memory_space<vmem>>, vector<2x256xbf16>
      tpu.vector_store %arg10[%c0_26, %c0_27], %111 {strides = array<i32>} : memref<4x256xbf16, #tpu.memory_space<vmem>>, vector<2x256xbf16>,
      %113 = vector.extract_strided_slice %109 {offsets = [0, 1, 0, 0], sizes = [1, 1, 2, 256], strides = [1, 1, 1, 1]} : vector<1x2x2x256xbf16> to vector<1x1x2x256xbf16>
      %114 = vector.shape_cast %113 : vector<1x1x2x256xbf16> to vector<2x256xbf16>
      %c2 = arith.constant 2 : index
      %c0_28 = arith.constant 0 : index
      %115 = vector.load %arg10[%c2, %c0_28] : memref<4x256xbf16, #tpu.memory_space<vmem>>, vector<2x256xbf16>
      tpu.vector_store %arg10[%c2, %c0_28], %114 {strides = array<i32>} : memref<4x256xbf16, #tpu.memory_space<vmem>>, vector<2x256xbf16>,
    } else {
    }
    %c0 = arith.constant 0 : index
    %c0_1 = arith.constant 0 : index
    %3 = vector.load %arg10[%c0, %c0_1] : memref<4x256xbf16, #tpu.memory_space<vmem>>, vector<4x256xbf16>
    %c0_2 = arith.constant 0 : index
    %c0_3 = arith.constant 0 : index
    %4 = vector.load %arg6[%c0_2, %c0_3] : memref<256x256xbf16, #tpu.memory_space<vmem>>, vector<256x256xbf16>
    %cst = arith.constant dense<0.000000e+00> : vector<4x256xf32>
    %5 = tpu.matmul %3, %4, %cst {dimension_numbers = #tpu.dot_dimension_numbers<[1], [0], [0], [1], [0, 0, 1, 1], [], []>} : vector<4x256xbf16>, vector<256x256xbf16>, vector<4x256xf32> -> vector<4x256xf32>
    %c0_4 = arith.constant 0 : index
    %c0_5 = arith.constant 0 : index
    %6 = vector.load %arg7[%c0_4, %c0_5] : memref<1x256xf32, #tpu.memory_space<vmem>>, vector<1x256xf32>
    %7 = vector.broadcast %6 : vector<1x256xf32> to vector<4x256xf32>
    %8 = arith.mulf %5, %7 : vector<4x256xf32>
    %c0_6 = arith.constant 0 : index
    %c0_7 = arith.constant 0 : index
    %9 = vector.load %arg8[%c0_6, %c0_7] : memref<1x256xf32, #tpu.memory_space<vmem>>, vector<1x256xf32>
    %10 = vector.broadcast %9 : vector<1x256xf32> to vector<4x256xf32>
    %11 = arith.addf %8, %10 : vector<4x256xf32>
    %cst_8 = arith.constant 0.000000e+00 : f32
    %12 = vector.broadcast %cst_8 : f32 to vector<4x256xf32>
    %13 = arith.maximumf %11, %12 : vector<4x256xf32>
    %cst_9 = arith.constant 6.000000e+00 : f32
    %14 = vector.broadcast %cst_9 : f32 to vector<4x256xf32>
    %15 = arith.minimumf %13, %14 : vector<4x256xf32>
    %16 = arith.truncf %15 : vector<4x256xf32> to vector<4x256xbf16>
    %c0_10 = arith.constant 0 : index
    %c0_11 = arith.constant 0 : index
    %c0_12 = arith.constant 0 : index
    %17 = vector.load %arg9[%c0_10, %c0_11, %c0_12] : memref<1x4x256xbf16, #tpu.memory_space<vmem>>, vector<1x4x256xbf16>
    %18 = vector.shape_cast %17 : vector<1x4x256xbf16> to vector<4x256xbf16>
    %19 = vector.shape_cast %16 : vector<4x256xbf16> to vector<1x4x256xbf16>
    tpu.vector_store %arg9[%c0_10, %c0_11, %c0_12], %19 {strides = array<i32>} : memref<1x4x256xbf16, #tpu.memory_space<vmem>>, vector<1x4x256xbf16>,
    return
  }
  func.func @transform_0(%arg0: i32, %arg1: i32) -> (i32, i32, i32, i32) {
    %c0_i32 = arith.constant 0 : i32
    %c0_i32_0 = arith.constant 0 : i32
    %c0_i32_1 = arith.constant 0 : i32
    %c0_i32_2 = arith.constant 0 : i32
    return %arg0, %c0_i32, %c0_i32_0, %c0_i32_1 : i32, i32, i32, i32
  }
  func.func @transform_1(%arg0: i32, %arg1: i32) -> (i32, i32) {
    %c0_i32 = arith.constant 0 : i32
    %c0_i32_0 = arith.constant 0 : i32
    %c0_i32_1 = arith.constant 0 : i32
    return %c0_i32, %c0_i32_0 : i32, i32
  }
  func.func @transform_2(%arg0: i32, %arg1: i32) -> (i32, i32) {
    %c0_i32 = arith.constant 0 : i32
    %c0_i32_0 = arith.constant 0 : i32
    %c0_i32_1 = arith.constant 0 : i32
    return %c0_i32, %c0_i32_0 : i32, i32
  }
  func.func @transform_3(%arg0: i32, %arg1: i32) -> (i32, i32) {
    %c0_i32 = arith.constant 0 : i32
    %c0_i32_0 = arith.constant 0 : i32
    %c0_i32_1 = arith.constant 0 : i32
    return %c0_i32, %c0_i32_0 : i32, i32
  }
  func.func @transform_4(%arg0: i32, %arg1: i32) -> (i32, i32) {
    %c0_i32 = arith.constant 0 : i32
    %c0_i32_0 = arith.constant 0 : i32
    return %c0_i32, %arg1 : i32, i32
  }
  func.func @transform_5(%arg0: i32, %arg1: i32) -> (i32, i32) {
    %c0_i32 = arith.constant 0 : i32
    %c0_i32_0 = arith.constant 0 : i32
    return %c0_i32, %arg1 : i32, i32
  }
  func.func @transform_6(%arg0: i32, %arg1: i32) -> (i32, i32) {
    %c0_i32 = arith.constant 0 : i32
    %c0_i32_0 = arith.constant 0 : i32
    return %c0_i32, %arg1 : i32, i32
  }
  func.func @transform_7(%arg0: i32, %arg1: i32) -> (i32, i32, i32) {
    %c0_i32 = arith.constant 0 : i32
    %c0_i32_0 = arith.constant 0 : i32
    return %arg0, %c0_i32, %arg1 : i32, i32, i32
  }
}

module attributes {stable_mosaic.version = 11 : i64} {
  func.func @_fused_block_s2_kernel(%arg0: i32, %arg1: i32, %arg2: memref<1x2x2x256xbf16, #tpu.memory_space<vmem>>, %arg3: memref<1x2x1x256xbf16, #tpu.memory_space<vmem>>, %arg4: memref<1x1x2x256xbf16, #tpu.memory_space<vmem>>, %arg5: memref<1x1x1x256xbf16, #tpu.memory_space<vmem>>, %arg6: memref<9x256xf32, #tpu.memory_space<vmem>>, %arg7: memref<1x256xf32, #tpu.memory_space<vmem>>, %arg8: memref<1x256xf32, #tpu.memory_space<vmem>>, %arg9: memref<256x256xbf16, #tpu.memory_space<vmem>>, %arg10: memref<1x256xf32, #tpu.memory_space<vmem>>, %arg11: memref<1x256xf32, #tpu.memory_space<vmem>>, %arg12: memref<1x1x256xbf16, #tpu.memory_space<vmem>>, %arg13: memref<1x256xbf16, #tpu.memory_space<vmem>>) attributes {dimension_semantics = [#tpu.dimension_semantics<parallel>, #tpu.dimension_semantics<arbitrary>], iteration_bounds = array<i64: 2, 2>, scalar_prefetch = 0 : i64, scratch_operands = 1 : i64, tpu.core_type = #tpu.core_type<tc>, window_params = [{transform_indices = @transform_0, window_bounds = array<i64: 1, 2, 2, 256>}, {transform_indices = @transform_1, window_bounds = array<i64: 1, 2, 1, 256>}, {transform_indices = @transform_2, window_bounds = array<i64: 1, 1, 2, 256>}, {transform_indices = @transform_3, window_bounds = array<i64: 1, 1, 1, 256>}, {pipeline_mode = #tpu.pipeline_mode<synchronous>, transform_indices = @transform_4, window_bounds = array<i64: 9, 256>}, {pipeline_mode = #tpu.pipeline_mode<synchronous>, transform_indices = @transform_5, window_bounds = array<i64: 1, 256>}, {pipeline_mode = #tpu.pipeline_mode<synchronous>, transform_indices = @transform_6, window_bounds = array<i64: 1, 256>}, {transform_indices = @transform_7, window_bounds = array<i64: 256, 256>}, {transform_indices = @transform_8, window_bounds = array<i64: 1, 256>}, {transform_indices = @transform_9, window_bounds = array<i64: 1, 256>}, {transform_indices = @transform_10, window_bounds = array<i64: 1, 1, 256>}]} {
    %c0_i32 = arith.constant 0 : i32
    %0 = arith.cmpi eq, %arg1, %c0_i32 : i32
    %1 = arith.extui %0 : i1 to i32
    %c0_i32_0 = arith.constant 0 : i32
    %2 = arith.cmpi ne, %1, %c0_i32_0 : i32
    scf.if %2 {
      %c0_13 = arith.constant 0 : index
      %c0_14 = arith.constant 0 : index
      %c0_15 = arith.constant 0 : index
      %c0_16 = arith.constant 0 : index
      %18 = vector.load %arg2[%c0_13, %c0_14, %c0_15, %c0_16] : memref<1x2x2x256xbf16, #tpu.memory_space<vmem>>, vector<1x2x2x256xbf16>
      %c0_17 = arith.constant 0 : index
      %c0_18 = arith.constant 0 : index
      %c0_19 = arith.constant 0 : index
      %c0_20 = arith.constant 0 : index
      %19 = vector.load %arg3[%c0_17, %c0_18, %c0_19, %c0_20] : memref<1x2x1x256xbf16, #tpu.memory_space<vmem>>, vector<1x2x1x256xbf16>
      %c0_21 = arith.constant 0 : index
      %c0_22 = arith.constant 0 : index
      %c0_23 = arith.constant 0 : index
      %c0_24 = arith.constant 0 : index
      %20 = vector.load %arg4[%c0_21, %c0_22, %c0_23, %c0_24] : memref<1x1x2x256xbf16, #tpu.memory_space<vmem>>, vector<1x1x2x256xbf16>
      %c0_25 = arith.constant 0 : index
      %c0_26 = arith.constant 0 : index
      %c0_27 = arith.constant 0 : index
      %c0_28 = arith.constant 0 : index
      %21 = vector.load %arg5[%c0_25, %c0_26, %c0_27, %c0_28] : memref<1x1x1x256xbf16, #tpu.memory_space<vmem>>, vector<1x1x1x256xbf16>
      %c0_29 = arith.constant 0 : index
      %c0_30 = arith.constant 0 : index
      %22 = vector.load %arg6[%c0_29, %c0_30] : memref<9x256xf32, #tpu.memory_space<vmem>>, vector<9x256xf32>
      %cst_31 = arith.constant 0.000000e+00 : f32
      %23 = vector.broadcast %cst_31 : f32 to vector<1x1x1x256xf32>
      %24 = vector.extract_strided_slice %18 {offsets = [0, 0, 0, 0], sizes = [1, 1, 1, 256], strides = [1, 1, 1, 1]} : vector<1x2x2x256xbf16> to vector<1x1x1x256xbf16>
      %25 = arith.extf %24 : vector<1x1x1x256xbf16> to vector<1x1x1x256xf32>
      %26 = vector.extract_strided_slice %22 {offsets = [0, 0], sizes = [1, 256], strides = [1, 1]} : vector<9x256xf32> to vector<1x256xf32>
      %27 = vector.shape_cast %26 : vector<1x256xf32> to vector<256xf32>
      %28 = vector.shape_cast %27 : vector<256xf32> to vector<1x1x1x256xf32>
      %29 = arith.mulf %25, %28 : vector<1x1x1x256xf32>
      %30 = arith.addf %23, %29 : vector<1x1x1x256xf32>
      %31 = vector.extract_strided_slice %19 {offsets = [0, 0, 0, 0], sizes = [1, 1, 1, 256], strides = [1, 1, 1, 1]} : vector<1x2x1x256xbf16> to vector<1x1x1x256xbf16>
      %32 = arith.extf %31 : vector<1x1x1x256xbf16> to vector<1x1x1x256xf32>
      %33 = vector.extract_strided_slice %22 {offsets = [1, 0], sizes = [1, 256], strides = [1, 1]} : vector<9x256xf32> to vector<1x256xf32>
      %34 = vector.shape_cast %33 : vector<1x256xf32> to vector<256xf32>
      %35 = vector.shape_cast %34 : vector<256xf32> to vector<1x1x1x256xf32>
      %36 = arith.mulf %32, %35 : vector<1x1x1x256xf32>
      %37 = arith.addf %30, %36 : vector<1x1x1x256xf32>
      %38 = vector.extract_strided_slice %18 {offsets = [0, 0, 1, 0], sizes = [1, 1, 1, 256], strides = [1, 1, 1, 1]} : vector<1x2x2x256xbf16> to vector<1x1x1x256xbf16>
      %39 = arith.extf %38 : vector<1x1x1x256xbf16> to vector<1x1x1x256xf32>
      %40 = vector.extract_strided_slice %22 {offsets = [2, 0], sizes = [1, 256], strides = [1, 1]} : vector<9x256xf32> to vector<1x256xf32>
      %41 = vector.shape_cast %40 : vector<1x256xf32> to vector<256xf32>
      %42 = vector.shape_cast %41 : vector<256xf32> to vector<1x1x1x256xf32>
      %43 = arith.mulf %39, %42 : vector<1x1x1x256xf32>
      %44 = arith.addf %37, %43 : vector<1x1x1x256xf32>
      %45 = vector.extract_strided_slice %20 {offsets = [0, 0, 0, 0], sizes = [1, 1, 1, 256], strides = [1, 1, 1, 1]} : vector<1x1x2x256xbf16> to vector<1x1x1x256xbf16>
      %46 = arith.extf %45 : vector<1x1x1x256xbf16> to vector<1x1x1x256xf32>
      %47 = vector.extract_strided_slice %22 {offsets = [3, 0], sizes = [1, 256], strides = [1, 1]} : vector<9x256xf32> to vector<1x256xf32>
      %48 = vector.shape_cast %47 : vector<1x256xf32> to vector<256xf32>
      %49 = vector.shape_cast %48 : vector<256xf32> to vector<1x1x1x256xf32>
      %50 = arith.mulf %46, %49 : vector<1x1x1x256xf32>
      %51 = arith.addf %44, %50 : vector<1x1x1x256xf32>
      %52 = arith.extf %21 : vector<1x1x1x256xbf16> to vector<1x1x1x256xf32>
      %53 = vector.extract_strided_slice %22 {offsets = [4, 0], sizes = [1, 256], strides = [1, 1]} : vector<9x256xf32> to vector<1x256xf32>
      %54 = vector.shape_cast %53 : vector<1x256xf32> to vector<256xf32>
      %55 = vector.shape_cast %54 : vector<256xf32> to vector<1x1x1x256xf32>
      %56 = arith.mulf %52, %55 : vector<1x1x1x256xf32>
      %57 = arith.addf %51, %56 : vector<1x1x1x256xf32>
      %58 = vector.extract_strided_slice %20 {offsets = [0, 0, 1, 0], sizes = [1, 1, 1, 256], strides = [1, 1, 1, 1]} : vector<1x1x2x256xbf16> to vector<1x1x1x256xbf16>
      %59 = arith.extf %58 : vector<1x1x1x256xbf16> to vector<1x1x1x256xf32>
      %60 = vector.extract_strided_slice %22 {offsets = [5, 0], sizes = [1, 256], strides = [1, 1]} : vector<9x256xf32> to vector<1x256xf32>
      %61 = vector.shape_cast %60 : vector<1x256xf32> to vector<256xf32>
      %62 = vector.shape_cast %61 : vector<256xf32> to vector<1x1x1x256xf32>
      %63 = arith.mulf %59, %62 : vector<1x1x1x256xf32>
      %64 = arith.addf %57, %63 : vector<1x1x1x256xf32>
      %65 = vector.extract_strided_slice %18 {offsets = [0, 1, 0, 0], sizes = [1, 1, 1, 256], strides = [1, 1, 1, 1]} : vector<1x2x2x256xbf16> to vector<1x1x1x256xbf16>
      %66 = arith.extf %65 : vector<1x1x1x256xbf16> to vector<1x1x1x256xf32>
      %67 = vector.extract_strided_slice %22 {offsets = [6, 0], sizes = [1, 256], strides = [1, 1]} : vector<9x256xf32> to vector<1x256xf32>
      %68 = vector.shape_cast %67 : vector<1x256xf32> to vector<256xf32>
      %69 = vector.shape_cast %68 : vector<256xf32> to vector<1x1x1x256xf32>
      %70 = arith.mulf %66, %69 : vector<1x1x1x256xf32>
      %71 = arith.addf %64, %70 : vector<1x1x1x256xf32>
      %72 = vector.extract_strided_slice %19 {offsets = [0, 1, 0, 0], sizes = [1, 1, 1, 256], strides = [1, 1, 1, 1]} : vector<1x2x1x256xbf16> to vector<1x1x1x256xbf16>
      %73 = arith.extf %72 : vector<1x1x1x256xbf16> to vector<1x1x1x256xf32>
      %74 = vector.extract_strided_slice %22 {offsets = [7, 0], sizes = [1, 256], strides = [1, 1]} : vector<9x256xf32> to vector<1x256xf32>
      %75 = vector.shape_cast %74 : vector<1x256xf32> to vector<256xf32>
      %76 = vector.shape_cast %75 : vector<256xf32> to vector<1x1x1x256xf32>
      %77 = arith.mulf %73, %76 : vector<1x1x1x256xf32>
      %78 = arith.addf %71, %77 : vector<1x1x1x256xf32>
      %79 = vector.extract_strided_slice %18 {offsets = [0, 1, 1, 0], sizes = [1, 1, 1, 256], strides = [1, 1, 1, 1]} : vector<1x2x2x256xbf16> to vector<1x1x1x256xbf16>
      %80 = arith.extf %79 : vector<1x1x1x256xbf16> to vector<1x1x1x256xf32>
      %81 = vector.extract_strided_slice %22 {offsets = [8, 0], sizes = [1, 256], strides = [1, 1]} : vector<9x256xf32> to vector<1x256xf32>
      %82 = vector.shape_cast %81 : vector<1x256xf32> to vector<256xf32>
      %83 = vector.shape_cast %82 : vector<256xf32> to vector<1x1x1x256xf32>
      %84 = arith.mulf %80, %83 : vector<1x1x1x256xf32>
      %85 = arith.addf %78, %84 : vector<1x1x1x256xf32>
      %c0_32 = arith.constant 0 : index
      %c0_33 = arith.constant 0 : index
      %86 = vector.load %arg7[%c0_32, %c0_33] : memref<1x256xf32, #tpu.memory_space<vmem>>, vector<1x256xf32>
      %87 = vector.shape_cast %86 : vector<1x256xf32> to vector<256xf32>
      %88 = vector.shape_cast %87 : vector<256xf32> to vector<1x1x1x256xf32>
      %89 = arith.mulf %85, %88 : vector<1x1x1x256xf32>
      %c0_34 = arith.constant 0 : index
      %c0_35 = arith.constant 0 : index
      %90 = vector.load %arg8[%c0_34, %c0_35] : memref<1x256xf32, #tpu.memory_space<vmem>>, vector<1x256xf32>
      %91 = vector.shape_cast %90 : vector<1x256xf32> to vector<256xf32>
      %92 = vector.shape_cast %91 : vector<256xf32> to vector<1x1x1x256xf32>
      %93 = arith.addf %89, %92 : vector<1x1x1x256xf32>
      %cst_36 = arith.constant 0.000000e+00 : f32
      %94 = vector.broadcast %cst_36 : f32 to vector<1x1x1x256xf32>
      %95 = arith.maximumf %93, %94 : vector<1x1x1x256xf32>
      %cst_37 = arith.constant 6.000000e+00 : f32
      %96 = vector.broadcast %cst_37 : f32 to vector<1x1x1x256xf32>
      %97 = arith.minimumf %95, %96 : vector<1x1x1x256xf32>
      %98 = arith.truncf %97 : vector<1x1x1x256xf32> to vector<1x1x1x256xbf16>
      %99 = vector.shape_cast %98 : vector<1x1x1x256xbf16> to vector<1x256xbf16>
      %c0_38 = arith.constant 0 : index
      %c0_39 = arith.constant 0 : index
      %100 = vector.load %arg13[%c0_38, %c0_39] : memref<1x256xbf16, #tpu.memory_space<vmem>>, vector<1x256xbf16>
      tpu.vector_store %arg13[%c0_38, %c0_39], %99 {strides = array<i32>} : memref<1x256xbf16, #tpu.memory_space<vmem>>, vector<1x256xbf16>,
    } else {
    }
    %c0 = arith.constant 0 : index
    %c0_1 = arith.constant 0 : index
    %3 = vector.load %arg13[%c0, %c0_1] : memref<1x256xbf16, #tpu.memory_space<vmem>>, vector<1x256xbf16>
    %c0_2 = arith.constant 0 : index
    %c0_3 = arith.constant 0 : index
    %4 = vector.load %arg9[%c0_2, %c0_3] : memref<256x256xbf16, #tpu.memory_space<vmem>>, vector<256x256xbf16>
    %cst = arith.constant dense<0.000000e+00> : vector<1x256xf32>
    %5 = tpu.matmul %3, %4, %cst {dimension_numbers = #tpu.dot_dimension_numbers<[1], [0], [0], [1], [0, 0, 1, 1], [], []>} : vector<1x256xbf16>, vector<256x256xbf16>, vector<1x256xf32> -> vector<1x256xf32>
    %c0_4 = arith.constant 0 : index
    %c0_5 = arith.constant 0 : index
    %6 = vector.load %arg10[%c0_4, %c0_5] : memref<1x256xf32, #tpu.memory_space<vmem>>, vector<1x256xf32>
    %7 = arith.mulf %5, %6 : vector<1x256xf32>
    %c0_6 = arith.constant 0 : index
    %c0_7 = arith.constant 0 : index
    %8 = vector.load %arg11[%c0_6, %c0_7] : memref<1x256xf32, #tpu.memory_space<vmem>>, vector<1x256xf32>
    %9 = arith.addf %7, %8 : vector<1x256xf32>
    %cst_8 = arith.constant 0.000000e+00 : f32
    %10 = vector.broadcast %cst_8 : f32 to vector<1x256xf32>
    %11 = arith.maximumf %9, %10 : vector<1x256xf32>
    %cst_9 = arith.constant 6.000000e+00 : f32
    %12 = vector.broadcast %cst_9 : f32 to vector<1x256xf32>
    %13 = arith.minimumf %11, %12 : vector<1x256xf32>
    %14 = arith.truncf %13 : vector<1x256xf32> to vector<1x256xbf16>
    %c0_10 = arith.constant 0 : index
    %c0_11 = arith.constant 0 : index
    %c0_12 = arith.constant 0 : index
    %15 = vector.load %arg12[%c0_10, %c0_11, %c0_12] : memref<1x1x256xbf16, #tpu.memory_space<vmem>>, vector<1x1x256xbf16>
    %16 = vector.shape_cast %15 : vector<1x1x256xbf16> to vector<1x256xbf16>
    %17 = vector.shape_cast %14 : vector<1x256xbf16> to vector<1x1x256xbf16>
    tpu.vector_store %arg12[%c0_10, %c0_11, %c0_12], %17 {strides = array<i32>} : memref<1x1x256xbf16, #tpu.memory_space<vmem>>, vector<1x1x256xbf16>,
    return
  }
  func.func @transform_0(%arg0: i32, %arg1: i32) -> (i32, i32, i32, i32) {
    %c0_i32 = arith.constant 0 : i32
    %c0_i32_0 = arith.constant 0 : i32
    %c0_i32_1 = arith.constant 0 : i32
    %c0_i32_2 = arith.constant 0 : i32
    return %arg0, %c0_i32, %c0_i32_0, %c0_i32_1 : i32, i32, i32, i32
  }
  func.func @transform_1(%arg0: i32, %arg1: i32) -> (i32, i32, i32, i32) {
    %c0_i32 = arith.constant 0 : i32
    %c0_i32_0 = arith.constant 0 : i32
    %c0_i32_1 = arith.constant 0 : i32
    %c0_i32_2 = arith.constant 0 : i32
    return %arg0, %c0_i32, %c0_i32_0, %c0_i32_1 : i32, i32, i32, i32
  }
  func.func @transform_2(%arg0: i32, %arg1: i32) -> (i32, i32, i32, i32) {
    %c0_i32 = arith.constant 0 : i32
    %c0_i32_0 = arith.constant 0 : i32
    %c0_i32_1 = arith.constant 0 : i32
    %c0_i32_2 = arith.constant 0 : i32
    return %arg0, %c0_i32, %c0_i32_0, %c0_i32_1 : i32, i32, i32, i32
  }
  func.func @transform_3(%arg0: i32, %arg1: i32) -> (i32, i32, i32, i32) {
    %c0_i32 = arith.constant 0 : i32
    %c0_i32_0 = arith.constant 0 : i32
    %c0_i32_1 = arith.constant 0 : i32
    %c0_i32_2 = arith.constant 0 : i32
    return %arg0, %c0_i32, %c0_i32_0, %c0_i32_1 : i32, i32, i32, i32
  }
  func.func @transform_4(%arg0: i32, %arg1: i32) -> (i32, i32) {
    %c0_i32 = arith.constant 0 : i32
    %c0_i32_0 = arith.constant 0 : i32
    %c0_i32_1 = arith.constant 0 : i32
    return %c0_i32, %c0_i32_0 : i32, i32
  }
  func.func @transform_5(%arg0: i32, %arg1: i32) -> (i32, i32) {
    %c0_i32 = arith.constant 0 : i32
    %c0_i32_0 = arith.constant 0 : i32
    %c0_i32_1 = arith.constant 0 : i32
    return %c0_i32, %c0_i32_0 : i32, i32
  }
  func.func @transform_6(%arg0: i32, %arg1: i32) -> (i32, i32) {
    %c0_i32 = arith.constant 0 : i32
    %c0_i32_0 = arith.constant 0 : i32
    %c0_i32_1 = arith.constant 0 : i32
    return %c0_i32, %c0_i32_0 : i32, i32
  }
  func.func @transform_7(%arg0: i32, %arg1: i32) -> (i32, i32) {
    %c0_i32 = arith.constant 0 : i32
    %c0_i32_0 = arith.constant 0 : i32
    return %c0_i32, %arg1 : i32, i32
  }
  func.func @transform_8(%arg0: i32, %arg1: i32) -> (i32, i32) {
    %c0_i32 = arith.constant 0 : i32
    %c0_i32_0 = arith.constant 0 : i32
    return %c0_i32, %arg1 : i32, i32
  }
  func.func @transform_9(%arg0: i32, %arg1: i32) -> (i32, i32) {
    %c0_i32 = arith.constant 0 : i32
    %c0_i32_0 = arith.constant 0 : i32
    return %c0_i32, %arg1 : i32, i32
  }
  func.func @transform_10(%arg0: i32, %arg1: i32) -> (i32, i32, i32) {
    %c0_i32 = arith.constant 0 : i32
    %c0_i32_0 = arith.constant 0 : i32
    return %arg0, %c0_i32, %arg1 : i32, i32, i32
  }
}

module attributes {stable_mosaic.version = 11 : i64} {
  func.func @_fused_block_s1_kernel(%arg0: i32, %arg1: i32, %arg2: memref<1x3x3x512xbf16, #tpu.memory_space<vmem>>, %arg3: memref<9x512xf32, #tpu.memory_space<vmem>>, %arg4: memref<1x512xf32, #tpu.memory_space<vmem>>, %arg5: memref<1x512xf32, #tpu.memory_space<vmem>>, %arg6: memref<512x256xbf16, #tpu.memory_space<vmem>>, %arg7: memref<1x256xf32, #tpu.memory_space<vmem>>, %arg8: memref<1x256xf32, #tpu.memory_space<vmem>>, %arg9: memref<1x1x256xbf16, #tpu.memory_space<vmem>>, %arg10: memref<1x512xbf16, #tpu.memory_space<vmem>>) attributes {dimension_semantics = [#tpu.dimension_semantics<parallel>, #tpu.dimension_semantics<arbitrary>], iteration_bounds = array<i64: 2, 2>, scalar_prefetch = 0 : i64, scratch_operands = 1 : i64, tpu.core_type = #tpu.core_type<tc>, window_params = [{transform_indices = @transform_0, window_bounds = array<i64: 1, 3, 3, 512>}, {pipeline_mode = #tpu.pipeline_mode<synchronous>, transform_indices = @transform_1, window_bounds = array<i64: 9, 512>}, {pipeline_mode = #tpu.pipeline_mode<synchronous>, transform_indices = @transform_2, window_bounds = array<i64: 1, 512>}, {pipeline_mode = #tpu.pipeline_mode<synchronous>, transform_indices = @transform_3, window_bounds = array<i64: 1, 512>}, {transform_indices = @transform_4, window_bounds = array<i64: 512, 256>}, {transform_indices = @transform_5, window_bounds = array<i64: 1, 256>}, {transform_indices = @transform_6, window_bounds = array<i64: 1, 256>}, {transform_indices = @transform_7, window_bounds = array<i64: 1, 1, 256>}]} {
    %c0_i32 = arith.constant 0 : i32
    %0 = arith.cmpi eq, %arg1, %c0_i32 : i32
    %1 = arith.extui %0 : i1 to i32
    %c0_i32_0 = arith.constant 0 : i32
    %2 = arith.cmpi ne, %1, %c0_i32_0 : i32
    scf.if %2 {
      %c0_13 = arith.constant 0 : index
      %c0_14 = arith.constant 0 : index
      %c0_15 = arith.constant 0 : index
      %c0_16 = arith.constant 0 : index
      %18 = vector.load %arg2[%c0_13, %c0_14, %c0_15, %c0_16] : memref<1x3x3x512xbf16, #tpu.memory_space<vmem>>, vector<1x3x3x512xbf16>
      %c0_17 = arith.constant 0 : index
      %c0_18 = arith.constant 0 : index
      %19 = vector.load %arg3[%c0_17, %c0_18] : memref<9x512xf32, #tpu.memory_space<vmem>>, vector<9x512xf32>
      %cst_19 = arith.constant 0.000000e+00 : f32
      %20 = vector.broadcast %cst_19 : f32 to vector<1x1x1x512xf32>
      %21 = vector.extract_strided_slice %18 {offsets = [0, 0, 0, 0], sizes = [1, 1, 1, 512], strides = [1, 1, 1, 1]} : vector<1x3x3x512xbf16> to vector<1x1x1x512xbf16>
      %22 = arith.extf %21 : vector<1x1x1x512xbf16> to vector<1x1x1x512xf32>
      %23 = vector.extract_strided_slice %19 {offsets = [0, 0], sizes = [1, 512], strides = [1, 1]} : vector<9x512xf32> to vector<1x512xf32>
      %24 = vector.shape_cast %23 : vector<1x512xf32> to vector<512xf32>
      %25 = vector.shape_cast %24 : vector<512xf32> to vector<1x1x1x512xf32>
      %26 = arith.mulf %22, %25 : vector<1x1x1x512xf32>
      %27 = arith.addf %20, %26 : vector<1x1x1x512xf32>
      %28 = vector.extract_strided_slice %18 {offsets = [0, 0, 1, 0], sizes = [1, 1, 1, 512], strides = [1, 1, 1, 1]} : vector<1x3x3x512xbf16> to vector<1x1x1x512xbf16>
      %29 = arith.extf %28 : vector<1x1x1x512xbf16> to vector<1x1x1x512xf32>
      %30 = vector.extract_strided_slice %19 {offsets = [1, 0], sizes = [1, 512], strides = [1, 1]} : vector<9x512xf32> to vector<1x512xf32>
      %31 = vector.shape_cast %30 : vector<1x512xf32> to vector<512xf32>
      %32 = vector.shape_cast %31 : vector<512xf32> to vector<1x1x1x512xf32>
      %33 = arith.mulf %29, %32 : vector<1x1x1x512xf32>
      %34 = arith.addf %27, %33 : vector<1x1x1x512xf32>
      %35 = vector.extract_strided_slice %18 {offsets = [0, 0, 2, 0], sizes = [1, 1, 1, 512], strides = [1, 1, 1, 1]} : vector<1x3x3x512xbf16> to vector<1x1x1x512xbf16>
      %36 = arith.extf %35 : vector<1x1x1x512xbf16> to vector<1x1x1x512xf32>
      %37 = vector.extract_strided_slice %19 {offsets = [2, 0], sizes = [1, 512], strides = [1, 1]} : vector<9x512xf32> to vector<1x512xf32>
      %38 = vector.shape_cast %37 : vector<1x512xf32> to vector<512xf32>
      %39 = vector.shape_cast %38 : vector<512xf32> to vector<1x1x1x512xf32>
      %40 = arith.mulf %36, %39 : vector<1x1x1x512xf32>
      %41 = arith.addf %34, %40 : vector<1x1x1x512xf32>
      %42 = vector.extract_strided_slice %18 {offsets = [0, 1, 0, 0], sizes = [1, 1, 1, 512], strides = [1, 1, 1, 1]} : vector<1x3x3x512xbf16> to vector<1x1x1x512xbf16>
      %43 = arith.extf %42 : vector<1x1x1x512xbf16> to vector<1x1x1x512xf32>
      %44 = vector.extract_strided_slice %19 {offsets = [3, 0], sizes = [1, 512], strides = [1, 1]} : vector<9x512xf32> to vector<1x512xf32>
      %45 = vector.shape_cast %44 : vector<1x512xf32> to vector<512xf32>
      %46 = vector.shape_cast %45 : vector<512xf32> to vector<1x1x1x512xf32>
      %47 = arith.mulf %43, %46 : vector<1x1x1x512xf32>
      %48 = arith.addf %41, %47 : vector<1x1x1x512xf32>
      %49 = vector.extract_strided_slice %18 {offsets = [0, 1, 1, 0], sizes = [1, 1, 1, 512], strides = [1, 1, 1, 1]} : vector<1x3x3x512xbf16> to vector<1x1x1x512xbf16>
      %50 = arith.extf %49 : vector<1x1x1x512xbf16> to vector<1x1x1x512xf32>
      %51 = vector.extract_strided_slice %19 {offsets = [4, 0], sizes = [1, 512], strides = [1, 1]} : vector<9x512xf32> to vector<1x512xf32>
      %52 = vector.shape_cast %51 : vector<1x512xf32> to vector<512xf32>
      %53 = vector.shape_cast %52 : vector<512xf32> to vector<1x1x1x512xf32>
      %54 = arith.mulf %50, %53 : vector<1x1x1x512xf32>
      %55 = arith.addf %48, %54 : vector<1x1x1x512xf32>
      %56 = vector.extract_strided_slice %18 {offsets = [0, 1, 2, 0], sizes = [1, 1, 1, 512], strides = [1, 1, 1, 1]} : vector<1x3x3x512xbf16> to vector<1x1x1x512xbf16>
      %57 = arith.extf %56 : vector<1x1x1x512xbf16> to vector<1x1x1x512xf32>
      %58 = vector.extract_strided_slice %19 {offsets = [5, 0], sizes = [1, 512], strides = [1, 1]} : vector<9x512xf32> to vector<1x512xf32>
      %59 = vector.shape_cast %58 : vector<1x512xf32> to vector<512xf32>
      %60 = vector.shape_cast %59 : vector<512xf32> to vector<1x1x1x512xf32>
      %61 = arith.mulf %57, %60 : vector<1x1x1x512xf32>
      %62 = arith.addf %55, %61 : vector<1x1x1x512xf32>
      %63 = vector.extract_strided_slice %18 {offsets = [0, 2, 0, 0], sizes = [1, 1, 1, 512], strides = [1, 1, 1, 1]} : vector<1x3x3x512xbf16> to vector<1x1x1x512xbf16>
      %64 = arith.extf %63 : vector<1x1x1x512xbf16> to vector<1x1x1x512xf32>
      %65 = vector.extract_strided_slice %19 {offsets = [6, 0], sizes = [1, 512], strides = [1, 1]} : vector<9x512xf32> to vector<1x512xf32>
      %66 = vector.shape_cast %65 : vector<1x512xf32> to vector<512xf32>
      %67 = vector.shape_cast %66 : vector<512xf32> to vector<1x1x1x512xf32>
      %68 = arith.mulf %64, %67 : vector<1x1x1x512xf32>
      %69 = arith.addf %62, %68 : vector<1x1x1x512xf32>
      %70 = vector.extract_strided_slice %18 {offsets = [0, 2, 1, 0], sizes = [1, 1, 1, 512], strides = [1, 1, 1, 1]} : vector<1x3x3x512xbf16> to vector<1x1x1x512xbf16>
      %71 = arith.extf %70 : vector<1x1x1x512xbf16> to vector<1x1x1x512xf32>
      %72 = vector.extract_strided_slice %19 {offsets = [7, 0], sizes = [1, 512], strides = [1, 1]} : vector<9x512xf32> to vector<1x512xf32>
      %73 = vector.shape_cast %72 : vector<1x512xf32> to vector<512xf32>
      %74 = vector.shape_cast %73 : vector<512xf32> to vector<1x1x1x512xf32>
      %75 = arith.mulf %71, %74 : vector<1x1x1x512xf32>
      %76 = arith.addf %69, %75 : vector<1x1x1x512xf32>
      %77 = vector.extract_strided_slice %18 {offsets = [0, 2, 2, 0], sizes = [1, 1, 1, 512], strides = [1, 1, 1, 1]} : vector<1x3x3x512xbf16> to vector<1x1x1x512xbf16>
      %78 = arith.extf %77 : vector<1x1x1x512xbf16> to vector<1x1x1x512xf32>
      %79 = vector.extract_strided_slice %19 {offsets = [8, 0], sizes = [1, 512], strides = [1, 1]} : vector<9x512xf32> to vector<1x512xf32>
      %80 = vector.shape_cast %79 : vector<1x512xf32> to vector<512xf32>
      %81 = vector.shape_cast %80 : vector<512xf32> to vector<1x1x1x512xf32>
      %82 = arith.mulf %78, %81 : vector<1x1x1x512xf32>
      %83 = arith.addf %76, %82 : vector<1x1x1x512xf32>
      %c0_20 = arith.constant 0 : index
      %c0_21 = arith.constant 0 : index
      %84 = vector.load %arg4[%c0_20, %c0_21] : memref<1x512xf32, #tpu.memory_space<vmem>>, vector<1x512xf32>
      %85 = vector.shape_cast %84 : vector<1x512xf32> to vector<512xf32>
      %86 = vector.shape_cast %85 : vector<512xf32> to vector<1x1x1x512xf32>
      %87 = arith.mulf %83, %86 : vector<1x1x1x512xf32>
      %c0_22 = arith.constant 0 : index
      %c0_23 = arith.constant 0 : index
      %88 = vector.load %arg5[%c0_22, %c0_23] : memref<1x512xf32, #tpu.memory_space<vmem>>, vector<1x512xf32>
      %89 = vector.shape_cast %88 : vector<1x512xf32> to vector<512xf32>
      %90 = vector.shape_cast %89 : vector<512xf32> to vector<1x1x1x512xf32>
      %91 = arith.addf %87, %90 : vector<1x1x1x512xf32>
      %cst_24 = arith.constant 0.000000e+00 : f32
      %92 = vector.broadcast %cst_24 : f32 to vector<1x1x1x512xf32>
      %93 = arith.maximumf %91, %92 : vector<1x1x1x512xf32>
      %cst_25 = arith.constant 6.000000e+00 : f32
      %94 = vector.broadcast %cst_25 : f32 to vector<1x1x1x512xf32>
      %95 = arith.minimumf %93, %94 : vector<1x1x1x512xf32>
      %96 = arith.truncf %95 : vector<1x1x1x512xf32> to vector<1x1x1x512xbf16>
      %97 = vector.shape_cast %96 : vector<1x1x1x512xbf16> to vector<1x512xbf16>
      %c0_26 = arith.constant 0 : index
      %c0_27 = arith.constant 0 : index
      %98 = vector.load %arg10[%c0_26, %c0_27] : memref<1x512xbf16, #tpu.memory_space<vmem>>, vector<1x512xbf16>
      tpu.vector_store %arg10[%c0_26, %c0_27], %97 {strides = array<i32>} : memref<1x512xbf16, #tpu.memory_space<vmem>>, vector<1x512xbf16>,
    } else {
    }
    %c0 = arith.constant 0 : index
    %c0_1 = arith.constant 0 : index
    %3 = vector.load %arg10[%c0, %c0_1] : memref<1x512xbf16, #tpu.memory_space<vmem>>, vector<1x512xbf16>
    %c0_2 = arith.constant 0 : index
    %c0_3 = arith.constant 0 : index
    %4 = vector.load %arg6[%c0_2, %c0_3] : memref<512x256xbf16, #tpu.memory_space<vmem>>, vector<512x256xbf16>
    %cst = arith.constant dense<0.000000e+00> : vector<1x256xf32>
    %5 = tpu.matmul %3, %4, %cst {dimension_numbers = #tpu.dot_dimension_numbers<[1], [0], [0], [1], [0, 0, 1, 1], [], []>} : vector<1x512xbf16>, vector<512x256xbf16>, vector<1x256xf32> -> vector<1x256xf32>
    %c0_4 = arith.constant 0 : index
    %c0_5 = arith.constant 0 : index
    %6 = vector.load %arg7[%c0_4, %c0_5] : memref<1x256xf32, #tpu.memory_space<vmem>>, vector<1x256xf32>
    %7 = arith.mulf %5, %6 : vector<1x256xf32>
    %c0_6 = arith.constant 0 : index
    %c0_7 = arith.constant 0 : index
    %8 = vector.load %arg8[%c0_6, %c0_7] : memref<1x256xf32, #tpu.memory_space<vmem>>, vector<1x256xf32>
    %9 = arith.addf %7, %8 : vector<1x256xf32>
    %cst_8 = arith.constant 0.000000e+00 : f32
    %10 = vector.broadcast %cst_8 : f32 to vector<1x256xf32>
    %11 = arith.maximumf %9, %10 : vector<1x256xf32>
    %cst_9 = arith.constant 6.000000e+00 : f32
    %12 = vector.broadcast %cst_9 : f32 to vector<1x256xf32>
    %13 = arith.minimumf %11, %12 : vector<1x256xf32>
    %14 = arith.truncf %13 : vector<1x256xf32> to vector<1x256xbf16>
    %c0_10 = arith.constant 0 : index
    %c0_11 = arith.constant 0 : index
    %c0_12 = arith.constant 0 : index
    %15 = vector.load %arg9[%c0_10, %c0_11, %c0_12] : memref<1x1x256xbf16, #tpu.memory_space<vmem>>, vector<1x1x256xbf16>
    %16 = vector.shape_cast %15 : vector<1x1x256xbf16> to vector<1x256xbf16>
    %17 = vector.shape_cast %14 : vector<1x256xbf16> to vector<1x1x256xbf16>
    tpu.vector_store %arg9[%c0_10, %c0_11, %c0_12], %17 {strides = array<i32>} : memref<1x1x256xbf16, #tpu.memory_space<vmem>>, vector<1x1x256xbf16>,
    return
  }
  func.func @transform_0(%arg0: i32, %arg1: i32) -> (i32, i32, i32, i32) {
    %c0_i32 = arith.constant 0 : i32
    %c0_i32_0 = arith.constant 0 : i32
    %c0_i32_1 = arith.constant 0 : i32
    %c0_i32_2 = arith.constant 0 : i32
    return %arg0, %c0_i32, %c0_i32_0, %c0_i32_1 : i32, i32, i32, i32
  }
  func.func @transform_1(%arg0: i32, %arg1: i32) -> (i32, i32) {
    %c0_i32 = arith.constant 0 : i32
    %c0_i32_0 = arith.constant 0 : i32
    %c0_i32_1 = arith.constant 0 : i32
    return %c0_i32, %c0_i32_0 : i32, i32
  }
  func.func @transform_2(%arg0: i32, %arg1: i32) -> (i32, i32) {
    %c0_i32 = arith.constant 0 : i32
    %c0_i32_0 = arith.constant 0 : i32
    %c0_i32_1 = arith.constant 0 : i32
    return %c0_i32, %c0_i32_0 : i32, i32
  }
  func.func @transform_3(%arg0: i32, %arg1: i32) -> (i32, i32) {
    %c0_i32 = arith.constant 0 : i32
    %c0_i32_0 = arith.constant 0 : i32
    %c0_i32_1 = arith.constant 0 : i32
    return %c0_i32, %c0_i32_0 : i32, i32
  }
  func.func @transform_4(%arg0: i32, %arg1: i32) -> (i32, i32) {
    %c0_i32 = arith.constant 0 : i32
    %c0_i32_0 = arith.constant 0 : i32
    return %c0_i32, %arg1 : i32, i32
  }
  func.func @transform_5(%arg0: i32, %arg1: i32) -> (i32, i32) {
    %c0_i32 = arith.constant 0 : i32
    %c0_i32_0 = arith.constant 0 : i32
    return %c0_i32, %arg1 : i32, i32
  }
  func.func @transform_6(%arg0: i32, %arg1: i32) -> (i32, i32) {
    %c0_i32 = arith.constant 0 : i32
    %c0_i32_0 = arith.constant 0 : i32
    return %c0_i32, %arg1 : i32, i32
  }
  func.func @transform_7(%arg0: i32, %arg1: i32) -> (i32, i32, i32) {
    %c0_i32 = arith.constant 0 : i32
    %c0_i32_0 = arith.constant 0 : i32
    return %arg0, %c0_i32, %arg1 : i32, i32, i32
  }
}

module attributes {stable_mosaic.version = 11 : i64} {
  func.func @_fused_block_s2_kernel(%arg0: i32, %arg1: i32, %arg2: memref<1x2x2x512xbf16, #tpu.memory_space<vmem>>, %arg3: memref<1x2x1x512xbf16, #tpu.memory_space<vmem>>, %arg4: memref<1x1x2x512xbf16, #tpu.memory_space<vmem>>, %arg5: memref<1x1x1x512xbf16, #tpu.memory_space<vmem>>, %arg6: memref<9x512xf32, #tpu.memory_space<vmem>>, %arg7: memref<1x512xf32, #tpu.memory_space<vmem>>, %arg8: memref<1x512xf32, #tpu.memory_space<vmem>>, %arg9: memref<512x256xbf16, #tpu.memory_space<vmem>>, %arg10: memref<1x256xf32, #tpu.memory_space<vmem>>, %arg11: memref<1x256xf32, #tpu.memory_space<vmem>>, %arg12: memref<1x1x256xbf16, #tpu.memory_space<vmem>>, %arg13: memref<1x512xbf16, #tpu.memory_space<vmem>>) attributes {dimension_semantics = [#tpu.dimension_semantics<parallel>, #tpu.dimension_semantics<arbitrary>], iteration_bounds = array<i64: 2, 4>, scalar_prefetch = 0 : i64, scratch_operands = 1 : i64, tpu.core_type = #tpu.core_type<tc>, window_params = [{transform_indices = @transform_0, window_bounds = array<i64: 1, 2, 2, 512>}, {transform_indices = @transform_1, window_bounds = array<i64: 1, 2, 1, 512>}, {transform_indices = @transform_2, window_bounds = array<i64: 1, 1, 2, 512>}, {transform_indices = @transform_3, window_bounds = array<i64: 1, 1, 1, 512>}, {pipeline_mode = #tpu.pipeline_mode<synchronous>, transform_indices = @transform_4, window_bounds = array<i64: 9, 512>}, {pipeline_mode = #tpu.pipeline_mode<synchronous>, transform_indices = @transform_5, window_bounds = array<i64: 1, 512>}, {pipeline_mode = #tpu.pipeline_mode<synchronous>, transform_indices = @transform_6, window_bounds = array<i64: 1, 512>}, {transform_indices = @transform_7, window_bounds = array<i64: 512, 256>}, {transform_indices = @transform_8, window_bounds = array<i64: 1, 256>}, {transform_indices = @transform_9, window_bounds = array<i64: 1, 256>}, {transform_indices = @transform_10, window_bounds = array<i64: 1, 1, 256>}]} {
    %c0_i32 = arith.constant 0 : i32
    %0 = arith.cmpi eq, %arg1, %c0_i32 : i32
    %1 = arith.extui %0 : i1 to i32
    %c0_i32_0 = arith.constant 0 : i32
    %2 = arith.cmpi ne, %1, %c0_i32_0 : i32
    scf.if %2 {
      %c0_13 = arith.constant 0 : index
      %c0_14 = arith.constant 0 : index
      %c0_15 = arith.constant 0 : index
      %c0_16 = arith.constant 0 : index
      %18 = vector.load %arg2[%c0_13, %c0_14, %c0_15, %c0_16] : memref<1x2x2x512xbf16, #tpu.memory_space<vmem>>, vector<1x2x2x512xbf16>
      %c0_17 = arith.constant 0 : index
      %c0_18 = arith.constant 0 : index
      %c0_19 = arith.constant 0 : index
      %c0_20 = arith.constant 0 : index
      %19 = vector.load %arg3[%c0_17, %c0_18, %c0_19, %c0_20] : memref<1x2x1x512xbf16, #tpu.memory_space<vmem>>, vector<1x2x1x512xbf16>
      %c0_21 = arith.constant 0 : index
      %c0_22 = arith.constant 0 : index
      %c0_23 = arith.constant 0 : index
      %c0_24 = arith.constant 0 : index
      %20 = vector.load %arg4[%c0_21, %c0_22, %c0_23, %c0_24] : memref<1x1x2x512xbf16, #tpu.memory_space<vmem>>, vector<1x1x2x512xbf16>
      %c0_25 = arith.constant 0 : index
      %c0_26 = arith.constant 0 : index
      %c0_27 = arith.constant 0 : index
      %c0_28 = arith.constant 0 : index
      %21 = vector.load %arg5[%c0_25, %c0_26, %c0_27, %c0_28] : memref<1x1x1x512xbf16, #tpu.memory_space<vmem>>, vector<1x1x1x512xbf16>
      %c0_29 = arith.constant 0 : index
      %c0_30 = arith.constant 0 : index
      %22 = vector.load %arg6[%c0_29, %c0_30] : memref<9x512xf32, #tpu.memory_space<vmem>>, vector<9x512xf32>
      %cst_31 = arith.constant 0.000000e+00 : f32
      %23 = vector.broadcast %cst_31 : f32 to vector<1x1x1x512xf32>
      %24 = vector.extract_strided_slice %18 {offsets = [0, 0, 0, 0], sizes = [1, 1, 1, 512], strides = [1, 1, 1, 1]} : vector<1x2x2x512xbf16> to vector<1x1x1x512xbf16>
      %25 = arith.extf %24 : vector<1x1x1x512xbf16> to vector<1x1x1x512xf32>
      %26 = vector.extract_strided_slice %22 {offsets = [0, 0], sizes = [1, 512], strides = [1, 1]} : vector<9x512xf32> to vector<1x512xf32>
      %27 = vector.shape_cast %26 : vector<1x512xf32> to vector<512xf32>
      %28 = vector.shape_cast %27 : vector<512xf32> to vector<1x1x1x512xf32>
      %29 = arith.mulf %25, %28 : vector<1x1x1x512xf32>
      %30 = arith.addf %23, %29 : vector<1x1x1x512xf32>
      %31 = vector.extract_strided_slice %19 {offsets = [0, 0, 0, 0], sizes = [1, 1, 1, 512], strides = [1, 1, 1, 1]} : vector<1x2x1x512xbf16> to vector<1x1x1x512xbf16>
      %32 = arith.extf %31 : vector<1x1x1x512xbf16> to vector<1x1x1x512xf32>
      %33 = vector.extract_strided_slice %22 {offsets = [1, 0], sizes = [1, 512], strides = [1, 1]} : vector<9x512xf32> to vector<1x512xf32>
      %34 = vector.shape_cast %33 : vector<1x512xf32> to vector<512xf32>
      %35 = vector.shape_cast %34 : vector<512xf32> to vector<1x1x1x512xf32>
      %36 = arith.mulf %32, %35 : vector<1x1x1x512xf32>
      %37 = arith.addf %30, %36 : vector<1x1x1x512xf32>
      %38 = vector.extract_strided_slice %18 {offsets = [0, 0, 1, 0], sizes = [1, 1, 1, 512], strides = [1, 1, 1, 1]} : vector<1x2x2x512xbf16> to vector<1x1x1x512xbf16>
      %39 = arith.extf %38 : vector<1x1x1x512xbf16> to vector<1x1x1x512xf32>
      %40 = vector.extract_strided_slice %22 {offsets = [2, 0], sizes = [1, 512], strides = [1, 1]} : vector<9x512xf32> to vector<1x512xf32>
      %41 = vector.shape_cast %40 : vector<1x512xf32> to vector<512xf32>
      %42 = vector.shape_cast %41 : vector<512xf32> to vector<1x1x1x512xf32>
      %43 = arith.mulf %39, %42 : vector<1x1x1x512xf32>
      %44 = arith.addf %37, %43 : vector<1x1x1x512xf32>
      %45 = vector.extract_strided_slice %20 {offsets = [0, 0, 0, 0], sizes = [1, 1, 1, 512], strides = [1, 1, 1, 1]} : vector<1x1x2x512xbf16> to vector<1x1x1x512xbf16>
      %46 = arith.extf %45 : vector<1x1x1x512xbf16> to vector<1x1x1x512xf32>
      %47 = vector.extract_strided_slice %22 {offsets = [3, 0], sizes = [1, 512], strides = [1, 1]} : vector<9x512xf32> to vector<1x512xf32>
      %48 = vector.shape_cast %47 : vector<1x512xf32> to vector<512xf32>
      %49 = vector.shape_cast %48 : vector<512xf32> to vector<1x1x1x512xf32>
      %50 = arith.mulf %46, %49 : vector<1x1x1x512xf32>
      %51 = arith.addf %44, %50 : vector<1x1x1x512xf32>
      %52 = arith.extf %21 : vector<1x1x1x512xbf16> to vector<1x1x1x512xf32>
      %53 = vector.extract_strided_slice %22 {offsets = [4, 0], sizes = [1, 512], strides = [1, 1]} : vector<9x512xf32> to vector<1x512xf32>
      %54 = vector.shape_cast %53 : vector<1x512xf32> to vector<512xf32>
      %55 = vector.shape_cast %54 : vector<512xf32> to vector<1x1x1x512xf32>
      %56 = arith.mulf %52, %55 : vector<1x1x1x512xf32>
      %57 = arith.addf %51, %56 : vector<1x1x1x512xf32>
      %58 = vector.extract_strided_slice %20 {offsets = [0, 0, 1, 0], sizes = [1, 1, 1, 512], strides = [1, 1, 1, 1]} : vector<1x1x2x512xbf16> to vector<1x1x1x512xbf16>
      %59 = arith.extf %58 : vector<1x1x1x512xbf16> to vector<1x1x1x512xf32>
      %60 = vector.extract_strided_slice %22 {offsets = [5, 0], sizes = [1, 512], strides = [1, 1]} : vector<9x512xf32> to vector<1x512xf32>
      %61 = vector.shape_cast %60 : vector<1x512xf32> to vector<512xf32>
      %62 = vector.shape_cast %61 : vector<512xf32> to vector<1x1x1x512xf32>
      %63 = arith.mulf %59, %62 : vector<1x1x1x512xf32>
      %64 = arith.addf %57, %63 : vector<1x1x1x512xf32>
      %65 = vector.extract_strided_slice %18 {offsets = [0, 1, 0, 0], sizes = [1, 1, 1, 512], strides = [1, 1, 1, 1]} : vector<1x2x2x512xbf16> to vector<1x1x1x512xbf16>
      %66 = arith.extf %65 : vector<1x1x1x512xbf16> to vector<1x1x1x512xf32>
      %67 = vector.extract_strided_slice %22 {offsets = [6, 0], sizes = [1, 512], strides = [1, 1]} : vector<9x512xf32> to vector<1x512xf32>
      %68 = vector.shape_cast %67 : vector<1x512xf32> to vector<512xf32>
      %69 = vector.shape_cast %68 : vector<512xf32> to vector<1x1x1x512xf32>
      %70 = arith.mulf %66, %69 : vector<1x1x1x512xf32>
      %71 = arith.addf %64, %70 : vector<1x1x1x512xf32>
      %72 = vector.extract_strided_slice %19 {offsets = [0, 1, 0, 0], sizes = [1, 1, 1, 512], strides = [1, 1, 1, 1]} : vector<1x2x1x512xbf16> to vector<1x1x1x512xbf16>
      %73 = arith.extf %72 : vector<1x1x1x512xbf16> to vector<1x1x1x512xf32>
      %74 = vector.extract_strided_slice %22 {offsets = [7, 0], sizes = [1, 512], strides = [1, 1]} : vector<9x512xf32> to vector<1x512xf32>
      %75 = vector.shape_cast %74 : vector<1x512xf32> to vector<512xf32>
      %76 = vector.shape_cast %75 : vector<512xf32> to vector<1x1x1x512xf32>
      %77 = arith.mulf %73, %76 : vector<1x1x1x512xf32>
      %78 = arith.addf %71, %77 : vector<1x1x1x512xf32>
      %79 = vector.extract_strided_slice %18 {offsets = [0, 1, 1, 0], sizes = [1, 1, 1, 512], strides = [1, 1, 1, 1]} : vector<1x2x2x512xbf16> to vector<1x1x1x512xbf16>
      %80 = arith.extf %79 : vector<1x1x1x512xbf16> to vector<1x1x1x512xf32>
      %81 = vector.extract_strided_slice %22 {offsets = [8, 0], sizes = [1, 512], strides = [1, 1]} : vector<9x512xf32> to vector<1x512xf32>
      %82 = vector.shape_cast %81 : vector<1x512xf32> to vector<512xf32>
      %83 = vector.shape_cast %82 : vector<512xf32> to vector<1x1x1x512xf32>
      %84 = arith.mulf %80, %83 : vector<1x1x1x512xf32>
      %85 = arith.addf %78, %84 : vector<1x1x1x512xf32>
      %c0_32 = arith.constant 0 : index
      %c0_33 = arith.constant 0 : index
      %86 = vector.load %arg7[%c0_32, %c0_33] : memref<1x512xf32, #tpu.memory_space<vmem>>, vector<1x512xf32>
      %87 = vector.shape_cast %86 : vector<1x512xf32> to vector<512xf32>
      %88 = vector.shape_cast %87 : vector<512xf32> to vector<1x1x1x512xf32>
      %89 = arith.mulf %85, %88 : vector<1x1x1x512xf32>
      %c0_34 = arith.constant 0 : index
      %c0_35 = arith.constant 0 : index
      %90 = vector.load %arg8[%c0_34, %c0_35] : memref<1x512xf32, #tpu.memory_space<vmem>>, vector<1x512xf32>
      %91 = vector.shape_cast %90 : vector<1x512xf32> to vector<512xf32>
      %92 = vector.shape_cast %91 : vector<512xf32> to vector<1x1x1x512xf32>
      %93 = arith.addf %89, %92 : vector<1x1x1x512xf32>
      %cst_36 = arith.constant 0.000000e+00 : f32
      %94 = vector.broadcast %cst_36 : f32 to vector<1x1x1x512xf32>
      %95 = arith.maximumf %93, %94 : vector<1x1x1x512xf32>
      %cst_37 = arith.constant 6.000000e+00 : f32
      %96 = vector.broadcast %cst_37 : f32 to vector<1x1x1x512xf32>
      %97 = arith.minimumf %95, %96 : vector<1x1x1x512xf32>
      %98 = arith.truncf %97 : vector<1x1x1x512xf32> to vector<1x1x1x512xbf16>
      %99 = vector.shape_cast %98 : vector<1x1x1x512xbf16> to vector<1x512xbf16>
      %c0_38 = arith.constant 0 : index
      %c0_39 = arith.constant 0 : index
      %100 = vector.load %arg13[%c0_38, %c0_39] : memref<1x512xbf16, #tpu.memory_space<vmem>>, vector<1x512xbf16>
      tpu.vector_store %arg13[%c0_38, %c0_39], %99 {strides = array<i32>} : memref<1x512xbf16, #tpu.memory_space<vmem>>, vector<1x512xbf16>,
    } else {
    }
    %c0 = arith.constant 0 : index
    %c0_1 = arith.constant 0 : index
    %3 = vector.load %arg13[%c0, %c0_1] : memref<1x512xbf16, #tpu.memory_space<vmem>>, vector<1x512xbf16>
    %c0_2 = arith.constant 0 : index
    %c0_3 = arith.constant 0 : index
    %4 = vector.load %arg9[%c0_2, %c0_3] : memref<512x256xbf16, #tpu.memory_space<vmem>>, vector<512x256xbf16>
    %cst = arith.constant dense<0.000000e+00> : vector<1x256xf32>
    %5 = tpu.matmul %3, %4, %cst {dimension_numbers = #tpu.dot_dimension_numbers<[1], [0], [0], [1], [0, 0, 1, 1], [], []>} : vector<1x512xbf16>, vector<512x256xbf16>, vector<1x256xf32> -> vector<1x256xf32>
    %c0_4 = arith.constant 0 : index
    %c0_5 = arith.constant 0 : index
    %6 = vector.load %arg10[%c0_4, %c0_5] : memref<1x256xf32, #tpu.memory_space<vmem>>, vector<1x256xf32>
    %7 = arith.mulf %5, %6 : vector<1x256xf32>
    %c0_6 = arith.constant 0 : index
    %c0_7 = arith.constant 0 : index
    %8 = vector.load %arg11[%c0_6, %c0_7] : memref<1x256xf32, #tpu.memory_space<vmem>>, vector<1x256xf32>
    %9 = arith.addf %7, %8 : vector<1x256xf32>
    %cst_8 = arith.constant 0.000000e+00 : f32
    %10 = vector.broadcast %cst_8 : f32 to vector<1x256xf32>
    %11 = arith.maximumf %9, %10 : vector<1x256xf32>
    %cst_9 = arith.constant 6.000000e+00 : f32
    %12 = vector.broadcast %cst_9 : f32 to vector<1x256xf32>
    %13 = arith.minimumf %11, %12 : vector<1x256xf32>
    %14 = arith.truncf %13 : vector<1x256xf32> to vector<1x256xbf16>
    %c0_10 = arith.constant 0 : index
    %c0_11 = arith.constant 0 : index
    %c0_12 = arith.constant 0 : index
    %15 = vector.load %arg12[%c0_10, %c0_11, %c0_12] : memref<1x1x256xbf16, #tpu.memory_space<vmem>>, vector<1x1x256xbf16>
    %16 = vector.shape_cast %15 : vector<1x1x256xbf16> to vector<1x256xbf16>
    %17 = vector.shape_cast %14 : vector<1x256xbf16> to vector<1x1x256xbf16>
    tpu.vector_store %arg12[%c0_10, %c0_11, %c0_12], %17 {strides = array<i32>} : memref<1x1x256xbf16, #tpu.memory_space<vmem>>, vector<1x1x256xbf16>,
    return
  }
  func.func @transform_0(%arg0: i32, %arg1: i32) -> (i32, i32, i32, i32) {
    %c0_i32 = arith.constant 0 : i32
    %c0_i32_0 = arith.constant 0 : i32
    %c0_i32_1 = arith.constant 0 : i32
    %c0_i32_2 = arith.constant 0 : i32
    return %arg0, %c0_i32, %c0_i32_0, %c0_i32_1 : i32, i32, i32, i32
  }
  func.func @transform_1(%arg0: i32, %arg1: i32) -> (i32, i32, i32, i32) {
    %c0_i32 = arith.constant 0 : i32
    %c0_i32_0 = arith.constant 0 : i32
    %c0_i32_1 = arith.constant 0 : i32
    %c0_i32_2 = arith.constant 0 : i32
    return %arg0, %c0_i32, %c0_i32_0, %c0_i32_1 : i32, i32, i32, i32
  }
  func.func @transform_2(%arg0: i32, %arg1: i32) -> (i32, i32, i32, i32) {
    %c0_i32 = arith.constant 0 : i32
    %c0_i32_0 = arith.constant 0 : i32
    %c0_i32_1 = arith.constant 0 : i32
    %c0_i32_2 = arith.constant 0 : i32
    return %arg0, %c0_i32, %c0_i32_0, %c0_i32_1 : i32, i32, i32, i32
  }
  func.func @transform_3(%arg0: i32, %arg1: i32) -> (i32, i32, i32, i32) {
    %c0_i32 = arith.constant 0 : i32
    %c0_i32_0 = arith.constant 0 : i32
    %c0_i32_1 = arith.constant 0 : i32
    %c0_i32_2 = arith.constant 0 : i32
    return %arg0, %c0_i32, %c0_i32_0, %c0_i32_1 : i32, i32, i32, i32
  }
  func.func @transform_4(%arg0: i32, %arg1: i32) -> (i32, i32) {
    %c0_i32 = arith.constant 0 : i32
    %c0_i32_0 = arith.constant 0 : i32
    %c0_i32_1 = arith.constant 0 : i32
    return %c0_i32, %c0_i32_0 : i32, i32
  }
  func.func @transform_5(%arg0: i32, %arg1: i32) -> (i32, i32) {
    %c0_i32 = arith.constant 0 : i32
    %c0_i32_0 = arith.constant 0 : i32
    %c0_i32_1 = arith.constant 0 : i32
    return %c0_i32, %c0_i32_0 : i32, i32
  }
  func.func @transform_6(%arg0: i32, %arg1: i32) -> (i32, i32) {
    %c0_i32 = arith.constant 0 : i32
    %c0_i32_0 = arith.constant 0 : i32
    %c0_i32_1 = arith.constant 0 : i32
    return %c0_i32, %c0_i32_0 : i32, i32
  }
  func.func @transform_7(%arg0: i32, %arg1: i32) -> (i32, i32) {
    %c0_i32 = arith.constant 0 : i32
    %c0_i32_0 = arith.constant 0 : i32
    return %c0_i32, %arg1 : i32, i32
  }
  func.func @transform_8(%arg0: i32, %arg1: i32) -> (i32, i32) {
    %c0_i32 = arith.constant 0 : i32
    %c0_i32_0 = arith.constant 0 : i32
    return %c0_i32, %arg1 : i32, i32
  }
  func.func @transform_9(%arg0: i32, %arg1: i32) -> (i32, i32) {
    %c0_i32 = arith.constant 0 : i32
    %c0_i32_0 = arith.constant 0 : i32
    return %c0_i32, %arg1 : i32, i32
  }
  func.func @transform_10(%arg0: i32, %arg1: i32) -> (i32, i32, i32) {
    %c0_i32 = arith.constant 0 : i32
    %c0_i32_0 = arith.constant 0 : i32
    return %arg0, %c0_i32, %arg1 : i32, i32, i32
  }
}

module attributes {stable_mosaic.version = 11 : i64} {
  func.func @_fused_block_s1_kernel(%arg0: i32, %arg1: i32, %arg2: memref<1x3x3x1024xbf16, #tpu.memory_space<vmem>>, %arg3: memref<9x1024xf32, #tpu.memory_space<vmem>>, %arg4: memref<1x1024xf32, #tpu.memory_space<vmem>>, %arg5: memref<1x1024xf32, #tpu.memory_space<vmem>>, %arg6: memref<1024x256xbf16, #tpu.memory_space<vmem>>, %arg7: memref<1x256xf32, #tpu.memory_space<vmem>>, %arg8: memref<1x256xf32, #tpu.memory_space<vmem>>, %arg9: memref<1x1x256xbf16, #tpu.memory_space<vmem>>, %arg10: memref<1x1024xbf16, #tpu.memory_space<vmem>>) attributes {dimension_semantics = [#tpu.dimension_semantics<parallel>, #tpu.dimension_semantics<arbitrary>], iteration_bounds = array<i64: 2, 4>, scalar_prefetch = 0 : i64, scratch_operands = 1 : i64, tpu.core_type = #tpu.core_type<tc>, window_params = [{transform_indices = @transform_0, window_bounds = array<i64: 1, 3, 3, 1024>}, {pipeline_mode = #tpu.pipeline_mode<synchronous>, transform_indices = @transform_1, window_bounds = array<i64: 9, 1024>}, {pipeline_mode = #tpu.pipeline_mode<synchronous>, transform_indices = @transform_2, window_bounds = array<i64: 1, 1024>}, {pipeline_mode = #tpu.pipeline_mode<synchronous>, transform_indices = @transform_3, window_bounds = array<i64: 1, 1024>}, {transform_indices = @transform_4, window_bounds = array<i64: 1024, 256>}, {transform_indices = @transform_5, window_bounds = array<i64: 1, 256>}, {transform_indices = @transform_6, window_bounds = array<i64: 1, 256>}, {transform_indices = @transform_7, window_bounds = array<i64: 1, 1, 256>}]} {
    %c0_i32 = arith.constant 0 : i32
    %0 = arith.cmpi eq, %arg1, %c0_i32 : i32
    %1 = arith.extui %0 : i1 to i32
    %c0_i32_0 = arith.constant 0 : i32
    %2 = arith.cmpi ne, %1, %c0_i32_0 : i32
    scf.if %2 {
      %c0_13 = arith.constant 0 : index
      %c0_14 = arith.constant 0 : index
      %c0_15 = arith.constant 0 : index
      %c0_16 = arith.constant 0 : index
      %18 = vector.load %arg2[%c0_13, %c0_14, %c0_15, %c0_16] : memref<1x3x3x1024xbf16, #tpu.memory_space<vmem>>, vector<1x3x3x1024xbf16>
      %c0_17 = arith.constant 0 : index
      %c0_18 = arith.constant 0 : index
      %19 = vector.load %arg3[%c0_17, %c0_18] : memref<9x1024xf32, #tpu.memory_space<vmem>>, vector<9x1024xf32>
      %cst_19 = arith.constant 0.000000e+00 : f32
      %20 = vector.broadcast %cst_19 : f32 to vector<1x1x1x1024xf32>
      %21 = vector.extract_strided_slice %18 {offsets = [0, 0, 0, 0], sizes = [1, 1, 1, 1024], strides = [1, 1, 1, 1]} : vector<1x3x3x1024xbf16> to vector<1x1x1x1024xbf16>
      %22 = arith.extf %21 : vector<1x1x1x1024xbf16> to vector<1x1x1x1024xf32>
      %23 = vector.extract_strided_slice %19 {offsets = [0, 0], sizes = [1, 1024], strides = [1, 1]} : vector<9x1024xf32> to vector<1x1024xf32>
      %24 = vector.shape_cast %23 : vector<1x1024xf32> to vector<1024xf32>
      %25 = vector.shape_cast %24 : vector<1024xf32> to vector<1x1x1x1024xf32>
      %26 = arith.mulf %22, %25 : vector<1x1x1x1024xf32>
      %27 = arith.addf %20, %26 : vector<1x1x1x1024xf32>
      %28 = vector.extract_strided_slice %18 {offsets = [0, 0, 1, 0], sizes = [1, 1, 1, 1024], strides = [1, 1, 1, 1]} : vector<1x3x3x1024xbf16> to vector<1x1x1x1024xbf16>
      %29 = arith.extf %28 : vector<1x1x1x1024xbf16> to vector<1x1x1x1024xf32>
      %30 = vector.extract_strided_slice %19 {offsets = [1, 0], sizes = [1, 1024], strides = [1, 1]} : vector<9x1024xf32> to vector<1x1024xf32>
      %31 = vector.shape_cast %30 : vector<1x1024xf32> to vector<1024xf32>
      %32 = vector.shape_cast %31 : vector<1024xf32> to vector<1x1x1x1024xf32>
      %33 = arith.mulf %29, %32 : vector<1x1x1x1024xf32>
      %34 = arith.addf %27, %33 : vector<1x1x1x1024xf32>
      %35 = vector.extract_strided_slice %18 {offsets = [0, 0, 2, 0], sizes = [1, 1, 1, 1024], strides = [1, 1, 1, 1]} : vector<1x3x3x1024xbf16> to vector<1x1x1x1024xbf16>
      %36 = arith.extf %35 : vector<1x1x1x1024xbf16> to vector<1x1x1x1024xf32>
      %37 = vector.extract_strided_slice %19 {offsets = [2, 0], sizes = [1, 1024], strides = [1, 1]} : vector<9x1024xf32> to vector<1x1024xf32>
      %38 = vector.shape_cast %37 : vector<1x1024xf32> to vector<1024xf32>
      %39 = vector.shape_cast %38 : vector<1024xf32> to vector<1x1x1x1024xf32>
      %40 = arith.mulf %36, %39 : vector<1x1x1x1024xf32>
      %41 = arith.addf %34, %40 : vector<1x1x1x1024xf32>
      %42 = vector.extract_strided_slice %18 {offsets = [0, 1, 0, 0], sizes = [1, 1, 1, 1024], strides = [1, 1, 1, 1]} : vector<1x3x3x1024xbf16> to vector<1x1x1x1024xbf16>
      %43 = arith.extf %42 : vector<1x1x1x1024xbf16> to vector<1x1x1x1024xf32>
      %44 = vector.extract_strided_slice %19 {offsets = [3, 0], sizes = [1, 1024], strides = [1, 1]} : vector<9x1024xf32> to vector<1x1024xf32>
      %45 = vector.shape_cast %44 : vector<1x1024xf32> to vector<1024xf32>
      %46 = vector.shape_cast %45 : vector<1024xf32> to vector<1x1x1x1024xf32>
      %47 = arith.mulf %43, %46 : vector<1x1x1x1024xf32>
      %48 = arith.addf %41, %47 : vector<1x1x1x1024xf32>
      %49 = vector.extract_strided_slice %18 {offsets = [0, 1, 1, 0], sizes = [1, 1, 1, 1024], strides = [1, 1, 1, 1]} : vector<1x3x3x1024xbf16> to vector<1x1x1x1024xbf16>
      %50 = arith.extf %49 : vector<1x1x1x1024xbf16> to vector<1x1x1x1024xf32>
      %51 = vector.extract_strided_slice %19 {offsets = [4, 0], sizes = [1, 1024], strides = [1, 1]} : vector<9x1024xf32> to vector<1x1024xf32>
      %52 = vector.shape_cast %51 : vector<1x1024xf32> to vector<1024xf32>
      %53 = vector.shape_cast %52 : vector<1024xf32> to vector<1x1x1x1024xf32>
      %54 = arith.mulf %50, %53 : vector<1x1x1x1024xf32>
      %55 = arith.addf %48, %54 : vector<1x1x1x1024xf32>
      %56 = vector.extract_strided_slice %18 {offsets = [0, 1, 2, 0], sizes = [1, 1, 1, 1024], strides = [1, 1, 1, 1]} : vector<1x3x3x1024xbf16> to vector<1x1x1x1024xbf16>
      %57 = arith.extf %56 : vector<1x1x1x1024xbf16> to vector<1x1x1x1024xf32>
      %58 = vector.extract_strided_slice %19 {offsets = [5, 0], sizes = [1, 1024], strides = [1, 1]} : vector<9x1024xf32> to vector<1x1024xf32>
      %59 = vector.shape_cast %58 : vector<1x1024xf32> to vector<1024xf32>
      %60 = vector.shape_cast %59 : vector<1024xf32> to vector<1x1x1x1024xf32>
      %61 = arith.mulf %57, %60 : vector<1x1x1x1024xf32>
      %62 = arith.addf %55, %61 : vector<1x1x1x1024xf32>
      %63 = vector.extract_strided_slice %18 {offsets = [0, 2, 0, 0], sizes = [1, 1, 1, 1024], strides = [1, 1, 1, 1]} : vector<1x3x3x1024xbf16> to vector<1x1x1x1024xbf16>
      %64 = arith.extf %63 : vector<1x1x1x1024xbf16> to vector<1x1x1x1024xf32>
      %65 = vector.extract_strided_slice %19 {offsets = [6, 0], sizes = [1, 1024], strides = [1, 1]} : vector<9x1024xf32> to vector<1x1024xf32>
      %66 = vector.shape_cast %65 : vector<1x1024xf32> to vector<1024xf32>
      %67 = vector.shape_cast %66 : vector<1024xf32> to vector<1x1x1x1024xf32>
      %68 = arith.mulf %64, %67 : vector<1x1x1x1024xf32>
      %69 = arith.addf %62, %68 : vector<1x1x1x1024xf32>
      %70 = vector.extract_strided_slice %18 {offsets = [0, 2, 1, 0], sizes = [1, 1, 1, 1024], strides = [1, 1, 1, 1]} : vector<1x3x3x1024xbf16> to vector<1x1x1x1024xbf16>
      %71 = arith.extf %70 : vector<1x1x1x1024xbf16> to vector<1x1x1x1024xf32>
      %72 = vector.extract_strided_slice %19 {offsets = [7, 0], sizes = [1, 1024], strides = [1, 1]} : vector<9x1024xf32> to vector<1x1024xf32>
      %73 = vector.shape_cast %72 : vector<1x1024xf32> to vector<1024xf32>
      %74 = vector.shape_cast %73 : vector<1024xf32> to vector<1x1x1x1024xf32>
      %75 = arith.mulf %71, %74 : vector<1x1x1x1024xf32>
      %76 = arith.addf %69, %75 : vector<1x1x1x1024xf32>
      %77 = vector.extract_strided_slice %18 {offsets = [0, 2, 2, 0], sizes = [1, 1, 1, 1024], strides = [1, 1, 1, 1]} : vector<1x3x3x1024xbf16> to vector<1x1x1x1024xbf16>
      %78 = arith.extf %77 : vector<1x1x1x1024xbf16> to vector<1x1x1x1024xf32>
      %79 = vector.extract_strided_slice %19 {offsets = [8, 0], sizes = [1, 1024], strides = [1, 1]} : vector<9x1024xf32> to vector<1x1024xf32>
      %80 = vector.shape_cast %79 : vector<1x1024xf32> to vector<1024xf32>
      %81 = vector.shape_cast %80 : vector<1024xf32> to vector<1x1x1x1024xf32>
      %82 = arith.mulf %78, %81 : vector<1x1x1x1024xf32>
      %83 = arith.addf %76, %82 : vector<1x1x1x1024xf32>
      %c0_20 = arith.constant 0 : index
      %c0_21 = arith.constant 0 : index
      %84 = vector.load %arg4[%c0_20, %c0_21] : memref<1x1024xf32, #tpu.memory_space<vmem>>, vector<1x1024xf32>
      %85 = vector.shape_cast %84 : vector<1x1024xf32> to vector<1024xf32>
      %86 = vector.shape_cast %85 : vector<1024xf32> to vector<1x1x1x1024xf32>
      %87 = arith.mulf %83, %86 : vector<1x1x1x1024xf32>
      %c0_22 = arith.constant 0 : index
      %c0_23 = arith.constant 0 : index
      %88 = vector.load %arg5[%c0_22, %c0_23] : memref<1x1024xf32, #tpu.memory_space<vmem>>, vector<1x1024xf32>
      %89 = vector.shape_cast %88 : vector<1x1024xf32> to vector<1024xf32>
      %90 = vector.shape_cast %89 : vector<1024xf32> to vector<1x1x1x1024xf32>
      %91 = arith.addf %87, %90 : vector<1x1x1x1024xf32>
      %cst_24 = arith.constant 0.000000e+00 : f32
      %92 = vector.broadcast %cst_24 : f32 to vector<1x1x1x1024xf32>
      %93 = arith.maximumf %91, %92 : vector<1x1x1x1024xf32>
      %cst_25 = arith.constant 6.000000e+00 : f32
      %94 = vector.broadcast %cst_25 : f32 to vector<1x1x1x1024xf32>
      %95 = arith.minimumf %93, %94 : vector<1x1x1x1024xf32>
      %96 = arith.truncf %95 : vector<1x1x1x1024xf32> to vector<1x1x1x1024xbf16>
      %97 = vector.shape_cast %96 : vector<1x1x1x1024xbf16> to vector<1x1024xbf16>
      %c0_26 = arith.constant 0 : index
      %c0_27 = arith.constant 0 : index
      %98 = vector.load %arg10[%c0_26, %c0_27] : memref<1x1024xbf16, #tpu.memory_space<vmem>>, vector<1x1024xbf16>
      tpu.vector_store %arg10[%c0_26, %c0_27], %97 {strides = array<i32>} : memref<1x1024xbf16, #tpu.memory_space<vmem>>, vector<1x1024xbf16>,
    } else {
    }
    %c0 = arith.constant 0 : index
    %c0_1 = arith.constant 0 : index
    %3 = vector.load %arg10[%c0, %c0_1] : memref<1x1024xbf16, #tpu.memory_space<vmem>>, vector<1x1024xbf16>
    %c0_2 = arith.constant 0 : index
    %c0_3 = arith.constant 0 : index
    %4 = vector.load %arg6[%c0_2, %c0_3] : memref<1024x256xbf16, #tpu.memory_space<vmem>>, vector<1024x256xbf16>
    %cst = arith.constant dense<0.000000e+00> : vector<1x256xf32>
    %5 = tpu.matmul %3, %4, %cst {dimension_numbers = #tpu.dot_dimension_numbers<[1], [0], [0], [1], [0, 0, 1, 1], [], []>} : vector<1x1024xbf16>, vector<1024x256xbf16>, vector<1x256xf32> -> vector<1x256xf32>
    %c0_4 = arith.constant 0 : index
    %c0_5 = arith.constant 0 : index
    %6 = vector.load %arg7[%c0_4, %c0_5] : memref<1x256xf32, #tpu.memory_space<vmem>>, vector<1x256xf32>
    %7 = arith.mulf %5, %6 : vector<1x256xf32>
    %c0_6 = arith.constant 0 : index
    %c0_7 = arith.constant 0 : index
    %8 = vector.load %arg8[%c0_6, %c0_7] : memref<1x256xf32, #tpu.memory_space<vmem>>, vector<1x256xf32>
    %9 = arith.addf %7, %8 : vector<1x256xf32>
    %cst_8 = arith.constant 0.000000e+00 : f32
    %10 = vector.broadcast %cst_8 : f32 to vector<1x256xf32>
    %11 = arith.maximumf %9, %10 : vector<1x256xf32>
    %cst_9 = arith.constant 6.000000e+00 : f32
    %12 = vector.broadcast %cst_9 : f32 to vector<1x256xf32>
    %13 = arith.minimumf %11, %12 : vector<1x256xf32>
    %14 = arith.truncf %13 : vector<1x256xf32> to vector<1x256xbf16>
    %c0_10 = arith.constant 0 : index
    %c0_11 = arith.constant 0 : index
    %c0_12 = arith.constant 0 : index
    %15 = vector.load %arg9[%c0_10, %c0_11, %c0_12] : memref<1x1x256xbf16, #tpu.memory_space<vmem>>, vector<1x1x256xbf16>
    %16 = vector.shape_cast %15 : vector<1x1x256xbf16> to vector<1x256xbf16>
    %17 = vector.shape_cast %14 : vector<1x256xbf16> to vector<1x1x256xbf16>
    tpu.vector_store %arg9[%c0_10, %c0_11, %c0_12], %17 {strides = array<i32>} : memref<1x1x256xbf16, #tpu.memory_space<vmem>>, vector<1x1x256xbf16>,
    return
  }
  func.func @transform_0(%arg0: i32, %arg1: i32) -> (i32, i32, i32, i32) {
    %c0_i32 = arith.constant 0 : i32
    %c0_i32_0 = arith.constant 0 : i32
    %c0_i32_1 = arith.constant 0 : i32
    %c0_i32_2 = arith.constant 0 : i32
    return %arg0, %c0_i32, %c0_i32_0, %c0_i32_1 : i32, i32, i32, i32
  }
  func.func @transform_1(%arg0: i32, %arg1: i32) -> (i32, i32) {
    %c0_i32 = arith.constant 0 : i32
    %c0_i32_0 = arith.constant 0 : i32
    %c0_i32_1 = arith.constant 0 : i32
    return %c0_i32, %c0_i32_0 : i32, i32
  }
  func.func @transform_2(%arg0: i32, %arg1: i32) -> (i32, i32) {
    %c0_i32 = arith.constant 0 : i32
    %c0_i32_0 = arith.constant 0 : i32
    %c0_i32_1 = arith.constant 0 : i32
    return %c0_i32, %c0_i32_0 : i32, i32
  }
  func.func @transform_3(%arg0: i32, %arg1: i32) -> (i32, i32) {
    %c0_i32 = arith.constant 0 : i32
    %c0_i32_0 = arith.constant 0 : i32
    %c0_i32_1 = arith.constant 0 : i32
    return %c0_i32, %c0_i32_0 : i32, i32
  }
  func.func @transform_4(%arg0: i32, %arg1: i32) -> (i32, i32) {
    %c0_i32 = arith.constant 0 : i32
    %c0_i32_0 = arith.constant 0 : i32
    return %c0_i32, %arg1 : i32, i32
  }
  func.func @transform_5(%arg0: i32, %arg1: i32) -> (i32, i32) {
    %c0_i32 = arith.constant 0 : i32
    %c0_i32_0 = arith.constant 0 : i32
    return %c0_i32, %arg1 : i32, i32
  }
  func.func @transform_6(%arg0: i32, %arg1: i32) -> (i32, i32) {
    %c0_i32 = arith.constant 0 : i32
    %c0_i32_0 = arith.constant 0 : i32
    return %c0_i32, %arg1 : i32, i32
  }
  func.func @transform_7(%arg0: i32, %arg1: i32) -> (i32, i32, i32) {
    %c0_i32 = arith.constant 0 : i32
    %c0_i32_0 = arith.constant 0 : i32
    return %arg0, %c0_i32, %arg1 : i32, i32, i32
  }
}

module attributes {stable_mosaic.version = 11 : i64} {
  func.func @_matmul_affine_kernel(%arg0: i32, %arg1: i32, %arg2: memref<8x1024xbf16, #tpu.memory_space<vmem>>, %arg3: memref<1024x128xbf16, #tpu.memory_space<vmem>>, %arg4: memref<1x128xf32, #tpu.memory_space<vmem>>, %arg5: memref<1x128xf32, #tpu.memory_space<vmem>>, %arg6: memref<8x128xf32, #tpu.memory_space<vmem>>) attributes {dimension_semantics = [#tpu.dimension_semantics<parallel>, #tpu.dimension_semantics<parallel>], iteration_bounds = array<i64: 1, 1>, scalar_prefetch = 0 : i64, scratch_operands = 0 : i64, tpu.core_type = #tpu.core_type<tc>, window_params = [{transform_indices = @transform_0, window_bounds = array<i64: 8, 1024>}, {transform_indices = @transform_1, window_bounds = array<i64: 1024, 128>}, {transform_indices = @transform_2, window_bounds = array<i64: 1, 128>}, {transform_indices = @transform_3, window_bounds = array<i64: 1, 128>}, {transform_indices = @transform_4, window_bounds = array<i64: 8, 128>}]} {
    %c0 = arith.constant 0 : index
    %c0_0 = arith.constant 0 : index
    %0 = vector.load %arg2[%c0, %c0_0] : memref<8x1024xbf16, #tpu.memory_space<vmem>>, vector<8x1024xbf16>
    %c0_1 = arith.constant 0 : index
    %c0_2 = arith.constant 0 : index
    %1 = vector.load %arg3[%c0_1, %c0_2] : memref<1024x128xbf16, #tpu.memory_space<vmem>>, vector<1024x128xbf16>
    %cst = arith.constant dense<0.000000e+00> : vector<8x128xf32>
    %2 = tpu.matmul %0, %1, %cst {dimension_numbers = #tpu.dot_dimension_numbers<[1], [0], [0], [1], [0, 0, 1, 1], [], []>} : vector<8x1024xbf16>, vector<1024x128xbf16>, vector<8x128xf32> -> vector<8x128xf32>
    %c0_3 = arith.constant 0 : index
    %c0_4 = arith.constant 0 : index
    %3 = vector.load %arg4[%c0_3, %c0_4] : memref<1x128xf32, #tpu.memory_space<vmem>>, vector<1x128xf32>
    %4 = vector.broadcast %3 : vector<1x128xf32> to vector<8x128xf32>
    %5 = arith.mulf %2, %4 : vector<8x128xf32>
    %c0_5 = arith.constant 0 : index
    %c0_6 = arith.constant 0 : index
    %6 = vector.load %arg5[%c0_5, %c0_6] : memref<1x128xf32, #tpu.memory_space<vmem>>, vector<1x128xf32>
    %7 = vector.broadcast %6 : vector<1x128xf32> to vector<8x128xf32>
    %8 = arith.addf %5, %7 : vector<8x128xf32>
    %c0_7 = arith.constant 0 : index
    %c0_8 = arith.constant 0 : index
    %9 = vector.load %arg6[%c0_7, %c0_8] : memref<8x128xf32, #tpu.memory_space<vmem>>, vector<8x128xf32>
    tpu.vector_store %arg6[%c0_7, %c0_8], %8 {strides = array<i32>} : memref<8x128xf32, #tpu.memory_space<vmem>>, vector<8x128xf32>,
    return
  }
  func.func @transform_0(%arg0: i32, %arg1: i32) -> (i32, i32) {
    %c0_i32 = arith.constant 0 : i32
    %c0_i32_0 = arith.constant 0 : i32
    return %arg0, %c0_i32 : i32, i32
  }
  func.func @transform_1(%arg0: i32, %arg1: i32) -> (i32, i32) {
    %c0_i32 = arith.constant 0 : i32
    %c0_i32_0 = arith.constant 0 : i32
    return %c0_i32, %arg1 : i32, i32
  }
  func.func @transform_2(%arg0: i32, %arg1: i32) -> (i32, i32) {
    %c0_i32 = arith.constant 0 : i32
    %c0_i32_0 = arith.constant 0 : i32
    return %c0_i32, %arg1 : i32, i32
  }
  func.func @transform_3(%arg0: i32, %arg1: i32) -> (i32, i32) {
    %c0_i32 = arith.constant 0 : i32
    %c0_i32_0 = arith.constant 0 : i32
    return %c0_i32, %arg1 : i32, i32
  }
  func.func @transform_4(%arg0: i32, %arg1: i32) -> (i32, i32) {
    %c0_i32 = arith.constant 0 : i32
    return %arg0, %arg1 : i32, i32
  }
}

</mosaic_0001>

<bundles_post_ra>
// kernel: mobilenetv1_forward.15
= control target key start
LH: loop header
LB: loop body
LE: loop exit
PB: predicated region body
PF: predicated region fallthrough
CT: control target
= control target key end

     0   :  { %9 = vsyncpa [#allocation3], 0  ;;  %s720_s0 = inlined_call_operand.vmem [shape: bf16[128,32], index: 0, kind: input, shape index: {}]   ;;  %s721_s1 = inlined_call_operand.vmem [shape: bf16[32,128], index: 1, kind: input, shape index: {}]   ;;  %s722_s2 = inlined_call_operand.hbm [shape: f32[1,128], index: 2, kind: input, shape index: {}]   ;;  %s723_s3 = inlined_call_operand.hbm [shape: f32[1,128], index: 3, kind: input, shape index: {}]   ;;  %s724_s4 = inlined_call_operand.vmem [shape: bf16[128,128], index: 4, kind: output, shape index: {}]  }
   0x1   :  { %10 = vsyncpa [#allocation5], 0  ;;  %s589_s15 = smov [#allocation2]   ;;  %s590_s17 = smov [#allocation4]  }
   0x2   :  { %s21_s16 = sshll.u32 %s589_s15, 4  ;;  %s31_s18 = sshll.u32 %s590_s17, 4  ;;  %s22_s16 = int_to_ptr.vmem [resolvable:$true] %s21_s16  ;;  %s32_s18 = int_to_ptr.vmem [resolvable:$true] %s31_s18 }
   0x3   :  { %s553_s19 = scalar_lea.vmem %s22_s16, 16  ;;  %s557_s20 = scalar_lea.vmem %s22_s16, 32 }
   0x4   :  { %p554_p0 = scmp.ne.s32.totalorder %s22_s16, %s553_s19  ;;  %p558_p1 = scmp.lt.s32.totalorder %s22_s16, %s22_s16 }
   0x5   :  { %p559_p2 = scmp.lt.s32.totalorder %s557_s20, %s553_s19 }
   0x7   :  { %p560_p3 = por %p559_p2, %p558_p1 }
   0x9   :  { %p561_p4 = pnand %p560_p3, %p554_p0 }
   0xb   :  { %564 = shalt.err (!%p561_p4)
}
   0xc   :  { %24 = dma.hbm_to_vmem [thread:$0]  %s722_s2, 16, %s22_s16, [#allocation3]  }
   0xd   :  { %s573_s23 = scalar_lea.vmem %s32_s18, 16  ;;  %s577_s24 = scalar_lea.vmem %s32_s18, 32 }
   0xe   :  { %p574_p5 = scmp.ne.s32.totalorder %s32_s18, %s573_s23  ;;  %p578_p6 = scmp.lt.s32.totalorder %s32_s18, %s32_s18 }
   0xf   :  { %p579_p7 = scmp.lt.s32.totalorder %s577_s24, %s573_s23 }
  0x11   :  { %p580_p8 = por %p579_p7, %p578_p6 }
  0x13   :  { %p581_p9 = pnand %p580_p8, %p574_p5 }
  0x15   :  { %584 = shalt.err (!%p581_p9)
}
  0x16   :  { %34 = dma.hbm_to_vmem [thread:$0]  %s723_s3, 16, %s32_s18, [#allocation5]  }
  0x17   :  { %585 = dma.done.wait [#allocation3], 16  }
  0x18   :  { %586 = vsyncadd [#allocation3], 4294967280 }
  0x19   :  { %587 = dma.done.wait [#allocation5], 16  }
  0x1a   :  { %588 = vsyncadd [#allocation5], 4294967280  ;;  %v535_v0 = vld [vmem:[%s721_s1 + $0x8] sm:$0xff]   ;;  %v536_v1 = vld [vmem:[%s721_s1] sm:$0xff]   ;;  %vm114_vm0 = vcmask 261120  }
  0x1b   :  { %509 = vmatprep.subr.bf16.mxu0 %v535_v0  ;;  %529 = vmatprep.subr.bf16.mxu1 %v535_v0  ;;  %v537_v2 = vld [vmem:[%s720_s0] sm:$0xff]   ;;  %v539_v4 = vld [vmem:[%s720_s0 + $0x8] sm:$0xff]   ;;  %v541_v6 = vld [vmem:[%s720_s0 + $0x10] sm:$0xff]  }
  0x1c   :  { %510 = vmatpush3.bf16.msra.mxu0 %v535_v0  ;;  %531 = vmatpush3.bf16.msra.mxu1 %v535_v0  ;;  %v538_v3 = vld [vmem:[%s720_s0 + $0x20] sm:$0xff]   ;;  %v540_v5 = vld [vmem:[%s720_s0 + $0x28] sm:$0xff]   ;;  %v542_v7 = vld [vmem:[%s720_s0 + $0x30] sm:$0xff]  }
  0x1d   :  { %511 = vmatprep.subr.bf16.mxu0 %v536_v1  ;;  %530 = vmatprep.subr.bf16.mxu1 %v536_v1  ;;  %v543_v8 = vld [vmem:[%s720_s0 + $0x18] sm:$0xff]   ;;  %v660_v10 = vld [vmem:[#allocation2] ss:$0 sm:$0xff]  ;;  %v662_v12 = vld [vmem:[#allocation4] ss:$0 sm:$0xff] }
  0x1e   :  { %513 = vmatprep.mubr.msk.bf16.mxu0 %vm114_vm0, %v537_v2  ;;  %521 = vmatprep.mubr.msk.bf16.mxu1 %vm114_vm0, %v538_v3  ;;  %v544_v9 = vld [vmem:[%s720_s0 + $0x38] sm:$0xff]  }
  0x20   :  { %512 = vmatpush3.bf16.msra.mxu0 %v536_v1  ;;  %532 = vmatpush3.bf16.msra.mxu1 %v536_v1 }
  0x23   :  { %514 = vmatmul.mubr.msk.bf16.vlgmr.msra.gmra.mxu0 %vm114_vm0, %v539_v4  ;;  %522 = vmatmul.mubr.msk.bf16.vlgmr.msra.gmra.mxu1 %vm114_vm0, %v540_v5 }
  0x24   :  { %517 = vmatprep.mubr.msk.bf16.mxu0 %vm114_vm0, %v541_v6  ;;  %525 = vmatprep.mubr.msk.bf16.mxu1 %vm114_vm0, %v542_v7 }
  0x2b   :  { %518 = vmatmul.mubr.msk.bf16.gmra.mxu0 %vm114_vm0, %v543_v8  ;;  %526 = vmatmul.mubr.msk.bf16.gmra.mxu1 %vm114_vm0, %v544_v9 }
  0xe3   :  { %v515_v11 = vpop.f32.mrf.mxu0  ;;  %v523_v13 = vpop.f32.mrf.mxu1 }
  0xe4   :  { %v245_v14 = vmul.f32 %v515_v11, %v660_v10  ;;  %v253_v15 = vmul.f32 %v523_v13, %v660_v10 }
  0xe5   :  { %v173_v16 = vpop.f32.mrf.mxu0  ;;  %v205_v17 = vpop.f32.mrf.mxu1 }
  0xe6   :  { %v268_v18 = vadd.f32 %v662_v12, %v245_v14  ;;  %v276_v19 = vadd.f32 %v662_v12, %v253_v15  ;;  %v243_v20 = vmul.f32 %v660_v10, %v173_v16  ;;  %v251_v21 = vmul.f32 %v660_v10, %v205_v17 }
  0xe7   :  { %v516_v22 = vpop.f32.mrf.mxu0  ;;  %v524_v23 = vpop.f32.mrf.mxu1 }
  0xe8   :  { %v266_v24 = vadd.f32 %v662_v12, %v243_v20  ;;  %v274_v25 = vadd.f32 %v662_v12, %v251_v21  ;;  %v246_v26 = vmul.f32 %v516_v22, %v660_v10  ;;  %v254_v27 = vmul.f32 %v524_v23, %v660_v10 }
  0xe9   :  { %v176_v28 = vpop.f32.mrf.mxu0  ;;  %v208_v29 = vpop.f32.mrf.mxu1  ;;  %v284_v30 = vmax.f32 %v268_v18, 0.0  ;;  %v292_v31 = vmax.f32 %v276_v19, 0.0 }
  0xea   :  { %v269_v32 = vadd.f32 %v662_v12, %v246_v26  ;;  %v277_v33 = vadd.f32 %v662_v12, %v254_v27  ;;  %v244_v34 = vmul.f32 %v660_v10, %v176_v28  ;;  %v252_v35 = vmul.f32 %v660_v10, %v208_v29 }
  0xeb   :  { %v519_v36 = vpop.f32.mrf.mxu0  ;;  %v527_v37 = vpop.f32.mrf.mxu1  ;;  %v282_v38 = vmax.f32 %v266_v24, 0.0  ;;  %v290_v39 = vmax.f32 %v274_v25, 0.0  ;;  %v300_v48 = vmin.f32 %v284_v30, 6.0  ;;  %v308_v49 = vmin.f32 %v292_v31, 6.0 }
  0xec   :  { %v249_v40 = vmul.f32 %v519_v36, %v660_v10  ;;  %v257_v41 = vmul.f32 %v527_v37, %v660_v10  ;;  %v285_v42 = vmax.f32 %v269_v32, 0.0  ;;  %v293_v43 = vmax.f32 %v277_v33, 0.0 }
  0xed   :  { %v267_v44 = vadd.f32 %v662_v12, %v244_v34  ;;  %v275_v45 = vadd.f32 %v662_v12, %v252_v35  ;;  %v189_v46 = vpop.f32.mrf.mxu0  ;;  %v221_v47 = vpop.f32.mrf.mxu1  ;;  %v298_v58 = vmin.f32 %v282_v38, 6.0  ;;  %v306_v59 = vmin.f32 %v290_v39, 6.0 }
  0xee   :  { %v247_v50 = vmul.f32 %v660_v10, %v189_v46  ;;  %v255_v51 = vmul.f32 %v660_v10, %v221_v47  ;;  %v301_v52 = vmin.f32 %v285_v42, 6.0  ;;  %v309_v53 = vmin.f32 %v293_v43, 6.0 }
  0xef   :  { %v283_v54 = vmax.f32 %v267_v44, 0.0  ;;  %v291_v55 = vmax.f32 %v275_v45, 0.0  ;;  %v520_v56 = vpop.f32.mrf.mxu0  ;;  %v528_v57 = vpop.f32.mrf.mxu1  ;;  %v272_v60 = vadd.f32 %v662_v12, %v249_v40  ;;  %v280_v61 = vadd.f32 %v662_v12, %v257_v41 }
  0xf0   :  { %v460_v62 = vpack.c.bf16 %v301_v52, %v300_v48  ;;  %v480_v63 = vpack.c.bf16 %v309_v53, %v308_v49  ;;  %v270_v4 = vadd.f32 %v662_v12, %v247_v50  ;;  %v278_v5 = vadd.f32 %v662_v12, %v255_v51 }
  0xf1   :  { %v299_v0 = vmin.f32 %v283_v54, 6.0  ;;  %v307_v1 = vmin.f32 %v291_v55, 6.0  ;;  %v192_v2 = vpop.f32.mrf.mxu0  ;;  %v224_v3 = vpop.f32.mrf.mxu1  ;;  %v250_v8 = vmul.f32 %v520_v56, %v660_v10  ;;  %v258_v9 = vmul.f32 %v528_v57, %v660_v10 }
  0xf2   :  { %492 = vst [vmem:[%s724_s4 + $0x8] sm:$0xff] %v460_v62   ;;  %496 = vst [vmem:[%s724_s4 + $0x28] sm:$0xff] %v480_v63   ;;  %v248_v11 = vmul.f32 %v660_v10, %v192_v2  ;;  %v256_v13 = vmul.f32 %v660_v10, %v224_v3  ;;  %v288_v14 = vmax.f32 %v272_v60, 0.0  ;;  %v296_v15 = vmax.f32 %v280_v61, 0.0 }
  0xf3   :  { %v455_v6 = vpack.c.bf16 %v299_v0, %v298_v58  ;;  %v475_v7 = vpack.c.bf16 %v307_v1, %v306_v59  ;;  %v273_v16 = vadd.f32 %v662_v12, %v250_v8  ;;  %v281_v17 = vadd.f32 %v662_v12, %v258_v9 }
  0xf4   :  { %v286_v18 = vmax.f32 %v270_v4, 0.0  ;;  %v294_v19 = vmax.f32 %v278_v5, 0.0  ;;  %v271_v20 = vadd.f32 %v662_v12, %v248_v11  ;;  %v279_v10 = vadd.f32 %v662_v12, %v256_v13 }
  0xf5   :  { %456 = vst [vmem:[%s724_s4] sm:$0xff] %v455_v6   ;;  %495 = vst [vmem:[%s724_s4 + $0x20] sm:$0xff] %v475_v7   ;;  %v289_v21 = vmax.f32 %v273_v16, 0.0  ;;  %v297_v22 = vmax.f32 %v281_v17, 0.0  ;;  %v304_v25 = vmin.f32 %v288_v14, 6.0  ;;  %v312_v26 = vmin.f32 %v296_v15, 6.0 }
  0xf6   :  { %v287_v23 = vmax.f32 %v271_v20, 0.0  ;;  %v295_v24 = vmax.f32 %v279_v10, 0.0  ;;  %v302_v29 = vmin.f32 %v286_v18, 6.0  ;;  %v310_v30 = vmin.f32 %v294_v19, 6.0 }
  0xf7   :  { %v305_v27 = vmin.f32 %v289_v21, 6.0  ;;  %v313_v28 = vmin.f32 %v297_v22, 6.0 }
  0xf8   :  { %v303_v31 = vmin.f32 %v287_v23, 6.0  ;;  %v311_v32 = vmin.f32 %v295_v24, 6.0 }
  0xf9   :  { %v470_v33 = vpack.c.bf16 %v305_v27, %v304_v25  ;;  %v490_v34 = vpack.c.bf16 %v313_v28, %v312_v26 }
  0xfa   :  { %v465_v35 = vpack.c.bf16 %v303_v31, %v302_v29  ;;  %v485_v36 = vpack.c.bf16 %v311_v32, %v310_v30 }
  0xfb   :  { %494 = vst [vmem:[%s724_s4 + $0x18] sm:$0xff] %v470_v33   ;;  %498 = vst [vmem:[%s724_s4 + $0x38] sm:$0xff] %v490_v34  }
  0xfc   :  { %493 = vst [vmem:[%s724_s4 + $0x10] sm:$0xff] %v465_v35   ;;  %497 = vst [vmem:[%s724_s4 + $0x30] sm:$0xff] %v485_v36  }
  0xfd   :  { %398 = vsyncpa [#allocation3], 1 }
  0xfe   :  { %399 = vsyncpa [#allocation5], 1 }

// kernel: mobilenetv1_forward.16
= control target key start
LH: loop header
LB: loop body
LE: loop exit
PB: predicated region body
PF: predicated region fallthrough
CT: control target
= control target key end

     0   :  { %12 = vsyncpa [#allocation4], 0  ;;  %s2390_s0 = inlined_call_operand.vmem [shape: bf16[2,10,10,128], index: 0, kind: input, shape index: {}]   ;;  %s2391_s1 = inlined_call_operand.hbm [shape: f32[9,128], index: 1, kind: input, shape index: {}]   ;;  %s2392_s2 = inlined_call_operand.hbm [shape: f32[1,128], index: 2, kind: input, shape index: {}]   ;;  %s2393_s3 = inlined_call_operand.hbm [shape: f32[1,128], index: 3, kind: input, shape index: {}]   ;;  %s2394_s4 = inlined_call_operand.vmem [shape: bf16[128,128], index: 4, kind: input, shape index: {}]   ;;  %s2395_s5 = inlined_call_operand.hbm [shape: f32[1,128], index: 5, kind: input, shape index: {}]   ;;  %s2396_s6 = inlined_call_operand.hbm [shape: f32[1,128], index: 6, kind: input, shape index: {}]   ;;  %s2397_s7 = inlined_call_operand.vmem [shape: bf16[2,64,128], index: 7, kind: output, shape index: {}]  }
   0x1   :  { %13 = vsyncpa [#allocation6], 0 }
   0x2   :  { %14 = vsyncpa [#allocation9], 0  ;;  %s1872_s24 = smov 0   ;;  %s1874_s25 = smov 0  }
   0x3   :  { %s1876_s26 = smov 0  }
   0x4 LB: > { %s1825_s27 = smov [#allocation5]   ;;  %s1416_s29 = sadd.s32 4294967295, %s1823_s26   ;;  %s1823_s26 = sphi %s1876_s26, %s20_s26   ;;  %s1819_s25 = sphi %s1874_s25, %s2410_s25   ;;  %s1815_s24 = sphi %s1872_s24, %s2409_s24  }
   0x5   : > { %s258_s28 = sshll.u32 %s1825_s27, 4  ;;  %p1418_p0 = scmp.ge.s32.totalorder %s1823_s26, 1  ;;  %s259_s28 = int_to_ptr.vmem [resolvable:$true] %s258_s28 }
   0x6   : > { %p232_p1 = scmp.lt.s32.totalorder %s1823_s26, 3  ;;  %p1890_p2 = scmp.eq.s32.totalorder %s1416_s29, 0 }
   0x7   : > { %s1826_s9 = smov [#allocation8]   ;;  %s32_s12 = sadd.s32 1, %s1819_s25 }
   0x8   : > { %s2401_s30 = scalar_select %p1890_p2, 1, 0 }
   0x9   : > { %p1894_p3 = pnand %p1418_p0, %p232_p1  ;;  %s289_s10 = sshll.u32 %s1826_s9, 4  ;;  %s290_s10 = int_to_ptr.vmem [resolvable:$true] %s289_s10 }
   0xa   : > { %p1907_p6 = scmp.ge.s32.totalorder %s32_s12, 2  ;;  %s1670_s15 = scalar_lea.vmem %s259_s28, 16 }
   0xb   : > { %s2402_s8 = scalar_select %p1894_p3, 1, 0 }
   0xc   : > { %p1590_p4 = pneg %p1894_p3  ;;  %p1671_p8 = scmp.ne.s32.totalorder %s259_s28, %s1670_s15 }
   0xd   : > { %s2404_s13 = scalar_select %p1907_p6, 1, 0 }
   0xe   : > { %p1902_p5 = pnand %p1890_p2, %p1590_p4  ;;  %s1677_s16 = scalar_lea.vmem %s259_s28, 32 }
   0xf   : > { %p1678_p11 = scmp.lt.s32.totalorder %s259_s28, %s259_s28  ;;  %p1679_p12 = scmp.lt.s32.totalorder %s1677_s16, %s1670_s15 }
  0x10   : > { %p1913_p7 = pneg %p1902_p5 }
  0x11   : > { %p1680_p13 = por %p1679_p12, %p1678_p11 }
  0x12   : > { %p1673_p9 = pnand %p1671_p8, %p1913_p7 }
  0x14   : > { %p1674_p10 = pneg %p1673_p9 }
  0x16   : > { %p1681_p0 = pnand %p1680_p13, %p1674_p10 }
  0x18   : > { %1684 = shalt.err (!%p1681_p0)
}
  0x19   : > { %1596 = dma.hbm_to_vmem [thread:$0]  (!%p1902_p5), %s2392_s2, 16, %s259_s28, [#allocation6]  }
  0x1a   : > { %s1696_s19 = scalar_lea.vmem %s290_s10, 16  ;;  %s1703_s20 = scalar_lea.vmem %s290_s10, 32 }
  0x1b   : > { %p1697_p1 = scmp.ne.s32.totalorder %s290_s10, %s1696_s19  ;;  %p1704_p8 = scmp.lt.s32.totalorder %s290_s10, %s290_s10 }
  0x1c   : > { %p1705_p9 = scmp.lt.s32.totalorder %s1703_s20, %s1696_s19 }
  0x1d   : > { %p1699_p4 = pnand %p1697_p1, %p1913_p7 }
  0x1e   : > { %p1706_p3 = por %p1705_p9, %p1704_p8 }
  0x1f   : > { %p1700_p2 = pneg %p1699_p4 }
  0x21   : > { %p1707_p6 = pnand %p1706_p3, %p1700_p2 }
  0x23   : > { %1710 = shalt.err (!%p1707_p6)
}
  0x24   : > { %1602 = dma.hbm_to_vmem [thread:$0]  (!%p1902_p5), %s2395_s5, 16, %s290_s10, [#allocation9]  }
  0x25   : > { %p2406_p10 = scmp.ne.s32.totalorder %s2404_s13, 0  ;;  %s1827_s23 = smov [#allocation3]  }
  0x26   : > { %s244_s27 = sshll.u32 %s1827_s23, 4  ;;  %s245_s27 = int_to_ptr.vmem [resolvable:$true] %s244_s27 }
  0x27   : > { %s2412_s12 = smov (%p2406_p10, %s32_s12), 0  ;;  %s1722_s28 = scalar_lea.vmem %s245_s27, 256 }
  0x28   : > { %p1723_p11 = scmp.ne.s32.totalorder %s245_s27, %s1722_s28  ;;  %p1730_p3 = scmp.lt.s32.totalorder %s245_s27, %s245_s27 }
  0x29   : > { %p1731_p6 = scmp.lt.s32.totalorder %s1722_s28, %s1722_s28 }
  0x2a   : > { %p1725_p12 = pnand %p1723_p11, %p1913_p7 }
  0x2b   : > { %p1732_p13 = por %p1731_p6, %p1730_p3 }
  0x2c   : > { %p1726_p2 = pneg %p1725_p12 }
  0x2e   : > { %p1733_p0 = pnand %p1732_p13, %p1726_p2 }
  0x30   : > { %1736 = shalt.err (!%p1733_p0)
}
  0x31   : > { %s1828_s29 = smov 128   ;;  %s1829_s9 = smov 8  }
  0x32   : > { %1593 = dma.hbm_to_vmem [thread:$0]  (!%p1902_p5), %s2391_s1, 256, %s245_s27, [#allocation4], %s1828_s29, %s1828_s29, %s1829_s9  }
  0x33   : > { %s1830_s15 = smov [#allocation7]   ;;  %s1831_s17 = smov [#allocation10]  }
  0x34   : > { %s269_s16 = sshll.u32 %s1830_s15, 4  ;;  %s302_s18 = sshll.u32 %s1831_s17, 4  ;;  %s270_s16 = int_to_ptr.vmem [resolvable:$true] %s269_s16  ;;  %s303_s18 = int_to_ptr.vmem [resolvable:$true] %s302_s18 }
  0x35   : > { %s1748_s19 = scalar_lea.vmem %s270_s16, 16  ;;  %s1755_s20 = scalar_lea.vmem %s270_s16, 32 }
  0x36   : > { %p1749_p1 = scmp.ne.s32.totalorder %s270_s16, %s1748_s19  ;;  %p1756_p9 = scmp.lt.s32.totalorder %s270_s16, %s270_s16 }
  0x37   : > { %p1757_p10 = scmp.lt.s32.totalorder %s1755_s20, %s1748_s19 }
  0x38   : > { %p1751_p4 = pnand %p1749_p1, %p1913_p7 }
  0x39   : > { %p1758_p11 = por %p1757_p10, %p1756_p9 }
  0x3a   : > { %p1752_p8 = pneg %p1751_p4 }
  0x3c   : > { %p1759_p12 = pnand %p1758_p11, %p1752_p8 }
  0x3e   : > { %1762 = shalt.err (!%p1759_p12)
}
  0x3f   : > { %1599 = dma.hbm_to_vmem [thread:$0]  (!%p1902_p5), %s2393_s3, 16, %s270_s16, [#allocation6]  }
  0x40   : > { %s1774_s23 = scalar_lea.vmem %s303_s18, 16  ;;  %s1781_s27 = scalar_lea.vmem %s303_s18, 32 }
  0x41   : > { %p1775_p2 = scmp.ne.s32.totalorder %s303_s18, %s1774_s23  ;;  %p1782_p13 = scmp.lt.s32.totalorder %s303_s18, %s303_s18 }
  0x42   : > { %p1783_p0 = scmp.lt.s32.totalorder %s1781_s27, %s1774_s23 }
  0x43   : > { %p1777_p3 = pnand %p1775_p2, %p1913_p7 }
  0x44   : > { %p1784_p1 = por %p1783_p0, %p1782_p13 }
  0x45   : > { %p1778_p6 = pneg %p1777_p3 }
  0x47   : > { %p1785_p4 = pnand %p1784_p1, %p1778_p6 }
  0x49   : > { %1788 = shalt.err (!%p1785_p4)
}
  0x4a   : > { %1605 = dma.hbm_to_vmem [thread:$0]  (!%p1902_p5), %s2396_s6, 16, %s303_s18, [#allocation9]  }
  0x4b   : > { %p2407_p8 = scmp.ne.s32.totalorder %s2402_s8, 0 }
  0x4c   : > { %p2408_p9 = scmp.ne.s32.totalorder (!%p2407_p8), %s2401_s30, 0 }
  0x4d   : > { %323 = sbr.rel (%p2407_p8) target bundleno = 420 (0x1a4), region = 48 }
  0x52   : > { %1802 = dma.done.wait (%p2408_p9), [#allocation4], 256  }
  0x53   : > { %1804 = vsyncadd (%p2408_p9), [#allocation4], 4294967040 }
  0x54   : > { %1806 = dma.done.wait (%p2408_p9), [#allocation6], 32  }
  0x55   : > { %1808 = vsyncadd (%p2408_p9), [#allocation6], 4294967264 }
  0x56   : > { %1810 = dma.done.wait (%p2408_p9), [#allocation9], 32  }
  0x57   : > { %1812 = vsyncadd (%p2408_p9), [#allocation9], 4294967264  ;;  %p378_p5 = scmp.lt.s32.totalorder %s1815_s24, 1  ;;  %v430_v0 = vlaneseq  ;;  %v1647_v2 = vld [vmem:[%s2394_s4 + $0x38] sm:$0xff]   ;;  %v1648_v3 = vld [vmem:[%s2394_s4 + $0x30] sm:$0xff]   ;;  %vm494_vm0 = vcmask 1046528  }
  0x58   : > { %1529 = vmatprep.subr.bf16.mxu0 %v1647_v2  ;;  %1553 = vmatprep.subr.bf16.mxu1 %v1647_v2  ;;  %v1649_v6 = vld [vmem:[%s2394_s4 + $0x28] sm:$0xff]   ;;  %v1650_v12 = vld [vmem:[%s2394_s4 + $0x20] sm:$0xff]   ;;  %vm571_vm1 = vcmask 1045504   ;;  %v1651_v33 = vld [vmem:[%s2394_s4 + $0x18] sm:$0xff]  }
  0x59   : > { %s2414_s24 = smov (!%p378_p5, %s1815_s24), 1  ;;  %v1974_v1 = vshrl.u32 %v430_v0, 7  ;;  %1530 = vmatpush3.bf16.msra.mxu0 %v1647_v2  ;;  %1561 = vmatpush3.bf16.msra.mxu1 %v1647_v2  ;;  %v2010_v23 = vld [vmem:[#allocation3] sm:$0xff]  ;;  %v1652_v50 = vld [vmem:[%s2394_s4 + $0x10] sm:$0xff]  }
  0x5a   : > { %s1569_s10 = smul.u32 80, %s2414_s24  ;;  %1531 = vmatprep.subr.bf16.mxu0 %v1648_v3  ;;  %1554 = vmatprep.subr.bf16.mxu1 %v1648_v3  ;;  %s1462_s11 = sshll.u32 %s2414_s24, 5 }
  0x5b   : > { %v432_v4 = vsub.s32 0, %v1974_v1  ;;  %v460_v5 = vsub.s32 1, %v1974_v1  ;;  %v537_v7 = vsub.s32 2, %v1974_v1  ;;  %v615_v8 = vsub.s32 3, %v1974_v1 }
  0x5c   : > { %s1992_s17 = scalar_lea.vmem %s2390_s0, %s1569_s10  ;;  %v636_v9 = vsub.s32 4, %v1974_v1  ;;  %v712_v10 = vsub.s32 5, %v1974_v1  ;;  %v789_v11 = vsub.s32 6, %v1974_v1  ;;  %v810_v13 = vsub.s32 7, %v1974_v1  ;;  %s394_s10 = scalar_lea.vmem %s2397_s7, %s1462_s11 }
  0x5d   : > { %1532 = vmatpush3.bf16.msra.mxu0 %v1648_v3  ;;  %1562 = vmatpush3.bf16.msra.mxu1 %v1648_v3  ;;  %v400_v14 = vld [vmem:[%s1992_s17] ss:$8 sps:$4 sm:$0xff]   ;;  %v401_v15 = vld [vmem:[%s1992_s17 + $0x4] sm:$0x1]  ;;  %v403_v16 = vld [vmem:[%s1992_s17 + $0xc] sm:$0x1]  ;;  %v2021_v28 = vrot.slane %v2010_v23, %v432_v4  ;;  %v2026_v30 = vrot.slane %v2010_v23, %v460_v5  ;;  %v2029_v31 = vrot.slane %v2010_v23, %v537_v7 }
  0x5e   : > { %1533 = vmatprep.subr.bf16.mxu0 %v1649_v6  ;;  %1555 = vmatprep.subr.bf16.mxu1 %v1649_v6  ;;  %v404_v17 = vld [vmem:[%s1992_s17 + $0x10] ss:$8 sps:$4 sm:$0xff]   ;;  %v405_v18 = vld [vmem:[%s1992_s17 + $0x14] sm:$0x1]  ;;  %v407_v19 = vld [vmem:[%s1992_s17 + $0x1c] sm:$0x1]  ;;  %v422_v20 = vunpack.c.l.bf16 %v400_v14  ;;  %v2008_v21 = vunpack.c.h.bf16 %v400_v14  ;;  %v450_v22 = vunpack.c.l.bf16 %v401_v15  ;;  %v2016_v26 = vunpack.c.l.bf16 %v403_v16 }
  0x5f   : > { %v2012_v24 = vunpack.c.l.bf16 %v404_v17  ;;  %v2014_v25 = vunpack.c.h.bf16 %v404_v17  ;;  %v2018_v27 = vunpack.c.l.bf16 %v405_v18  ;;  %v2023_v29 = vunpack.c.l.bf16 %v407_v19  ;;  %v408_v32 = vld [vmem:[%s1992_s17 + $0x20] ss:$8 sps:$4 sm:$0xff]   ;;  %v412_v59 = vld [vmem:[%s1992_s17 + $0x30] ss:$8 sps:$4 sm:$0xff]  }
  0x60   : > { %v2036_v34 = vrot.slane %v2010_v23, %v615_v8  ;;  %v2039_v35 = vrot.slane %v2010_v23, %v636_v9  ;;  %v2042_v36 = vrot.slane %v2010_v23, %v712_v10  ;;  %v2044_v37 = vunpack.c.l.bf16 %v408_v32  ;;  %v1653_v5 = vld [vmem:[%s2394_s4 + $0x8] sm:$0xff]  }
  0x61   : > { %1534 = vmatpush3.bf16.msra.mxu0 %v1649_v6  ;;  %1563 = vmatpush3.bf16.msra.mxu1 %v1649_v6  ;;  %v434_v38 = vmul.f32 %v2021_v28, %v422_v20  ;;  %v435_v39 = vmul.f32 %v2021_v28, %v2008_v21  ;;  %v462_v40 = vmul.f32 %v2026_v30, %v422_v20  ;;  %v2075_v4 = vunpack.c.h.bf16 %v408_v32 }
  0x62   : > { %1535 = vmatprep.subr.bf16.mxu0 %v1650_v12  ;;  %1556 = vmatprep.subr.bf16.mxu1 %v1650_v12  ;;  %v463_v41 = vmul.f32 %v2026_v30, %v450_v22  ;;  %v464_v42 = vmul.f32 %v2026_v30, %v2008_v21  ;;  %v465_v43 = vmul.f32 %v2026_v30, %v2016_v26  ;;  %v2084_v9 = vunpack.c.l.bf16 %v412_v59 }
  0x63   : > { %v539_v44 = vmul.f32 %v2029_v31, %v422_v20  ;;  %v540_v45 = vmul.f32 %v2029_v31, %v450_v22  ;;  %v495_v46 = vrot.slane %v462_v40, 1  ;;  %v541_v48 = vmul.f32 %v2029_v31, %v2008_v21 }
  0x64   : > { %v496_v47 = vrot.slane %v463_v41, 1  ;;  %v542_v49 = vmul.f32 %v2029_v31, %v2016_v26  ;;  %v498_v51 = vrot.slane %v464_v42, 1  ;;  %v499_v52 = vrot.slane %v465_v43, 1  ;;  %v2105_v41 = vld [vmem:[#allocation3 + $0x8] ss:$0 sm:$0xff] }
  0x65   : > { %1536 = vmatpush3.bf16.msra.mxu0 %v1650_v12  ;;  %1564 = vmatpush3.bf16.msra.mxu1 %v1650_v12  ;;  %v572_v53 = vrot.slane %v539_v44, 2  ;;  %v573_v54 = vrot.slane %v540_v45, 2  ;;  %v575_v56 = vrot.slane %v541_v48, 2  ;;  %v617_v58 = vmul.f32 %v2036_v34, %v2008_v21 }
  0x66   : > { %1537 = vmatprep.subr.bf16.mxu0 %v1651_v33  ;;  %1557 = vmatprep.subr.bf16.mxu1 %v1651_v33  ;;  %v497_v55 = vsel %vm494_vm0, %v495_v46, %v496_v47  ;;  %v576_v57 = vrot.slane %v542_v49, 2  ;;  %v500_v60 = vsel %vm494_vm0, %v498_v51, %v499_v52  ;;  %v618_v63 = vmul.f32 %v2036_v34, %v2012_v24  ;;  %v409_v46 = vld [vmem:[%s1992_s17 + $0x24] sm:$0x1] }
  0x67   : > { %v527_v61 = vadd.f32 %v497_v55, %v434_v38  ;;  %v574_v62 = vsel %vm571_vm1, %v572_v53, %v573_v54  ;;  %v528_v0 = vadd.f32 %v500_v60, %v435_v39  ;;  %v638_v3 = vmul.f32 %v2039_v35, %v2008_v21 }
  0x68   : > { %v577_v2 = vsel %vm571_vm1, %v575_v56, %v576_v57  ;;  %v639_v7 = vmul.f32 %v2039_v35, %v2016_v26  ;;  %v640_v8 = vmul.f32 %v2039_v35, %v2012_v24  ;;  %v641_v12 = vmul.f32 %v2039_v35, %v2018_v27 }
  0x69   : > { %1538 = vmatpush3.bf16.msra.mxu0 %v1651_v33  ;;  %1565 = vmatpush3.bf16.msra.mxu1 %v1651_v33  ;;  %v604_v6 = vadd.f32 %v574_v62, %v527_v61  ;;  %v605_v10 = vadd.f32 %v577_v2, %v528_v0  ;;  %v670_v14 = vrot.slane %v638_v3, 1  ;;  %v714_v15 = vmul.f32 %v2042_v36, %v2008_v21  ;;  %v1654_v21 = vld [vmem:[%s2394_s4] sm:$0xff]  }
  0x6a   : > { %1539 = vmatprep.subr.bf16.mxu0 %v1652_v50  ;;  %1558 = vmatprep.subr.bf16.mxu1 %v1652_v50  ;;  %v671_v17 = vrot.slane %v639_v7, 1  ;;  %v673_v18 = vrot.slane %v640_v8, 1  ;;  %v715_v19 = vmul.f32 %v2042_v36, %v2016_v26  ;;  %v674_v22 = vrot.slane %v641_v12, 1 }
  0x6b   : > { %v625_v16 = vadd.f32 %v617_v58, %v604_v6  ;;  %v626_v20 = vadd.f32 %v618_v63, %v605_v10  ;;  %v716_v32 = vmul.f32 %v2042_v36, %v2012_v24  ;;  %v717_v33 = vmul.f32 %v2042_v36, %v2018_v27  ;;  %v411_v63 = vld [vmem:[%s1992_s17 + $0x2c] sm:$0x1]  ;;  %v413_v6 = vld [vmem:[%s1992_s17 + $0x34] sm:$0x1] }
  0x6c   : > { %v672_v38 = vsel %vm494_vm0, %v670_v14, %v671_v17  ;;  %v746_v26 = vrot.slane %v714_v15, 2  ;;  %v747_v39 = vrot.slane %v715_v19, 2  ;;  %v2103_v40 = vrot.slane %v2010_v23, %v789_v11  ;;  %v415_v14 = vld [vmem:[%s1992_s17 + $0x3c] sm:$0x1] }
  0x6d   : > { %1540 = vmatpush3.bf16.msra.mxu0 %v1652_v50  ;;  %1566 = vmatpush3.bf16.msra.mxu1 %v1652_v50  ;;  %v675_v42 = vsel %vm494_vm0, %v673_v18, %v674_v22  ;;  %v702_v43 = vadd.f32 %v672_v38, %v625_v16  ;;  %v749_v44 = vrot.slane %v716_v32, 2  ;;  %v750_v45 = vrot.slane %v717_v33, 2 }
  0x6e   : > { %1541 = vmatprep.subr.bf16.mxu0 %v1653_v5  ;;  %1559 = vmatprep.subr.bf16.mxu1 %v1653_v5  ;;  %v703_v47 = vadd.f32 %v675_v42, %v626_v20  ;;  %v748_v48 = vsel %vm571_vm1, %v746_v26, %v747_v39  ;;  %v791_v49 = vmul.f32 %v2103_v40, %v2012_v24  ;;  %v2120_v53 = vunpack.c.h.bf16 %v412_v59 }
  0x6f   : > { %v792_v50 = vmul.f32 %v2103_v40, %v2014_v25  ;;  %v751_v11 = vsel %vm571_vm1, %v749_v44, %v750_v45  ;;  %v778_v51 = vadd.f32 %v748_v48, %v702_v43  ;;  %v2118_v52 = vrot.slane %v2010_v23, %v810_v13 }
  0x70   : > { %v779_v54 = vadd.f32 %v751_v11, %v703_v47  ;;  %v888_v55 = vmul.f32 %v2105_v41, %v2012_v24  ;;  %v889_v56 = vmul.f32 %v2105_v41, %v2018_v27  ;;  %v2126_v57 = vunpack.c.l.bf16 %v409_v46  ;;  %v2167_v47 = vld [vmem:[#allocation7] ss:$0 sm:$0xff] }
  0x71   : > { %1542 = vmatpush3.bf16.msra.mxu0 %v1653_v5  ;;  %1567 = vmatpush3.bf16.msra.mxu1 %v1653_v5  ;;  %v799_v58 = vadd.f32 %v791_v49, %v778_v51  ;;  %v812_v1 = vmul.f32 %v2118_v52, %v2012_v24  ;;  %v813_v13 = vmul.f32 %v2118_v52, %v2018_v27  ;;  %v2148_v18 = vunpack.c.l.bf16 %v411_v63 }
  0x72   : > { %1543 = vmatprep.subr.bf16.mxu0 %v1654_v21  ;;  %1560 = vmatprep.subr.bf16.mxu1 %v1654_v21  ;;  %v814_v23 = vmul.f32 %v2118_v52, %v2014_v25  ;;  %v800_v59 = vadd.f32 %v792_v50, %v779_v54  ;;  %v815_v60 = vmul.f32 %v2118_v52, %v2023_v29  ;;  %v920_v5 = vrot.slane %v888_v55, 2 }
  0x73   : > { %v890_v61 = vmul.f32 %v2105_v41, %v2014_v25  ;;  %v891_v62 = vmul.f32 %v2105_v41, %v2023_v29  ;;  %v844_v0 = vrot.slane %v812_v1, 1  ;;  %v845_v2 = vrot.slane %v813_v13, 1 }
  0x74   : > { %v847_v3 = vrot.slane %v814_v23, 1  ;;  %v848_v7 = vrot.slane %v815_v60, 1  ;;  %v921_v8 = vrot.slane %v889_v56, 2  ;;  %v438_v16 = vmul.f32 %v2021_v28, %v2044_v37 }
  0x75   : > { %1544 = vmatpush3.bf16.msra.mxu0 %v1654_v21  ;;  %1568 = vmatpush3.bf16.msra.mxu1 %v1654_v21  ;;  %v923_v10 = vrot.slane %v890_v61, 2  ;;  %v924_v12 = vrot.slane %v891_v62, 2  ;;  %v846_v15 = vsel %vm494_vm0, %v844_v0, %v845_v2  ;;  %v439_v17 = vmul.f32 %v2021_v28, %v2075_v4  ;;  %v2153_v21 = vld [vmem:[#allocation5] ss:$0 sm:$0xff] }
  0x76   : > { %v849_v19 = vsel %vm494_vm0, %v847_v3, %v848_v7  ;;  %v876_v20 = vadd.f32 %v846_v15, %v799_v58  ;;  %v922_v22 = vsel %vm571_vm1, %v920_v5, %v921_v8  ;;  %v2155_v38 = vunpack.c.l.bf16 %v413_v6 }
  0x77   : > { %v925_v32 = vsel %vm571_vm1, %v923_v10, %v924_v12  ;;  %v877_v33 = vadd.f32 %v849_v19, %v800_v59  ;;  %v2157_v26 = vunpack.c.l.bf16 %v415_v14  ;;  %v470_v39 = vmul.f32 %v2026_v30, %v2044_v37 }
  0x78   : > { %v952_v42 = vadd.f32 %v922_v22, %v876_v20  ;;  %v471_v43 = vmul.f32 %v2026_v30, %v2126_v57  ;;  %v472_v44 = vmul.f32 %v2026_v30, %v2075_v4  ;;  %v473_v45 = vmul.f32 %v2026_v30, %v2148_v18 }
  0x79   : > { %v953_v46 = vadd.f32 %v925_v32, %v877_v33  ;;  %v507_v48 = vrot.slane %v470_v39, 1  ;;  %v547_v49 = vmul.f32 %v2029_v31, %v2044_v37  ;;  %v548_v50 = vmul.f32 %v2029_v31, %v2126_v57 }
  0x7a   : > { %v967_v11 = vmul.f32 %v2153_v21, %v952_v42  ;;  %v508_v51 = vrot.slane %v471_v43, 1  ;;  %v510_v54 = vrot.slane %v472_v44, 1  ;;  %v511_v55 = vrot.slane %v473_v45, 1 }
  0x7b   : > { %v968_v56 = vmul.f32 %v2153_v21, %v953_v46  ;;  %v549_v58 = vmul.f32 %v2029_v31, %v2075_v4  ;;  %v550_v1 = vmul.f32 %v2029_v31, %v2148_v18  ;;  %v584_v13 = vrot.slane %v547_v49, 2 }
  0x7c   : > { %v982_v23 = vadd.f32 %v2167_v47, %v967_v11  ;;  %v509_v59 = vsel %vm494_vm0, %v507_v48, %v508_v51  ;;  %v512_v60 = vsel %vm494_vm0, %v510_v54, %v511_v55  ;;  %v585_v61 = vrot.slane %v548_v50, 2 }
  0x7d   : > { %v983_v62 = vadd.f32 %v2167_v47, %v968_v56  ;;  %v531_v63 = vadd.f32 %v509_v59, %v438_v16  ;;  %v532_v0 = vadd.f32 %v512_v60, %v439_v17  ;;  %v587_v2 = vrot.slane %v549_v58, 2 }
  0x7e   : > { %v990_v3 = vmax.f32 %v982_v23, 0.0  ;;  %v586_v5 = vsel %vm571_vm1, %v584_v13, %v585_v61  ;;  %v588_v6 = vrot.slane %v550_v1, 2  ;;  %v621_v7 = vmul.f32 %v2036_v34, %v2075_v4 }
  0x7f   : > { %v991_v8 = vmax.f32 %v983_v62, 0.0  ;;  %v608_v10 = vadd.f32 %v586_v5, %v531_v63  ;;  %v622_v12 = vmul.f32 %v2036_v34, %v2084_v9  ;;  %v646_v14 = vmul.f32 %v2039_v35, %v2075_v4 }
  0x80   : > { %v998_v15 = vmin.f32 %v990_v3, 6.0  ;;  %v589_v16 = vsel %vm571_vm1, %v587_v2, %v588_v6  ;;  %v647_v17 = vmul.f32 %v2039_v35, %v2148_v18  ;;  %v648_v19 = vmul.f32 %v2039_v35, %v2084_v9 }
  0x81   : > { %v999_v20 = vmin.f32 %v991_v8, 6.0  ;;  %v609_v22 = vadd.f32 %v589_v16, %v532_v0  ;;  %v629_v32 = vadd.f32 %v621_v7, %v608_v10  ;;  %v649_v33 = vmul.f32 %v2039_v35, %v2155_v38 }
  0x82   : > { %v682_v39 = vrot.slane %v646_v14, 1  ;;  %v683_v42 = vrot.slane %v647_v17, 1  ;;  %v685_v43 = vrot.slane %v648_v19, 1  ;;  %v722_v44 = vmul.f32 %v2042_v36, %v2075_v4 }
  0x83   : > { %v1474_v45 = vpack.c.bf16 %v999_v20, %v998_v15  ;;  %v630_v46 = vadd.f32 %v622_v12, %v609_v22  ;;  %v686_v48 = vrot.slane %v649_v33, 1  ;;  %v723_v49 = vmul.f32 %v2042_v36, %v2148_v18 }
  0x84   : > { %v684_v50 = vsel %vm494_vm0, %v682_v39, %v683_v42  ;;  %v724_v11 = vmul.f32 %v2042_v36, %v2084_v9  ;;  %v725_v51 = vmul.f32 %v2042_v36, %v2155_v38  ;;  %v758_v54 = vrot.slane %v722_v44, 2 }
  0x85   : > { %1475 = vst [vmem:[#allocation2] sm:$0xff] %v1474_v45   ;;  %v687_v55 = vsel %vm494_vm0, %v685_v43, %v686_v48  ;;  %v706_v56 = vadd.f32 %v684_v50, %v629_v32  ;;  %v759_v58 = vrot.slane %v723_v49, 2  ;;  %v795_v1 = vmul.f32 %v2103_v40, %v2084_v9 }
  0x86   : > { %v707_v13 = vadd.f32 %v687_v55, %v630_v46  ;;  %v761_v23 = vrot.slane %v724_v11, 2  ;;  %v762_v59 = vrot.slane %v725_v51, 2  ;;  %v796_v60 = vmul.f32 %v2103_v40, %v2120_v53 }
  0x87   : > { %v760_v61 = vsel %vm571_vm1, %v758_v54, %v759_v58  ;;  %v820_v62 = vmul.f32 %v2118_v52, %v2084_v9  ;;  %v821_v63 = vmul.f32 %v2118_v52, %v2155_v38  ;;  %v822_v0 = vmul.f32 %v2118_v52, %v2120_v53 }
  0x88   : > { %v763_v2 = vsel %vm571_vm1, %v761_v23, %v762_v59  ;;  %v782_v3 = vadd.f32 %v760_v61, %v706_v56  ;;  %v823_v5 = vmul.f32 %v2118_v52, %v2157_v26  ;;  %v896_v6 = vmul.f32 %v2105_v41, %v2084_v9 }
  0x89   : > { %v783_v7 = vadd.f32 %v763_v2, %v707_v13  ;;  %v856_v8 = vrot.slane %v820_v62, 1  ;;  %v857_v10 = vrot.slane %v821_v63, 1  ;;  %v859_v12 = vrot.slane %v822_v0, 1 }
  0x8a   : > { %v803_v14 = vadd.f32 %v795_v1, %v782_v3  ;;  %v860_v15 = vrot.slane %v823_v5, 1  ;;  %v897_v16 = vmul.f32 %v2105_v41, %v2155_v38  ;;  %v898_v17 = vmul.f32 %v2105_v41, %v2120_v53 }
  0x8b   : > { %v804_v19 = vadd.f32 %v796_v60, %v783_v7  ;;  %v858_v20 = vsel %vm494_vm0, %v856_v8, %v857_v10  ;;  %v899_v22 = vmul.f32 %v2105_v41, %v2157_v26  ;;  %v932_v32 = vrot.slane %v896_v6, 2 }
  0x8c   : > { %v1655_v33 = vld [vmem:[#allocation2] sm:$0xff]   ;;  %v861_v39 = vsel %vm494_vm0, %v859_v12, %v860_v15  ;;  %v880_v42 = vadd.f32 %v858_v20, %v803_v14  ;;  %v933_v43 = vrot.slane %v897_v16, 2  ;;  %v436_v44 = vmul.f32 %v2021_v28, %v2012_v24 }
  0x8d   : > { %v881_v45 = vadd.f32 %v861_v39, %v804_v19  ;;  %v935_v46 = vrot.slane %v898_v17, 2  ;;  %v936_v48 = vrot.slane %v899_v22, 2  ;;  %v437_v49 = vmul.f32 %v2021_v28, %v2014_v25  ;;  %1545 = vmatprep.mubr.bf16.mxu0 %v1655_v33 }
  0x8e   : > { %v934_v50 = vsel %vm571_vm1, %v932_v32, %v933_v43  ;;  %v466_v11 = vmul.f32 %v2026_v30, %v2012_v24  ;;  %v467_v51 = vmul.f32 %v2026_v30, %v2018_v27  ;;  %v468_v54 = vmul.f32 %v2026_v30, %v2014_v25 }
  0x8f   : > { %v937_v55 = vsel %vm571_vm1, %v935_v46, %v936_v48  ;;  %v956_v56 = vadd.f32 %v934_v50, %v880_v42  ;;  %v469_v58 = vmul.f32 %v2026_v30, %v2023_v29  ;;  %v543_v1 = vmul.f32 %v2029_v31, %v2012_v24 }
  0x90   : > { %v957_v13 = vadd.f32 %v937_v55, %v881_v45  ;;  %v501_v23 = vrot.slane %v466_v11, 1  ;;  %v502_v59 = vrot.slane %v467_v51, 1  ;;  %v504_v60 = vrot.slane %v468_v54, 1 }
  0x91   : > { %v971_v61 = vmul.f32 %v2153_v21, %v956_v56  ;;  %v505_v62 = vrot.slane %v469_v58, 1  ;;  %v544_v63 = vmul.f32 %v2029_v31, %v2018_v27  ;;  %v545_v0 = vmul.f32 %v2029_v31, %v2014_v25 }
  0x92   : > { %v972_v2 = vmul.f32 %v2153_v21, %v957_v13  ;;  %v503_v3 = vsel %vm494_vm0, %v501_v23, %v502_v59  ;;  %v546_v24 = vmul.f32 %v2029_v31, %v2023_v29  ;;  %v578_v5 = vrot.slane %v543_v1, 2 }
  0x93   : > { %v986_v6 = vadd.f32 %v2167_v47, %v971_v61  ;;  %v506_v7 = vsel %vm494_vm0, %v504_v60, %v505_v62  ;;  %v529_v8 = vadd.f32 %v503_v3, %v436_v44  ;;  %v579_v10 = vrot.slane %v544_v63, 2 }
  0x94   : > { %v987_v12 = vadd.f32 %v2167_v47, %v972_v2  ;;  %v530_v27 = vadd.f32 %v506_v7, %v437_v49  ;;  %v581_v14 = vrot.slane %v545_v0, 2  ;;  %v582_v15 = vrot.slane %v546_v24, 2 }
  0x95   : > { %v994_v16 = vmax.f32 %v986_v6, 0.0  ;;  %v580_v17 = vsel %vm571_vm1, %v578_v5, %v579_v10  ;;  %v619_v19 = vmul.f32 %v2036_v34, %v2014_v25  ;;  %v620_v20 = vmul.f32 %v2036_v34, %v2044_v37 }
  0x96   : > { %v995_v22 = vmax.f32 %v987_v12, 0.0  ;;  %v583_v32 = vsel %vm571_vm1, %v581_v14, %v582_v15  ;;  %v606_v33 = vadd.f32 %v580_v17, %v529_v8  ;;  %v642_v39 = vmul.f32 %v2039_v35, %v2014_v25 }
  0x97   : > { %v1002_v42 = vmin.f32 %v994_v16, 6.0  ;;  %v607_v43 = vadd.f32 %v583_v32, %v530_v27  ;;  %v643_v44 = vmul.f32 %v2039_v35, %v2023_v29  ;;  %v644_v45 = vmul.f32 %v2039_v35, %v2044_v37 }
  0x98   : > { %v1003_v46 = vmin.f32 %v995_v22, 6.0  ;;  %v627_v48 = vadd.f32 %v619_v19, %v606_v33  ;;  %v645_v49 = vmul.f32 %v2039_v35, %v2126_v57  ;;  %v676_v50 = vrot.slane %v642_v39, 1 }
  0x99   : > { %v628_v11 = vadd.f32 %v620_v20, %v607_v43  ;;  %v677_v51 = vrot.slane %v643_v44, 1  ;;  %v679_v54 = vrot.slane %v644_v45, 1  ;;  %v718_v55 = vmul.f32 %v2042_v36, %v2014_v25 }
  0x9a   : > { %v1484_v56 = vpack.c.bf16 %v1003_v46, %v1002_v42  ;;  %v680_v58 = vrot.slane %v645_v49, 1  ;;  %v719_v1 = vmul.f32 %v2042_v36, %v2023_v29  ;;  %v720_v13 = vmul.f32 %v2042_v36, %v2044_v37 }
  0x9b   : > { %v678_v23 = vsel %vm494_vm0, %v676_v50, %v677_v51  ;;  %v721_v59 = vmul.f32 %v2042_v36, %v2126_v57  ;;  %v752_v60 = vrot.slane %v718_v55, 2  ;;  %v793_v61 = vmul.f32 %v2103_v40, %v2044_v37 }
  0x9c   : > { %1512 = vst [vmem:[#allocation2 + $0x10] sm:$0xff] %v1484_v56   ;;  %v681_v25 = vsel %vm494_vm0, %v679_v54, %v680_v58  ;;  %v704_v62 = vadd.f32 %v678_v23, %v627_v48  ;;  %v753_v63 = vrot.slane %v719_v1, 2  ;;  %v755_v0 = vrot.slane %v720_v13, 2 }
  0x9d   : > { %v705_v2 = vadd.f32 %v681_v25, %v628_v11  ;;  %v756_v29 = vrot.slane %v721_v59, 2  ;;  %v794_v3 = vmul.f32 %v2103_v40, %v2075_v4  ;;  %v816_v24 = vmul.f32 %v2118_v52, %v2044_v37  ;;  %v416_v25 = vld [vmem:[%s1992_s17 + $0x40] ss:$8 sps:$4 sm:$0xff]  }
  0x9e   : > { %v754_v5 = vsel %vm571_vm1, %v752_v60, %v753_v63  ;;  %v817_v6 = vmul.f32 %v2118_v52, %v2126_v57  ;;  %v818_v7 = vmul.f32 %v2118_v52, %v2075_v4  ;;  %v819_v8 = vmul.f32 %v2118_v52, %v2148_v18 }
  0x9f   : > { %v757_v10 = vsel %vm571_vm1, %v755_v0, %v756_v29  ;;  %v780_v12 = vadd.f32 %v754_v5, %v704_v62  ;;  %v850_v27 = vrot.slane %v816_v24, 1  ;;  %v892_v14 = vmul.f32 %v2105_v41, %v2044_v37 }
  0xa0   : > { %v781_v15 = vadd.f32 %v757_v10, %v705_v2  ;;  %v851_v16 = vrot.slane %v817_v6, 1  ;;  %v853_v17 = vrot.slane %v818_v7, 1  ;;  %v854_v19 = vrot.slane %v819_v8, 1  ;;  %v417_v2 = vld [vmem:[%s1992_s17 + $0x44] sm:$0x1] }
  0xa1   : > { %v801_v20 = vadd.f32 %v793_v61, %v780_v12  ;;  %v893_v22 = vmul.f32 %v2105_v41, %v2126_v57  ;;  %v894_v32 = vmul.f32 %v2105_v41, %v2075_v4  ;;  %v895_v33 = vmul.f32 %v2105_v41, %v2148_v18 }
  0xa2   : > { %v802_v39 = vadd.f32 %v794_v3, %v781_v15  ;;  %v852_v42 = vsel %vm494_vm0, %v850_v27, %v851_v16  ;;  %v855_v43 = vsel %vm494_vm0, %v853_v17, %v854_v19  ;;  %v926_v37 = vrot.slane %v892_v14, 2 }
  0xa3   : > { %v1656_v44 = vld [vmem:[#allocation2 + $0x10] sm:$0xff]   ;;  %v878_v45 = vadd.f32 %v852_v42, %v801_v20  ;;  %v927_v46 = vrot.slane %v893_v22, 2  ;;  %v440_v48 = vmul.f32 %v2021_v28, %v2084_v9  ;;  %v441_v57 = vmul.f32 %v2021_v28, %v2120_v53 }
  0xa4   : > { %v879_v49 = vadd.f32 %v855_v43, %v802_v39  ;;  %v929_v4 = vrot.slane %v894_v32, 2  ;;  %v930_v50 = vrot.slane %v895_v33, 2  ;;  %v474_v18 = vmul.f32 %v2026_v30, %v2084_v9  ;;  %1549 = vmatprep.mubr.bf16.mxu1 %v1656_v44 }
  0xa5   : > { %v928_v11 = vsel %vm571_vm1, %v926_v37, %v927_v46  ;;  %v475_v51 = vmul.f32 %v2026_v30, %v2155_v38  ;;  %v476_v54 = vmul.f32 %v2026_v30, %v2120_v53  ;;  %v477_v28 = vmul.f32 %v2026_v30, %v2157_v26 }
  0xa6   : > { %v931_v55 = vsel %vm571_vm1, %v929_v4, %v930_v50  ;;  %v954_v56 = vadd.f32 %v928_v11, %v878_v45  ;;  %v513_v58 = vrot.slane %v474_v18, 1  ;;  %v551_v1 = vmul.f32 %v2029_v31, %v2084_v9  ;;  %v419_v18 = vld [vmem:[%s1992_s17 + $0x4c] sm:$0x1] }
  0xa7   : > { %v955_v13 = vadd.f32 %v931_v55, %v879_v49  ;;  %v514_v23 = vrot.slane %v475_v51, 1  ;;  %v516_v59 = vrot.slane %v476_v54, 1  ;;  %v517_v60 = vrot.slane %v477_v28, 1 }
  0xa8   : > { %v969_v61 = vmul.f32 %v2153_v21, %v954_v56  ;;  %v552_v62 = vmul.f32 %v2029_v31, %v2155_v38  ;;  %v553_v30 = vmul.f32 %v2029_v31, %v2120_v53  ;;  %v554_v63 = vmul.f32 %v2029_v31, %v2157_v26 }
  0xa9   : > { %v970_v0 = vmul.f32 %v2153_v21, %v955_v13  ;;  %v515_v9 = vsel %vm494_vm0, %v513_v58, %v514_v23  ;;  %v518_v29 = vsel %vm494_vm0, %v516_v59, %v517_v60  ;;  %v590_v3 = vrot.slane %v551_v1, 2 }
  0xaa   : > { %v984_v24 = vadd.f32 %v2167_v47, %v969_v61  ;;  %v533_v5 = vadd.f32 %v515_v9, %v440_v48  ;;  %v534_v6 = vadd.f32 %v518_v29, %v441_v57  ;;  %v591_v7 = vrot.slane %v552_v62, 2 }
  0xab   : > { %v985_v38 = vadd.f32 %v2167_v47, %v970_v0  ;;  %v593_v8 = vrot.slane %v553_v30, 2  ;;  %v594_v10 = vrot.slane %v554_v63, 2  ;;  %v612_v12 = vunpack.c.l.bf16 %v416_v25 }
  0xac   : > { %v992_v27 = vmax.f32 %v984_v24, 0.0  ;;  %v592_v31 = vsel %vm571_vm1, %v590_v3, %v591_v7  ;;  %v623_v14 = vmul.f32 %v2036_v34, %v2120_v53  ;;  %v633_v15 = vunpack.c.l.bf16 %v417_v2 }
  0xad   : > { %v993_v16 = vmax.f32 %v985_v38, 0.0  ;;  %v595_v17 = vsel %vm571_vm1, %v593_v8, %v594_v10  ;;  %v610_v19 = vadd.f32 %v592_v31, %v533_v5  ;;  %v624_v20 = vmul.f32 %v2036_v34, %v612_v12 }
  0xae   : > { %v1000_v22 = vmin.f32 %v992_v27, 6.0  ;;  %v611_v32 = vadd.f32 %v595_v17, %v534_v6  ;;  %v650_v33 = vmul.f32 %v2039_v35, %v2120_v53  ;;  %v651_v39 = vmul.f32 %v2039_v35, %v2157_v26 }
  0xaf   : > { %v1001_v42 = vmin.f32 %v993_v16, 6.0  ;;  %v631_v43 = vadd.f32 %v623_v14, %v610_v19  ;;  %v652_v37 = vmul.f32 %v2039_v35, %v612_v12  ;;  %v653_v44 = vmul.f32 %v2039_v35, %v633_v15 }
  0xb0   : > { %v632_v45 = vadd.f32 %v624_v20, %v611_v32  ;;  %v688_v46 = vrot.slane %v650_v33, 1  ;;  %v689_v48 = vrot.slane %v651_v39, 1  ;;  %v726_v34 = vmul.f32 %v2042_v36, %v2120_v53 }
  0xb1   : > { %v1479_v57 = vpack.c.bf16 %v1001_v42, %v1000_v22  ;;  %v691_v49 = vrot.slane %v652_v37, 1  ;;  %v692_v4 = vrot.slane %v653_v44, 1  ;;  %v727_v50 = vmul.f32 %v2042_v36, %v2157_v26 }
  0xb2   : > { %v690_v11 = vsel %vm494_vm0, %v688_v46, %v689_v48  ;;  %v728_v51 = vmul.f32 %v2042_v36, %v612_v12  ;;  %v729_v54 = vmul.f32 %v2042_v36, %v633_v15  ;;  %v764_v35 = vrot.slane %v726_v34, 2  ;;  %v1450_v48 = vld [vmem:[#allocation8] ss:$0 sm:$0xff] }
  0xb3   : > { %1511 = vst [vmem:[#allocation2 + $0x8] sm:$0xff] %v1479_v57   ;;  %v693_v28 = vsel %vm494_vm0, %v691_v49, %v692_v4  ;;  %v708_v55 = vadd.f32 %v690_v11, %v631_v43  ;;  %v765_v56 = vrot.slane %v727_v50, 2  ;;  %v786_v53 = vunpack.c.h.bf16 %v416_v25  ;;  %v1451_v57 = vld [vmem:[#allocation10] ss:$0 sm:$0xff] }
  0xb4   : > { %v709_v58 = vadd.f32 %v693_v28, %v632_v45  ;;  %v767_v1 = vrot.slane %v728_v51, 2  ;;  %v768_v13 = vrot.slane %v729_v54, 2  ;;  %v797_v23 = vmul.f32 %v2103_v40, %v612_v12 }
  0xb5   : > { %v766_v26 = vsel %vm571_vm1, %v764_v35, %v765_v56  ;;  %v798_v59 = vmul.f32 %v2103_v40, %v786_v53  ;;  %v807_v60 = vunpack.c.l.bf16 %v419_v18  ;;  %v824_v61 = vmul.f32 %v2118_v52, %v612_v12 }
  0xb6   : > { %v769_v36 = vsel %vm571_vm1, %v767_v1, %v768_v13  ;;  %v784_v62 = vadd.f32 %v766_v26, %v708_v55  ;;  %v825_v30 = vmul.f32 %v2118_v52, %v633_v15  ;;  %v826_v63 = vmul.f32 %v2118_v52, %v786_v53 }
  0xb7   : > { %v785_v25 = vadd.f32 %v769_v36, %v709_v58  ;;  %v827_v0 = vmul.f32 %v2118_v52, %v807_v60  ;;  %v862_v2 = vrot.slane %v824_v61, 1  ;;  %v900_v9 = vmul.f32 %v2105_v41, %v612_v12 }
  0xb8   : > { %v805_v29 = vadd.f32 %v797_v23, %v784_v62  ;;  %v863_v3 = vrot.slane %v825_v30, 1  ;;  %v865_v24 = vrot.slane %v826_v63, 1  ;;  %v901_v40 = vmul.f32 %v2105_v41, %v633_v15 }
  0xb9   : > { %v806_v5 = vadd.f32 %v798_v59, %v785_v25  ;;  %v866_v6 = vrot.slane %v827_v0, 1  ;;  %v902_v7 = vmul.f32 %v2105_v41, %v786_v53  ;;  %v903_v38 = vmul.f32 %v2105_v41, %v807_v60 }
  0xba   : > { %v1657_v8 = vld [vmem:[#allocation2 + $0x8] sm:$0xff]   ;;  %v864_v10 = vsel %vm494_vm0, %v862_v2, %v863_v3  ;;  %v938_v27 = vrot.slane %v900_v9, 2  ;;  %v939_v14 = vrot.slane %v901_v40, 2 }
  0xbb   : > { %v867_v52 = vsel %vm494_vm0, %v865_v24, %v866_v6  ;;  %v882_v31 = vadd.f32 %v864_v10, %v805_v29  ;;  %v941_v12 = vrot.slane %v902_v7, 2  ;;  %1546 = vmatmul.mubr.bf16.vlgmr.msra.gmra.mxu0 %v1657_v8  ;;  %v942_v17 = vrot.slane %v903_v38, 2 }
  0xbc   : > { %v883_v16 = vadd.f32 %v867_v52, %v806_v5  ;;  %v940_v15 = vsel %vm571_vm1, %v938_v27, %v939_v14 }
  0xbd   : > { %v943_v19 = vsel %vm571_vm1, %v941_v12, %v942_v17  ;;  %v958_v20 = vadd.f32 %v940_v15, %v882_v31 }
  0xbe   : > { %v959_v22 = vadd.f32 %v943_v19, %v883_v16 }
  0xbf   : > { %v973_v41 = vmul.f32 %v2153_v21, %v958_v20 }
  0xc0   : > { %v974_v32 = vmul.f32 %v2153_v21, %v959_v22 }
  0xc1   : > { %v988_v33 = vadd.f32 %v2167_v47, %v973_v41 }
  0xc2   : > { %v989_v39 = vadd.f32 %v2167_v47, %v974_v32 }
  0xc3   : > { %v996_v42 = vmax.f32 %v988_v33, 0.0 }
  0xc4   : > { %v997_v43 = vmax.f32 %v989_v39, 0.0 }
  0xc5   : > { %v1004_v37 = vmin.f32 %v996_v42, 6.0 }
  0xc6   : > { %v1005_v44 = vmin.f32 %v997_v43, 6.0 }
  0xc8   : > { %v1489_v45 = vpack.c.bf16 %v1005_v44, %v1004_v37 }
  0xca   : > { %1513 = vst [vmem:[#allocation2 + $0x18] sm:$0xff] %v1489_v45  }
  0xd1   : > { %v1658_v46 = vld [vmem:[#allocation2 + $0x18] sm:$0xff]  }
  0xd2   : > { %1550 = vmatmul.mubr.bf16.vlgmr.msra.gmra.mxu1 %v1658_v46 }
 0x17b   : > { %v1547_v34 = vpop.f32.mrf.mxu0 }
 0x17c   : > { %v1192_v49 = vmul.f32 %v1547_v34, %v1450_v48 }
 0x17d   : > { %v1152_v4 = vpop.f32.mrf.mxu0 }
 0x17e   : > { %v1207_v50 = vadd.f32 %v1451_v57, %v1192_v49  ;;  %v1190_v21 = vmul.f32 %v1450_v48, %v1152_v4 }
 0x17f   : > { %v1548_v18 = vpop.f32.mrf.mxu0 }
 0x180   : > { %v1205_v11 = vadd.f32 %v1451_v57, %v1190_v21  ;;  %v1193_v51 = vmul.f32 %v1548_v18, %v1450_v48  ;;  %v1215_v54 = vmax.f32 %v1207_v50, 0.0 }
 0x181   : > { %v1155_v47 = vpop.f32.mrf.mxu0 }
 0x182   : > { %v1208_v35 = vadd.f32 %v1451_v57, %v1193_v51  ;;  %v1191_v28 = vmul.f32 %v1450_v48, %v1155_v47  ;;  %v1213_v55 = vmax.f32 %v1205_v11, 0.0  ;;  %v1223_v58 = vmin.f32 %v1215_v54, 6.0 }
 0x184   : > { %v1216_v56 = vmax.f32 %v1208_v35, 0.0  ;;  %v1206_v53 = vadd.f32 %v1451_v57, %v1191_v28  ;;  %v1221_v23 = vmin.f32 %v1213_v55, 6.0 }
 0x186   : > { %v1224_v1 = vmin.f32 %v1216_v56, 6.0  ;;  %v1214_v13 = vmax.f32 %v1206_v53, 0.0 }
 0x188   : > { %v1499_v26 = vpack.c.bf16 %v1224_v1, %v1223_v58  ;;  %v1222_v59 = vmin.f32 %v1214_v13, 6.0 }
 0x18a   : > { %1514 = vst [vmem:[%s394_s10 + $0x8] sm:$0xff] %v1499_v26   ;;  %v1494_v60 = vpack.c.bf16 %v1222_v59, %v1221_v23 }
 0x18c   : > { %1495 = vst [vmem:[%s394_s10] sm:$0xff] %v1494_v60  }
 0x192   : > { %v1551_v61 = vpop.f32.mrf.mxu1 }
 0x193   : > { %v1196_v36 = vmul.f32 %v1551_v61, %v1450_v48 }
 0x194   : > { %v1168_v62 = vpop.f32.mrf.mxu1 }
 0x195   : > { %v1211_v30 = vadd.f32 %v1451_v57, %v1196_v36  ;;  %v1194_v63 = vmul.f32 %v1450_v48, %v1168_v62 }
 0x196   : > { %v1552_v25 = vpop.f32.mrf.mxu1 }
 0x197   : > { %v1209_v0 = vadd.f32 %v1451_v57, %v1194_v63  ;;  %v1197_v2 = vmul.f32 %v1552_v25, %v1450_v48  ;;  %v1219_v29 = vmax.f32 %v1211_v30, 0.0 }
 0x198   : > { %v1171_v9 = vpop.f32.mrf.mxu1 }
 0x199   : > { %v1212_v3 = vadd.f32 %v1451_v57, %v1197_v2  ;;  %v1195_v24 = vmul.f32 %v1450_v48, %v1171_v9  ;;  %v1217_v40 = vmax.f32 %v1209_v0, 0.0  ;;  %v1227_v7 = vmin.f32 %v1219_v29, 6.0 }
 0x19b   : > { %v1220_v5 = vmax.f32 %v1212_v3, 0.0  ;;  %v1210_v6 = vadd.f32 %v1451_v57, %v1195_v24  ;;  %v1225_v10 = vmin.f32 %v1217_v40, 6.0 }
 0x19d   : > { %v1228_v38 = vmin.f32 %v1220_v5, 6.0  ;;  %v1218_v8 = vmax.f32 %v1210_v6, 0.0 }
 0x19f   : > { %v1509_v27 = vpack.c.bf16 %v1228_v38, %v1227_v7  ;;  %v1226_v52 = vmin.f32 %v1218_v8, 6.0 }
 0x1a1   : > { %1516 = vst [vmem:[%s394_s10 + $0x18] sm:$0xff] %v1509_v27   ;;  %v1504_v31 = vpack.c.bf16 %v1226_v52, %v1225_v10 }
 0x1a3   : > { %1515 = vst [vmem:[%s394_s10 + $0x10] sm:$0xff] %v1504_v31  }
 0x1a4 PF: > { %s20_s26 = sadd.s32 1, %s1823_s26   ;;  %s2409_s24 = smov %s1819_s25 }
 0x1a5   : > { %p17_p7 = scmp.ge.s32.totalorder %s20_s26, 4   ;;  %s2410_s25 = smov %s2412_s12 }
 0x1a7   :  { %19 = sbr.rel (!%p17_p7) target bundleno = 4 (0x4), region = 108 }
 0x1ac   :  { %1296 = vsyncpa [#allocation4], 1 }
 0x1ad   :  { %1298 = vsyncpa [#allocation4 + $0x1], 1 }
 0x1ae   :  { %1299 = vsyncpa [#allocation6], 1 }
 0x1af   :  { %1300 = vsyncpa [#allocation9], 1 }

// kernel: mobilenetv1_forward.17
= control target key start
LH: loop header
LB: loop body
LE: loop exit
PB: predicated region body
PF: predicated region fallthrough
CT: control target
= control target key end

     0   :  { %s1213_s13 = smov 0   ;;  %s1215_s14 = smov 0   ;;  %s1407_s0 = inlined_call_operand.vmem [shape: bf16[2,5,5,128], index: 0, kind: input, shape index: {}]   ;;  %s1408_s1 = inlined_call_operand.vmem [shape: bf16[2,5,4,128], index: 1, kind: input, shape index: {}]   ;;  %s1409_s2 = inlined_call_operand.vmem [shape: bf16[2,4,5,128], index: 2, kind: input, shape index: {}]   ;;  %s1410_s3 = inlined_call_operand.vmem [shape: bf16[2,4,4,128], index: 3, kind: input, shape index: {}]   ;;  %s1411_s4 = inlined_call_operand.vmem [shape: f32[9,128], index: 4, kind: input, shape index: {}]   ;;  %s1412_s5 = inlined_call_operand.vmem [shape: f32[1,128], index: 5, kind: input, shape index: {}]   ;;  %s1413_s6 = inlined_call_operand.vmem [shape: f32[1,128], index: 6, kind: input, shape index: {}]   ;;  %s1414_s7 = inlined_call_operand.vmem [shape: bf16[128,128], index: 7, kind: input, shape index: {}]   ;;  %s1415_s8 = inlined_call_operand.vmem [shape: f32[1,128], index: 8, kind: input, shape index: {}]   ;;  %s1416_s9 = inlined_call_operand.vmem [shape: f32[1,128], index: 9, kind: input, shape index: {}]   ;;  %s1417_s10 = inlined_call_operand.vmem [shape: bf16[2,16,128], index: 10, kind: output, shape index: {}]  }
   0x1   :  { %s1217_s15 = smov 0  }
   0x2 LB: > { %s32_s16 = sadd.s32 1, %s1150_s14  ;;  %p1025_p0 = scmp.ge.s32.totalorder %s1154_s15, 1  ;;  %s1154_s15 = sphi %s1217_s15, %s20_s15   ;;  %s1150_s14 = sphi %s1215_s14, %s1419_s14   ;;  %s1146_s13 = sphi %s1213_s13, %s1418_s13  }
   0x3   : > { %p34_p1 = scmp.ge.s32.totalorder %s32_s16, 2  ;;  %p381_p2 = scmp.lt.s32.totalorder %s1154_s15, 3 }
   0x5   : > { %s1421_s16 = smov (%p34_p1, %s32_s16), 0  ;;  %p382_p3 = pnand %p1025_p0, %p381_p2 }
   0x6   : > { %p447_p4 = scmp.lt.s32.totalorder (!%p382_p3), %s1146_s13, 1 }
   0x7   : > { %385 = sbr.rel (%p382_p3) target bundleno = 276 (0x114), region = 60 }
   0xc   : > { %v1123_v0 = vld [vmem:[%s1414_s7 + $0x38] sm:$0xff]   ;;  %v514_v1 = vlaneseq  ;;  %v1156_v2 = vmov 0.0   ;;  %v1124_v3 = vld [vmem:[%s1414_s7 + $0x30] sm:$0xff]   ;;  %vm1157_vm0 = vmmov 0   ;;  %s1423_s13 = smov (!%p447_p4, %s1146_s13), 1  ;;  %v1125_v6 = vld [vmem:[%s1414_s7 + $0x28] sm:$0xff]  }
   0xd   : > { %1075 = vmatprep.subr.bf16.mxu0 %v1156_v2  ;;  %1091 = vmatprep.mubr.msk.bf16.mxu0 %vm1157_vm0, %v1156_v2  ;;  %s1095_s23 = smul.u32 20, %s1423_s13  ;;  %s1054_s28 = sshll.u32 %s1423_s13, 4  ;;  %v1258_v7 = vld [vmem:[%s1411_s4] sm:$0xff]  ;;  %v1127_v36 = vld [vmem:[%s1414_s7 + $0x18] sm:$0xff]   ;;  %v1128_v60 = vld [vmem:[%s1414_s7 + $0x10] sm:$0xff]  }
   0xe   : > { %1076 = vmatpush3.bf16.msra.mxu0 %v1123_v0  ;;  %v1240_v4 = vshrl.u32 %v514_v1, 7  ;;  %s1096_s24 = smul.u32 10, %s1423_s13  ;;  %v1126_v14 = vld [vmem:[%s1414_s7 + $0x20] sm:$0xff]   ;;  %s1055_s20 = sshll.u32 %s1423_s13, 3 }
   0xf   : > { %1077 = vmatprep.subr.bf16.mxu0 %v1156_v2  ;;  %s451_s27 = scalar_lea.vmem %s1407_s0, %s1095_s23  ;;  %s461_s23 = scalar_lea.vmem %s1409_s2, %s1054_s28 }
  0x10   : > { %v516_v5 = vsub.s32 0, %v1240_v4  ;;  %v532_v8 = vsub.s32 1, %v1240_v4  ;;  %v544_v9 = vsub.s32 2, %v1240_v4  ;;  %s1265_s17 = scalar_lea.vmem %s1408_s1, %s1096_s24  ;;  %v490_v10 = vld [vmem:[%s451_s27] sm:$0x7]  ;;  %s466_s28 = scalar_lea.vmem %s1410_s3, %s1055_s20 }
  0x11   : > { %v491_v11 = vld [vmem:[%s451_s27 + $0x4] sm:$0x7]  ;;  %v492_v12 = vld [vmem:[%s451_s27 + $0x8] sm:$0x7]  ;;  %v493_v15 = vld [vmem:[%s451_s27 + $0xc] sm:$0x7]  ;;  %v510_v17 = vunpack.c.l.bf16 %v490_v10  ;;  %s484_s12 = scalar_lea.vmem %s1417_s10, %s1055_s20 }
  0x12   : > { %1078 = vmatpush3.bf16.msra.mxu0 %v1124_v3  ;;  %v517_v13 = vrot.slane %v1258_v7, %v516_v5  ;;  %v1272_v16 = vld [vmem:[%s451_s27 + $0x10] sm:$0x7]  ;;  %v1274_v18 = vunpack.c.l.bf16 %v491_v11  ;;  %v1276_v19 = vunpack.c.l.bf16 %v492_v12  ;;  %v495_v20 = vld [vmem:[%s1265_s17] sm:$0x3]  ;;  %v1281_v21 = vld [vmem:[%s1265_s17 + $0x2] sm:$0x3]  ;;  %v1286_v23 = vunpack.c.l.bf16 %v493_v15 }
  0x13   : > { %1079 = vmatprep.subr.bf16.mxu0 %v1156_v2  ;;  %v1284_v22 = vld [vmem:[%s1265_s17 + $0x4] sm:$0x3]  ;;  %v533_v24 = vrot.slane %v1258_v7, %v532_v8  ;;  %v545_v25 = vrot.slane %v1258_v7, %v544_v9  ;;  %v622_v26 = vunpack.c.l.bf16 %v1272_v16  ;;  %v1295_v27 = vld [vmem:[%s1265_s17 + $0x6] sm:$0x3]  ;;  %v526_v31 = vunpack.c.l.bf16 %v495_v20  ;;  %v1311_v37 = vld [vmem:[%s461_s23] sm:$0x7] }
  0x14   : > { %v518_v28 = vmul.f32 %v517_v13, %v510_v17  ;;  %v519_v29 = vmul.f32 %v517_v13, %v1274_v18  ;;  %v520_v30 = vmul.f32 %v517_v13, %v1276_v19  ;;  %v521_v32 = vmul.f32 %v517_v13, %v1286_v23  ;;  %v1316_v42 = vld [vmem:[%s461_s23 + $0x4] sm:$0x7]  ;;  %v1318_v43 = vld [vmem:[%s461_s23 + $0x8] sm:$0x7]  ;;  %v1320_v44 = vld [vmem:[%s461_s23 + $0xc] sm:$0x7] }
  0x15   : > { %v527_v33 = vunpack.c.l.bf16 %v1281_v21  ;;  %v528_v34 = vunpack.c.l.bf16 %v1284_v22  ;;  %v529_v35 = vunpack.c.l.bf16 %v1295_v27  ;;  %v534_v38 = vmul.f32 %v533_v24, %v526_v31  ;;  %v504_v49 = vld [vmem:[%s466_s28] sm:$0x3]  ;;  %v505_v54 = vld [vmem:[%s466_s28 + $0x2] sm:$0x3]  ;;  %v506_v55 = vld [vmem:[%s466_s28 + $0x4] sm:$0x3] }
  0x16   : > { %1080 = vmatpush3.bf16.msra.mxu0 %v1125_v6  ;;  %v546_v39 = vmul.f32 %v545_v25, %v510_v17  ;;  %v547_v40 = vmul.f32 %v545_v25, %v1274_v18  ;;  %v548_v41 = vmul.f32 %v545_v25, %v1276_v19  ;;  %v549_v48 = vmul.f32 %v545_v25, %v1286_v23  ;;  %v507_v61 = vld [vmem:[%s466_s28 + $0x6] sm:$0x3]  ;;  %v1337_v3 = vld [vmem:[%s1265_s17 + $0x8] sm:$0x3]  ;;  %v1036_v27 = vld [vmem:[%s1413_s6] ss:$0 sm:$0xff] }
  0x17   : > { %1081 = vmatprep.subr.bf16.mxu0 %v1156_v2  ;;  %v535_v45 = vmul.f32 %v533_v24, %v527_v33  ;;  %v536_v46 = vmul.f32 %v533_v24, %v528_v34  ;;  %v537_v47 = vmul.f32 %v533_v24, %v529_v35  ;;  %v538_v50 = vadd.f32 %v534_v38, %v518_v28  ;;  %v1034_v10 = vld [vmem:[%s1411_s4 + $0x8] ss:$0 sm:$0xff] }
  0x18   : > { %v554_v51 = vrot.slane %v546_v39, 1  ;;  %v555_v52 = vrot.slane %v547_v40, 1  ;;  %v556_v53 = vrot.slane %v548_v41, 1  ;;  %v557_v59 = vrot.slane %v549_v48, 1  ;;  %v1129_v25 = vld [vmem:[%s1414_s7 + $0x8] sm:$0xff]  }
  0x19   : > { %v539_v56 = vadd.f32 %v535_v45, %v519_v29  ;;  %v540_v57 = vadd.f32 %v536_v46, %v520_v30  ;;  %v541_v58 = vadd.f32 %v537_v47, %v521_v32  ;;  %v566_v63 = vunpack.c.l.bf16 %v1311_v37  ;;  %v1130_v46 = vld [vmem:[%s1414_s7] sm:$0xff]  }
  0x1a   : > { %1082 = vmatpush3.bf16.msra.mxu0 %v1126_v14  ;;  %v562_v62 = vadd.f32 %v554_v51, %v538_v50  ;;  %v567_v0 = vunpack.c.l.bf16 %v1316_v42  ;;  %v568_v1 = vunpack.c.l.bf16 %v1318_v43  ;;  %v569_v9 = vunpack.c.l.bf16 %v1320_v44 }
  0x1b   : > { %1083 = vmatprep.subr.bf16.mxu0 %v1156_v2  ;;  %v563_v5 = vadd.f32 %v555_v52, %v539_v56  ;;  %v564_v6 = vadd.f32 %v556_v53, %v540_v57  ;;  %v565_v8 = vadd.f32 %v557_v59, %v541_v58  ;;  %v572_v11 = vsub.s32 3, %v1240_v4 }
  0x1c   : > { %v582_v12 = vunpack.c.l.bf16 %v504_v49  ;;  %v583_v13 = vunpack.c.l.bf16 %v505_v54  ;;  %v584_v14 = vunpack.c.l.bf16 %v506_v55  ;;  %v585_v15 = vunpack.c.l.bf16 %v507_v61 }
  0x1d   : > { %v588_v17 = vsub.s32 4, %v1240_v4  ;;  %v600_v20 = vsub.s32 5, %v1240_v4  ;;  %v625_v24 = vsub.s32 6, %v1240_v4  ;;  %v573_v28 = vrot.slane %v1258_v7, %v572_v11 }
  0x1e   : > { %1084 = vmatpush3.bf16.msra.mxu0 %v1127_v36  ;;  %v635_v29 = vunpack.c.l.bf16 %v1337_v3  ;;  %v638_v30 = vsub.s32 7, %v1240_v4  ;;  %v1354_v31 = vmul.f32 %v1034_v10, %v1274_v18  ;;  %v653_v38 = vmul.f32 %v1034_v10, %v1276_v19 }
  0x1f   : > { %1085 = vmatprep.subr.bf16.mxu0 %v1156_v2  ;;  %v589_v32 = vrot.slane %v1258_v7, %v588_v17  ;;  %v601_v36 = vrot.slane %v1258_v7, %v600_v20  ;;  %v626_v37 = vrot.slane %v1258_v7, %v625_v24  ;;  %v574_v39 = vmul.f32 %v573_v28, %v566_v63 }
  0x20   : > { %v575_v40 = vmul.f32 %v573_v28, %v567_v0  ;;  %v576_v41 = vmul.f32 %v573_v28, %v568_v1  ;;  %v577_v42 = vmul.f32 %v573_v28, %v569_v9  ;;  %v654_v11 = vmul.f32 %v1034_v10, %v1286_v23 }
  0x21   : > { %v590_v43 = vmul.f32 %v589_v32, %v582_v12  ;;  %v591_v44 = vmul.f32 %v589_v32, %v583_v13  ;;  %v592_v4 = vmul.f32 %v589_v32, %v584_v14  ;;  %v593_v45 = vmul.f32 %v589_v32, %v585_v15 }
  0x22   : > { %1086 = vmatpush3.bf16.msra.mxu0 %v1128_v60  ;;  %v578_v47 = vadd.f32 %v574_v39, %v562_v62  ;;  %v579_v48 = vadd.f32 %v575_v40, %v563_v5  ;;  %v580_v49 = vadd.f32 %v576_v41, %v564_v6  ;;  %v581_v50 = vadd.f32 %v577_v42, %v565_v8 }
  0x23   : > { %1087 = vmatprep.subr.bf16.mxu0 %v1156_v2  ;;  %v602_v51 = vmul.f32 %v601_v36, %v566_v63  ;;  %v603_v52 = vmul.f32 %v601_v36, %v567_v0  ;;  %v604_v53 = vmul.f32 %v601_v36, %v568_v1  ;;  %v605_v54 = vmul.f32 %v601_v36, %v569_v9 }
  0x24   : > { %v594_v55 = vadd.f32 %v590_v43, %v578_v47  ;;  %v595_v56 = vadd.f32 %v591_v44, %v579_v48  ;;  %v596_v57 = vadd.f32 %v592_v4, %v580_v49  ;;  %v597_v58 = vadd.f32 %v593_v45, %v581_v50 }
  0x25   : > { %v610_v59 = vrot.slane %v602_v51, 1  ;;  %v611_v60 = vrot.slane %v603_v52, 1  ;;  %v612_v61 = vrot.slane %v604_v53, 1  ;;  %v613_v3 = vrot.slane %v605_v54, 1 }
  0x26   : > { %1088 = vmatpush3.bf16.msra.mxu0 %v1129_v25  ;;  %v627_v62 = vmul.f32 %v626_v37, %v1274_v18  ;;  %v628_v5 = vmul.f32 %v626_v37, %v1276_v19  ;;  %v629_v6 = vmul.f32 %v626_v37, %v1286_v23  ;;  %v639_v9 = vrot.slane %v1258_v7, %v638_v30 }
  0x27   : > { %1089 = vmatprep.subr.bf16.mxu0 %v1156_v2  ;;  %v630_v2 = vmul.f32 %v626_v37, %v622_v26  ;;  %v618_v63 = vadd.f32 %v610_v59, %v594_v55  ;;  %v619_v0 = vadd.f32 %v611_v60, %v595_v56  ;;  %v620_v1 = vadd.f32 %v612_v61, %v596_v57  ;;  %v1048_v55 = vld [vmem:[%s1415_s8] ss:$0 sm:$0xff] }
  0x28   : > { %v621_v8 = vadd.f32 %v613_v3, %v597_v58  ;;  %v655_v12 = vmul.f32 %v1034_v10, %v622_v26  ;;  %v660_v18 = vrot.slane %v1354_v31, 1  ;;  %v640_v17 = vmul.f32 %v639_v9, %v527_v33  ;;  %v1035_v31 = vld [vmem:[%s1412_s5] ss:$0 sm:$0xff] }
  0x29   : > { %v631_v13 = vadd.f32 %v627_v62, %v618_v63  ;;  %v632_v19 = vadd.f32 %v628_v5, %v619_v0  ;;  %v633_v14 = vadd.f32 %v629_v6, %v620_v1  ;;  %v641_v20 = vmul.f32 %v639_v9, %v528_v34  ;;  %v1049_v57 = vld [vmem:[%s1416_s9] ss:$0 sm:$0xff] }
  0x2a   : > { %1090 = vmatpush3.bf16.msra.mxu0 %v1130_v46  ;;  %v634_v15 = vadd.f32 %v630_v2, %v621_v8  ;;  %v642_v7 = vmul.f32 %v639_v9, %v529_v35  ;;  %v643_v24 = vmul.f32 %v639_v9, %v635_v29  ;;  %v661_v23 = vrot.slane %v653_v38, 1 }
  0x2b   : > { %v662_v25 = vrot.slane %v654_v11, 1  ;;  %v663_v16 = vrot.slane %v655_v12, 1  ;;  %v644_v26 = vadd.f32 %v640_v17, %v631_v13  ;;  %v645_v10 = vadd.f32 %v641_v20, %v632_v19 }
  0x2c   : > { %v646_v28 = vadd.f32 %v642_v7, %v633_v14  ;;  %v647_v30 = vadd.f32 %v643_v24, %v634_v15 }
  0x2d   : > { %v668_v21 = vadd.f32 %v660_v18, %v644_v26  ;;  %v669_v33 = vadd.f32 %v661_v23, %v645_v10 }
  0x2e   : > { %v670_v32 = vadd.f32 %v662_v25, %v646_v28  ;;  %v671_v22 = vadd.f32 %v663_v16, %v647_v30 }
  0x2f   : > { %v679_v34 = vmul.f32 %v1035_v31, %v668_v21  ;;  %v680_v35 = vmul.f32 %v1035_v31, %v669_v33 }
  0x30   : > { %v681_v29 = vmul.f32 %v1035_v31, %v670_v32  ;;  %v682_v36 = vmul.f32 %v1035_v31, %v671_v22 }
  0x31   : > { %v690_v37 = vadd.f32 %v1036_v27, %v679_v34  ;;  %v691_v38 = vadd.f32 %v1036_v27, %v680_v35 }
  0x32   : > { %v692_v39 = vadd.f32 %v1036_v27, %v681_v29  ;;  %v693_v40 = vadd.f32 %v1036_v27, %v682_v36 }
  0x33   : > { %v694_v41 = vmax.f32 %v690_v37, 0.0  ;;  %v695_v42 = vmax.f32 %v691_v38, 0.0 }
  0x34   : > { %v696_v43 = vmax.f32 %v692_v39, 0.0  ;;  %v697_v44 = vmax.f32 %v693_v40, 0.0 }
  0x35   : > { %v698_v4 = vmin.f32 %v694_v41, 6.0  ;;  %v699_v45 = vmin.f32 %v695_v42, 6.0 }
  0x36   : > { %v700_v46 = vmin.f32 %v696_v43, 6.0  ;;  %v701_v47 = vmin.f32 %v697_v44, 6.0 }
  0x37   : > { %v702_v48 = vpack.c.bf16 %v698_v4, %v698_v4  ;;  %v1057_v50 = vpack.c.bf16 %v699_v45, %v699_v45 }
  0x38   : > { %v704_v49 = vpack.c.bf16 %v700_v46, %v700_v46  ;;  %v1058_v51 = vpack.c.bf16 %v701_v47, %v701_v47 }
  0x39   : > { %706 = vst [vmem:[#allocation2] sm:$0x3] %v702_v48  ;;  %v710_v52 = vrot.slane %v1057_v50, 6 }
  0x3a   : > { %713 = vst [vmem:[#allocation2 + $0x4] sm:$0x3] %v704_v49  ;;  %v717_v53 = vrot.slane %v1058_v51, 6 }
  0x3b   : > { %712 = vst [vmem:[#allocation2] sm:$0xc] %v710_v52 }
  0x3c   : > { %719 = vst [vmem:[#allocation2 + $0x4] sm:$0xc] %v717_v53 }
  0x43   : > { %v1131_v54 = vld [vmem:[#allocation2] sm:$0xff]  }
  0x44   : > { %1092 = vmatmul.mubr.bf16.vlgmr.msra.gmra.mxu0 %v1131_v54 }
 0x104   : > { %v826_v56 = vpop.f32.mrf.mxu0 }
 0x105   : > { %v840_v58 = vmul.f32 %v1048_v55, %v826_v56 }
 0x106   : > { %v1093_v59 = vpop.f32.mrf.mxu0 }
 0x107   : > { %v849_v60 = vadd.f32 %v1049_v57, %v840_v58 }
 0x108   : > { %v829_v61 = vpop.f32.mrf.mxu0 }
 0x109   : > { %v841_v3 = vmul.f32 %v1048_v55, %v829_v61  ;;  %v851_v5 = vmax.f32 %v849_v60, 0.0 }
 0x10a   : > { %v1094_v62 = vpop.f32.mrf.mxu0 }
 0x10b   : > { %v850_v6 = vadd.f32 %v1049_v57, %v841_v3  ;;  %v853_v63 = vmin.f32 %v851_v5, 6.0 }
 0x10d   : > { %v852_v2 = vmax.f32 %v850_v6, 0.0 }
 0x10f   : > { %v854_v0 = vmin.f32 %v852_v2, 6.0 }
 0x111   : > { %v1064_v1 = vpack.c.bf16 %v854_v0, %v853_v63 }
 0x113   : > { %1065 = vst [vmem:[%s484_s12] sm:$0xff] %v1064_v1  }
 0x114 PF: > { %s20_s15 = sadd.s32 1, %s1154_s15   ;;  %s1418_s13 = smov %s1150_s14 }
 0x115   : > { %p17_p5 = scmp.ge.s32.totalorder %s20_s15, 4   ;;  %s1419_s14 = smov %s1421_s16 }
 0x117   :  { %19 = sbr.rel (!%p17_p5) target bundleno = 2 (0x2), region = 112 }

// kernel: mobilenetv1_forward.18
= control target key start
LH: loop header
LB: loop body
LE: loop exit
PB: predicated region body
PF: predicated region fallthrough
CT: control target
= control target key end

     0   :  { %s1025_s24 = smov 0   ;;  %s1027_s25 = smov 0   ;;  %s1179_s0 = inlined_call_operand.vmem [shape: bf16[2,6,6,128], index: 0, kind: input, shape index: {}]   ;;  %s1180_s1 = inlined_call_operand.vmem [shape: f32[9,128], index: 1, kind: input, shape index: {}]   ;;  %s1181_s2 = inlined_call_operand.vmem [shape: f32[1,128], index: 2, kind: input, shape index: {}]   ;;  %s1182_s3 = inlined_call_operand.vmem [shape: f32[1,128], index: 3, kind: input, shape index: {}]   ;;  %s1183_s4 = inlined_call_operand.vmem [shape: bf16[128,128], index: 4, kind: input, shape index: {}]   ;;  %s1184_s5 = inlined_call_operand.vmem [shape: f32[1,128], index: 5, kind: input, shape index: {}]   ;;  %s1185_s6 = inlined_call_operand.vmem [shape: f32[1,128], index: 6, kind: input, shape index: {}]   ;;  %s1186_s7 = inlined_call_operand.vmem [shape: bf16[2,16,128], index: 7, kind: output, shape index: {}]  }
   0x1   :  { %s1029_s26 = smov 0  }
   0x2 LB: > { %s29_s27 = sadd.s32 1, %s977_s25  ;;  %p860_p0 = scmp.ge.s32.totalorder %s981_s26, 1  ;;  %s981_s26 = sphi %s1029_s26, %s17_s26   ;;  %s977_s25 = sphi %s1027_s25, %s1188_s25   ;;  %s973_s24 = sphi %s1025_s24, %s1187_s24  }
   0x3   : > { %p31_p1 = scmp.ge.s32.totalorder %s29_s27, 2  ;;  %p276_p2 = scmp.lt.s32.totalorder %s981_s26, 3 }
   0x5   : > { %s1190_s27 = smov (%p31_p1, %s29_s27), 0  ;;  %p277_p3 = pnand %p860_p0, %p276_p2 }
   0x6   : > { %p321_p4 = scmp.lt.s32.totalorder (!%p277_p3), %s973_s24, 1 }
   0x7   : > { %280 = sbr.rel (%p277_p3) target bundleno = 276 (0x114), region = 48 }
   0xc   : > { %v950_v0 = vld [vmem:[%s1183_s4 + $0x38] sm:$0xff]   ;;  %v361_v1 = vlaneseq  ;;  %v983_v2 = vmov 0.0   ;;  %v951_v3 = vld [vmem:[%s1183_s4 + $0x30] sm:$0xff]   ;;  %vm984_vm0 = vmmov 0   ;;  %s1192_s24 = smov (!%p321_p4, %s973_s24), 1  ;;  %v952_v6 = vld [vmem:[%s1183_s4 + $0x28] sm:$0xff]  }
   0xd   : > { %903 = vmatprep.subr.bf16.mxu0 %v983_v2  ;;  %919 = vmatprep.mubr.msk.bf16.mxu0 %vm984_vm0, %v983_v2  ;;  %s923_s11 = smul.u32 24, %s1192_s24  ;;  %v1071_v8 = vld [vmem:[%s1180_s1] sm:$0xff]  ;;  %v954_v36 = vld [vmem:[%s1183_s4 + $0x18] sm:$0xff]   ;;  %v955_v53 = vld [vmem:[%s1183_s4 + $0x10] sm:$0xff]   ;;  %s884_s18 = sshll.u32 %s1192_s24, 3 }
   0xe   : > { %904 = vmatpush3.bf16.msra.mxu0 %v950_v0  ;;  %v1052_v4 = vshrl.u32 %v361_v1, 7  ;;  %v953_v17 = vld [vmem:[%s1183_s4 + $0x20] sm:$0xff]   ;;  %s343_s21 = scalar_lea.vmem %s1186_s7, %s884_s18 }
   0xf   : > { %905 = vmatprep.subr.bf16.mxu0 %v983_v2  ;;  %s1066_s14 = scalar_lea.vmem %s1179_s0, %s923_s11 }
  0x10   : > { %v363_v5 = vsub.s32 0, %v1052_v4  ;;  %v375_v7 = vsub.s32 1, %v1052_v4  ;;  %v399_v9 = vsub.s32 2, %v1052_v4  ;;  %v424_v10 = vsub.s32 3, %v1052_v4  ;;  %v349_v12 = vld [vmem:[%s1066_s14] sm:$0x7] }
  0x11   : > { %v436_v11 = vsub.s32 4, %v1052_v4  ;;  %v350_v13 = vld [vmem:[%s1066_s14 + $0x4] sm:$0x7]  ;;  %v351_v14 = vld [vmem:[%s1066_s14 + $0x8] sm:$0x7]  ;;  %v357_v20 = vunpack.c.l.bf16 %v349_v12 }
  0x12   : > { %906 = vmatpush3.bf16.msra.mxu0 %v951_v3  ;;  %v364_v15 = vrot.slane %v1071_v8, %v363_v5  ;;  %v376_v16 = vrot.slane %v1071_v8, %v375_v7  ;;  %v352_v18 = vld [vmem:[%s1066_s14 + $0xc] sm:$0x7]  ;;  %v353_v19 = vld [vmem:[%s1066_s14 + $0x10] sm:$0x7]  ;;  %v1086_v21 = vunpack.c.l.bf16 %v350_v13  ;;  %v1088_v22 = vunpack.c.l.bf16 %v351_v14  ;;  %v354_v62 = vld [vmem:[%s1066_s14 + $0x14] sm:$0x7] }
  0x13   : > { %907 = vmatprep.subr.bf16.mxu0 %v983_v2  ;;  %v400_v23 = vrot.slane %v1071_v8, %v399_v9  ;;  %v1092_v24 = vunpack.c.l.bf16 %v352_v18  ;;  %v1094_v25 = vunpack.c.l.bf16 %v353_v19  ;;  %v425_v26 = vrot.slane %v1071_v8, %v424_v10  ;;  %v956_v10 = vld [vmem:[%s1183_s4 + $0x8] sm:$0xff]  }
  0x14   : > { %v437_v27 = vrot.slane %v1071_v8, %v436_v11  ;;  %v365_v28 = vmul.f32 %v364_v15, %v357_v20  ;;  %v366_v29 = vmul.f32 %v364_v15, %v1086_v21  ;;  %v367_v30 = vmul.f32 %v364_v15, %v1088_v22  ;;  %v864_v19 = vld [vmem:[%s1180_s1 + $0x8] ss:$0 sm:$0xff] }
  0x15   : > { %v377_v31 = vmul.f32 %v376_v16, %v357_v20  ;;  %v368_v32 = vmul.f32 %v364_v15, %v1092_v24  ;;  %v378_v33 = vmul.f32 %v376_v16, %v1086_v21  ;;  %v379_v34 = vmul.f32 %v376_v16, %v1088_v22 }
  0x16   : > { %908 = vmatpush3.bf16.msra.mxu0 %v952_v6  ;;  %v380_v35 = vmul.f32 %v376_v16, %v1092_v24  ;;  %v401_v38 = vmul.f32 %v400_v23, %v357_v20  ;;  %v402_v39 = vmul.f32 %v400_v23, %v1086_v21  ;;  %v403_v40 = vmul.f32 %v400_v23, %v1088_v22 }
  0x17   : > { %909 = vmatprep.subr.bf16.mxu0 %v983_v2  ;;  %v385_v37 = vrot.slane %v377_v31, 1  ;;  %v386_v41 = vrot.slane %v378_v33, 1  ;;  %v387_v42 = vrot.slane %v379_v34, 1  ;;  %v404_v44 = vmul.f32 %v400_v23, %v1092_v24 }
  0x18   : > { %v388_v43 = vrot.slane %v380_v35, 1  ;;  %v409_v46 = vrot.slane %v401_v38, 2  ;;  %v410_v47 = vrot.slane %v402_v39, 2  ;;  %v411_v48 = vrot.slane %v403_v40, 2 }
  0x19   : > { %v393_v45 = vadd.f32 %v385_v37, %v365_v28  ;;  %v394_v49 = vadd.f32 %v386_v41, %v366_v29  ;;  %v395_v50 = vadd.f32 %v387_v42, %v367_v30  ;;  %v412_v52 = vrot.slane %v404_v44, 2 }
  0x1a   : > { %910 = vmatpush3.bf16.msra.mxu0 %v953_v17  ;;  %v396_v51 = vadd.f32 %v388_v43, %v368_v32  ;;  %v426_v55 = vmul.f32 %v425_v26, %v1086_v21  ;;  %v427_v56 = vmul.f32 %v425_v26, %v1088_v22  ;;  %v428_v57 = vmul.f32 %v425_v26, %v1092_v24 }
  0x1b   : > { %911 = vmatprep.subr.bf16.mxu0 %v983_v2  ;;  %v417_v54 = vadd.f32 %v409_v46, %v393_v45  ;;  %v418_v58 = vadd.f32 %v410_v47, %v394_v49  ;;  %v419_v59 = vadd.f32 %v411_v48, %v395_v50  ;;  %v429_v61 = vmul.f32 %v425_v26, %v1094_v25 }
  0x1c   : > { %v420_v60 = vadd.f32 %v412_v52, %v396_v51  ;;  %v438_v0 = vmul.f32 %v437_v27, %v1086_v21  ;;  %v439_v1 = vmul.f32 %v437_v27, %v1088_v22  ;;  %v440_v3 = vmul.f32 %v437_v27, %v1092_v24 }
  0x1d   : > { %v430_v63 = vadd.f32 %v426_v55, %v417_v54  ;;  %v431_v5 = vadd.f32 %v427_v56, %v418_v58  ;;  %v432_v6 = vadd.f32 %v428_v57, %v419_v59  ;;  %v441_v9 = vmul.f32 %v437_v27, %v1094_v25 }
  0x1e   : > { %912 = vmatpush3.bf16.msra.mxu0 %v954_v36  ;;  %v433_v7 = vadd.f32 %v429_v61, %v420_v60  ;;  %v446_v11 = vrot.slane %v438_v0, 1  ;;  %v447_v12 = vrot.slane %v439_v1, 1  ;;  %v448_v13 = vrot.slane %v440_v3, 1 }
  0x1f   : > { %913 = vmatprep.subr.bf16.mxu0 %v983_v2  ;;  %v460_v14 = vsub.s32 5, %v1052_v4  ;;  %v449_v15 = vrot.slane %v441_v9, 1  ;;  %v482_v16 = vunpack.c.l.bf16 %v354_v62  ;;  %v485_v17 = vsub.s32 6, %v1052_v4 }
  0x20   : > { %v497_v18 = vsub.s32 7, %v1052_v4  ;;  %v454_v20 = vadd.f32 %v446_v11, %v430_v63  ;;  %v455_v23 = vadd.f32 %v447_v12, %v431_v5  ;;  %v456_v26 = vadd.f32 %v448_v13, %v432_v6  ;;  %v957_v4 = vld [vmem:[%s1183_s4] sm:$0xff]  }
  0x21   : > { %v461_v27 = vrot.slane %v1071_v8, %v460_v14  ;;  %v457_v28 = vadd.f32 %v449_v15, %v433_v7  ;;  %v486_v29 = vrot.slane %v1071_v8, %v485_v17  ;;  %v523_v31 = vmul.f32 %v864_v19, %v1088_v22  ;;  %v865_v6 = vld [vmem:[%s1181_s2] ss:$0 sm:$0xff] }
  0x22   : > { %914 = vmatpush3.bf16.msra.mxu0 %v955_v53  ;;  %v498_v30 = vrot.slane %v1071_v8, %v497_v18  ;;  %v525_v57 = vmul.f32 %v864_v19, %v1094_v25  ;;  %v526_v58 = vmul.f32 %v864_v19, %v482_v16 }
  0x23   : > { %915 = vmatprep.subr.bf16.mxu0 %v983_v2  ;;  %v462_v32 = vmul.f32 %v461_v27, %v1086_v21  ;;  %v463_v33 = vmul.f32 %v461_v27, %v1088_v22  ;;  %v464_v34 = vmul.f32 %v461_v27, %v1092_v24  ;;  %v465_v35 = vmul.f32 %v461_v27, %v1094_v25 }
  0x24   : > { %v487_v36 = vmul.f32 %v486_v29, %v1088_v22  ;;  %v488_v8 = vmul.f32 %v486_v29, %v1092_v24  ;;  %v489_v37 = vmul.f32 %v486_v29, %v1094_v25  ;;  %v490_v38 = vmul.f32 %v486_v29, %v482_v16 }
  0x25   : > { %v470_v39 = vrot.slane %v462_v32, 2  ;;  %v471_v40 = vrot.slane %v463_v33, 2  ;;  %v472_v41 = vrot.slane %v464_v34, 2  ;;  %v473_v42 = vrot.slane %v465_v35, 2 }
  0x26   : > { %916 = vmatpush3.bf16.msra.mxu0 %v956_v10  ;;  %v499_v21 = vmul.f32 %v498_v30, %v1088_v22  ;;  %v500_v43 = vmul.f32 %v498_v30, %v1092_v24  ;;  %v501_v44 = vmul.f32 %v498_v30, %v1094_v25  ;;  %v502_v45 = vmul.f32 %v498_v30, %v482_v16  ;;  %v866_v25 = vld [vmem:[%s1182_s3] ss:$0 sm:$0xff] }
  0x27   : > { %917 = vmatprep.subr.bf16.mxu0 %v983_v2  ;;  %v478_v2 = vadd.f32 %v470_v39, %v454_v20  ;;  %v479_v46 = vadd.f32 %v471_v40, %v455_v23  ;;  %v480_v47 = vadd.f32 %v472_v41, %v456_v26  ;;  %v481_v48 = vadd.f32 %v473_v42, %v457_v28 }
  0x28   : > { %v507_v49 = vrot.slane %v499_v21, 1  ;;  %v508_v50 = vrot.slane %v500_v43, 1  ;;  %v509_v51 = vrot.slane %v501_v44, 1  ;;  %v510_v52 = vrot.slane %v502_v45, 1 }
  0x29   : > { %v491_v53 = vadd.f32 %v487_v36, %v478_v2  ;;  %v492_v54 = vadd.f32 %v488_v8, %v479_v46  ;;  %v493_v55 = vadd.f32 %v489_v37, %v480_v47  ;;  %v494_v56 = vadd.f32 %v490_v38, %v481_v48  ;;  %v878_v36 = vld [vmem:[%s1184_s5] ss:$0 sm:$0xff] }
  0x2a   : > { %918 = vmatpush3.bf16.msra.mxu0 %v957_v4  ;;  %v524_v22 = vmul.f32 %v864_v19, %v1092_v24  ;;  %v531_v59 = vrot.slane %v523_v31, 2  ;;  %v533_v1 = vrot.slane %v525_v57, 2  ;;  %v534_v3 = vrot.slane %v526_v58, 2  ;;  %v879_v37 = vld [vmem:[%s1185_s6] ss:$0 sm:$0xff] }
  0x2b   : > { %v515_v60 = vadd.f32 %v507_v49, %v491_v53  ;;  %v516_v61 = vadd.f32 %v508_v50, %v492_v54  ;;  %v517_v62 = vadd.f32 %v509_v51, %v493_v55  ;;  %v518_v63 = vadd.f32 %v510_v52, %v494_v56 }
  0x2c   : > { %v532_v0 = vrot.slane %v524_v22, 2 }
  0x2d   : > { %v539_v5 = vadd.f32 %v531_v59, %v515_v60  ;;  %v541_v9 = vadd.f32 %v533_v1, %v517_v62  ;;  %v542_v10 = vadd.f32 %v534_v3, %v518_v63 }
  0x2e   : > { %v540_v7 = vadd.f32 %v532_v0, %v516_v61 }
  0x2f   : > { %v550_v24 = vmul.f32 %v865_v6, %v539_v5  ;;  %v552_v12 = vmul.f32 %v865_v6, %v541_v9  ;;  %v553_v13 = vmul.f32 %v865_v6, %v542_v10 }
  0x30   : > { %v551_v11 = vmul.f32 %v865_v6, %v540_v7 }
  0x31   : > { %v561_v14 = vadd.f32 %v866_v25, %v550_v24  ;;  %v563_v16 = vadd.f32 %v866_v25, %v552_v12  ;;  %v564_v17 = vadd.f32 %v866_v25, %v553_v13 }
  0x32   : > { %v562_v15 = vadd.f32 %v866_v25, %v551_v11 }
  0x33   : > { %v565_v18 = vmax.f32 %v561_v14, 0.0  ;;  %v567_v20 = vmax.f32 %v563_v16, 0.0  ;;  %v568_v23 = vmax.f32 %v564_v17, 0.0 }
  0x34   : > { %v566_v19 = vmax.f32 %v562_v15, 0.0 }
  0x35   : > { %v569_v26 = vmin.f32 %v565_v18, 6.0  ;;  %v571_v28 = vmin.f32 %v567_v20, 6.0  ;;  %v572_v29 = vmin.f32 %v568_v23, 6.0 }
  0x36   : > { %v570_v27 = vmin.f32 %v566_v19, 6.0 }
  0x37   : > { %v573_v30 = vpack.c.bf16 %v569_v26, %v569_v26  ;;  %v575_v31 = vpack.c.bf16 %v571_v28, %v571_v28  ;;  %v886_v32 = vpack.c.bf16 %v572_v29, %v572_v29 }
  0x38   : > { %v885_v4 = vpack.c.bf16 %v570_v27, %v570_v27 }
  0x39   : > { %577 = vst [vmem:[#allocation2] sm:$0x3] %v573_v30  ;;  %584 = vst [vmem:[#allocation2 + $0x4] sm:$0x3] %v575_v31  ;;  %v588_v34 = vrot.slane %v886_v32, 6 }
  0x3a   : > { %v581_v33 = vrot.slane %v885_v4, 6 }
  0x3b   : > { %590 = vst [vmem:[#allocation2 + $0x4] sm:$0xc] %v588_v34 }
  0x3c   : > { %583 = vst [vmem:[#allocation2] sm:$0xc] %v581_v33 }
  0x43   : > { %v958_v35 = vld [vmem:[#allocation2] sm:$0xff]  }
  0x44   : > { %920 = vmatmul.mubr.bf16.vlgmr.msra.gmra.mxu0 %v958_v35 }
 0x104   : > { %v697_v8 = vpop.f32.mrf.mxu0 }
 0x105   : > { %v711_v38 = vmul.f32 %v878_v36, %v697_v8 }
 0x106   : > { %v921_v39 = vpop.f32.mrf.mxu0 }
 0x107   : > { %v720_v40 = vadd.f32 %v879_v37, %v711_v38 }
 0x108   : > { %v700_v41 = vpop.f32.mrf.mxu0 }
 0x109   : > { %v712_v42 = vmul.f32 %v878_v36, %v700_v41  ;;  %v722_v43 = vmax.f32 %v720_v40, 0.0 }
 0x10a   : > { %v922_v21 = vpop.f32.mrf.mxu0 }
 0x10b   : > { %v721_v44 = vadd.f32 %v879_v37, %v712_v42  ;;  %v724_v2 = vmin.f32 %v722_v43, 6.0 }
 0x10d   : > { %v723_v45 = vmax.f32 %v721_v44, 0.0 }
 0x10f   : > { %v725_v46 = vmin.f32 %v723_v45, 6.0 }
 0x111   : > { %v892_v47 = vpack.c.bf16 %v725_v46, %v724_v2 }
 0x113   : > { %893 = vst [vmem:[%s343_s21] sm:$0xff] %v892_v47  }
 0x114 PF: > { %s17_s26 = sadd.s32 1, %s981_s26   ;;  %s1187_s24 = smov %s977_s25 }
 0x115   : > { %p14_p5 = scmp.ge.s32.totalorder %s17_s26, 4   ;;  %s1188_s25 = smov %s1190_s27 }
 0x117   :  { %16 = sbr.rel (!%p14_p5) target bundleno = 2 (0x2), region = 91 }

// kernel: mobilenetv1_forward.19
= control target key start
LH: loop header
LB: loop body
LE: loop exit
PB: predicated region body
PF: predicated region fallthrough
CT: control target
= control target key end

     0   :  { %s1174_s13 = smov 0   ;;  %s1176_s14 = smov 0   ;;  %s1330_s0 = inlined_call_operand.vmem [shape: bf16[2,3,3,128], index: 0, kind: input, shape index: {}]   ;;  %s1331_s1 = inlined_call_operand.vmem [shape: bf16[2,3,2,128], index: 1, kind: input, shape index: {}]   ;;  %s1332_s2 = inlined_call_operand.vmem [shape: bf16[2,2,3,128], index: 2, kind: input, shape index: {}]   ;;  %s1333_s3 = inlined_call_operand.vmem [shape: bf16[2,2,2,128], index: 3, kind: input, shape index: {}]   ;;  %s1334_s4 = inlined_call_operand.vmem [shape: f32[9,128], index: 4, kind: input, shape index: {}]   ;;  %s1335_s5 = inlined_call_operand.vmem [shape: f32[1,128], index: 5, kind: input, shape index: {}]   ;;  %s1336_s6 = inlined_call_operand.vmem [shape: f32[1,128], index: 6, kind: input, shape index: {}]   ;;  %s1337_s7 = inlined_call_operand.vmem [shape: bf16[128,256], index: 7, kind: input, shape index: {}]   ;;  %s1338_s8 = inlined_call_operand.vmem [shape: f32[1,256], index: 8, kind: input, shape index: {}]   ;;  %s1339_s9 = inlined_call_operand.vmem [shape: f32[1,256], index: 9, kind: input, shape index: {}]   ;;  %s1340_s10 = inlined_call_operand.vmem [shape: bf16[2,4,256], index: 10, kind: output, shape index: {}]  }
   0x1   :  { %s1178_s15 = smov 0  }
   0x2 LB: > { %s32_s16 = sadd.s32 1, %s1111_s14  ;;  %p1003_p0 = scmp.ge.s32.totalorder %s1115_s15, 1  ;;  %s1115_s15 = sphi %s1178_s15, %s20_s15   ;;  %s1111_s14 = sphi %s1176_s14, %s1342_s14   ;;  %s1107_s13 = sphi %s1174_s13, %s1341_s13  }
   0x3   : > { %p34_p1 = scmp.ge.s32.totalorder %s32_s16, 2  ;;  %p385_p2 = scmp.lt.s32.totalorder %s1115_s15, 3 }
   0x5   : > { %s1344_s16 = smov (%p34_p1, %s32_s16), 0  ;;  %p386_p3 = pnand %p1003_p0, %p385_p2 }
   0x6   : > { %p453_p4 = scmp.lt.s32.totalorder (!%p386_p3), %s1107_s13, 1 }
   0x7   : > { %389 = sbr.rel (%p386_p3) target bundleno = 268 (0x10c), region = 60 }
   0xc   : > { %v1069_v0 = vld [vmem:[%s1337_s7 + $0x74] ss:$8 sps:$4 sm:$0xff]   ;;  %v1071_v1 = vld [vmem:[%s1337_s7 + $0x70] ss:$8 sps:$4 sm:$0xff]   ;;  %v1117_v2 = vmov 0   ;;  %s1346_s13 = smov (!%p453_p4, %s1107_s13), 1  ;;  %v516_v4 = vlaneseq }
   0xd   : > { %785 = vmatprep.mubr.bf16.mxu0 %v1117_v2  ;;  %753 = vmatprep.subr.bf16.mxu0 %v1069_v0  ;;  %v1072_v3 = vld [vmem:[%s1337_s7 + $0x64] ss:$8 sps:$4 sm:$0xff]   ;;  %v1074_v5 = vld [vmem:[%s1337_s7 + $0x60] ss:$8 sps:$4 sm:$0xff]   ;;  %v1075_v6 = vld [vmem:[%s1337_s7 + $0x54] ss:$8 sps:$4 sm:$0xff]  }
   0xe   : > { %754 = vmatpush1.bf16.msra.mxu0 %v1071_v1  ;;  %s1041_s27 = smul.u32 6, %s1346_s13  ;;  %v1211_v7 = vshrl.u32 %v516_v4, 7  ;;  %v1077_v8 = vld [vmem:[%s1337_s7 + $0x50] ss:$8 sps:$4 sm:$0xff]   ;;  %s1039_s11 = sshll.u32 %s1346_s13, 2  ;;  %v512_v29 = vld [vmem:[%s1334_s4] sm:$0xff] }
   0xf   : > { %755 = vmatprep.subr.bf16.mxu0 %v1072_v3  ;;  %s1042_s28 = smul.u32 3, %s1346_s13  ;;  %s1007_s12 = sshll.u32 %s1346_s13, 1  ;;  %v1078_v9 = vld [vmem:[%s1337_s7 + $0x44] ss:$8 sps:$4 sm:$0xff]   ;;  %v1080_v10 = vld [vmem:[%s1337_s7 + $0x40] ss:$8 sps:$4 sm:$0xff]  }
  0x10   : > { %s1224_s21 = scalar_lea.vmem %s1330_s0, %s1041_s27  ;;  %v1081_v11 = vld [vmem:[%s1337_s7 + $0x34] ss:$8 sps:$4 sm:$0xff]   ;;  %s466_s18 = scalar_lea.vmem %s1332_s2, %s1039_s11  ;;  %v1247_v13 = vsub.s32 0, %v1211_v7  ;;  %v1250_v14 = vsub.s32 1, %v1211_v7  ;;  %v536_v17 = vsub.s32 2, %v1211_v7  ;;  %v554_v18 = vsub.s32 3, %v1211_v7 }
  0x11   : > { %s1232_s26 = scalar_lea.vmem %s1331_s1, %s1042_s28  ;;  %s470_s22 = scalar_lea.vmem %s1333_s3, %s1007_s12  ;;  %v502_v12 = vld [vmem:[%s1224_s21] sm:$0x3]  ;;  %v503_v15 = vld [vmem:[%s1224_s21 + $0x2] sm:$0x3]  ;;  %v572_v21 = vsub.s32 5, %v1211_v7  ;;  %v564_v32 = vsub.s32 4, %v1211_v7 }
  0x12   : > { %756 = vmatpush1.bf16.msra.mxu0 %v1074_v5  ;;  %v505_v16 = vld [vmem:[%s1232_s26] sm:$0x1]  ;;  %v1257_v19 = vld [vmem:[%s1232_s26 + $0x1] sm:$0x1]  ;;  %v509_v22 = vld [vmem:[%s466_s18 + $0x2] sm:$0x3]  ;;  %v514_v25 = vunpack.c.l.bf16 %v502_v12  ;;  %v515_v26 = vunpack.c.l.bf16 %v503_v15  ;;  %v519_v34 = vrot.slane %v512_v29, %v1247_v13  ;;  %v529_v35 = vrot.slane %v512_v29, %v1250_v14 }
  0x13   : > { %757 = vmatprep.subr.bf16.mxu0 %v1075_v6  ;;  %v508_v20 = vld [vmem:[%s466_s18] sm:$0x3]  ;;  %v524_v27 = vunpack.c.l.bf16 %v505_v16  ;;  %v525_v28 = vunpack.c.l.bf16 %v1257_v19  ;;  %v551_v31 = vunpack.c.l.bf16 %v509_v22  ;;  %v1083_v33 = vld [vmem:[%s1337_s7 + $0x30] ss:$8 sps:$4 sm:$0xff]   ;;  %v537_v36 = vrot.slane %v512_v29, %v536_v17  ;;  %v1084_v38 = vld [vmem:[%s1337_s7 + $0x24] ss:$8 sps:$4 sm:$0xff]  }
  0x14   : > { %v510_v23 = vld [vmem:[%s470_s22] sm:$0x1]  ;;  %v511_v24 = vld [vmem:[%s470_s22 + $0x1] sm:$0x1]  ;;  %v550_v30 = vunpack.c.l.bf16 %v508_v20  ;;  %v555_v37 = vrot.slane %v512_v29, %v554_v18  ;;  %v573_v41 = vrot.slane %v512_v29, %v572_v21  ;;  %v589_v42 = vsub.s32 6, %v1211_v7  ;;  %s495_s22 = scalar_lea.vmem %s1340_s10, %s1039_s11 }
  0x15   : > { %v560_v39 = vunpack.c.l.bf16 %v510_v23  ;;  %v561_v40 = vunpack.c.l.bf16 %v511_v24  ;;  %v520_v43 = vmul.f32 %v519_v34, %v514_v25  ;;  %v521_v44 = vmul.f32 %v519_v34, %v515_v26  ;;  %v504_v47 = vld [vmem:[%s1224_s21 + $0x4] sm:$0x3]  ;;  %v1086_v52 = vld [vmem:[%s1337_s7 + $0x20] ss:$8 sps:$4 sm:$0xff]   ;;  %v1087_v57 = vld [vmem:[%s1337_s7 + $0x14] ss:$8 sps:$4 sm:$0xff]  }
  0x16   : > { %758 = vmatpush1.bf16.msra.mxu0 %v1077_v8  ;;  %v530_v45 = vmul.f32 %v529_v35, %v524_v27  ;;  %v531_v46 = vmul.f32 %v529_v35, %v525_v28  ;;  %v538_v48 = vmul.f32 %v537_v36, %v514_v25  ;;  %v539_v49 = vmul.f32 %v537_v36, %v515_v26  ;;  %v507_v58 = vld [vmem:[%s1232_s26 + $0x2] sm:$0x1]  ;;  %v1089_v5 = vld [vmem:[%s1337_s7 + $0x10] ss:$8 sps:$4 sm:$0xff]   ;;  %v1014_v6 = vld [vmem:[%s1334_s4 + $0x8] ss:$0 sm:$0xff] }
  0x17   : > { %759 = vmatprep.subr.bf16.mxu0 %v1078_v9  ;;  %v565_v50 = vrot.slane %v512_v29, %v564_v32  ;;  %v598_v51 = vsub.s32 7, %v1211_v7  ;;  %v556_v55 = vmul.f32 %v555_v37, %v550_v30  ;;  %v557_v56 = vmul.f32 %v555_v37, %v551_v31  ;;  %v1092_v24 = vld [vmem:[%s1337_s7] ss:$8 sps:$4 sm:$0xff]  }
  0x18   : > { %v532_v53 = vadd.f32 %v530_v45, %v520_v43  ;;  %v533_v54 = vadd.f32 %v531_v46, %v521_v44  ;;  %v1010_v59 = vrot.slane %v538_v48, 9  ;;  %v1011_v60 = vrot.slane %v539_v49, 9  ;;  %v1017_v36 = vld [vmem:[%s1335_s5] ss:$0 sm:$0xff] }
  0x19   : > { %v574_v61 = vmul.f32 %v573_v41, %v550_v30  ;;  %v575_v62 = vmul.f32 %v573_v41, %v551_v31  ;;  %v586_v63 = vunpack.c.l.bf16 %v504_v47  ;;  %v590_v0 = vrot.slane %v512_v29, %v589_v42  ;;  %v1018_v19 = vld [vmem:[%s1336_s6] ss:$0 sm:$0xff] }
  0x1a   : > { %760 = vmatpush1.bf16.msra.mxu0 %v1080_v10  ;;  %v548_v1 = vadd.f32 %v1010_v59, %v532_v53  ;;  %v549_v2 = vadd.f32 %v1011_v60, %v533_v54  ;;  %v566_v3 = vmul.f32 %v565_v50, %v560_v39  ;;  %v567_v4 = vmul.f32 %v565_v50, %v561_v40  ;;  %v1090_v10 = vld [vmem:[%s1337_s7 + $0x4] ss:$8 sps:$4 sm:$0xff]  }
  0x1b   : > { %761 = vmatprep.subr.bf16.mxu0 %v1081_v11  ;;  %v595_v8 = vunpack.c.l.bf16 %v507_v58  ;;  %v599_v9 = vrot.slane %v512_v29, %v598_v51  ;;  %v1012_v15 = vrot.slane %v574_v61, 9  ;;  %v1013_v16 = vrot.slane %v575_v62, 9 }
  0x1c   : > { %v558_v11 = vadd.f32 %v556_v55, %v548_v1  ;;  %v559_v12 = vadd.f32 %v557_v56, %v549_v2  ;;  %v591_v17 = vmul.f32 %v590_v0, %v515_v26  ;;  %v592_v18 = vmul.f32 %v590_v0, %v586_v63  ;;  %v794_v55 = vld [vmem:[%s1338_s8] sm:$0x3] }
  0x1d   : > { %v608_v22 = vmul.f32 %v1014_v6, %v515_v26  ;;  %v609_v23 = vmul.f32 %v1014_v6, %v586_v63  ;;  %v600_v29 = vmul.f32 %v599_v9, %v525_v28  ;;  %v601_v30 = vmul.f32 %v599_v9, %v595_v8  ;;  %v808_v56 = vld [vmem:[%s1339_s9] sm:$0x3] }
  0x1e   : > { %762 = vmatpush1.bf16.msra.mxu0 %v1083_v33  ;;  %v568_v20 = vadd.f32 %v566_v3, %v558_v11  ;;  %v569_v21 = vadd.f32 %v567_v4, %v559_v12  ;;  %v1118_v39 = vmov 1983009808   ;;  %v803_v58 = vrot.slane %v794_v55, %v1250_v14 }
  0x1f   : > { %763 = vmatprep.subr.bf16.mxu0 %v1084_v38  ;;  %v1015_v33 = vrot.slane %v608_v22, 9  ;;  %v1016_v34 = vrot.slane %v609_v23, 9  ;;  %v647_v40 = vunpack.c.l.s4 %v1118_v39  ;;  %v817_v61 = vrot.slane %v808_v56, %v1250_v14 }
  0x20   : > { %v584_v25 = vadd.f32 %v1012_v15, %v568_v20  ;;  %v585_v27 = vadd.f32 %v1013_v16, %v569_v21 }
  0x21   : > { %v648_v44 = vunpack.c.0.s8 %v647_v40 }
  0x22   : > { %764 = vmatpush1.bf16.msra.mxu0 %v1086_v52  ;;  %v593_v31 = vadd.f32 %v591_v17, %v584_v25  ;;  %v594_v32 = vadd.f32 %v592_v18, %v585_v27 }
  0x23   : > { %765 = vmatprep.subr.bf16.mxu0 %v1087_v57  ;;  %v651_v49 = vsub.s32 %v648_v44, %v1211_v7  ;;  %v799_v57 = vrot.slane %v794_v55, %v1247_v13  ;;  %v813_v7 = vrot.slane %v808_v56, %v1247_v13 }
  0x24   : > { %v602_v35 = vadd.f32 %v600_v29, %v593_v31  ;;  %v603_v26 = vadd.f32 %v601_v30, %v594_v32 }
  0x26   : > { %766 = vmatpush1.bf16.msra.mxu0 %v1089_v5  ;;  %v618_v37 = vadd.f32 %v1015_v33, %v602_v35  ;;  %v619_v38 = vadd.f32 %v1016_v34, %v603_v26 }
  0x27   : > { %767 = vmatprep.subr.bf16.mxu0 %v1090_v10 }
  0x28   : > { %v627_v28 = vmul.f32 %v1017_v36, %v618_v37  ;;  %v628_v41 = vmul.f32 %v1017_v36, %v619_v38 }
  0x2a   : > { %768 = vmatpush1.bf16.msra.mxu0 %v1092_v24  ;;  %v636_v42 = vadd.f32 %v1018_v19, %v627_v28  ;;  %v637_v43 = vadd.f32 %v1018_v19, %v628_v41 }
  0x2c   : > { %v638_v45 = vmax.f32 %v636_v42, 0.0  ;;  %v639_v46 = vmax.f32 %v637_v43, 0.0 }
  0x2e   : > { %v640_v47 = vmin.f32 %v638_v45, 6.0  ;;  %v641_v48 = vmin.f32 %v639_v46, 6.0 }
  0x30   : > { %v642_v50 = vpack.c.bf16 %v640_v47, %v640_v47  ;;  %v643_v51 = vpack.c.bf16 %v641_v48, %v641_v48 }
  0x32   : > { %644 = vst [vmem:[#allocation2] sm:$0x1] %v642_v50  ;;  %v652_v52 = vrot.slane %v643_v51, %v651_v49 }
  0x34   : > { %v653_v53 = vrot.slane %v652_v52, 7 }
  0x36   : > { %655 = vst [vmem:[#allocation2] sm:$0x2] %v653_v53 }
  0x3d   : > { %v656_v54 = vld [vmem:[#allocation2] sm:$0x3] }
  0x3e   : > { %786 = vmatmul.mubr.bf16.vlgmr.msra.gmra.mxu0 %v656_v54 }
  0xfe   : > { %v787_v59 = vpop.f32.mrf.mxu0 }
  0xff   : > { %v806_v60 = vmul.f32 %v799_v57, %v787_v59 }
 0x100   : > { %v789_v62 = vpop.f32.mrf.mxu0 }
 0x101   : > { %v820_v63 = vadd.f32 %v813_v7, %v806_v60  ;;  %v807_v0 = vmul.f32 %v803_v58, %v789_v62 }
 0x102   : > { %v791_v1 = vpop.f32.mrf.mxu0 }
 0x103   : > { %v822_v2 = vmax.f32 %v820_v63, 0.0  ;;  %v821_v3 = vadd.f32 %v817_v61, %v807_v0 }
 0x104   : > { %v792_v4 = vpop.f32.mrf.mxu0 }
 0x105   : > { %v823_v5 = vmax.f32 %v821_v3, 0.0  ;;  %v824_v6 = vmin.f32 %v822_v2, 6.0 }
 0x107   : > { %v825_v8 = vmin.f32 %v823_v5, 6.0 }
 0x109   : > { %v1035_v13 = vpack.c.bf16 %v825_v8, %v824_v6 }
 0x10b   : > { %1036 = vst.sshfl [vmem:[%s495_s22] sm:$0x33 pattern:$0x76325410] %v1035_v13 }
 0x10c PF: > { %s20_s15 = sadd.s32 1, %s1115_s15   ;;  %s1341_s13 = smov %s1111_s14 }
 0x10d   : > { %p17_p5 = scmp.ge.s32.totalorder %s20_s15, 4   ;;  %s1342_s14 = smov %s1344_s16 }
 0x10f   :  { %19 = sbr.rel (!%p17_p5) target bundleno = 2 (0x2), region = 112 }

// kernel: mobilenetv1_forward.20
= control target key start
LH: loop header
LB: loop body
LE: loop exit
PB: predicated region body
PF: predicated region fallthrough
CT: control target
= control target key end

     0   :  { %s1269_s24 = smov 0   ;;  %s1271_s25 = smov 0   ;;  %s1490_s0 = inlined_call_operand.vmem [shape: bf16[2,4,4,256], index: 0, kind: input, shape index: {}]   ;;  %s1491_s1 = inlined_call_operand.vmem [shape: f32[9,256], index: 1, kind: input, shape index: {}]   ;;  %s1492_s2 = inlined_call_operand.vmem [shape: f32[1,256], index: 2, kind: input, shape index: {}]   ;;  %s1493_s3 = inlined_call_operand.vmem [shape: f32[1,256], index: 3, kind: input, shape index: {}]   ;;  %s1494_s4 = inlined_call_operand.vmem [shape: bf16[256,256], index: 4, kind: input, shape index: {}]   ;;  %s1495_s5 = inlined_call_operand.vmem [shape: f32[1,256], index: 5, kind: input, shape index: {}]   ;;  %s1496_s6 = inlined_call_operand.vmem [shape: f32[1,256], index: 6, kind: input, shape index: {}]   ;;  %s1497_s7 = inlined_call_operand.vmem [shape: bf16[2,4,256], index: 7, kind: output, shape index: {}]  }
   0x1   :  { %s1273_s26 = smov 0  }
   0x2 LB: > { %s29_s27 = sadd.s32 1, %s1222_s25  ;;  %p1061_p0 = scmp.ge.s32.totalorder %s1226_s26, 1  ;;  %s1226_s26 = sphi %s1273_s26, %s17_s26   ;;  %s1222_s25 = sphi %s1271_s25, %s1499_s25   ;;  %s1218_s24 = sphi %s1269_s24, %s1498_s24  }
   0x3   : > { %p31_p1 = scmp.ge.s32.totalorder %s29_s27, 2  ;;  %p282_p2 = scmp.lt.s32.totalorder %s1226_s26, 3 }
   0x5   : > { %s1501_s27 = smov (%p31_p1, %s29_s27), 0  ;;  %p283_p3 = pnand %p1061_p0, %p282_p2 }
   0x6   : > { %p331_p4 = scmp.lt.s32.totalorder (!%p283_p3), %s1218_s24, 1 }
   0x7   : > { %286 = sbr.rel (%p283_p3) target bundleno = 284 (0x11c), region = 48 }
   0xc   : > { %v1156_v0 = vld [vmem:[%s1494_s4 + $0x74] ss:$8 sps:$4 sm:$0xff]   ;;  %v1158_v1 = vld [vmem:[%s1494_s4 + $0x70] ss:$8 sps:$4 sm:$0xff]   ;;  %v1159_v2 = vld [vmem:[%s1494_s4 + $0x64] ss:$8 sps:$4 sm:$0xff]   ;;  %v376_v8 = vlaneseq }
   0xd   : > { %847 = vmatprep.subr.bf16.mxu0 %v1156_v0  ;;  %v1161_v3 = vld [vmem:[%s1494_s4 + $0x60] ss:$8 sps:$4 sm:$0xff]   ;;  %v1162_v4 = vld [vmem:[%s1494_s4 + $0x54] ss:$8 sps:$4 sm:$0xff]   ;;  %v1164_v5 = vld [vmem:[%s1494_s4 + $0x50] ss:$8 sps:$4 sm:$0xff]  }
   0xe   : > { %848 = vmatpush1.bf16.msra.mxu0 %v1158_v1  ;;  %v1165_v6 = vld [vmem:[%s1494_s4 + $0x44] ss:$8 sps:$4 sm:$0xff]   ;;  %v1167_v7 = vld [vmem:[%s1494_s4 + $0x40] ss:$8 sps:$4 sm:$0xff]   ;;  %s1503_s24 = smov (!%p331_p4, %s1218_s24), 1  ;;  %v1320_v11 = vshrl.u32 %v376_v8, 7 }
   0xf   : > { %849 = vmatprep.subr.bf16.mxu0 %v1159_v2  ;;  %v1168_v9 = vld [vmem:[%s1494_s4 + $0x34] ss:$8 sps:$4 sm:$0xff]   ;;  %v1170_v10 = vld [vmem:[%s1494_s4 + $0x30] ss:$8 sps:$4 sm:$0xff]   ;;  %s1120_s29 = sshll.u32 %s1503_s24, 4  ;;  %v1347_v24 = vld [vmem:[%s1491_s1] sm:$0xff] }
  0x10   : > { %v1171_v12 = vld [vmem:[%s1494_s4 + $0x24] ss:$8 sps:$4 sm:$0xff]   ;;  %s335_s11 = scalar_lea.vmem %s1490_s0, %s1120_s29  ;;  %v1173_v13 = vld [vmem:[%s1494_s4 + $0x20] ss:$8 sps:$4 sm:$0xff]   ;;  %v1332_v14 = vsub.s32 0, %v1320_v11  ;;  %v1335_v15 = vsub.s32 1, %v1320_v11 }
  0x11   : > { %v1174_v16 = vld [vmem:[%s1494_s4 + $0x14] ss:$8 sps:$4 sm:$0xff]   ;;  %v419_v17 = vsub.s32 2, %v1320_v11  ;;  %v445_v18 = vsub.s32 3, %v1320_v11  ;;  %v1123_v19 = vld [vmem:[%s335_s11] sm:$0xff]   ;;  %v461_v20 = vsub.s32 4, %v1320_v11 }
  0x12   : > { %850 = vmatpush1.bf16.msra.mxu0 %v1161_v3  ;;  %v486_v21 = vsub.s32 5, %v1320_v11  ;;  %v1124_v22 = vunpack.c.l.bf16 %v1123_v19  ;;  %v1125_v23 = vunpack.c.h.bf16 %v1123_v19  ;;  %v1352_v25 = vld [vmem:[%s1491_s1 + $0x8] sm:$0xff]  ;;  %v512_v26 = vsub.s32 6, %v1320_v11  ;;  %v1176_v28 = vld [vmem:[%s1494_s4 + $0x10] ss:$8 sps:$4 sm:$0xff]   ;;  %s1121_s13 = sshll.u32 %s1503_s24, 2 }
  0x13   : > { %851 = vmatprep.subr.bf16.mxu0 %v1162_v4  ;;  %v528_v27 = vsub.s32 7, %v1320_v11  ;;  %v1130_v29 = vld [vmem:[%s335_s11 + $0x8] sm:$0xff]   ;;  %v379_v30 = vrot.slane %v1347_v24, %v1332_v14  ;;  %v383_v31 = vrot.slane %v1352_v25, %v1332_v14  ;;  %v395_v32 = vrot.slane %v1347_v24, %v1335_v15  ;;  %v1180_v52 = vld [vmem:[%s1494_s4 + $0xf4] ss:$8 sps:$4 sm:$0xff]   ;;  %v1182_v1 = vld [vmem:[%s1494_s4 + $0xf0] ss:$8 sps:$4 sm:$0xff]   ;;  %s360_s16 = scalar_lea.vmem %s1497_s7, %s1121_s13 }
  0x14   : > { %v399_v33 = vrot.slane %v1352_v25, %v1335_v15  ;;  %v1177_v34 = vld [vmem:[%s1494_s4 + $0x4] ss:$8 sps:$4 sm:$0xff]   ;;  %v420_v35 = vrot.slane %v1347_v24, %v419_v17  ;;  %v424_v36 = vrot.slane %v1352_v25, %v419_v17  ;;  %v446_v37 = vrot.slane %v1347_v24, %v445_v18  ;;  %v1179_v47 = vld [vmem:[%s1494_s4] ss:$8 sps:$4 sm:$0xff]   ;;  %v1077_v8 = vld [vmem:[%s1491_s1 + $0x18] ss:$0 sm:$0xff] }
  0x15   : > { %v450_v38 = vrot.slane %v1352_v25, %v445_v18  ;;  %v386_v39 = vcombine.low %v379_v30, %v383_v31  ;;  %v462_v41 = vrot.slane %v1347_v24, %v461_v20  ;;  %v466_v42 = vrot.slane %v1352_v25, %v461_v20  ;;  %v1183_v2 = vld [vmem:[%s1494_s4 + $0xe4] ss:$8 sps:$4 sm:$0xff]  }
  0x16   : > { %852 = vmatpush1.bf16.msra.mxu0 %v1164_v5  ;;  %v402_v40 = vcombine.low %v395_v32, %v399_v33  ;;  %v1376_v43 = vunpack.c.l.bf16 %v1130_v29  ;;  %v427_v44 = vcombine.low %v420_v35, %v424_v36  ;;  %v487_v45 = vrot.slane %v1347_v24, %v486_v21  ;;  %v1186_v32 = vld [vmem:[%s1494_s4 + $0xd4] ss:$8 sps:$4 sm:$0xff]  }
  0x17   : > { %853 = vmatprep.subr.bf16.mxu0 %v1165_v6  ;;  %v491_v46 = vrot.slane %v1352_v25, %v486_v21  ;;  %v1383_v48 = vunpack.c.h.bf16 %v1130_v29  ;;  %v453_v50 = vcombine.low %v446_v37, %v450_v38  ;;  %v469_v51 = vcombine.low %v462_v41, %v466_v42  ;;  %v576_v38 = vld [vmem:[%s1492_s2] sm:$0x3] }
  0x18   : > { %v403_v49 = vrot.slane %v402_v40, 7  ;;  %v388_v53 = vmul.f32 %v1124_v22, %v386_v39  ;;  %v389_v54 = vmul.f32 %v1125_v23, %v386_v39  ;;  %v428_v55 = vrot.slane %v427_v44, 6 }
  0x19   : > { %v494_v56 = vcombine.low %v487_v45, %v491_v46  ;;  %v470_v59 = vrot.slane %v469_v51, 7  ;;  %v513_v60 = vrot.slane %v1347_v24, %v512_v26  ;;  %v517_v0 = vrot.slane %v1352_v25, %v512_v26  ;;  %v590_v45 = vld [vmem:[%s1493_s3] sm:$0x3]  ;;  %v1189_v46 = vld [vmem:[%s1494_s4 + $0xc4] ss:$8 sps:$4 sm:$0xff]  }
  0x1a   : > { %854 = vmatpush1.bf16.msra.mxu0 %v1167_v7  ;;  %v405_v57 = vmul.f32 %v1124_v22, %v403_v49  ;;  %v406_v58 = vmul.f32 %v1125_v23, %v403_v49  ;;  %v430_v61 = vmul.f32 %v1124_v22, %v428_v55  ;;  %v431_v62 = vmul.f32 %v1125_v23, %v428_v55  ;;  %v1076_v7 = vld [vmem:[%s1491_s1 + $0x10] ss:$0 sm:$0xff] }
  0x1b   : > { %855 = vmatprep.subr.bf16.mxu0 %v1168_v9  ;;  %v495_v63 = vrot.slane %v494_v56, 6  ;;  %v472_v5 = vmul.f32 %v1125_v23, %v470_v59  ;;  %v473_v6 = vmul.f32 %v1376_v43, %v470_v59  ;;  %v455_v18 = vmul.f32 %v1125_v23, %v453_v50  ;;  %v1191_v59 = vld [vmem:[%s1494_s4 + $0xc0] ss:$8 sps:$4 sm:$0xff]  }
  0x1c   : > { %v1066_v3 = vrot.slane %v405_v57, 9  ;;  %v1067_v4 = vrot.slane %v406_v58, 9  ;;  %v1068_v9 = vrot.slane %v430_v61, 10  ;;  %v456_v19 = vmul.f32 %v1376_v43, %v453_v50 }
  0x1d   : > { %v1070_v20 = vrot.slane %v472_v5, 9  ;;  %v1071_v21 = vrot.slane %v473_v6, 9  ;;  %v520_v22 = vcombine.low %v513_v60, %v517_v0  ;;  %v529_v26 = vrot.slane %v1347_v24, %v528_v27  ;;  %v1195_v6 = vld [vmem:[%s1494_s4 + $0xa4] ss:$8 sps:$4 sm:$0xff]  }
  0x1e   : > { %856 = vmatpush1.bf16.msra.mxu0 %v1170_v10  ;;  %v1069_v10 = vrot.slane %v431_v62, 10  ;;  %v416_v17 = vadd.f32 %v1067_v4, %v389_v54  ;;  %v561_v31 = vcombine.low %v1076_v7, %v1077_v8  ;;  %v581_v49 = vrot.slane %v576_v38, %v1332_v14 }
  0x1f   : > { %857 = vmatprep.subr.bf16.mxu0 %v1171_v12  ;;  %v497_v12 = vmul.f32 %v1125_v23, %v495_v63  ;;  %v533_v23 = vrot.slane %v1352_v25, %v528_v27  ;;  %v522_v39 = vmul.f32 %v1376_v43, %v520_v22  ;;  %v523_v25 = vmul.f32 %v1383_v48, %v520_v22  ;;  %v1188_v27 = vld [vmem:[%s1494_s4 + $0xd0] ss:$8 sps:$4 sm:$0xff]  }
  0x20   : > { %v441_v30 = vadd.f32 %v1069_v10, %v416_v17  ;;  %v562_v37 = vrot.slane %v561_v31, 6  ;;  %v585_v50 = vrot.slane %v576_v38, %v1335_v15  ;;  %v595_v57 = vrot.slane %v590_v45, %v1332_v14  ;;  %v1198_v17 = vld [vmem:[%s1494_s4 + $0x94] ss:$8 sps:$4 sm:$0xff]   ;;  %v1203_v31 = vld [vmem:[%s1494_s4 + $0x80] ss:$8 sps:$4 sm:$0xff]  }
  0x21   : > { %v1072_v33 = vrot.slane %v497_v12, 10  ;;  %v536_v36 = vcombine.low %v529_v26, %v533_v23  ;;  %v599_v58 = vrot.slane %v590_v45, %v1335_v15  ;;  %v1197_v12 = vld [vmem:[%s1494_s4 + $0xa0] ss:$8 sps:$4 sm:$0xff]  }
  0x22   : > { %858 = vmatpush1.bf16.msra.mxu0 %v1173_v13  ;;  %v498_v13 = vmul.f32 %v1376_v43, %v495_v63  ;;  %v458_v35 = vadd.f32 %v456_v19, %v441_v30  ;;  %v564_v44 = vmul.f32 %v1376_v43, %v562_v37 }
  0x23   : > { %859 = vmatprep.subr.bf16.mxu0 %v1174_v16  ;;  %v415_v16 = vadd.f32 %v1066_v3, %v388_v53  ;;  %v537_v42 = vrot.slane %v536_v36, 7  ;;  %v600_v5 = vcombine.low %v595_v57, %v599_v58 }
  0x24   : > { %v483_v41 = vadd.f32 %v1071_v21, %v458_v35  ;;  %v1078_v55 = vrot.slane %v564_v44, 10  ;;  %v1200_v21 = vld [vmem:[%s1494_s4 + $0x90] ss:$8 sps:$4 sm:$0xff]  }
  0x25   : > { %v440_v29 = vadd.f32 %v1068_v9, %v415_v16  ;;  %v539_v53 = vmul.f32 %v1376_v43, %v537_v42  ;;  %v540_v54 = vmul.f32 %v1383_v48, %v537_v42  ;;  %v1192_v43 = vld [vmem:[%s1494_s4 + $0xb4] ss:$8 sps:$4 sm:$0xff]   ;;  %v1228_v9 = vmov 1983009808  }
  0x26   : > { %860 = vmatpush1.bf16.msra.mxu0 %v1176_v28  ;;  %v1185_v28 = vld [vmem:[%s1494_s4 + $0xe0] ss:$8 sps:$4 sm:$0xff]   ;;  %v634_v10 = vunpack.c.l.s4 %v1228_v9 }
  0x27   : > { %861 = vmatprep.subr.bf16.mxu0 %v1177_v34  ;;  %v1073_v34 = vrot.slane %v498_v13, 10  ;;  %v457_v24 = vadd.f32 %v455_v18, %v440_v29  ;;  %v1074_v62 = vrot.slane %v539_v53, 9  ;;  %v1075_v63 = vrot.slane %v540_v54, 9 }
  0x29   : > { %v482_v40 = vadd.f32 %v1070_v20, %v457_v24  ;;  %v635_v20 = vunpack.c.0.s8 %v634_v10 }
  0x2a   : > { %862 = vmatpush1.bf16.msra.mxu0 %v1179_v47  ;;  %v565_v47 = vmul.f32 %v1383_v48, %v562_v37  ;;  %v902_v37 = vld [vmem:[%s1496_s6] sm:$0x3] }
  0x2b   : > { %863 = vmatprep.subr.bf16.mxu0 %v1180_v52  ;;  %v507_v51 = vadd.f32 %v1072_v33, %v482_v40  ;;  %v508_v52 = vadd.f32 %v1073_v34, %v483_v41  ;;  %v638_v23 = vsub.s32 %v635_v20, %v1320_v11  ;;  %v888_v11 = vld [vmem:[%s1495_s5] sm:$0x3]  ;;  %v911_v41 = vrot.slane %v902_v37, %v1335_v15 }
  0x2c   : > { %v1079_v56 = vrot.slane %v565_v47, 10  ;;  %v893_v38 = vrot.slane %v888_v11, %v1332_v14 }
  0x2d   : > { %v524_v60 = vadd.f32 %v522_v39, %v507_v51  ;;  %v525_v61 = vadd.f32 %v523_v25, %v508_v52  ;;  %v907_v39 = vrot.slane %v902_v37, %v1332_v14  ;;  %v897_v25 = vrot.slane %v888_v11, %v1335_v15 }
  0x2e   : > { %864 = vmatpush2.bf16.msra.mxu0 %v1182_v1  ;;  %v586_v1 = vcombine.low %v581_v49, %v585_v50 }
  0x2f   : > { %865 = vmatprep.subr.bf16.mxu0 %v1183_v2  ;;  %v549_v48 = vadd.f32 %v1074_v62, %v524_v60  ;;  %v550_v0 = vadd.f32 %v1075_v63, %v525_v61  ;;  %v1194_v2 = vld [vmem:[%s1494_s4 + $0xb0] ss:$8 sps:$4 sm:$0xff]  }
  0x31   : > { %v574_v3 = vadd.f32 %v1078_v55, %v549_v48  ;;  %v575_v4 = vadd.f32 %v1079_v56, %v550_v0 }
  0x32   : > { %866 = vmatpush2.bf16.msra.mxu0 %v1185_v28  ;;  %v1201_v28 = vld [vmem:[%s1494_s4 + $0x84] ss:$8 sps:$4 sm:$0xff]  }
  0x33   : > { %867 = vmatprep.subr.bf16.mxu0 %v1186_v32  ;;  %v588_v7 = vmul.f32 %v586_v1, %v574_v3  ;;  %v589_v8 = vmul.f32 %v586_v1, %v575_v4 }
  0x35   : > { %v602_v13 = vadd.f32 %v600_v5, %v588_v7  ;;  %v603_v16 = vadd.f32 %v600_v5, %v589_v8 }
  0x36   : > { %868 = vmatpush2.bf16.msra.mxu0 %v1188_v27 }
  0x37   : > { %869 = vmatprep.subr.bf16.mxu0 %v1189_v46  ;;  %v604_v18 = vmax.f32 %v602_v13, 0.0  ;;  %v605_v19 = vmax.f32 %v603_v16, 0.0 }
  0x39   : > { %v606_v22 = vmin.f32 %v604_v18, 6.0  ;;  %v607_v26 = vmin.f32 %v605_v19, 6.0 }
  0x3a   : > { %870 = vmatpush2.bf16.msra.mxu0 %v1191_v59 }
  0x3b   : > { %871 = vmatprep.subr.bf16.mxu0 %v1192_v43  ;;  %v610_v29 = vcombine.high %v606_v22, %v606_v22  ;;  %v611_v30 = vcombine.high %v607_v26, %v607_v26 }
  0x3d   : > { %v1080_v32 = vpack.c.bf16 %v610_v29, %v606_v22  ;;  %v1082_v33 = vpack.c.bf16 %v611_v30, %v607_v26 }
  0x3e   : > { %872 = vmatpush2.bf16.msra.mxu0 %v1194_v2 }
  0x3f   : > { %873 = vmatprep.subr.bf16.mxu0 %v1195_v6  ;;  %1081 = vst.sshfl [vmem:[#allocation2] sm:$0x11 pattern:$0x76325410] %v1080_v32  ;;  %v639_v34 = vrot.slane %v1082_v33, %v638_v23 }
  0x41   : > { %v640_v24 = vrot.slane %v639_v34, 7 }
  0x42   : > { %874 = vmatpush2.bf16.msra.mxu0 %v1197_v12 }
  0x43   : > { %875 = vmatprep.subr.bf16.mxu0 %v1198_v17  ;;  %642 = vst [vmem:[#allocation2] sm:$0xa] %v640_v24 }
  0x46   : > { %876 = vmatpush2.bf16.msra.mxu0 %v1200_v21 }
  0x47   : > { %877 = vmatprep.subr.bf16.mxu0 %v1201_v28 }
  0x4a   : > { %878 = vmatpush2.bf16.msra.mxu0 %v1203_v31  ;;  %v1083_v35 = vld.sshfl [vmem:[#allocation2] sm:$0x33 pattern:$0x76325410] }
  0x4b   : > { %v684_v36 = vcombine.high %v1083_v35, %v1083_v35 }
  0x4d   : > { %879 = vmatprep.mubr.bf16.mxu0 %v684_v36 }
  0x4e   : > { %880 = vmatmul.mubr.bf16.vlgmr.msra.gmra.mxu0 %v1083_v35 }
 0x10e   : > { %v881_v27 = vpop.f32.mrf.mxu0 }
 0x10f   : > { %v900_v40 = vmul.f32 %v893_v38, %v881_v27 }
 0x110   : > { %v883_v42 = vpop.f32.mrf.mxu0 }
 0x111   : > { %v914_v44 = vadd.f32 %v907_v39, %v900_v40  ;;  %v901_v45 = vmul.f32 %v897_v25, %v883_v42 }
 0x112   : > { %v885_v46 = vpop.f32.mrf.mxu0 }
 0x113   : > { %v916_v47 = vmax.f32 %v914_v44, 0.0  ;;  %v915_v49 = vadd.f32 %v911_v41, %v901_v45 }
 0x114   : > { %v886_v50 = vpop.f32.mrf.mxu0 }
 0x115   : > { %v917_v51 = vmax.f32 %v915_v49, 0.0  ;;  %v918_v52 = vmin.f32 %v916_v47, 6.0 }
 0x117   : > { %v919_v53 = vmin.f32 %v917_v51, 6.0 }
 0x119   : > { %v1116_v14 = vpack.c.bf16 %v919_v53, %v918_v52 }
 0x11b   : > { %1117 = vst.sshfl [vmem:[%s360_s16] sm:$0x33 pattern:$0x76325410] %v1116_v14 }
 0x11c PF: > { %s17_s26 = sadd.s32 1, %s1226_s26   ;;  %s1498_s24 = smov %s1222_s25 }
 0x11d   : > { %p14_p5 = scmp.ge.s32.totalorder %s17_s26, 4   ;;  %s1499_s25 = smov %s1501_s27 }
 0x11f   :  { %16 = sbr.rel (!%p14_p5) target bundleno = 2 (0x2), region = 91 }

// kernel: mobilenetv1_forward.21
= control target key start
LH: loop header
LB: loop body
LE: loop exit
PB: predicated region body
PF: predicated region fallthrough
CT: control target
= control target key end

     0   :  { %s1830_s0 = inlined_call_operand.vmem [shape: bf16[2,2,2,256], index: 0, kind: input, shape index: {}]   ;;  %s1831_s1 = inlined_call_operand.vmem [shape: bf16[2,2,1,256], index: 1, kind: input, shape index: {}]   ;;  %s1832_s2 = inlined_call_operand.vmem [shape: bf16[2,1,2,256], index: 2, kind: input, shape index: {}]   ;;  %s1833_s3 = inlined_call_operand.vmem [shape: bf16[2,1,1,256], index: 3, kind: input, shape index: {}]   ;;  %s1834_s4 = inlined_call_operand.vmem [shape: f32[9,256], index: 4, kind: input, shape index: {}]   ;;  %s1835_s5 = inlined_call_operand.vmem [shape: f32[1,256], index: 5, kind: input, shape index: {}]   ;;  %s1836_s6 = inlined_call_operand.vmem [shape: f32[1,256], index: 6, kind: input, shape index: {}]   ;;  %s1837_s7 = inlined_call_operand.vmem [shape: bf16[256,512], index: 7, kind: input, shape index: {}]   ;;  %s1838_s8 = inlined_call_operand.vmem [shape: f32[1,512], index: 8, kind: input, shape index: {}]   ;;  %s1839_s9 = inlined_call_operand.vmem [shape: f32[1,512], index: 9, kind: input, shape index: {}]   ;;  %s1840_s10 = inlined_call_operand.vmem [shape: bf16[2,1,512], index: 10, kind: output, shape index: {}]  }
   0x1   :  { %1846 = sst [smem:[#allocation11_spill]] %s1830_s0 }
   0x2   :  { %1847 = sst [smem:[#allocation12_spill]] %s1831_s1 }
   0x3   :  { %1848 = sst [smem:[#allocation13_spill]] %s1837_s7 }
   0x4   :  { %s1567_s13 = smov 0   ;;  %s1569_s14 = smov 0  }
   0x5   :  { %s1571_s15 = smov 0   ;;  %s1573_s16 = smov 0  }
   0x6   :  { %s1575_s17 = smov 0   ;;  %s1577_s18 = smov 0  }
   0x7   :  { %s1579_s19 = smov 0  }
   0x8 LB: > { %1849 = sst [smem:[#allocation4_spill]] %s1486_s14  ;;  %s29_s20 = sadd.s32 1, %s1498_s17  ;;  %s1506_s19 = sphi %s1579_s19, %s20_s19   ;;  %s1502_s18 = sphi %s1577_s18, %s1865_s18   ;;  %s1498_s17 = sphi %s1575_s17, %s1864_s17   ;;  %s1494_s16 = sphi %s1573_s16, %s1863_s16   ;;  %s1490_s15 = sphi %s1571_s15, %s1862_s15   ;;  %s1486_s14 = sphi %s1569_s14, %s1861_s14   ;;  %s1482_s13 = sphi %s1567_s13, %s1860_s13  }
   0x9   : > { %1850 = sst [smem:[#allocation5_spill]] %s1498_s17  ;;  %s32_s21 = sadd.s32 1, %s1502_s18 }
   0xa   : > { %1851 = sst [smem:[#allocation6_spill]] %s1502_s18  ;;  %p30_p0 = scmp.ge.s32.totalorder %s29_s20, 2 }
   0xb   : > { %1852 = sst [smem:[#allocation7_spill]] %s1506_s19  ;;  %s206_s22 = sadd.s32 1, %s1486_s14 }
   0xc   : > { %p213_p1 = scmp.ne.s32.totalorder %s1486_s14, %s1482_s13  ;;  %p214_p2 = scmp.eq.s32.totalorder %s1506_s19, 0 }
   0xd   : > { %s1867_s20 = smov (%p30_p0, %s29_s20), 0  ;;  %s1869_s21 = smov (!%p30_p0, %s32_s21), %s1502_s18 }
   0xe   : > { %1853 = sst [smem:[#allocation8_spill]] %s1867_s20  ;;  %s203_s23 = ssub.s32 %s1498_s17, %s1867_s20 }
   0xf   : > { %p215_p3 = por %p214_p2, %p213_p1  ;;  %p34_p4 = scmp.ge.s32.totalorder %s1869_s21, 2 }
  0x10   : > { %p204_p5 = scmp.eq.s32.totalorder %s203_s23, 0  ;;  %p1282_p6 = scmp.ge.s32.totalorder %s1506_s19, 4 }
  0x11   : > { %s1871_s21 = smov (%p34_p4, %s1869_s21), 0 }
  0x12   : > { %1854 = sst [smem:[#allocation9_spill]] %s1871_s21  ;;  %328 = sbr.rel (%p1282_p6) target bundleno = 49 (0x31), region = 28 }
  0x13   : > { %s1616_s24 = scalar_select %p204_p5, %s1486_s14, %s206_s22  }
  0x15   : > { %1855 = sst [smem:[#allocation10_spill]] %s1616_s24 }
  0x17   : > { %359 = sbr.rel (!%p215_p3) target bundleno = 49 (0x31), region = 48  ;;  %s361_s25 = sand.u32 (%p215_p3), 1, %s1486_s14  }
  0x18   : > { %s1339_s26 = sshll.u32 (%p215_p3), %s1498_s17, 3  ;;  %s1283_s27 = sshll.u32 (%p215_p3), %s361_s25, 8 }
  0x19   : > { %s1856_s7 = sld [smem:[#allocation13_spill]] (%p215_p3)  ;;  %s1629_s11 = scalar_lea.vmem (%p215_p3), [#allocation3], %s1283_s27 }
  0x1f   : > { %s1624_s30 = scalar_lea.vmem %s1856_s7, %s1339_s26 }
  0x20   : > { %v457_v0 = vld [vmem:[%s1624_s30] sm:$0xff]  ;;  %v459_v1 = vld [vmem:[%s1624_s30 + $0x10] sm:$0xff] }
  0x21   : > { %v461_v2 = vld [vmem:[%s1624_s30 + $0x20] sm:$0xff]  ;;  %458 = vst [vmem:[%s1629_s11] sm:$0xff] %v457_v0  ;;  %460 = vst [vmem:[%s1629_s11 + $0x8] sm:$0xff] %v459_v1  ;;  %v463_v3 = vld [vmem:[%s1624_s30 + $0x30] sm:$0xff] }
  0x22   : > { %462 = vst [vmem:[%s1629_s11 + $0x10] sm:$0xff] %v461_v2  ;;  %v465_v4 = vld [vmem:[%s1624_s30 + $0x40] sm:$0xff]  ;;  %v467_v5 = vld [vmem:[%s1624_s30 + $0x50] sm:$0xff]  ;;  %464 = vst [vmem:[%s1629_s11 + $0x18] sm:$0xff] %v463_v3 }
  0x23   : > { %466 = vst [vmem:[%s1629_s11 + $0x20] sm:$0xff] %v465_v4  ;;  %468 = vst [vmem:[%s1629_s11 + $0x28] sm:$0xff] %v467_v5  ;;  %v469_v6 = vld [vmem:[%s1624_s30 + $0x60] sm:$0xff]  ;;  %v471_v7 = vld [vmem:[%s1624_s30 + $0x70] sm:$0xff] }
  0x24   : > { %v473_v8 = vld [vmem:[%s1624_s30 + $0x80] sm:$0xff]  ;;  %470 = vst [vmem:[%s1629_s11 + $0x30] sm:$0xff] %v469_v6  ;;  %472 = vst [vmem:[%s1629_s11 + $0x38] sm:$0xff] %v471_v7  ;;  %v475_v9 = vld [vmem:[%s1624_s30 + $0x90] sm:$0xff] }
  0x25   : > { %474 = vst [vmem:[%s1629_s11 + $0x40] sm:$0xff] %v473_v8  ;;  %v477_v10 = vld [vmem:[%s1624_s30 + $0xa0] sm:$0xff]  ;;  %v479_v11 = vld [vmem:[%s1624_s30 + $0xb0] sm:$0xff]  ;;  %476 = vst [vmem:[%s1629_s11 + $0x48] sm:$0xff] %v475_v9 }
  0x26   : > { %478 = vst [vmem:[%s1629_s11 + $0x50] sm:$0xff] %v477_v10  ;;  %480 = vst [vmem:[%s1629_s11 + $0x58] sm:$0xff] %v479_v11  ;;  %v481_v12 = vld [vmem:[%s1624_s30 + $0xc0] sm:$0xff]  ;;  %v483_v13 = vld [vmem:[%s1624_s30 + $0xd0] sm:$0xff] }
  0x27   : > { %v485_v14 = vld [vmem:[%s1624_s30 + $0xe0] sm:$0xff]  ;;  %482 = vst [vmem:[%s1629_s11 + $0x60] sm:$0xff] %v481_v12  ;;  %484 = vst [vmem:[%s1629_s11 + $0x68] sm:$0xff] %v483_v13  ;;  %v487_v15 = vld [vmem:[%s1624_s30 + $0xf0] sm:$0xff] }
  0x28   : > { %486 = vst [vmem:[%s1629_s11 + $0x70] sm:$0xff] %v485_v14  ;;  %v489_v16 = vld [vmem:[%s1624_s30 + $0x100] sm:$0xff]  ;;  %v491_v17 = vld [vmem:[%s1624_s30 + $0x110] sm:$0xff]  ;;  %488 = vst [vmem:[%s1629_s11 + $0x78] sm:$0xff] %v487_v15 }
  0x29   : > { %490 = vst [vmem:[%s1629_s11 + $0x80] sm:$0xff] %v489_v16  ;;  %492 = vst [vmem:[%s1629_s11 + $0x88] sm:$0xff] %v491_v17  ;;  %v493_v18 = vld [vmem:[%s1624_s30 + $0x120] sm:$0xff]  ;;  %v495_v19 = vld [vmem:[%s1624_s30 + $0x130] sm:$0xff] }
  0x2a   : > { %v497_v20 = vld [vmem:[%s1624_s30 + $0x140] sm:$0xff]  ;;  %494 = vst [vmem:[%s1629_s11 + $0x90] sm:$0xff] %v493_v18  ;;  %496 = vst [vmem:[%s1629_s11 + $0x98] sm:$0xff] %v495_v19  ;;  %v499_v21 = vld [vmem:[%s1624_s30 + $0x150] sm:$0xff] }
  0x2b   : > { %498 = vst [vmem:[%s1629_s11 + $0xa0] sm:$0xff] %v497_v20  ;;  %v501_v22 = vld [vmem:[%s1624_s30 + $0x160] sm:$0xff]  ;;  %v503_v23 = vld [vmem:[%s1624_s30 + $0x170] sm:$0xff]  ;;  %500 = vst [vmem:[%s1629_s11 + $0xa8] sm:$0xff] %v499_v21 }
  0x2c   : > { %502 = vst [vmem:[%s1629_s11 + $0xb0] sm:$0xff] %v501_v22  ;;  %504 = vst [vmem:[%s1629_s11 + $0xb8] sm:$0xff] %v503_v23  ;;  %v505_v24 = vld [vmem:[%s1624_s30 + $0x180] sm:$0xff]  ;;  %v507_v25 = vld [vmem:[%s1624_s30 + $0x190] sm:$0xff] }
  0x2d   : > { %v509_v26 = vld [vmem:[%s1624_s30 + $0x1a0] sm:$0xff]  ;;  %506 = vst [vmem:[%s1629_s11 + $0xc0] sm:$0xff] %v505_v24  ;;  %508 = vst [vmem:[%s1629_s11 + $0xc8] sm:$0xff] %v507_v25  ;;  %v511_v27 = vld [vmem:[%s1624_s30 + $0x1b0] sm:$0xff] }
  0x2e   : > { %510 = vst [vmem:[%s1629_s11 + $0xd0] sm:$0xff] %v509_v26  ;;  %v513_v28 = vld [vmem:[%s1624_s30 + $0x1c0] sm:$0xff]  ;;  %v515_v29 = vld [vmem:[%s1624_s30 + $0x1d0] sm:$0xff]  ;;  %512 = vst [vmem:[%s1629_s11 + $0xd8] sm:$0xff] %v511_v27 }
  0x2f   : > { %514 = vst [vmem:[%s1629_s11 + $0xe0] sm:$0xff] %v513_v28  ;;  %516 = vst [vmem:[%s1629_s11 + $0xe8] sm:$0xff] %v515_v29  ;;  %v517_v30 = vld [vmem:[%s1624_s30 + $0x1e0] sm:$0xff]  ;;  %v519_v31 = vld [vmem:[%s1624_s30 + $0x1f0] sm:$0xff] }
  0x30   : > { %518 = vst [vmem:[%s1629_s11 + $0xf0] sm:$0xff] %v517_v30  ;;  %520 = vst [vmem:[%s1629_s11 + $0xf8] sm:$0xff] %v519_v31 }
  0x31 PF: > { %p1286_p7 = scmp.ge.s32.totalorder %s1506_s19, 1  ;;  %p541_p8 = scmp.lt.s32.totalorder %s1506_s19, 5 }
  0x33   : > { %p542_p9 = pnand %p1286_p7, %p541_p8 }
  0x34   : > { %s548_s12 = sand.u32 (!%p542_p9), 1, %s1482_s13   ;;  %p612_p10 = scmp.lt.s32.totalorder (!%p542_p9), %s1494_s16, 1 }
  0x35   : > { %545 = sbr.rel (%p542_p9) target bundleno = 393 (0x189), region = 94  ;;  %s1287_s22 = sshll.u32 (!%p542_p9), %s548_s12, 8 }
  0x36   : > { %s1292_s23 = sshll.u32 (!%p542_p9), %s1490_s15, 1  ;;  %s1857_s0 = sld [smem:[#allocation11_spill]] (!%p542_p9) }
  0x37   : > { %p630_p11 = scmp.lt.s32.totalorder (!%p542_p9), %s1292_s23, 3  ;;  %s1858_s1 = sld [smem:[#allocation12_spill]] (!%p542_p9) }
  0x38   : > { %s1730_s7 = scalar_lea.vmem (!%p542_p9), [#allocation3], %s1287_s22  ;;  %p1296_p12 = scmp.ne.s32.totalorder (!%p542_p9), %s1490_s15, 0 }
  0x3a   : > { %s1873_s16 = smov (!%p612_p10, %s1494_s16), 1  ;;  %s1875_s23 = smov (!%p630_p11, %s1292_s23), 3 }
  0x3b   : > { %s1288_s25 = sshll.u32 %s1873_s16, 2  ;;  %s1290_s26 = sshll.u32 %s1873_s16, 1 }
  0x3c   : > { %s1703_s29 = scalar_lea.vmem %s1857_s0, %s1288_s25  ;;  %s623_s21 = scalar_lea.vmem %s1832_s2, %s1290_s26 }
  0x3d   : > { %s1708_s13 = scalar_lea.vmem %s1858_s1, %s1288_s25  ;;  %s627_s17 = scalar_lea.vmem %s1833_s3, %s1290_s26 }
  0x3e   : > { %s632_s14 = scalar_lea.vmem %s1838_s8, %s1875_s23  ;;  %s637_s0 = scalar_lea.vmem %s1839_s9, %s1875_s23 }
  0x3f   : > { %s645_s19 = sadd.s32 %s1288_s25, %s1875_s23  ;;  %651 = sbr.rel (%p1296_p12) target bundleno = 117 (0x75), region = 102 }
  0x40   : > { %s1728_s1 = scalar_lea.vmem %s1840_s10, %s645_s19 }
  0x44   : > { %v669_v32 = vlaneseq  ;;  %v1508_v33 = vmov 1983009808   ;;  %v652_v36 = vld [vmem:[%s1703_s29] sm:$0x3]  ;;  %v1402_v45 = vld [vmem:[%s1834_s4 + $0x4] ss:$8 sps:$4 sm:$0xff]  }
  0x45   : > { %v667_v34 = vunpack.c.l.s4 %v1508_v33  ;;  %v1400_v37 = vld [vmem:[%s1834_s4] ss:$8 sps:$4 sm:$0xff]   ;;  %v662_v40 = vunpack.c.l.bf16 %v652_v36  ;;  %v1403_v50 = vld [vmem:[%s1834_s4 + $0x10] ss:$8 sps:$4 sm:$0x11]   ;;  %vm798_vm0 = vcmask 1040384  }
  0x46   : > { %v1733_v35 = vshrl.u32 %v669_v32, 7  ;;  %v654_v39 = vld [vmem:[%s1708_s13] sm:$0x3]  ;;  %v653_v60 = vld [vmem:[%s1703_s29 + $0x2] sm:$0x3]  ;;  %vm801_vm2 = vcmask 1041409  }
  0x47   : > { %v668_v38 = vunpack.c.0.s8 %v667_v34  ;;  %v656_v42 = vld [vmem:[%s623_s21] sm:$0x3]  ;;  %v676_v44 = vunpack.c.l.bf16 %v654_v39  ;;  %v1509_v61 = vmov 857870592   ;;  %v655_v63 = vld [vmem:[%s1708_s13 + $0x2] sm:$0x3]  ;;  %v714_v6 = vunpack.c.l.bf16 %v653_v60 }
  0x48   : > { %v657_v46 = vld [vmem:[%s627_s17] sm:$0x3]  ;;  %v691_v51 = vunpack.c.l.bf16 %v656_v42  ;;  %v746_v62 = vunpack.c.l.s4 %v1509_v61  ;;  %v719_v8 = vunpack.c.l.bf16 %v655_v63  ;;  %v1510_v28 = vmov 1966171168  }
  0x49   : > { %v671_v41 = vsub.s32 %v668_v38, %v1733_v35  ;;  %v696_v55 = vunpack.c.l.bf16 %v657_v46  ;;  %v743_v19 = vld [vmem:[%s1835_s5] sm:$0x3]  ;;  %v784_v29 = vunpack.c.l.s4 %v1510_v28  ;;  %v770_v32 = vsub.s32 0, %v1733_v35 }
  0x4a   : > { %v747_v12 = vunpack.c.0.s8 %v746_v62  ;;  %v754_v22 = vld [vmem:[%s1836_s6] sm:$0x3]  ;;  %v774_v33 = vsub.s32 2, %v1733_v35  ;;  %vm799_vm1 = vsmask.f32 256 }
  0x4b   : > { %v672_v43 = vrot.slane %v1400_v37, %v671_v41  ;;  %v704_v54 = vrot.slane %v1402_v45, %v671_v41  ;;  %v734_v59 = vrot.slane %v1403_v50, %v671_v41  ;;  %v785_v34 = vunpack.c.0.s8 %v784_v29  ;;  %vm800_vm4 = vmand %vm798_vm0, %vm799_vm1  ;;  %v805_v42 = vld [vmem:[#allocation2] sm:$0x3] }
  0x4c   : > { %v750_v18 = vsub.s32 %v747_v12, %v1733_v35  ;;  %vm802_vm3 = vsmask.f32 1280 }
  0x4d   : > { %v674_v47 = vmul.f32 %v672_v43, %v662_v40  ;;  %v1297_v48 = vrot.slane %v672_v43, 9  ;;  %v682_v49 = vcombine.high %v672_v43, %v672_v43  ;;  %v708_v2 = vmul.f32 %v704_v54, %v691_v51  ;;  %vm803_vm5 = vmand %vm801_vm2, %vm802_vm3 }
  0x4e   : > { %v715_v3 = vcombine.high %v704_v54, %v704_v54  ;;  %v706_v5 = vmul.f32 %v704_v54, %v696_v55  ;;  %v735_v7 = vrot.slane %v734_v59, 7  ;;  %v751_v24 = vrot.slane %v743_v19, %v750_v18  ;;  %vm804_vm6 = vmor %vm803_vm5, %vm800_vm4 }
  0x4f   : > { %v680_v52 = vmul.f32 %v1297_v48, %v676_v44  ;;  %v683_v53 = vrot.slane %v682_v49, 7  ;;  %v1299_v10 = vrot.slane %v708_v2, 9  ;;  %v762_v26 = vrot.slane %v754_v22, %v750_v18 }
  0x50   : > { %v1300_v11 = vrot.slane %v715_v3, 9  ;;  %v717_v14 = vmul.f32 %v715_v3, %v714_v6  ;;  %v737_v15 = vmul.f32 %v735_v7, %v714_v6  ;;  %v788_v39 = vsub.s32 %v785_v34, %v1733_v35 }
  0x51   : > { %v681_v56 = vadd.f32 %v680_v52, %v674_v47  ;;  %v685_v57 = vmul.f32 %v683_v53, %v662_v40  ;;  %v692_v58 = vrot.slane %v683_v53, 2 }
  0x52   : > { %v723_v17 = vmul.f32 %v1300_v11, %v719_v8  ;;  %v1301_v21 = vrot.slane %v737_v15, 9 }
  0x53   : > { %v1298_v0 = vrot.slane %v685_v57, 9  ;;  %v694_v1 = vmul.f32 %v692_v58, %v691_v51 }
  0x55   : > { %v690_v4 = vadd.f32 %v1298_v0, %v681_v56 }
  0x57   : > { %v695_v9 = vadd.f32 %v694_v1, %v690_v4 }
  0x59   : > { %v707_v13 = vadd.f32 %v706_v5, %v695_v9 }
  0x5b   : > { %v713_v16 = vadd.f32 %v1299_v10, %v707_v13 }
  0x5d   : > { %v718_v20 = vadd.f32 %v717_v14, %v713_v16 }
  0x5f   : > { %v724_v23 = vadd.f32 %v723_v17, %v718_v20 }
  0x61   : > { %v742_v25 = vadd.f32 %v1301_v21, %v724_v23 }
  0x63   : > { %v753_v27 = vmul.f32 %v751_v24, %v742_v25 }
  0x65   : > { %v764_v30 = vadd.f32 %v762_v26, %v753_v27 }
  0x67   : > { %v765_v31 = vmax.f32 %v764_v30, 0.0 }
  0x69   : > { %v766_v36 = vmin.f32 %v765_v31, 6.0 }
  0x6b   : > { %v771_v37 = vrot.slane %v766_v36, %v770_v32  ;;  %v775_v38 = vrot.slane %v766_v36, %v774_v33 }
  0x6d   : > { %v1302_v40 = vpack.c.bf16 %v775_v38, %v771_v37 }
  0x6f   : > { %v789_v41 = vrot.slane %v1302_v40, %v788_v39 }
  0x71   : > { %v796_v43 = vrot.slane %v789_v41, %v788_v39 }
  0x73   : > { %v806_v44 = vsel %vm804_vm6, %v796_v43, %v805_v42 }
  0x74   : > { %807 = vst [vmem:[#allocation2] sm:$0x3] %v806_v44 }
  0x75 PF: > { %v1404_v35 = vld [vmem:[%s1730_s7 + $0x74] ss:$8 sps:$4 sm:$0xff]   ;;  %v1406_v45 = vld [vmem:[%s1730_s7 + $0x70] ss:$8 sps:$4 sm:$0xff]   ;;  %v1407_v46 = vld [vmem:[%s1730_s7 + $0x64] ss:$8 sps:$4 sm:$0xff]   ;;  %v853_v55 = vlaneseq }
  0x76   : > { %1026 = vmatprep.subr.bf16.mxu0 %v1404_v35  ;;  %v1409_v47 = vld [vmem:[%s1730_s7 + $0x60] ss:$8 sps:$4 sm:$0xff]   ;;  %v1410_v48 = vld [vmem:[%s1730_s7 + $0x54] ss:$8 sps:$4 sm:$0xff]   ;;  %v1412_v49 = vld [vmem:[%s1730_s7 + $0x50] ss:$8 sps:$4 sm:$0xff]  }
  0x77   : > { %1027 = vmatpush1.bf16.msra.mxu0 %v1406_v45  ;;  %v1413_v50 = vld [vmem:[%s1730_s7 + $0x44] ss:$8 sps:$4 sm:$0xff]   ;;  %v1415_v51 = vld [vmem:[%s1730_s7 + $0x40] ss:$8 sps:$4 sm:$0xff]   ;;  %v1416_v52 = vld [vmem:[%s1730_s7 + $0x34] ss:$8 sps:$4 sm:$0xff]  }
  0x78   : > { %1028 = vmatprep.subr.bf16.mxu0 %v1407_v46  ;;  %v1511_v53 = vmov 1966171168   ;;  %v1418_v56 = vld [vmem:[%s1730_s7 + $0x30] ss:$8 sps:$4 sm:$0xff]   ;;  %v1419_v57 = vld [vmem:[%s1730_s7 + $0x24] ss:$8 sps:$4 sm:$0xff]  }
  0x79   : > { %v851_v54 = vunpack.c.l.s4 %v1511_v53  ;;  %v854_v59 = vshrl.u32 %v853_v55, 7  ;;  %v1421_v60 = vld [vmem:[%s1730_s7 + $0x20] ss:$8 sps:$4 sm:$0xff]   ;;  %v1422_v61 = vld [vmem:[%s1730_s7 + $0x14] ss:$8 sps:$4 sm:$0xff]   ;;  %vm1119_vm7 = vcmask 1040384  }
  0x7a   : > { %v1424_v1 = vld [vmem:[%s1730_s7 + $0x10] ss:$8 sps:$4 sm:$0xff]   ;;  %v1425_v2 = vld [vmem:[%s1730_s7 + $0x4] ss:$8 sps:$4 sm:$0xff]   ;;  %v1427_v4 = vld [vmem:[%s1730_s7] ss:$8 sps:$4 sm:$0xff]  }
  0x7b   : > { %1029 = vmatpush1.bf16.msra.mxu0 %v1409_v47  ;;  %v852_v58 = vunpack.c.0.s8 %v851_v54  ;;  %v1303_v63 = vld.sshfl [vmem:[#allocation2] sm:$0x11 pattern:$0x75316420]  ;;  %v1430_v6 = vld [vmem:[%s1730_s7 + $0xf0] ss:$8 sps:$4 sm:$0xff]  }
  0x7c   : > { %1030 = vmatprep.subr.bf16.mxu0 %v1410_v48  ;;  %v849_v0 = vcombine.high %v1303_v63, %v1303_v63  ;;  %v1428_v5 = vld [vmem:[%s1730_s7 + $0xf4] ss:$8 sps:$4 sm:$0xff]   ;;  %v1431_v7 = vld [vmem:[%s1730_s7 + $0xe4] ss:$8 sps:$4 sm:$0xff]   ;;  %v1433_v8 = vld [vmem:[%s1730_s7 + $0xe0] ss:$8 sps:$4 sm:$0xff]  }
  0x7d   : > { %v1772_v62 = vsub.s32 %v852_v58, %v854_v59  ;;  %v1434_v9 = vld [vmem:[%s1730_s7 + $0xd4] ss:$8 sps:$4 sm:$0xff]   ;;  %v1436_v10 = vld [vmem:[%s1730_s7 + $0xd0] ss:$8 sps:$4 sm:$0xff]   ;;  %v1437_v11 = vld [vmem:[%s1730_s7 + $0xc4] ss:$8 sps:$4 sm:$0xff]  }
  0x7e   : > { %v1439_v12 = vld [vmem:[%s1730_s7 + $0xc0] ss:$8 sps:$4 sm:$0xff]   ;;  %v1440_v13 = vld [vmem:[%s1730_s7 + $0xb4] ss:$8 sps:$4 sm:$0xff]   ;;  %v1442_v14 = vld [vmem:[%s1730_s7 + $0xb0] ss:$8 sps:$4 sm:$0xff]  }
  0x7f   : > { %1031 = vmatpush1.bf16.msra.mxu0 %v1412_v49  ;;  %v863_v3 = vrot.slane %v849_v0, %v1772_v62  ;;  %v1443_v15 = vld [vmem:[%s1730_s7 + $0xa4] ss:$8 sps:$4 sm:$0xff]   ;;  %v1445_v16 = vld [vmem:[%s1730_s7 + $0xa0] ss:$8 sps:$4 sm:$0xff]   ;;  %v1446_v17 = vld [vmem:[%s1730_s7 + $0x94] ss:$8 sps:$4 sm:$0xff]   ;;  %v856_v21 = vrot.slane %v1303_v63, %v1772_v62 }
  0x80   : > { %1032 = vmatprep.subr.bf16.mxu0 %v1413_v50  ;;  %v1448_v18 = vld [vmem:[%s1730_s7 + $0x90] ss:$8 sps:$4 sm:$0xff]   ;;  %v1449_v19 = vld [vmem:[%s1730_s7 + $0x84] ss:$8 sps:$4 sm:$0xff]   ;;  %v1451_v20 = vld [vmem:[%s1730_s7 + $0x80] ss:$8 sps:$4 sm:$0xff]  }
  0x81   : > { %1058 = vmatprep.mubr.bf16.mxu0 %v863_v3  ;;  %v1071_v22 = vsub.s32 0, %v854_v59  ;;  %v1067_v23 = vld [vmem:[%s632_s14] sm:$0x3]  ;;  %v1075_v24 = vsub.s32 1, %v854_v59  ;;  %vm1120_vm8 = vsmask.f32 256 }
  0x82   : > { %v1081_v25 = vld [vmem:[%s637_s0] sm:$0x3]  ;;  %vm1122_vm9 = vcmask 1041409   ;;  %vm1123_vm10 = vsmask.f32 1280  ;;  %vm1121_vm11 = vmand %vm1119_vm7, %vm1120_vm8 }
  0x83   : > { %1033 = vmatpush1.bf16.msra.mxu0 %v1415_v51  ;;  %v1072_v26 = vrot.slane %v1067_v23, %v1071_v22  ;;  %v1086_v27 = vrot.slane %v1081_v25, %v1071_v22  ;;  %v1076_v28 = vrot.slane %v1067_v23, %v1075_v24  ;;  %v1090_v31 = vrot.slane %v1081_v25, %v1075_v24  ;;  %vm1124_vm12 = vmand %vm1122_vm9, %vm1123_vm10  ;;  %v1126_v35 = vld [vmem:[%s1728_s1] sm:$0x3] }
  0x84   : > { %1034 = vmatprep.subr.bf16.mxu0 %v1416_v52  ;;  %vm1125_vm13 = vmor %vm1124_vm12, %vm1121_vm11 }
  0x87   : > { %1035 = vmatpush1.bf16.msra.mxu0 %v1418_v56 }
  0x88   : > { %1036 = vmatprep.subr.bf16.mxu0 %v1419_v57 }
  0x8b   : > { %1037 = vmatpush1.bf16.msra.mxu0 %v1421_v60 }
  0x8c   : > { %1038 = vmatprep.subr.bf16.mxu0 %v1422_v61 }
  0x8f   : > { %1039 = vmatpush1.bf16.msra.mxu0 %v1424_v1 }
  0x90   : > { %1040 = vmatprep.subr.bf16.mxu0 %v1425_v2 }
  0x93   : > { %1041 = vmatpush1.bf16.msra.mxu0 %v1427_v4 }
  0x94   : > { %1042 = vmatprep.subr.bf16.mxu0 %v1428_v5 }
  0x97   : > { %1043 = vmatpush2.bf16.msra.mxu0 %v1430_v6 }
  0x98   : > { %1044 = vmatprep.subr.bf16.mxu0 %v1431_v7 }
  0x9b   : > { %1045 = vmatpush2.bf16.msra.mxu0 %v1433_v8 }
  0x9c   : > { %1046 = vmatprep.subr.bf16.mxu0 %v1434_v9 }
  0x9f   : > { %1047 = vmatpush2.bf16.msra.mxu0 %v1436_v10 }
  0xa0   : > { %1048 = vmatprep.subr.bf16.mxu0 %v1437_v11 }
  0xa3   : > { %1049 = vmatpush2.bf16.msra.mxu0 %v1439_v12 }
  0xa4   : > { %1050 = vmatprep.subr.bf16.mxu0 %v1440_v13 }
  0xa7   : > { %1051 = vmatpush2.bf16.msra.mxu0 %v1442_v14 }
  0xa8   : > { %1052 = vmatprep.subr.bf16.mxu0 %v1443_v15 }
  0xab   : > { %1053 = vmatpush2.bf16.msra.mxu0 %v1445_v16 }
  0xac   : > { %1054 = vmatprep.subr.bf16.mxu0 %v1446_v17 }
  0xaf   : > { %1055 = vmatpush2.bf16.msra.mxu0 %v1448_v18 }
  0xb0   : > { %1056 = vmatprep.subr.bf16.mxu0 %v1449_v19 }
  0xb3   : > { %1057 = vmatpush2.bf16.msra.mxu0 %v1451_v20 }
  0xb6   : > { %1059 = vmatmul.mubr.bf16.vlgmr.msra.gmra.mxu0 %v856_v21 }
 0x176   : > { %v1060_v29 = vpop.f32.mrf.mxu0 }
 0x177   : > { %v1079_v30 = vmul.f32 %v1072_v26, %v1060_v29 }
 0x178   : > { %v1062_v32 = vpop.f32.mrf.mxu0 }
 0x179   : > { %v1093_v33 = vadd.f32 %v1086_v27, %v1079_v30  ;;  %v1080_v34 = vmul.f32 %v1076_v28, %v1062_v32 }
 0x17a   : > { %v1064_v36 = vpop.f32.mrf.mxu0 }
 0x17b   : > { %v1095_v37 = vmax.f32 %v1093_v33, 0.0  ;;  %v1094_v38 = vadd.f32 %v1090_v31, %v1080_v34 }
 0x17c   : > { %v1065_v39 = vpop.f32.mrf.mxu0 }
 0x17d   : > { %v1096_v40 = vmax.f32 %v1094_v38, 0.0  ;;  %v1097_v41 = vmin.f32 %v1095_v37, 6.0 }
 0x17f   : > { %v1098_v42 = vmin.f32 %v1096_v40, 6.0 }
 0x181   : > { %v1336_v43 = vpack.c.bf16 %v1098_v42, %v1097_v41 }
 0x183   : > { %v1110_v44 = vrot.slane %v1336_v43, %v1772_v62 }
 0x185   : > { %v1117_v45 = vrot.slane %v1110_v44, %v1772_v62 }
 0x187   : > { %v1127_v46 = vsel %vm1125_vm13, %v1117_v45, %v1126_v35 }
 0x188   : > { %1128 = vst [vmem:[%s1728_s1] sm:$0x3] %v1127_v46 }
 0x189 PF: > { %s1859_s0 = sld [smem:[#allocation7_spill]] }
 0x18a   : > { %s1860_s13 = sld [smem:[#allocation4_spill]] }
 0x18b   : > { %s1861_s14 = sld [smem:[#allocation10_spill]] }
 0x18c   : > { %s1862_s15 = sld [smem:[#allocation5_spill]] }
 0x18d   : > { %s1863_s16 = sld [smem:[#allocation6_spill]] }
 0x18e   : > { %s1864_s17 = sld [smem:[#allocation8_spill]] }
 0x18f   : > { %s20_s19 = sadd.s32 1, %s1859_s0   ;;  %s1865_s18 = sld [smem:[#allocation9_spill]] }
 0x190   : > { %p17_p13 = scmp.ge.s32.totalorder %s20_s19, 6  }
 0x192   :  { %19 = sbr.rel (!%p17_p13) target bundleno = 8 (0x8), region = 155 }

// kernel: mobilenetv1_forward.22
= control target key start
LH: loop header
LB: loop body
LE: loop exit
PB: predicated region body
PF: predicated region fallthrough
CT: control target
= control target key end

     0   :  { %s2293_s0 = inlined_call_operand.vmem [shape: bf16[2,3,3,512], index: 0, kind: input, shape index: {}]   ;;  %s2294_s1 = inlined_call_operand.vmem [shape: f32[9,512], index: 1, kind: input, shape index: {}]   ;;  %s2295_s2 = inlined_call_operand.vmem [shape: f32[1,512], index: 2, kind: input, shape index: {}]   ;;  %s2296_s3 = inlined_call_operand.vmem [shape: f32[1,512], index: 3, kind: input, shape index: {}]   ;;  %s2297_s4 = inlined_call_operand.vmem [shape: bf16[512,512], index: 4, kind: input, shape index: {}]   ;;  %s2298_s5 = inlined_call_operand.vmem [shape: f32[1,512], index: 5, kind: input, shape index: {}]   ;;  %s2299_s6 = inlined_call_operand.vmem [shape: f32[1,512], index: 6, kind: input, shape index: {}]   ;;  %s2300_s7 = inlined_call_operand.vmem [shape: bf16[2,1,512], index: 7, kind: output, shape index: {}]  }
   0x1   :  { %2303 = sst [smem:[#allocation7_spill]] %s2297_s4 }
   0x2   :  { %s1932_s24 = smov 0   ;;  %s1934_s25 = smov 0  }
   0x3   :  { %s1936_s26 = smov 0   ;;  %s1938_s27 = smov 0  }
   0x4   :  { %s1940_s28 = smov 0   ;;  %s1942_s29 = smov 0  }
   0x5   :  { %s1944_s30 = smov 0  }
   0x6 LB: > { %2304 = sst [smem:[#allocation4_spill]] %s1882_s29  ;;  %s26_s8 = sadd.s32 1, %s1878_s28  ;;  %s1886_s30 = sphi %s1944_s30, %s17_s30   ;;  %s1882_s29 = sphi %s1942_s29, %s2319_s29   ;;  %s1878_s28 = sphi %s1940_s28, %s2318_s28   ;;  %s1874_s27 = sphi %s1938_s27, %s2312_s27   ;;  %s1870_s26 = sphi %s1936_s26, %s2317_s26   ;;  %s1866_s25 = sphi %s1934_s25, %s2316_s25   ;;  %s1862_s24 = sphi %s1932_s24, %s2315_s24  }
   0x7   : > { %s29_s9 = sadd.s32 1, %s1882_s29  ;;  %p27_p0 = scmp.ge.s32.totalorder %s26_s8, 2 }
   0x8   : > { %s125_s10 = sadd.s32 1, %s1866_s25  ;;  %p132_p1 = scmp.ne.s32.totalorder %s1866_s25, %s1862_s24 }
   0x9   : > { %p133_p2 = scmp.eq.s32.totalorder %s1886_s30, 0  ;;  %s2321_s8 = smov (%p27_p0, %s26_s8), 0 }
   0xa   : > { %2305 = sst [smem:[#allocation5_spill]] %s2321_s8  ;;  %s2323_s9 = smov (!%p27_p0, %s29_s9), %s1882_s29 }
   0xb   : > { %s122_s11 = ssub.s32 %s1878_s28, %s2321_s8  ;;  %p134_p3 = por %p133_p2, %p132_p1 }
   0xc   : > { %p31_p4 = scmp.ge.s32.totalorder %s2323_s9, 2  ;;  %p123_p5 = scmp.eq.s32.totalorder %s122_s11, 0 }
   0xd   : > { %p1568_p6 = scmp.ge.s32.totalorder %s1886_s30, 4 }
   0xe   : > { %s2325_s9 = smov (%p31_p4, %s2323_s9), 0 }
   0xf   : > { %2306 = sst [smem:[#allocation6_spill]] %s2325_s9  ;;  %247 = sbr.rel (%p1568_p6) target bundleno = 62 (0x3e), region = 28 }
  0x10   : > { %s1981_s12 = scalar_select %p123_p5, %s1866_s25, %s125_s10  }
  0x14   : > { %258 = sbr.rel (!%p134_p3) target bundleno = 62 (0x3e), region = 36  ;;  %s260_s13 = sand.u32 (%p134_p3), 1, %s1866_s25  }
  0x15   : > { %s1666_s14 = sshll.u32 (%p134_p3), %s1878_s28, 3  ;;  %s1569_s15 = sshll.u32 (%p134_p3), %s260_s13, 9 }
  0x16   : > { %s2307_s4 = sld [smem:[#allocation7_spill]] (%p134_p3)  ;;  %s1994_s19 = scalar_lea.vmem (%p134_p3), [#allocation3], %s1569_s15 }
  0x1c   : > { %s1989_s18 = scalar_lea.vmem %s2307_s4, %s1666_s14 }
  0x1d   : > { %v420_v0 = vld [vmem:[%s1989_s18] sm:$0xff]  ;;  %v422_v1 = vld [vmem:[%s1989_s18 + $0x10] sm:$0xff] }
  0x1e   : > { %v424_v2 = vld [vmem:[%s1989_s18 + $0x20] sm:$0xff]  ;;  %421 = vst [vmem:[%s1994_s19] sm:$0xff] %v420_v0  ;;  %423 = vst [vmem:[%s1994_s19 + $0x8] sm:$0xff] %v422_v1  ;;  %v426_v3 = vld [vmem:[%s1989_s18 + $0x30] sm:$0xff] }
  0x1f   : > { %425 = vst [vmem:[%s1994_s19 + $0x10] sm:$0xff] %v424_v2  ;;  %v428_v4 = vld [vmem:[%s1989_s18 + $0x40] sm:$0xff]  ;;  %v430_v5 = vld [vmem:[%s1989_s18 + $0x50] sm:$0xff]  ;;  %427 = vst [vmem:[%s1994_s19 + $0x18] sm:$0xff] %v426_v3 }
  0x20   : > { %429 = vst [vmem:[%s1994_s19 + $0x20] sm:$0xff] %v428_v4  ;;  %431 = vst [vmem:[%s1994_s19 + $0x28] sm:$0xff] %v430_v5  ;;  %v432_v6 = vld [vmem:[%s1989_s18 + $0x60] sm:$0xff]  ;;  %v434_v7 = vld [vmem:[%s1989_s18 + $0x70] sm:$0xff] }
  0x21   : > { %v436_v8 = vld [vmem:[%s1989_s18 + $0x80] sm:$0xff]  ;;  %433 = vst [vmem:[%s1994_s19 + $0x30] sm:$0xff] %v432_v6  ;;  %435 = vst [vmem:[%s1994_s19 + $0x38] sm:$0xff] %v434_v7  ;;  %v438_v9 = vld [vmem:[%s1989_s18 + $0x90] sm:$0xff] }
  0x22   : > { %437 = vst [vmem:[%s1994_s19 + $0x40] sm:$0xff] %v436_v8  ;;  %v440_v10 = vld [vmem:[%s1989_s18 + $0xa0] sm:$0xff]  ;;  %v442_v11 = vld [vmem:[%s1989_s18 + $0xb0] sm:$0xff]  ;;  %439 = vst [vmem:[%s1994_s19 + $0x48] sm:$0xff] %v438_v9 }
  0x23   : > { %441 = vst [vmem:[%s1994_s19 + $0x50] sm:$0xff] %v440_v10  ;;  %443 = vst [vmem:[%s1994_s19 + $0x58] sm:$0xff] %v442_v11  ;;  %v444_v12 = vld [vmem:[%s1989_s18 + $0xc0] sm:$0xff]  ;;  %v446_v13 = vld [vmem:[%s1989_s18 + $0xd0] sm:$0xff] }
  0x24   : > { %v448_v14 = vld [vmem:[%s1989_s18 + $0xe0] sm:$0xff]  ;;  %445 = vst [vmem:[%s1994_s19 + $0x60] sm:$0xff] %v444_v12  ;;  %447 = vst [vmem:[%s1994_s19 + $0x68] sm:$0xff] %v446_v13  ;;  %v450_v15 = vld [vmem:[%s1989_s18 + $0xf0] sm:$0xff] }
  0x25   : > { %449 = vst [vmem:[%s1994_s19 + $0x70] sm:$0xff] %v448_v14  ;;  %v452_v16 = vld [vmem:[%s1989_s18 + $0x100] sm:$0xff]  ;;  %v454_v17 = vld [vmem:[%s1989_s18 + $0x110] sm:$0xff]  ;;  %451 = vst [vmem:[%s1994_s19 + $0x78] sm:$0xff] %v450_v15 }
  0x26   : > { %453 = vst [vmem:[%s1994_s19 + $0x80] sm:$0xff] %v452_v16  ;;  %455 = vst [vmem:[%s1994_s19 + $0x88] sm:$0xff] %v454_v17  ;;  %v456_v18 = vld [vmem:[%s1989_s18 + $0x120] sm:$0xff]  ;;  %v458_v19 = vld [vmem:[%s1989_s18 + $0x130] sm:$0xff] }
  0x27   : > { %v460_v20 = vld [vmem:[%s1989_s18 + $0x140] sm:$0xff]  ;;  %457 = vst [vmem:[%s1994_s19 + $0x90] sm:$0xff] %v456_v18  ;;  %459 = vst [vmem:[%s1994_s19 + $0x98] sm:$0xff] %v458_v19  ;;  %v462_v21 = vld [vmem:[%s1989_s18 + $0x150] sm:$0xff] }
  0x28   : > { %461 = vst [vmem:[%s1994_s19 + $0xa0] sm:$0xff] %v460_v20  ;;  %v464_v22 = vld [vmem:[%s1989_s18 + $0x160] sm:$0xff]  ;;  %v466_v23 = vld [vmem:[%s1989_s18 + $0x170] sm:$0xff]  ;;  %463 = vst [vmem:[%s1994_s19 + $0xa8] sm:$0xff] %v462_v21 }
  0x29   : > { %465 = vst [vmem:[%s1994_s19 + $0xb0] sm:$0xff] %v464_v22  ;;  %467 = vst [vmem:[%s1994_s19 + $0xb8] sm:$0xff] %v466_v23  ;;  %v468_v24 = vld [vmem:[%s1989_s18 + $0x180] sm:$0xff]  ;;  %v470_v25 = vld [vmem:[%s1989_s18 + $0x190] sm:$0xff] }
  0x2a   : > { %v472_v26 = vld [vmem:[%s1989_s18 + $0x1a0] sm:$0xff]  ;;  %469 = vst [vmem:[%s1994_s19 + $0xc0] sm:$0xff] %v468_v24  ;;  %471 = vst [vmem:[%s1994_s19 + $0xc8] sm:$0xff] %v470_v25  ;;  %v474_v27 = vld [vmem:[%s1989_s18 + $0x1b0] sm:$0xff] }
  0x2b   : > { %473 = vst [vmem:[%s1994_s19 + $0xd0] sm:$0xff] %v472_v26  ;;  %v476_v28 = vld [vmem:[%s1989_s18 + $0x1c0] sm:$0xff]  ;;  %v478_v29 = vld [vmem:[%s1989_s18 + $0x1d0] sm:$0xff]  ;;  %475 = vst [vmem:[%s1994_s19 + $0xd8] sm:$0xff] %v474_v27 }
  0x2c   : > { %477 = vst [vmem:[%s1994_s19 + $0xe0] sm:$0xff] %v476_v28  ;;  %479 = vst [vmem:[%s1994_s19 + $0xe8] sm:$0xff] %v478_v29  ;;  %v480_v30 = vld [vmem:[%s1989_s18 + $0x1e0] sm:$0xff]  ;;  %v482_v31 = vld [vmem:[%s1989_s18 + $0x1f0] sm:$0xff] }
  0x2d   : > { %v484_v32 = vld [vmem:[%s1989_s18 + $0x200] sm:$0xff]  ;;  %481 = vst [vmem:[%s1994_s19 + $0xf0] sm:$0xff] %v480_v30  ;;  %483 = vst [vmem:[%s1994_s19 + $0xf8] sm:$0xff] %v482_v31  ;;  %v486_v33 = vld [vmem:[%s1989_s18 + $0x210] sm:$0xff] }
  0x2e   : > { %485 = vst [vmem:[%s1994_s19 + $0x100] sm:$0xff] %v484_v32  ;;  %v488_v34 = vld [vmem:[%s1989_s18 + $0x220] sm:$0xff]  ;;  %v490_v35 = vld [vmem:[%s1989_s18 + $0x230] sm:$0xff]  ;;  %487 = vst [vmem:[%s1994_s19 + $0x108] sm:$0xff] %v486_v33 }
  0x2f   : > { %489 = vst [vmem:[%s1994_s19 + $0x110] sm:$0xff] %v488_v34  ;;  %491 = vst [vmem:[%s1994_s19 + $0x118] sm:$0xff] %v490_v35  ;;  %v492_v36 = vld [vmem:[%s1989_s18 + $0x240] sm:$0xff]  ;;  %v494_v37 = vld [vmem:[%s1989_s18 + $0x250] sm:$0xff] }
  0x30   : > { %v496_v38 = vld [vmem:[%s1989_s18 + $0x260] sm:$0xff]  ;;  %493 = vst [vmem:[%s1994_s19 + $0x120] sm:$0xff] %v492_v36  ;;  %495 = vst [vmem:[%s1994_s19 + $0x128] sm:$0xff] %v494_v37  ;;  %v498_v39 = vld [vmem:[%s1989_s18 + $0x270] sm:$0xff] }
  0x31   : > { %497 = vst [vmem:[%s1994_s19 + $0x130] sm:$0xff] %v496_v38  ;;  %v500_v40 = vld [vmem:[%s1989_s18 + $0x280] sm:$0xff]  ;;  %v502_v41 = vld [vmem:[%s1989_s18 + $0x290] sm:$0xff]  ;;  %499 = vst [vmem:[%s1994_s19 + $0x138] sm:$0xff] %v498_v39 }
  0x32   : > { %501 = vst [vmem:[%s1994_s19 + $0x140] sm:$0xff] %v500_v40  ;;  %503 = vst [vmem:[%s1994_s19 + $0x148] sm:$0xff] %v502_v41  ;;  %v504_v42 = vld [vmem:[%s1989_s18 + $0x2a0] sm:$0xff]  ;;  %v506_v43 = vld [vmem:[%s1989_s18 + $0x2b0] sm:$0xff] }
  0x33   : > { %v508_v44 = vld [vmem:[%s1989_s18 + $0x2c0] sm:$0xff]  ;;  %505 = vst [vmem:[%s1994_s19 + $0x150] sm:$0xff] %v504_v42  ;;  %507 = vst [vmem:[%s1994_s19 + $0x158] sm:$0xff] %v506_v43  ;;  %v510_v45 = vld [vmem:[%s1989_s18 + $0x2d0] sm:$0xff] }
  0x34   : > { %509 = vst [vmem:[%s1994_s19 + $0x160] sm:$0xff] %v508_v44  ;;  %v512_v46 = vld [vmem:[%s1989_s18 + $0x2e0] sm:$0xff]  ;;  %v514_v47 = vld [vmem:[%s1989_s18 + $0x2f0] sm:$0xff]  ;;  %511 = vst [vmem:[%s1994_s19 + $0x168] sm:$0xff] %v510_v45 }
  0x35   : > { %513 = vst [vmem:[%s1994_s19 + $0x170] sm:$0xff] %v512_v46  ;;  %515 = vst [vmem:[%s1994_s19 + $0x178] sm:$0xff] %v514_v47  ;;  %v516_v48 = vld [vmem:[%s1989_s18 + $0x300] sm:$0xff]  ;;  %v518_v49 = vld [vmem:[%s1989_s18 + $0x310] sm:$0xff] }
  0x36   : > { %v520_v50 = vld [vmem:[%s1989_s18 + $0x320] sm:$0xff]  ;;  %517 = vst [vmem:[%s1994_s19 + $0x180] sm:$0xff] %v516_v48  ;;  %519 = vst [vmem:[%s1994_s19 + $0x188] sm:$0xff] %v518_v49  ;;  %v522_v51 = vld [vmem:[%s1989_s18 + $0x330] sm:$0xff] }
  0x37   : > { %521 = vst [vmem:[%s1994_s19 + $0x190] sm:$0xff] %v520_v50  ;;  %v524_v52 = vld [vmem:[%s1989_s18 + $0x340] sm:$0xff]  ;;  %v526_v53 = vld [vmem:[%s1989_s18 + $0x350] sm:$0xff]  ;;  %523 = vst [vmem:[%s1994_s19 + $0x198] sm:$0xff] %v522_v51 }
  0x38   : > { %525 = vst [vmem:[%s1994_s19 + $0x1a0] sm:$0xff] %v524_v52  ;;  %527 = vst [vmem:[%s1994_s19 + $0x1a8] sm:$0xff] %v526_v53  ;;  %v528_v54 = vld [vmem:[%s1989_s18 + $0x360] sm:$0xff]  ;;  %v530_v55 = vld [vmem:[%s1989_s18 + $0x370] sm:$0xff] }
  0x39   : > { %v532_v56 = vld [vmem:[%s1989_s18 + $0x380] sm:$0xff]  ;;  %529 = vst [vmem:[%s1994_s19 + $0x1b0] sm:$0xff] %v528_v54  ;;  %531 = vst [vmem:[%s1994_s19 + $0x1b8] sm:$0xff] %v530_v55  ;;  %v534_v57 = vld [vmem:[%s1989_s18 + $0x390] sm:$0xff] }
  0x3a   : > { %533 = vst [vmem:[%s1994_s19 + $0x1c0] sm:$0xff] %v532_v56  ;;  %v536_v58 = vld [vmem:[%s1989_s18 + $0x3a0] sm:$0xff]  ;;  %v538_v59 = vld [vmem:[%s1989_s18 + $0x3b0] sm:$0xff]  ;;  %535 = vst [vmem:[%s1994_s19 + $0x1c8] sm:$0xff] %v534_v57 }
  0x3b   : > { %537 = vst [vmem:[%s1994_s19 + $0x1d0] sm:$0xff] %v536_v58  ;;  %539 = vst [vmem:[%s1994_s19 + $0x1d8] sm:$0xff] %v538_v59  ;;  %v540_v60 = vld [vmem:[%s1989_s18 + $0x3c0] sm:$0xff]  ;;  %v542_v61 = vld [vmem:[%s1989_s18 + $0x3d0] sm:$0xff] }
  0x3c   : > { %v544_v62 = vld [vmem:[%s1989_s18 + $0x3e0] sm:$0xff]  ;;  %541 = vst [vmem:[%s1994_s19 + $0x1e0] sm:$0xff] %v540_v60  ;;  %543 = vst [vmem:[%s1994_s19 + $0x1e8] sm:$0xff] %v542_v61  ;;  %v546_v63 = vld [vmem:[%s1989_s18 + $0x3f0] sm:$0xff] }
  0x3d   : > { %545 = vst [vmem:[%s1994_s19 + $0x1f0] sm:$0xff] %v544_v62  ;;  %547 = vst [vmem:[%s1994_s19 + $0x1f8] sm:$0xff] %v546_v63 }
  0x3e PF: > { %p1572_p7 = scmp.ge.s32.totalorder %s1886_s30, 1  ;;  %p568_p8 = scmp.lt.s32.totalorder %s1886_s30, 5 }
  0x40   : > { %p569_p9 = pnand %p1572_p7, %p568_p8 }
  0x41   : > { %s575_s20 = sand.u32 (!%p569_p9), 1, %s1862_s24   ;;  %p622_p10 = scmp.lt.s32.totalorder (!%p569_p9), %s1874_s27, 1 }
  0x42   : > { %572 = sbr.rel (%p569_p9) target bundleno = 402 (0x192), region = 82  ;;  %s1573_s21 = sshll.u32 (!%p569_p9), %s575_s20, 9 }
  0x43   : > { %s1575_s22 = sshll.u32 (!%p569_p9), %s1870_s26, 1  ;;  %s2146_s29 = scalar_lea.vmem (!%p569_p9), [#allocation3], %s1573_s21 }
  0x44   : > { %p629_p11 = scmp.lt.s32.totalorder (!%p569_p9), %s1575_s22, 3  ;;  %p1579_p12 = scmp.ne.s32.totalorder (!%p569_p9), %s1870_s26, 0 }
  0x47   : > { %s2327_s27 = smov (!%p622_p10, %s1874_s27), 1  ;;  %s2329_s22 = smov (!%p629_p11, %s1575_s22), 3 }
  0x48   : > { %s1667_s23 = smul.u32 24, %s2327_s27  ;;  %s1578_s10 = sshll.u32 %s2327_s27, 2 }
  0x49   : > { %s631_s14 = scalar_lea.vmem %s2298_s5, %s2329_s22  ;;  %s636_s24 = scalar_lea.vmem %s2299_s6, %s2329_s22 }
  0x4a   : > { %s626_s19 = scalar_lea.vmem %s2293_s0, %s1667_s23  ;;  %s644_s20 = sadd.s32 %s1578_s10, %s2329_s22 }
  0x4b   : > { %s2144_s8 = scalar_lea.vmem %s2300_s7, %s644_s20  ;;  %650 = sbr.rel (%p1579_p12) target bundleno = 123 (0x7b), region = 90 }
  0x50   : > { %v651_v0 = vld [vmem:[%s626_s19] sm:$0xff]  ;;  %v652_v1 = vld [vmem:[%s626_s19 + $0x8] sm:$0xff]  ;;  %v653_v3 = vld [vmem:[%s626_s19 + $0x10] sm:$0xff]  ;;  %v781_v10 = vlaneseq  ;;  %v1888_v27 = vmov 286326784   ;;  %v1889_v36 = vmov 858989090  }
  0x51   : > { %v662_v2 = vunpack.c.l.bf16 %v651_v0  ;;  %v663_v4 = vunpack.c.h.bf16 %v651_v0  ;;  %v1728_v5 = vld [vmem:[%s2294_s1] ss:$8 sps:$4 sm:$0xff]   ;;  %v1730_v6 = vld [vmem:[%s2294_s1 + $0x10] ss:$8 sps:$4 sm:$0xff]   ;;  %v694_v7 = vunpack.c.l.bf16 %v652_v1  ;;  %v1732_v8 = vld [vmem:[%s2294_s1 + $0x4] ss:$8 sps:$4 sm:$0xff]   ;;  %v695_v12 = vunpack.c.h.bf16 %v652_v1 }
  0x52   : > { %v1733_v9 = vld [vmem:[%s2294_s1 + $0x14] ss:$8 sps:$4 sm:$0xff]   ;;  %v1584_v13 = vrot.slane %v1728_v5, 11  ;;  %v1585_v15 = vrot.slane %v1730_v6, 11  ;;  %v708_v16 = vrot.slane %v1732_v8, 7  ;;  %v732_v20 = vunpack.c.l.bf16 %v653_v3 }
  0x53   : > { %v672_v11 = vmul.f32 %v1728_v5, %v662_v2  ;;  %v673_v14 = vmul.f32 %v1730_v6, %v663_v4  ;;  %v709_v17 = vrot.slane %v1733_v9, 7  ;;  %v733_v21 = vunpack.c.h.bf16 %v653_v3  ;;  %v1734_v22 = vld [vmem:[%s2294_s1 + $0x20] ss:$8 sps:$4 sm:$0x11]  }
  0x54   : > { %v712_v25 = vmul.f32 %v708_v16, %v694_v7  ;;  %v1735_v26 = vld [vmem:[%s2294_s1 + $0x30] ss:$8 sps:$4 sm:$0x11]   ;;  %v779_v28 = vunpack.c.l.s4 %v1888_v27  ;;  %v702_v30 = vmul.f32 %v1584_v13, %v694_v7  ;;  %v1590_v32 = vrot.slane %v1732_v8, 10  ;;  %v776_v62 = vld [vmem:[%s2295_s2] sm:$0xf] }
  0x55   : > { %v1580_v18 = vrot.slane %v672_v11, 9  ;;  %v1582_v19 = vrot.slane %v672_v11, 10  ;;  %v1581_v23 = vrot.slane %v673_v14, 9  ;;  %v1583_v24 = vrot.slane %v673_v14, 10  ;;  %v796_v4 = vld [vmem:[%s2296_s3] sm:$0xf] }
  0x56   : > { %v713_v31 = vmul.f32 %v709_v17, %v695_v12  ;;  %v703_v34 = vmul.f32 %v1585_v15, %v695_v12  ;;  %v1591_v35 = vrot.slane %v1733_v9, 10  ;;  %v786_v37 = vunpack.c.l.s4 %v1889_v36 }
  0x57   : > { %v684_v29 = vadd.f32 %v1580_v18, %v672_v11  ;;  %v685_v33 = vadd.f32 %v1581_v23, %v673_v14  ;;  %v1586_v39 = vrot.slane %v712_v25, 9  ;;  %v760_v40 = vrot.slane %v1734_v22, 6 }
  0x58   : > { %v1587_v42 = vrot.slane %v713_v31, 9  ;;  %v761_v43 = vrot.slane %v1735_v26, 6  ;;  %v782_v44 = vshrl.u32 %v781_v10, 7  ;;  %v1588_v46 = vrot.slane %v712_v25, 10 }
  0x59   : > { %v692_v38 = vadd.f32 %v1582_v19, %v684_v29  ;;  %v693_v41 = vadd.f32 %v1583_v24, %v685_v33  ;;  %v740_v47 = vmul.f32 %v1590_v32, %v732_v20  ;;  %v780_v48 = vunpack.c.0.s8 %v779_v28 }
  0x5a   : > { %v1589_v50 = vrot.slane %v713_v31, 10  ;;  %v741_v51 = vmul.f32 %v1591_v35, %v733_v21  ;;  %v787_v52 = vunpack.c.0.s8 %v786_v37  ;;  %v764_v54 = vmul.f32 %v760_v40, %v732_v20 }
  0x5b   : > { %v704_v45 = vadd.f32 %v702_v30, %v692_v38  ;;  %v705_v49 = vadd.f32 %v703_v34, %v693_v41  ;;  %v765_v56 = vmul.f32 %v761_v43, %v733_v21  ;;  %v1592_v58 = vrot.slane %v740_v47, 9  ;;  %v890_v38 = vld [vmem:[#allocation2] sm:$0xf] }
  0x5c   : > { %v783_v59 = vsub.s32 %v780_v48, %v782_v44  ;;  %v1593_v61 = vrot.slane %v741_v51, 9  ;;  %v790_v63 = vsub.s32 %v787_v52, %v782_v44  ;;  %v1594_v1 = vrot.slane %v764_v54, 10 }
  0x5d   : > { %v722_v53 = vadd.f32 %v1586_v39, %v704_v45  ;;  %v723_v55 = vadd.f32 %v1587_v42, %v705_v49  ;;  %v1595_v3 = vrot.slane %v765_v56, 10  ;;  %v1890_v14 = vmov 1966171168  }
  0x5e   : > { %v784_v6 = vrot.slane %v776_v62, %v783_v59  ;;  %v791_v8 = vrot.slane %v776_v62, %v790_v63  ;;  %v804_v10 = vrot.slane %v796_v4, %v783_v59  ;;  %v811_v12 = vrot.slane %v796_v4, %v790_v63 }
  0x5f   : > { %v730_v57 = vadd.f32 %v1588_v46, %v722_v53  ;;  %v731_v60 = vadd.f32 %v1589_v50, %v723_v55  ;;  %v853_v15 = vunpack.c.l.s4 %v1890_v14  ;;  %vm875_vm0 = vcmask 1040384  }
  0x60   : > { %vm876_vm1 = vsmask.f32 256  ;;  %vm878_vm2 = vcmask 1041409   ;;  %vm879_vm3 = vsmask.f32 1280  ;;  %v824_v20 = vsub.s32 0, %v782_v44 }
  0x61   : > { %v742_v0 = vadd.f32 %v740_v47, %v730_v57  ;;  %v743_v2 = vadd.f32 %v741_v51, %v731_v60  ;;  %v828_v21 = vsub.s32 4, %v782_v44  ;;  %v854_v22 = vunpack.c.0.s8 %v853_v15  ;;  %vm2173_vm4 = vmand %vm875_vm0, %vm876_vm1 }
  0x62   : > { %vm2177_vm5 = vmand %vm878_vm2, %vm879_vm3  ;;  %vm882_vm6 = vcmask 1042434   ;;  %vm883_vm7 = vsmask.f32 2304  ;;  %vm886_vm10 = vcmask 1043459   ;;  %vm887_vm11 = vsmask.f32 3328 }
  0x63   : > { %v752_v5 = vadd.f32 %v1592_v58, %v742_v0  ;;  %v753_v7 = vadd.f32 %v1593_v61, %v743_v2  ;;  %v857_v30 = vsub.s32 %v854_v22, %v782_v44  ;;  %vm881_vm8 = vmor %vm2177_vm5, %vm2173_vm4 }
  0x64   : > { %vm884_vm9 = vmand %vm882_vm6, %vm883_vm7 }
  0x65   : > { %v774_v9 = vadd.f32 %v1594_v1, %v752_v5  ;;  %v775_v11 = vadd.f32 %v1595_v3, %v753_v7  ;;  %vm885_vm12 = vmor %vm884_vm9, %vm881_vm8 }
  0x66   : > { %vm888_vm13 = vmand %vm886_vm10, %vm887_vm11 }
  0x67   : > { %v794_v13 = vmul.f32 %v784_v6, %v774_v9  ;;  %v795_v16 = vmul.f32 %v791_v8, %v775_v11  ;;  %vm889_vm14 = vmor %vm888_vm13, %vm885_vm12 }
  0x69   : > { %v814_v17 = vadd.f32 %v804_v10, %v794_v13  ;;  %v815_v18 = vadd.f32 %v811_v12, %v795_v16 }
  0x6b   : > { %v816_v19 = vmax.f32 %v814_v17, 0.0  ;;  %v817_v24 = vmax.f32 %v815_v18, 0.0 }
  0x6d   : > { %v818_v26 = vmin.f32 %v816_v19, 6.0  ;;  %v819_v27 = vmin.f32 %v817_v24, 6.0 }
  0x6f   : > { %v825_v28 = vrot.slane %v818_v26, %v824_v20  ;;  %v829_v29 = vrot.slane %v818_v26, %v828_v21  ;;  %v833_v31 = vrot.slane %v819_v27, %v824_v20  ;;  %v837_v32 = vrot.slane %v819_v27, %v828_v21 }
  0x71   : > { %v1596_v33 = vpack.c.bf16 %v829_v29, %v825_v28  ;;  %v1597_v34 = vpack.c.bf16 %v837_v32, %v833_v31 }
  0x73   : > { %v858_v35 = vrot.slane %v1596_v33, %v857_v30  ;;  %v865_v36 = vrot.slane %v1597_v34, %v857_v30 }
  0x75   : > { %v866_v37 = vcombine.low %v858_v35, %v865_v36 }
  0x77   : > { %v873_v39 = vrot.slane %v866_v37, %v857_v30 }
  0x79   : > { %v891_v40 = vsel %vm889_vm14, %v873_v39, %v890_v38 }
  0x7a   : > { %892 = vst [vmem:[#allocation2] sm:$0xf] %v891_v40 }
  0x7b PF: > { %v1736_v41 = vld [vmem:[%s2146_s29 + $0x74] ss:$8 sps:$4 sm:$0xff]   ;;  %v1740_v43 = vld [vmem:[%s2146_s29 + $0x70] ss:$8 sps:$4 sm:$0xff]   ;;  %v1742_v45 = vld [vmem:[%s2146_s29 + $0x64] ss:$8 sps:$4 sm:$0xff]   ;;  %v970_v17 = vlaneseq }
  0x7c   : > { %v1738_v42 = vld [vmem:[%s2146_s29 + $0x174] ss:$8 sps:$4 sm:$0xff]   ;;  %1307 = vmatprep.subr.bf16.mxu0 %v1736_v41  ;;  %v1741_v44 = vld [vmem:[%s2146_s29 + $0x170] ss:$8 sps:$4 sm:$0xff]   ;;  %v1744_v46 = vld [vmem:[%s2146_s29 + $0x164] ss:$8 sps:$4 sm:$0xff]  }
  0x7d   : > { %1348 = vmatprep.subr.bf16.mxu1 %v1738_v42  ;;  %1308 = vmatpush1.bf16.msra.mxu0 %v1740_v43  ;;  %v1746_v47 = vld [vmem:[%s2146_s29 + $0x60] ss:$8 sps:$4 sm:$0xff]   ;;  %v1748_v49 = vld [vmem:[%s2146_s29 + $0x54] ss:$8 sps:$4 sm:$0xff]   ;;  %v1752_v51 = vld [vmem:[%s2146_s29 + $0x50] ss:$8 sps:$4 sm:$0xff]  }
  0x7e   : > { %1349 = vmatpush1.bf16.msra.mxu1 %v1741_v44  ;;  %1309 = vmatprep.subr.bf16.mxu0 %v1742_v45  ;;  %v1747_v48 = vld [vmem:[%s2146_s29 + $0x160] ss:$8 sps:$4 sm:$0xff]   ;;  %v1750_v50 = vld [vmem:[%s2146_s29 + $0x154] ss:$8 sps:$4 sm:$0xff]   ;;  %v1753_v52 = vld [vmem:[%s2146_s29 + $0x150] ss:$8 sps:$4 sm:$0xff]  }
  0x7f   : > { %1350 = vmatprep.subr.bf16.mxu1 %v1744_v46  ;;  %v1754_v53 = vld [vmem:[%s2146_s29 + $0x44] ss:$8 sps:$4 sm:$0xff]   ;;  %v1758_v55 = vld [vmem:[%s2146_s29 + $0x40] ss:$8 sps:$4 sm:$0xff]   ;;  %v1760_v57 = vld [vmem:[%s2146_s29 + $0x34] ss:$8 sps:$4 sm:$0xff]  }
  0x80   : > { %v1756_v54 = vld [vmem:[%s2146_s29 + $0x144] ss:$8 sps:$4 sm:$0xff]   ;;  %v1759_v56 = vld [vmem:[%s2146_s29 + $0x140] ss:$8 sps:$4 sm:$0xff]   ;;  %v1762_v58 = vld [vmem:[%s2146_s29 + $0x134] ss:$8 sps:$4 sm:$0xff]  }
  0x81   : > { %1310 = vmatpush1.bf16.msra.mxu0 %v1746_v47  ;;  %v1764_v59 = vld [vmem:[%s2146_s29 + $0x30] ss:$8 sps:$4 sm:$0xff]   ;;  %v1766_v61 = vld [vmem:[%s2146_s29 + $0x24] ss:$8 sps:$4 sm:$0xff]   ;;  %v1770_v63 = vld [vmem:[%s2146_s29 + $0x20] ss:$8 sps:$4 sm:$0xff]  }
  0x82   : > { %1351 = vmatpush1.bf16.msra.mxu1 %v1747_v48  ;;  %1311 = vmatprep.subr.bf16.mxu0 %v1748_v49  ;;  %v1765_v60 = vld [vmem:[%s2146_s29 + $0x130] ss:$8 sps:$4 sm:$0xff]   ;;  %v1768_v62 = vld [vmem:[%s2146_s29 + $0x124] ss:$8 sps:$4 sm:$0xff]   ;;  %v1771_v0 = vld [vmem:[%s2146_s29 + $0x120] ss:$8 sps:$4 sm:$0xff]  }
  0x83   : > { %1352 = vmatprep.subr.bf16.mxu1 %v1750_v50  ;;  %v1772_v1 = vld [vmem:[%s2146_s29 + $0x14] ss:$8 sps:$4 sm:$0xff]   ;;  %v1776_v3 = vld [vmem:[%s2146_s29 + $0x10] ss:$8 sps:$4 sm:$0xff]   ;;  %v1778_v5 = vld [vmem:[%s2146_s29 + $0x4] ss:$8 sps:$4 sm:$0xff]  }
  0x84   : > { %v1774_v2 = vld [vmem:[%s2146_s29 + $0x114] ss:$8 sps:$4 sm:$0xff]   ;;  %v1777_v4 = vld [vmem:[%s2146_s29 + $0x110] ss:$8 sps:$4 sm:$0xff]   ;;  %v1780_v6 = vld [vmem:[%s2146_s29 + $0x104] ss:$8 sps:$4 sm:$0xff]  }
  0x85   : > { %1312 = vmatpush1.bf16.msra.mxu0 %v1752_v51  ;;  %v1782_v7 = vld [vmem:[%s2146_s29] ss:$8 sps:$4 sm:$0xff]   ;;  %v1784_v9 = vld [vmem:[%s2146_s29 + $0xf4] ss:$8 sps:$4 sm:$0xff]   ;;  %v1788_v11 = vld [vmem:[%s2146_s29 + $0xf0] ss:$8 sps:$4 sm:$0xff]  }
  0x86   : > { %1353 = vmatpush1.bf16.msra.mxu1 %v1753_v52  ;;  %1313 = vmatprep.subr.bf16.mxu0 %v1754_v53  ;;  %v1783_v8 = vld [vmem:[%s2146_s29 + $0x100] ss:$8 sps:$4 sm:$0xff]   ;;  %v1786_v10 = vld [vmem:[%s2146_s29 + $0x1f4] ss:$8 sps:$4 sm:$0xff]   ;;  %v1789_v12 = vld [vmem:[%s2146_s29 + $0x1f0] ss:$8 sps:$4 sm:$0xff]  }
  0x87   : > { %1354 = vmatprep.subr.bf16.mxu1 %v1756_v54  ;;  %v1790_v13 = vld [vmem:[%s2146_s29 + $0xe4] ss:$8 sps:$4 sm:$0xff]   ;;  %v1891_v15 = vmov 1966171168   ;;  %v1794_v18 = vld [vmem:[%s2146_s29 + $0xe0] ss:$8 sps:$4 sm:$0xff]  }
  0x88   : > { %v1792_v14 = vld [vmem:[%s2146_s29 + $0x1e4] ss:$8 sps:$4 sm:$0xff]   ;;  %v968_v16 = vunpack.c.l.s4 %v1891_v15  ;;  %v1795_v19 = vld [vmem:[%s2146_s29 + $0x1e0] ss:$8 sps:$4 sm:$0xff]   ;;  %v1796_v20 = vld [vmem:[%s2146_s29 + $0xd4] ss:$8 sps:$4 sm:$0xff]  }
  0x89   : > { %1314 = vmatpush1.bf16.msra.mxu0 %v1758_v55  ;;  %v1798_v21 = vld [vmem:[%s2146_s29 + $0x1d4] ss:$8 sps:$4 sm:$0xff]   ;;  %v2227_v23 = vshrl.u32 %v970_v17, 7  ;;  %v1800_v24 = vld [vmem:[%s2146_s29 + $0xd0] ss:$8 sps:$4 sm:$0xff]   ;;  %vm1441_vm15 = vcmask 1040384  }
  0x8a   : > { %1355 = vmatpush1.bf16.msra.mxu1 %v1759_v56  ;;  %1315 = vmatprep.subr.bf16.mxu0 %v1760_v57  ;;  %v969_v22 = vunpack.c.0.s8 %v968_v16  ;;  %v1801_v25 = vld [vmem:[%s2146_s29 + $0x1d0] ss:$8 sps:$4 sm:$0xff]   ;;  %v1802_v26 = vld [vmem:[%s2146_s29 + $0xc4] ss:$8 sps:$4 sm:$0xff]   ;;  %v1806_v30 = vld [vmem:[%s2146_s29 + $0xc0] ss:$8 sps:$4 sm:$0xff]  }
  0x8b   : > { %1356 = vmatprep.subr.bf16.mxu1 %v1762_v58  ;;  %v1804_v27 = vld [vmem:[%s2146_s29 + $0x1c4] ss:$8 sps:$4 sm:$0xff]   ;;  %v1598_v29 = vld.sshfl [vmem:[#allocation2] sm:$0x33 pattern:$0x75316420] }
  0x8c   : > { %v2234_v28 = vsub.s32 %v969_v22, %v2227_v23  ;;  %v1807_v31 = vld [vmem:[%s2146_s29 + $0x1c0] ss:$8 sps:$4 sm:$0xff]   ;;  %v966_v32 = vcombine.high %v1598_v29, %v1598_v29  ;;  %v1808_v33 = vld [vmem:[%s2146_s29 + $0xb4] ss:$8 sps:$4 sm:$0xff]   ;;  %v1812_v36 = vld [vmem:[%s2146_s29 + $0xb0] ss:$8 sps:$4 sm:$0xff]  }
  0x8d   : > { %1316 = vmatpush1.bf16.msra.mxu0 %v1764_v59  ;;  %v1810_v34 = vld [vmem:[%s2146_s29 + $0x1b4] ss:$8 sps:$4 sm:$0xff]   ;;  %v1813_v37 = vld [vmem:[%s2146_s29 + $0x1b0] ss:$8 sps:$4 sm:$0xff]   ;;  %v1814_v39 = vld [vmem:[%s2146_s29 + $0xa4] ss:$8 sps:$4 sm:$0xff]  }
  0x8e   : > { %1357 = vmatpush1.bf16.msra.mxu1 %v1765_v60  ;;  %1317 = vmatprep.subr.bf16.mxu0 %v1766_v61  ;;  %v980_v35 = vrot.slane %v966_v32, %v2234_v28  ;;  %v1816_v40 = vld [vmem:[%s2146_s29 + $0x1a4] ss:$8 sps:$4 sm:$0xff]   ;;  %v1818_v41 = vld [vmem:[%s2146_s29 + $0xa0] ss:$8 sps:$4 sm:$0xff]   ;;  %v1820_v43 = vld [vmem:[%s2146_s29 + $0x94] ss:$8 sps:$4 sm:$0xff]   ;;  %v973_v49 = vrot.slane %v1598_v29, %v2234_v28 }
  0x8f   : > { %1358 = vmatprep.subr.bf16.mxu1 %v1768_v62  ;;  %v1819_v42 = vld [vmem:[%s2146_s29 + $0x1a0] ss:$8 sps:$4 sm:$0xff]   ;;  %v1822_v44 = vld [vmem:[%s2146_s29 + $0x194] ss:$8 sps:$4 sm:$0xff]   ;;  %v1824_v45 = vld [vmem:[%s2146_s29 + $0x90] ss:$8 sps:$4 sm:$0xff]  }
  0x90   : > { %v982_v38 = vcombine.high %v980_v35, %v980_v35  ;;  %1339 = vmatprep.mubr.bf16.mxu0 %v980_v35  ;;  %v1825_v46 = vld [vmem:[%s2146_s29 + $0x190] ss:$8 sps:$4 sm:$0xff]   ;;  %v1826_v47 = vld [vmem:[%s2146_s29 + $0x84] ss:$8 sps:$4 sm:$0xff]   ;;  %v1830_v50 = vld [vmem:[%s2146_s29 + $0x80] ss:$8 sps:$4 sm:$0xff]   ;;  %v981_v52 = vcombine.high %v973_v49, %v973_v49 }
  0x91   : > { %1318 = vmatpush1.bf16.msra.mxu0 %v1770_v63  ;;  %v1828_v48 = vld [vmem:[%s2146_s29 + $0x184] ss:$8 sps:$4 sm:$0xff]   ;;  %v1831_v51 = vld [vmem:[%s2146_s29 + $0x180] ss:$8 sps:$4 sm:$0xff]   ;;  %v1393_v53 = vsub.s32 0, %v2227_v23  ;;  %v1397_v55 = vsub.s32 1, %v2227_v23 }
  0x92   : > { %1359 = vmatpush1.bf16.msra.mxu1 %v1771_v0  ;;  %1319 = vmatprep.subr.bf16.mxu0 %v1772_v1  ;;  %v1389_v54 = vld [vmem:[%s631_s14] sm:$0x3]  ;;  %vm1442_vm0 = vsmask.f32 256  ;;  %vm1444_vm1 = vcmask 1041409  }
  0x93   : > { %1360 = vmatprep.subr.bf16.mxu1 %v1774_v2  ;;  %1380 = vmatprep.mubr.bf16.mxu1 %v982_v38  ;;  %v1403_v56 = vld [vmem:[%s636_s24] sm:$0x3]  ;;  %v1394_v57 = vrot.slane %v1389_v54, %v1393_v53  ;;  %v1398_v62 = vrot.slane %v1389_v54, %v1397_v55  ;;  %vm1445_vm2 = vsmask.f32 1280  ;;  %vm1443_vm3 = vmand %vm1441_vm15, %vm1442_vm0 }
  0x94   : > { %v1408_v61 = vrot.slane %v1403_v56, %v1393_v53  ;;  %vm1446_vm4 = vmand %vm1444_vm1, %vm1445_vm2  ;;  %v1448_v17 = vld [vmem:[%s2144_s8] sm:$0x3] }
  0x95   : > { %1320 = vmatpush1.bf16.msra.mxu0 %v1776_v3  ;;  %v1412_v3 = vrot.slane %v1403_v56, %v1397_v55  ;;  %vm1447_vm5 = vmor %vm1446_vm4, %vm1443_vm3 }
  0x96   : > { %1361 = vmatpush1.bf16.msra.mxu1 %v1777_v4  ;;  %1321 = vmatprep.subr.bf16.mxu0 %v1778_v5 }
  0x97   : > { %1362 = vmatprep.subr.bf16.mxu1 %v1780_v6 }
  0x99   : > { %1322 = vmatpush1.bf16.msra.mxu0 %v1782_v7 }
  0x9a   : > { %1363 = vmatpush1.bf16.msra.mxu1 %v1783_v8  ;;  %1323 = vmatprep.subr.bf16.mxu0 %v1784_v9 }
  0x9b   : > { %1364 = vmatprep.subr.bf16.mxu1 %v1786_v10 }
  0x9d   : > { %1324 = vmatpush2.bf16.msra.mxu0 %v1788_v11 }
  0x9e   : > { %1365 = vmatpush2.bf16.msra.mxu1 %v1789_v12  ;;  %1325 = vmatprep.subr.bf16.mxu0 %v1790_v13 }
  0x9f   : > { %1366 = vmatprep.subr.bf16.mxu1 %v1792_v14 }
  0xa1   : > { %1326 = vmatpush2.bf16.msra.mxu0 %v1794_v18 }
  0xa2   : > { %1367 = vmatpush2.bf16.msra.mxu1 %v1795_v19  ;;  %1327 = vmatprep.subr.bf16.mxu0 %v1796_v20 }
  0xa3   : > { %1368 = vmatprep.subr.bf16.mxu1 %v1798_v21 }
  0xa5   : > { %1328 = vmatpush2.bf16.msra.mxu0 %v1800_v24 }
  0xa6   : > { %1369 = vmatpush2.bf16.msra.mxu1 %v1801_v25  ;;  %1329 = vmatprep.subr.bf16.mxu0 %v1802_v26 }
  0xa7   : > { %1370 = vmatprep.subr.bf16.mxu1 %v1804_v27 }
  0xa9   : > { %1330 = vmatpush2.bf16.msra.mxu0 %v1806_v30 }
  0xaa   : > { %1371 = vmatpush2.bf16.msra.mxu1 %v1807_v31  ;;  %1331 = vmatprep.subr.bf16.mxu0 %v1808_v33 }
  0xab   : > { %1372 = vmatprep.subr.bf16.mxu1 %v1810_v34 }
  0xad   : > { %1332 = vmatpush2.bf16.msra.mxu0 %v1812_v36 }
  0xae   : > { %1373 = vmatpush2.bf16.msra.mxu1 %v1813_v37  ;;  %1333 = vmatprep.subr.bf16.mxu0 %v1814_v39 }
  0xaf   : > { %1374 = vmatprep.subr.bf16.mxu1 %v1816_v40 }
  0xb1   : > { %1334 = vmatpush2.bf16.msra.mxu0 %v1818_v41 }
  0xb2   : > { %1375 = vmatpush2.bf16.msra.mxu1 %v1819_v42  ;;  %1335 = vmatprep.subr.bf16.mxu0 %v1820_v43 }
  0xb3   : > { %1376 = vmatprep.subr.bf16.mxu1 %v1822_v44 }
  0xb5   : > { %1336 = vmatpush2.bf16.msra.mxu0 %v1824_v45 }
  0xb6   : > { %1377 = vmatpush2.bf16.msra.mxu1 %v1825_v46  ;;  %1337 = vmatprep.subr.bf16.mxu0 %v1826_v47 }
  0xb7   : > { %1378 = vmatprep.subr.bf16.mxu1 %v1828_v48 }
  0xb9   : > { %1338 = vmatpush2.bf16.msra.mxu0 %v1830_v50 }
  0xba   : > { %1379 = vmatpush2.bf16.msra.mxu1 %v1831_v51 }
  0xbc   : > { %1340 = vmatmul.mubr.bf16.vlgmr.msra.gmra.mxu0 %v973_v49 }
  0xbd   : > { %1381 = vmatmul.mubr.bf16.vlgmr.msra.gmra.mxu1 %v981_v52 }
 0x17c   : > { %v1341_v58 = vpop.f32.mrf.mxu0 }
 0x17d   : > { %v1382_v59 = vpop.f32.mrf.mxu1 }
 0x17e   : > { %v1383_v60 = vadd.f32 %v1382_v59, %v1341_v58  ;;  %v1343_v63 = vpop.f32.mrf.mxu0 }
 0x17f   : > { %v1384_v0 = vpop.f32.mrf.mxu1 }
 0x180   : > { %v1401_v1 = vmul.f32 %v1394_v57, %v1383_v60  ;;  %v1385_v2 = vadd.f32 %v1384_v0, %v1343_v63  ;;  %v1345_v4 = vpop.f32.mrf.mxu0 }
 0x181   : > { %v1386_v5 = vpop.f32.mrf.mxu1 }
 0x182   : > { %v1415_v6 = vadd.f32 %v1408_v61, %v1401_v1  ;;  %v1402_v7 = vmul.f32 %v1398_v62, %v1385_v2  ;;  %v1346_v8 = vpop.f32.mrf.mxu0 }
 0x183   : > { %v1387_v9 = vpop.f32.mrf.mxu1 }
 0x184   : > { %v1417_v10 = vmax.f32 %v1415_v6, 0.0  ;;  %v1416_v11 = vadd.f32 %v1412_v3, %v1402_v7 }
 0x186   : > { %v1418_v12 = vmax.f32 %v1416_v11, 0.0  ;;  %v1419_v13 = vmin.f32 %v1417_v10, 6.0 }
 0x188   : > { %v1420_v14 = vmin.f32 %v1418_v12, 6.0 }
 0x18a   : > { %v1663_v15 = vpack.c.bf16 %v1420_v14, %v1419_v13 }
 0x18c   : > { %v1432_v16 = vrot.slane %v1663_v15, %v2234_v28 }
 0x18e   : > { %v1439_v18 = vrot.slane %v1432_v16, %v2234_v28 }
 0x190   : > { %v1449_v19 = vsel %vm1447_vm5, %v1439_v18, %v1448_v17 }
 0x191   : > { %1450 = vst [vmem:[%s2144_s8] sm:$0x3] %v1449_v19 }
 0x192 PF: > { %s17_s30 = sadd.s32 1, %s1886_s30   ;;  %s2312_s27 = sld [smem:[#allocation4_spill]] }
 0x193   : > { %p14_p13 = scmp.ge.s32.totalorder %s17_s30, 6   ;;  %s2313_s29 = sld [smem:[#allocation5_spill]] }
 0x194   : > { %s2314_s22 = sld [smem:[#allocation6_spill]]  ;;  %s2315_s24 = smov %s1866_s25 }
 0x195   : > { %s2316_s25 = smov %s1981_s12  ;;  %s2317_s26 = smov %s1878_s28 }
 0x196   :  { %16 = sbr.rel (!%p14_p13) target bundleno = 6 (0x6), region = 134 }
 0x199   : > { %s2318_s28 = smov %s2313_s29 }
 0x19a   : > { %s2319_s29 = smov %s2314_s22 }

// kernel: mobilenetv1_forward.27
= control target key start
LH: loop header
LB: loop body
LE: loop exit
PB: predicated region body
PF: predicated region fallthrough
CT: control target
= control target key end

     0   :  { %s2470_s0 = inlined_call_operand.vmem [shape: bf16[2,2,2,512], index: 0, kind: input, shape index: {}]   ;;  %s2471_s1 = inlined_call_operand.vmem [shape: bf16[2,2,1,512], index: 1, kind: input, shape index: {}]   ;;  %s2472_s2 = inlined_call_operand.vmem [shape: bf16[2,1,2,512], index: 2, kind: input, shape index: {}]   ;;  %s2473_s3 = inlined_call_operand.vmem [shape: bf16[2,1,1,512], index: 3, kind: input, shape index: {}]   ;;  %s2474_s4 = inlined_call_operand.vmem [shape: f32[9,512], index: 4, kind: input, shape index: {}]   ;;  %s2475_s5 = inlined_call_operand.vmem [shape: f32[1,512], index: 5, kind: input, shape index: {}]   ;;  %s2476_s6 = inlined_call_operand.vmem [shape: f32[1,512], index: 6, kind: input, shape index: {}]   ;;  %s2477_s7 = inlined_call_operand.vmem [shape: bf16[512,1024], index: 7, kind: input, shape index: {}]   ;;  %s2478_s8 = inlined_call_operand.vmem [shape: f32[1,1024], index: 8, kind: input, shape index: {}]   ;;  %s2479_s9 = inlined_call_operand.vmem [shape: f32[1,1024], index: 9, kind: input, shape index: {}]   ;;  %s2480_s10 = inlined_call_operand.vmem [shape: bf16[2,1,1024], index: 10, kind: output, shape index: {}]  }
   0x1   :  { %2486 = sst [smem:[#allocation11_spill]] %s2470_s0 }
   0x2   :  { %2487 = sst [smem:[#allocation12_spill]] %s2476_s6 }
   0x3   :  { %2488 = sst [smem:[#allocation13_spill]] %s2477_s7 }
   0x4   :  { %s2091_s13 = smov 0   ;;  %s2093_s14 = smov 0  }
   0x5   :  { %s2095_s15 = smov 0   ;;  %s2097_s16 = smov 0  }
   0x6   :  { %s2099_s17 = smov 0   ;;  %s2101_s18 = smov 0  }
   0x7   :  { %s2103_s19 = smov 0  }
   0x8 LB: > { %2489 = sst [smem:[#allocation4_spill]] %s2010_s14  ;;  %s29_s20 = sadd.s32 1, %s2022_s17  ;;  %s2030_s19 = sphi %s2103_s19, %s20_s19   ;;  %s2026_s18 = sphi %s2101_s18, %s2509_s18   ;;  %s2022_s17 = sphi %s2099_s17, %s2508_s17   ;;  %s2018_s16 = sphi %s2097_s16, %s2507_s16   ;;  %s2014_s15 = sphi %s2095_s15, %s2506_s15   ;;  %s2010_s14 = sphi %s2093_s14, %s2505_s14   ;;  %s2006_s13 = sphi %s2091_s13, %s2504_s13  }
   0x9   : > { %2490 = sst [smem:[#allocation5_spill]] %s2022_s17  ;;  %s32_s21 = sadd.s32 1, %s2026_s18 }
   0xa   : > { %2491 = sst [smem:[#allocation6_spill]] %s2026_s18  ;;  %p30_p0 = scmp.ge.s32.totalorder %s29_s20, 4 }
   0xb   : > { %2492 = sst [smem:[#allocation7_spill]] %s2030_s19  ;;  %s206_s22 = sadd.s32 1, %s2010_s14 }
   0xc   : > { %p213_p1 = scmp.ne.s32.totalorder %s2010_s14, %s2006_s13  ;;  %p214_p2 = scmp.eq.s32.totalorder %s2030_s19, 0 }
   0xd   : > { %s2511_s20 = smov (%p30_p0, %s29_s20), 0  ;;  %s2513_s21 = smov (!%p30_p0, %s32_s21), %s2026_s18 }
   0xe   : > { %2493 = sst [smem:[#allocation8_spill]] %s2511_s20  ;;  %s203_s23 = ssub.s32 %s2022_s17, %s2511_s20 }
   0xf   : > { %p215_p3 = por %p214_p2, %p213_p1  ;;  %p34_p4 = scmp.ge.s32.totalorder %s2513_s21, 2 }
  0x10   : > { %p204_p5 = scmp.eq.s32.totalorder %s203_s23, 0  ;;  %p1713_p6 = scmp.ge.s32.totalorder %s2030_s19, 8 }
  0x11   : > { %s2515_s21 = smov (%p34_p4, %s2513_s21), 0 }
  0x12   : > { %2494 = sst [smem:[#allocation9_spill]] %s2515_s21  ;;  %328 = sbr.rel (%p1713_p6) target bundleno = 97 (0x61), region = 28 }
  0x13   : > { %s2140_s24 = scalar_select %p204_p5, %s2010_s14, %s206_s22  }
  0x15   : > { %2495 = sst [smem:[#allocation10_spill]] %s2140_s24 }
  0x17   : > { %359 = sbr.rel (!%p215_p3) target bundleno = 97 (0x61), region = 48  ;;  %s361_s25 = sand.u32 (%p215_p3), 1, %s2010_s14  }
  0x18   : > { %s1803_s26 = sshll.u32 (%p215_p3), %s2022_s17, 3  ;;  %s1714_s27 = sshll.u32 (%p215_p3), %s361_s25, 9 }
  0x19   : > { %s2496_s7 = sld [smem:[#allocation13_spill]] (%p215_p3)  ;;  %s2153_s11 = scalar_lea.vmem (%p215_p3), [#allocation3], %s1714_s27 }
  0x1f   : > { %s2148_s30 = scalar_lea.vmem %s2496_s7, %s1803_s26 }
  0x20   : > { %v521_v0 = vld [vmem:[%s2148_s30] sm:$0xff] }
  0x21   : > { %v523_v1 = vld [vmem:[%s2148_s30 + $0x20] sm:$0xff]  ;;  %522 = vst [vmem:[%s2153_s11] sm:$0xff] %v521_v0 }
  0x22   : > { %v525_v2 = vld [vmem:[%s2148_s30 + $0x40] sm:$0xff]  ;;  %524 = vst [vmem:[%s2153_s11 + $0x8] sm:$0xff] %v523_v1 }
  0x23   : > { %526 = vst [vmem:[%s2153_s11 + $0x10] sm:$0xff] %v525_v2  ;;  %v527_v3 = vld [vmem:[%s2148_s30 + $0x60] sm:$0xff] }
  0x24   : > { %v529_v4 = vld [vmem:[%s2148_s30 + $0x80] sm:$0xff]  ;;  %528 = vst [vmem:[%s2153_s11 + $0x18] sm:$0xff] %v527_v3 }
  0x25   : > { %v531_v5 = vld [vmem:[%s2148_s30 + $0xa0] sm:$0xff]  ;;  %530 = vst [vmem:[%s2153_s11 + $0x20] sm:$0xff] %v529_v4 }
  0x26   : > { %532 = vst [vmem:[%s2153_s11 + $0x28] sm:$0xff] %v531_v5  ;;  %v533_v6 = vld [vmem:[%s2148_s30 + $0xc0] sm:$0xff] }
  0x27   : > { %v535_v7 = vld [vmem:[%s2148_s30 + $0xe0] sm:$0xff]  ;;  %534 = vst [vmem:[%s2153_s11 + $0x30] sm:$0xff] %v533_v6 }
  0x28   : > { %v537_v8 = vld [vmem:[%s2148_s30 + $0x100] sm:$0xff]  ;;  %536 = vst [vmem:[%s2153_s11 + $0x38] sm:$0xff] %v535_v7 }
  0x29   : > { %538 = vst [vmem:[%s2153_s11 + $0x40] sm:$0xff] %v537_v8  ;;  %v539_v9 = vld [vmem:[%s2148_s30 + $0x120] sm:$0xff] }
  0x2a   : > { %v541_v10 = vld [vmem:[%s2148_s30 + $0x140] sm:$0xff]  ;;  %540 = vst [vmem:[%s2153_s11 + $0x48] sm:$0xff] %v539_v9 }
  0x2b   : > { %v543_v11 = vld [vmem:[%s2148_s30 + $0x160] sm:$0xff]  ;;  %542 = vst [vmem:[%s2153_s11 + $0x50] sm:$0xff] %v541_v10 }
  0x2c   : > { %544 = vst [vmem:[%s2153_s11 + $0x58] sm:$0xff] %v543_v11  ;;  %v545_v12 = vld [vmem:[%s2148_s30 + $0x180] sm:$0xff] }
  0x2d   : > { %v547_v13 = vld [vmem:[%s2148_s30 + $0x1a0] sm:$0xff]  ;;  %546 = vst [vmem:[%s2153_s11 + $0x60] sm:$0xff] %v545_v12 }
  0x2e   : > { %v549_v14 = vld [vmem:[%s2148_s30 + $0x1c0] sm:$0xff]  ;;  %548 = vst [vmem:[%s2153_s11 + $0x68] sm:$0xff] %v547_v13 }
  0x2f   : > { %550 = vst [vmem:[%s2153_s11 + $0x70] sm:$0xff] %v549_v14  ;;  %v551_v15 = vld [vmem:[%s2148_s30 + $0x1e0] sm:$0xff] }
  0x30   : > { %v553_v16 = vld [vmem:[%s2148_s30 + $0x200] sm:$0xff]  ;;  %552 = vst [vmem:[%s2153_s11 + $0x78] sm:$0xff] %v551_v15 }
  0x31   : > { %v555_v17 = vld [vmem:[%s2148_s30 + $0x220] sm:$0xff]  ;;  %554 = vst [vmem:[%s2153_s11 + $0x80] sm:$0xff] %v553_v16 }
  0x32   : > { %556 = vst [vmem:[%s2153_s11 + $0x88] sm:$0xff] %v555_v17  ;;  %v557_v18 = vld [vmem:[%s2148_s30 + $0x240] sm:$0xff] }
  0x33   : > { %v559_v19 = vld [vmem:[%s2148_s30 + $0x260] sm:$0xff]  ;;  %558 = vst [vmem:[%s2153_s11 + $0x90] sm:$0xff] %v557_v18 }
  0x34   : > { %v561_v20 = vld [vmem:[%s2148_s30 + $0x280] sm:$0xff]  ;;  %560 = vst [vmem:[%s2153_s11 + $0x98] sm:$0xff] %v559_v19 }
  0x35   : > { %562 = vst [vmem:[%s2153_s11 + $0xa0] sm:$0xff] %v561_v20  ;;  %v563_v21 = vld [vmem:[%s2148_s30 + $0x2a0] sm:$0xff] }
  0x36   : > { %v565_v22 = vld [vmem:[%s2148_s30 + $0x2c0] sm:$0xff]  ;;  %564 = vst [vmem:[%s2153_s11 + $0xa8] sm:$0xff] %v563_v21 }
  0x37   : > { %v567_v23 = vld [vmem:[%s2148_s30 + $0x2e0] sm:$0xff]  ;;  %566 = vst [vmem:[%s2153_s11 + $0xb0] sm:$0xff] %v565_v22 }
  0x38   : > { %568 = vst [vmem:[%s2153_s11 + $0xb8] sm:$0xff] %v567_v23  ;;  %v569_v24 = vld [vmem:[%s2148_s30 + $0x300] sm:$0xff] }
  0x39   : > { %v571_v25 = vld [vmem:[%s2148_s30 + $0x320] sm:$0xff]  ;;  %570 = vst [vmem:[%s2153_s11 + $0xc0] sm:$0xff] %v569_v24 }
  0x3a   : > { %v573_v26 = vld [vmem:[%s2148_s30 + $0x340] sm:$0xff]  ;;  %572 = vst [vmem:[%s2153_s11 + $0xc8] sm:$0xff] %v571_v25 }
  0x3b   : > { %574 = vst [vmem:[%s2153_s11 + $0xd0] sm:$0xff] %v573_v26  ;;  %v575_v27 = vld [vmem:[%s2148_s30 + $0x360] sm:$0xff] }
  0x3c   : > { %v577_v28 = vld [vmem:[%s2148_s30 + $0x380] sm:$0xff]  ;;  %576 = vst [vmem:[%s2153_s11 + $0xd8] sm:$0xff] %v575_v27 }
  0x3d   : > { %v579_v29 = vld [vmem:[%s2148_s30 + $0x3a0] sm:$0xff]  ;;  %578 = vst [vmem:[%s2153_s11 + $0xe0] sm:$0xff] %v577_v28 }
  0x3e   : > { %580 = vst [vmem:[%s2153_s11 + $0xe8] sm:$0xff] %v579_v29  ;;  %v581_v30 = vld [vmem:[%s2148_s30 + $0x3c0] sm:$0xff] }
  0x3f   : > { %v583_v31 = vld [vmem:[%s2148_s30 + $0x3e0] sm:$0xff]  ;;  %582 = vst [vmem:[%s2153_s11 + $0xf0] sm:$0xff] %v581_v30 }
  0x40   : > { %v585_v32 = vld [vmem:[%s2148_s30 + $0x400] sm:$0xff]  ;;  %584 = vst [vmem:[%s2153_s11 + $0xf8] sm:$0xff] %v583_v31 }
  0x41   : > { %586 = vst [vmem:[%s2153_s11 + $0x100] sm:$0xff] %v585_v32  ;;  %v587_v33 = vld [vmem:[%s2148_s30 + $0x420] sm:$0xff] }
  0x42   : > { %v589_v34 = vld [vmem:[%s2148_s30 + $0x440] sm:$0xff]  ;;  %588 = vst [vmem:[%s2153_s11 + $0x108] sm:$0xff] %v587_v33 }
  0x43   : > { %v591_v35 = vld [vmem:[%s2148_s30 + $0x460] sm:$0xff]  ;;  %590 = vst [vmem:[%s2153_s11 + $0x110] sm:$0xff] %v589_v34 }
  0x44   : > { %592 = vst [vmem:[%s2153_s11 + $0x118] sm:$0xff] %v591_v35  ;;  %v593_v36 = vld [vmem:[%s2148_s30 + $0x480] sm:$0xff] }
  0x45   : > { %v595_v37 = vld [vmem:[%s2148_s30 + $0x4a0] sm:$0xff]  ;;  %594 = vst [vmem:[%s2153_s11 + $0x120] sm:$0xff] %v593_v36 }
  0x46   : > { %v597_v38 = vld [vmem:[%s2148_s30 + $0x4c0] sm:$0xff]  ;;  %596 = vst [vmem:[%s2153_s11 + $0x128] sm:$0xff] %v595_v37 }
  0x47   : > { %598 = vst [vmem:[%s2153_s11 + $0x130] sm:$0xff] %v597_v38  ;;  %v599_v39 = vld [vmem:[%s2148_s30 + $0x4e0] sm:$0xff] }
  0x48   : > { %v601_v40 = vld [vmem:[%s2148_s30 + $0x500] sm:$0xff]  ;;  %600 = vst [vmem:[%s2153_s11 + $0x138] sm:$0xff] %v599_v39 }
  0x49   : > { %v603_v41 = vld [vmem:[%s2148_s30 + $0x520] sm:$0xff]  ;;  %602 = vst [vmem:[%s2153_s11 + $0x140] sm:$0xff] %v601_v40 }
  0x4a   : > { %604 = vst [vmem:[%s2153_s11 + $0x148] sm:$0xff] %v603_v41  ;;  %v605_v42 = vld [vmem:[%s2148_s30 + $0x540] sm:$0xff] }
  0x4b   : > { %v607_v43 = vld [vmem:[%s2148_s30 + $0x560] sm:$0xff]  ;;  %606 = vst [vmem:[%s2153_s11 + $0x150] sm:$0xff] %v605_v42 }
  0x4c   : > { %v609_v44 = vld [vmem:[%s2148_s30 + $0x580] sm:$0xff]  ;;  %608 = vst [vmem:[%s2153_s11 + $0x158] sm:$0xff] %v607_v43 }
  0x4d   : > { %610 = vst [vmem:[%s2153_s11 + $0x160] sm:$0xff] %v609_v44  ;;  %v611_v45 = vld [vmem:[%s2148_s30 + $0x5a0] sm:$0xff] }
  0x4e   : > { %v613_v46 = vld [vmem:[%s2148_s30 + $0x5c0] sm:$0xff]  ;;  %612 = vst [vmem:[%s2153_s11 + $0x168] sm:$0xff] %v611_v45 }
  0x4f   : > { %v615_v47 = vld [vmem:[%s2148_s30 + $0x5e0] sm:$0xff]  ;;  %614 = vst [vmem:[%s2153_s11 + $0x170] sm:$0xff] %v613_v46 }
  0x50   : > { %616 = vst [vmem:[%s2153_s11 + $0x178] sm:$0xff] %v615_v47  ;;  %v617_v48 = vld [vmem:[%s2148_s30 + $0x600] sm:$0xff] }
  0x51   : > { %v619_v49 = vld [vmem:[%s2148_s30 + $0x620] sm:$0xff]  ;;  %618 = vst [vmem:[%s2153_s11 + $0x180] sm:$0xff] %v617_v48 }
  0x52   : > { %v621_v50 = vld [vmem:[%s2148_s30 + $0x640] sm:$0xff]  ;;  %620 = vst [vmem:[%s2153_s11 + $0x188] sm:$0xff] %v619_v49 }
  0x53   : > { %622 = vst [vmem:[%s2153_s11 + $0x190] sm:$0xff] %v621_v50  ;;  %v623_v51 = vld [vmem:[%s2148_s30 + $0x660] sm:$0xff] }
  0x54   : > { %v625_v52 = vld [vmem:[%s2148_s30 + $0x680] sm:$0xff]  ;;  %624 = vst [vmem:[%s2153_s11 + $0x198] sm:$0xff] %v623_v51 }
  0x55   : > { %v627_v53 = vld [vmem:[%s2148_s30 + $0x6a0] sm:$0xff]  ;;  %626 = vst [vmem:[%s2153_s11 + $0x1a0] sm:$0xff] %v625_v52 }
  0x56   : > { %628 = vst [vmem:[%s2153_s11 + $0x1a8] sm:$0xff] %v627_v53  ;;  %v629_v54 = vld [vmem:[%s2148_s30 + $0x6c0] sm:$0xff] }
  0x57   : > { %v631_v55 = vld [vmem:[%s2148_s30 + $0x6e0] sm:$0xff]  ;;  %630 = vst [vmem:[%s2153_s11 + $0x1b0] sm:$0xff] %v629_v54 }
  0x58   : > { %v633_v56 = vld [vmem:[%s2148_s30 + $0x700] sm:$0xff]  ;;  %632 = vst [vmem:[%s2153_s11 + $0x1b8] sm:$0xff] %v631_v55 }
  0x59   : > { %634 = vst [vmem:[%s2153_s11 + $0x1c0] sm:$0xff] %v633_v56  ;;  %v635_v57 = vld [vmem:[%s2148_s30 + $0x720] sm:$0xff] }
  0x5a   : > { %v637_v58 = vld [vmem:[%s2148_s30 + $0x740] sm:$0xff]  ;;  %636 = vst [vmem:[%s2153_s11 + $0x1c8] sm:$0xff] %v635_v57 }
  0x5b   : > { %v639_v59 = vld [vmem:[%s2148_s30 + $0x760] sm:$0xff]  ;;  %638 = vst [vmem:[%s2153_s11 + $0x1d0] sm:$0xff] %v637_v58 }
  0x5c   : > { %640 = vst [vmem:[%s2153_s11 + $0x1d8] sm:$0xff] %v639_v59  ;;  %v641_v60 = vld [vmem:[%s2148_s30 + $0x780] sm:$0xff] }
  0x5d   : > { %v643_v61 = vld [vmem:[%s2148_s30 + $0x7a0] sm:$0xff]  ;;  %642 = vst [vmem:[%s2153_s11 + $0x1e0] sm:$0xff] %v641_v60 }
  0x5e   : > { %v645_v62 = vld [vmem:[%s2148_s30 + $0x7c0] sm:$0xff]  ;;  %644 = vst [vmem:[%s2153_s11 + $0x1e8] sm:$0xff] %v643_v61 }
  0x5f   : > { %646 = vst [vmem:[%s2153_s11 + $0x1f0] sm:$0xff] %v645_v62  ;;  %v647_v63 = vld [vmem:[%s2148_s30 + $0x7e0] sm:$0xff] }
  0x60   : > { %648 = vst [vmem:[%s2153_s11 + $0x1f8] sm:$0xff] %v647_v63 }
  0x61 PF: > { %p1717_p7 = scmp.ge.s32.totalorder %s2030_s19, 1  ;;  %p669_p8 = scmp.lt.s32.totalorder %s2030_s19, 9 }
  0x63   : > { %p670_p9 = pnand %p1717_p7, %p669_p8 }
  0x64   : > { %s676_s12 = sand.u32 (!%p670_p9), 1, %s2006_s13   ;;  %p740_p10 = scmp.lt.s32.totalorder (!%p670_p9), %s2018_s16, 1 }
  0x65   : > { %673 = sbr.rel (%p670_p9) target bundleno = 446 (0x1be), region = 94  ;;  %s1718_s22 = sshll.u32 (!%p670_p9), %s676_s12, 9 }
  0x66   : > { %s1723_s23 = sshll.u32 (!%p670_p9), %s2014_s15, 1  ;;  %s2497_s0 = sld [smem:[#allocation11_spill]] (!%p670_p9) }
  0x67   : > { %p758_p11 = scmp.lt.s32.totalorder (!%p670_p9), %s1723_s23, 7  ;;  %s2314_s7 = scalar_lea.vmem (!%p670_p9), [#allocation3], %s1718_s22 }
  0x68   : > { %p1727_p12 = scmp.ne.s32.totalorder (!%p670_p9), %s2014_s15, 0 }
  0x6a   : > { %s2517_s16 = smov (!%p740_p10, %s2018_s16), 1  ;;  %s2519_s23 = smov (!%p758_p11, %s1723_s23), 7 }
  0x6b   : > { %s1719_s25 = sshll.u32 %s2517_s16, 3  ;;  %s1721_s26 = sshll.u32 %s2517_s16, 2 }
  0x6c   : > { %s743_s29 = scalar_lea.vmem %s2497_s0, %s1719_s25  ;;  %s747_s13 = scalar_lea.vmem %s2471_s1, %s1719_s25 }
  0x6d   : > { %s751_s21 = scalar_lea.vmem %s2472_s2, %s1721_s26  ;;  %s755_s17 = scalar_lea.vmem %s2473_s3, %s1721_s26 }
  0x6e   : > { %s760_s16 = scalar_lea.vmem %s2478_s8, %s2519_s23  ;;  %s765_s27 = scalar_lea.vmem %s2479_s9, %s2519_s23 }
  0x6f   : > { %s773_s28 = sadd.s32 %s1719_s25, %s2519_s23  ;;  %779 = sbr.rel (%p1727_p12) target bundleno = 167 (0xa7), region = 102 }
  0x70   : > { %s2312_s11 = scalar_lea.vmem %s2480_s10, %s773_s28  ;;  %s2498_s28 = sld [smem:[#allocation12_spill]] (!%p1727_p12) }
  0x74   : > { %v804_v0 = vlaneseq  ;;  %v1805_v1 = vld [vmem:[%s743_s29] sm:$0xff]   ;;  %v2032_v2 = vmov 1983009808   ;;  %v1874_v6 = vld [vmem:[%s2474_s4 + $0x10] ss:$8 sps:$4 sm:$0xff]   ;;  %vm984_vm0 = vcmask 1040384  }
  0x75   : > { %v802_v3 = vunpack.c.l.s4 %v2032_v2  ;;  %v1872_v5 = vld [vmem:[%s2474_s4] ss:$8 sps:$4 sm:$0xff]   ;;  %v1876_v8 = vld [vmem:[%s2474_s4 + $0x4] ss:$8 sps:$4 sm:$0xff]   ;;  %v1877_v10 = vld [vmem:[%s2474_s4 + $0x14] ss:$8 sps:$4 sm:$0xff]   ;;  %v1806_v14 = vunpack.c.l.bf16 %v1805_v1  ;;  %v1807_v43 = vunpack.c.h.bf16 %v1805_v1 }
  0x76   : > { %v2317_v4 = vshrl.u32 %v804_v0, 7  ;;  %v1809_v9 = vld [vmem:[%s747_s13] sm:$0xff]   ;;  %v1879_v13 = vld [vmem:[%s2474_s4 + $0x30] ss:$8 sps:$4 sm:$0x11]   ;;  %vm987_vm2 = vcmask 1041409  }
  0x77   : > { %v803_v7 = vunpack.c.0.s8 %v802_v3  ;;  %v1878_v12 = vld [vmem:[%s2474_s4 + $0x20] ss:$8 sps:$4 sm:$0x11]   ;;  %v1810_v20 = vunpack.c.l.bf16 %v1809_v9  ;;  %v2033_v37 = vmov 857870592   ;;  %v1811_v47 = vunpack.c.h.bf16 %v1809_v9 }
  0x78   : > { %v784_v15 = vld [vmem:[%s751_s21] sm:$0xf]  ;;  %v909_v38 = vunpack.c.l.s4 %v2033_v37  ;;  %v2034_v2 = vmov 1966171168   ;;  %vm985_vm1 = vsmask.f32 256 }
  0x79   : > { %v806_v11 = vsub.s32 %v803_v7, %v2317_v4  ;;  %v785_v21 = vld [vmem:[%s755_s17] sm:$0xf]  ;;  %v834_v26 = vunpack.c.l.bf16 %v784_v15  ;;  %v962_v3 = vunpack.c.l.s4 %v2034_v2  ;;  %vm988_vm3 = vsmask.f32 1280  ;;  %vm2346_vm4 = vmand %vm984_vm0, %vm985_vm1 }
  0x7a   : > { %v839_v31 = vunpack.c.l.bf16 %v785_v21  ;;  %v910_v51 = vunpack.c.0.s8 %v909_v38  ;;  %v906_v58 = vld [vmem:[%s2475_s5] sm:$0xf]  ;;  %v933_v7 = vsub.s32 0, %v2317_v4  ;;  %vm2353_vm5 = vmand %vm987_vm2, %vm988_vm3  ;;  %vm991_vm6 = vcmask 1042434  }
  0x7b   : > { %v807_v16 = vrot.slane %v1872_v5, %v806_v11  ;;  %v814_v17 = vrot.slane %v1874_v6, %v806_v11  ;;  %v848_v18 = vrot.slane %v1876_v8, %v806_v11  ;;  %v855_v19 = vrot.slane %v1877_v10, %v806_v11  ;;  %v917_v61 = vld [vmem:[%s2498_s28] sm:$0xf]  ;;  %vm990_vm8 = vmor %vm2353_vm5, %vm2346_vm4 }
  0x7c   : > { %v889_v24 = vrot.slane %v1878_v12, %v806_v11  ;;  %v896_v25 = vrot.slane %v1879_v13, %v806_v11  ;;  %v913_v57 = vsub.s32 %v910_v51, %v2317_v4  ;;  %v963_v8 = vunpack.c.0.s8 %v962_v3 }
  0x7d   : > { %v815_v22 = vcombine.low %v807_v16, %v814_v17  ;;  %v825_v23 = vcombine.high %v807_v16, %v814_v17  ;;  %v856_v30 = vcombine.low %v848_v18, %v855_v19  ;;  %v867_v36 = vcombine.high %v848_v18, %v855_v19 }
  0x7e   : > { %v897_v35 = vcombine.low %v889_v24, %v896_v25  ;;  %v914_v63 = vrot.slane %v906_v58, %v913_v57  ;;  %v925_v1 = vrot.slane %v917_v61, %v913_v57  ;;  %v937_v11 = vsub.s32 2, %v2317_v4 }
  0x7f   : > { %v817_v27 = vmul.f32 %v1806_v14, %v815_v22  ;;  %v1728_v28 = vrot.slane %v815_v22, 9  ;;  %v826_v29 = vrot.slane %v825_v23, 7  ;;  %v860_v42 = vmul.f32 %v856_v30, %v834_v26 }
  0x80   : > { %v858_v45 = vmul.f32 %v856_v30, %v839_v31  ;;  %v898_v46 = vrot.slane %v897_v35, 7  ;;  %v1731_v50 = vrot.slane %v867_v36, 9  ;;  %v869_v53 = vmul.f32 %v1807_v43, %v867_v36 }
  0x81   : > { %v823_v32 = vmul.f32 %v1810_v20, %v1728_v28  ;;  %v828_v33 = vmul.f32 %v1806_v14, %v826_v29  ;;  %v835_v34 = vrot.slane %v826_v29, 2  ;;  %v1730_v49 = vrot.slane %v860_v42, 9 }
  0x82   : > { %v900_v54 = vmul.f32 %v1807_v43, %v898_v46  ;;  %v875_v56 = vmul.f32 %v1811_v47, %v1731_v50  ;;  %v941_v12 = vsub.s32 4, %v2317_v4  ;;  %v945_v13 = vsub.s32 6, %v2317_v4 }
  0x83   : > { %v824_v39 = vadd.f32 %v823_v32, %v817_v27  ;;  %v1729_v40 = vrot.slane %v828_v33, 9  ;;  %v837_v41 = vmul.f32 %v835_v34, %v834_v26  ;;  %vm992_vm7 = vsmask.f32 2304 }
  0x84   : > { %v1732_v60 = vrot.slane %v900_v54, 9  ;;  %v966_v16 = vsub.s32 %v963_v8, %v2317_v4  ;;  %vm993_vm9 = vmand %vm991_vm6, %vm992_vm7  ;;  %vm995_vm10 = vcmask 1043459   ;;  %vm996_vm11 = vsmask.f32 3328  ;;  %v999_v4 = vld [vmem:[#allocation2] sm:$0xf] }
  0x85   : > { %v833_v44 = vadd.f32 %v1729_v40, %v824_v39  ;;  %vm994_vm12 = vmor %vm993_vm9, %vm990_vm8 }
  0x86   : > { %vm997_vm13 = vmand %vm995_vm10, %vm996_vm11 }
  0x87   : > { %v838_v48 = vadd.f32 %v837_v41, %v833_v44  ;;  %vm998_vm14 = vmor %vm997_vm13, %vm994_vm12 }
  0x89   : > { %v859_v52 = vadd.f32 %v858_v45, %v838_v48 }
  0x8b   : > { %v865_v55 = vadd.f32 %v1730_v49, %v859_v52 }
  0x8d   : > { %v870_v59 = vadd.f32 %v869_v53, %v865_v55 }
  0x8f   : > { %v876_v62 = vadd.f32 %v875_v56, %v870_v59 }
  0x91   : > { %v905_v0 = vadd.f32 %v1732_v60, %v876_v62 }
  0x93   : > { %v916_v5 = vmul.f32 %v914_v63, %v905_v0 }
  0x95   : > { %v927_v6 = vadd.f32 %v925_v1, %v916_v5 }
  0x97   : > { %v928_v10 = vmax.f32 %v927_v6, 0.0 }
  0x99   : > { %v929_v15 = vmin.f32 %v928_v10, 6.0 }
  0x9b   : > { %v934_v17 = vrot.slane %v929_v15, %v933_v7  ;;  %v938_v18 = vrot.slane %v929_v15, %v937_v11  ;;  %v942_v19 = vrot.slane %v929_v15, %v941_v12  ;;  %v946_v20 = vrot.slane %v929_v15, %v945_v13 }
  0x9d   : > { %v1733_v21 = vpack.c.bf16 %v938_v18, %v934_v17  ;;  %v1734_v22 = vpack.c.bf16 %v946_v20, %v942_v19 }
  0x9f   : > { %v967_v23 = vrot.slane %v1733_v21, %v966_v16  ;;  %v974_v24 = vrot.slane %v1734_v22, %v966_v16 }
  0xa1   : > { %v975_v25 = vcombine.low %v967_v23, %v974_v24 }
  0xa3   : > { %v982_v26 = vrot.slane %v975_v25, %v966_v16 }
  0xa5   : > { %v1000_v27 = vsel %vm998_vm14, %v982_v26, %v999_v4 }
  0xa6   : > { %1001 = vst [vmem:[#allocation2] sm:$0xf] %v1000_v27 }
  0xa7 PF: > { %v1880_v28 = vld [vmem:[%s2314_s7 + $0x74] ss:$8 sps:$4 sm:$0xff]   ;;  %v1884_v30 = vld [vmem:[%s2314_s7 + $0x70] ss:$8 sps:$4 sm:$0xff]   ;;  %v1886_v32 = vld [vmem:[%s2314_s7 + $0x64] ss:$8 sps:$4 sm:$0xff]   ;;  %v1079_v5 = vlaneseq }
  0xa8   : > { %v1882_v29 = vld [vmem:[%s2314_s7 + $0x174] ss:$8 sps:$4 sm:$0xff]   ;;  %1416 = vmatprep.subr.bf16.mxu0 %v1880_v28  ;;  %v1885_v31 = vld [vmem:[%s2314_s7 + $0x170] ss:$8 sps:$4 sm:$0xff]   ;;  %v1888_v33 = vld [vmem:[%s2314_s7 + $0x164] ss:$8 sps:$4 sm:$0xff]  }
  0xa9   : > { %1457 = vmatprep.subr.bf16.mxu1 %v1882_v29  ;;  %1417 = vmatpush1.bf16.msra.mxu0 %v1884_v30  ;;  %v1890_v34 = vld [vmem:[%s2314_s7 + $0x60] ss:$8 sps:$4 sm:$0xff]   ;;  %v1892_v36 = vld [vmem:[%s2314_s7 + $0x54] ss:$8 sps:$4 sm:$0xff]   ;;  %v1896_v38 = vld [vmem:[%s2314_s7 + $0x50] ss:$8 sps:$4 sm:$0xff]  }
  0xaa   : > { %1458 = vmatpush1.bf16.msra.mxu1 %v1885_v31  ;;  %1418 = vmatprep.subr.bf16.mxu0 %v1886_v32  ;;  %v1891_v35 = vld [vmem:[%s2314_s7 + $0x160] ss:$8 sps:$4 sm:$0xff]   ;;  %v1894_v37 = vld [vmem:[%s2314_s7 + $0x154] ss:$8 sps:$4 sm:$0xff]   ;;  %v1897_v39 = vld [vmem:[%s2314_s7 + $0x150] ss:$8 sps:$4 sm:$0xff]  }
  0xab   : > { %1459 = vmatprep.subr.bf16.mxu1 %v1888_v33  ;;  %v1898_v40 = vld [vmem:[%s2314_s7 + $0x44] ss:$8 sps:$4 sm:$0xff]   ;;  %v1902_v42 = vld [vmem:[%s2314_s7 + $0x40] ss:$8 sps:$4 sm:$0xff]   ;;  %v1904_v44 = vld [vmem:[%s2314_s7 + $0x34] ss:$8 sps:$4 sm:$0xff]  }
  0xac   : > { %v1900_v41 = vld [vmem:[%s2314_s7 + $0x144] ss:$8 sps:$4 sm:$0xff]   ;;  %v1903_v43 = vld [vmem:[%s2314_s7 + $0x140] ss:$8 sps:$4 sm:$0xff]   ;;  %v1906_v45 = vld [vmem:[%s2314_s7 + $0x134] ss:$8 sps:$4 sm:$0xff]  }
  0xad   : > { %1419 = vmatpush1.bf16.msra.mxu0 %v1890_v34  ;;  %v1908_v46 = vld [vmem:[%s2314_s7 + $0x30] ss:$8 sps:$4 sm:$0xff]   ;;  %v1910_v48 = vld [vmem:[%s2314_s7 + $0x24] ss:$8 sps:$4 sm:$0xff]   ;;  %v1914_v50 = vld [vmem:[%s2314_s7 + $0x20] ss:$8 sps:$4 sm:$0xff]  }
  0xae   : > { %1460 = vmatpush1.bf16.msra.mxu1 %v1891_v35  ;;  %1420 = vmatprep.subr.bf16.mxu0 %v1892_v36  ;;  %v1909_v47 = vld [vmem:[%s2314_s7 + $0x130] ss:$8 sps:$4 sm:$0xff]   ;;  %v1912_v49 = vld [vmem:[%s2314_s7 + $0x124] ss:$8 sps:$4 sm:$0xff]   ;;  %v1915_v51 = vld [vmem:[%s2314_s7 + $0x120] ss:$8 sps:$4 sm:$0xff]  }
  0xaf   : > { %1461 = vmatprep.subr.bf16.mxu1 %v1894_v37  ;;  %v1916_v52 = vld [vmem:[%s2314_s7 + $0x14] ss:$8 sps:$4 sm:$0xff]   ;;  %v1920_v54 = vld [vmem:[%s2314_s7 + $0x10] ss:$8 sps:$4 sm:$0xff]   ;;  %v1922_v56 = vld [vmem:[%s2314_s7 + $0x4] ss:$8 sps:$4 sm:$0xff]  }
  0xb0   : > { %v1918_v53 = vld [vmem:[%s2314_s7 + $0x114] ss:$8 sps:$4 sm:$0xff]   ;;  %v1921_v55 = vld [vmem:[%s2314_s7 + $0x110] ss:$8 sps:$4 sm:$0xff]   ;;  %v1924_v57 = vld [vmem:[%s2314_s7 + $0x104] ss:$8 sps:$4 sm:$0xff]  }
  0xb1   : > { %1421 = vmatpush1.bf16.msra.mxu0 %v1896_v38  ;;  %v1926_v58 = vld [vmem:[%s2314_s7] ss:$8 sps:$4 sm:$0xff]   ;;  %v1928_v60 = vld [vmem:[%s2314_s7 + $0xf4] ss:$8 sps:$4 sm:$0xff]   ;;  %v1932_v62 = vld [vmem:[%s2314_s7 + $0xf0] ss:$8 sps:$4 sm:$0xff]  }
  0xb2   : > { %1462 = vmatpush1.bf16.msra.mxu1 %v1897_v39  ;;  %1422 = vmatprep.subr.bf16.mxu0 %v1898_v40  ;;  %v1927_v59 = vld [vmem:[%s2314_s7 + $0x100] ss:$8 sps:$4 sm:$0xff]   ;;  %v1930_v61 = vld [vmem:[%s2314_s7 + $0x1f4] ss:$8 sps:$4 sm:$0xff]   ;;  %v1933_v63 = vld [vmem:[%s2314_s7 + $0x1f0] ss:$8 sps:$4 sm:$0xff]  }
  0xb3   : > { %1463 = vmatprep.subr.bf16.mxu1 %v1900_v41  ;;  %v1934_v0 = vld [vmem:[%s2314_s7 + $0xe4] ss:$8 sps:$4 sm:$0xff]   ;;  %v2035_v2 = vmov 1966171168   ;;  %v1938_v6 = vld [vmem:[%s2314_s7 + $0xe0] ss:$8 sps:$4 sm:$0xff]  }
  0xb4   : > { %v1936_v1 = vld [vmem:[%s2314_s7 + $0x1e4] ss:$8 sps:$4 sm:$0xff]   ;;  %v1077_v3 = vunpack.c.l.s4 %v2035_v2  ;;  %v1939_v7 = vld [vmem:[%s2314_s7 + $0x1e0] ss:$8 sps:$4 sm:$0xff]   ;;  %v1940_v8 = vld [vmem:[%s2314_s7 + $0xd4] ss:$8 sps:$4 sm:$0xff]  }
  0xb5   : > { %1423 = vmatpush1.bf16.msra.mxu0 %v1902_v42  ;;  %v1942_v9 = vld [vmem:[%s2314_s7 + $0x1d4] ss:$8 sps:$4 sm:$0xff]   ;;  %v2404_v11 = vshrl.u32 %v1079_v5, 7  ;;  %v1944_v12 = vld [vmem:[%s2314_s7 + $0xd0] ss:$8 sps:$4 sm:$0xff]   ;;  %vm1550_vm15 = vcmask 1040384  }
  0xb6   : > { %1464 = vmatpush1.bf16.msra.mxu1 %v1903_v43  ;;  %1424 = vmatprep.subr.bf16.mxu0 %v1904_v44  ;;  %v1078_v10 = vunpack.c.0.s8 %v1077_v3  ;;  %v1945_v13 = vld [vmem:[%s2314_s7 + $0x1d0] ss:$8 sps:$4 sm:$0xff]   ;;  %v1946_v14 = vld [vmem:[%s2314_s7 + $0xc4] ss:$8 sps:$4 sm:$0xff]   ;;  %v1950_v18 = vld [vmem:[%s2314_s7 + $0xc0] ss:$8 sps:$4 sm:$0xff]  }
  0xb7   : > { %1465 = vmatprep.subr.bf16.mxu1 %v1906_v45  ;;  %v1948_v15 = vld [vmem:[%s2314_s7 + $0x1c4] ss:$8 sps:$4 sm:$0xff]   ;;  %v1735_v17 = vld.sshfl [vmem:[#allocation2] sm:$0x33 pattern:$0x75316420] }
  0xb8   : > { %v2411_v16 = vsub.s32 %v1078_v10, %v2404_v11  ;;  %v1951_v19 = vld [vmem:[%s2314_s7 + $0x1c0] ss:$8 sps:$4 sm:$0xff]   ;;  %v1075_v20 = vcombine.high %v1735_v17, %v1735_v17  ;;  %v1952_v21 = vld [vmem:[%s2314_s7 + $0xb4] ss:$8 sps:$4 sm:$0xff]   ;;  %v1956_v24 = vld [vmem:[%s2314_s7 + $0xb0] ss:$8 sps:$4 sm:$0xff]  }
  0xb9   : > { %1425 = vmatpush1.bf16.msra.mxu0 %v1908_v46  ;;  %v1954_v22 = vld [vmem:[%s2314_s7 + $0x1b4] ss:$8 sps:$4 sm:$0xff]   ;;  %v1957_v25 = vld [vmem:[%s2314_s7 + $0x1b0] ss:$8 sps:$4 sm:$0xff]   ;;  %v1958_v26 = vld [vmem:[%s2314_s7 + $0xa4] ss:$8 sps:$4 sm:$0xff]  }
  0xba   : > { %1466 = vmatpush1.bf16.msra.mxu1 %v1909_v47  ;;  %1426 = vmatprep.subr.bf16.mxu0 %v1910_v48  ;;  %v1089_v23 = vrot.slane %v1075_v20, %v2411_v16  ;;  %v1960_v27 = vld [vmem:[%s2314_s7 + $0x1a4] ss:$8 sps:$4 sm:$0xff]   ;;  %v1962_v28 = vld [vmem:[%s2314_s7 + $0xa0] ss:$8 sps:$4 sm:$0xff]   ;;  %v1964_v30 = vld [vmem:[%s2314_s7 + $0x94] ss:$8 sps:$4 sm:$0xff]   ;;  %v1082_v36 = vrot.slane %v1735_v17, %v2411_v16 }
  0xbb   : > { %1467 = vmatprep.subr.bf16.mxu1 %v1912_v49  ;;  %v1963_v29 = vld [vmem:[%s2314_s7 + $0x1a0] ss:$8 sps:$4 sm:$0xff]   ;;  %v1966_v31 = vld [vmem:[%s2314_s7 + $0x194] ss:$8 sps:$4 sm:$0xff]   ;;  %v1968_v32 = vld [vmem:[%s2314_s7 + $0x90] ss:$8 sps:$4 sm:$0xff]  }
  0xbc   : > { %v1091_v4 = vcombine.high %v1089_v23, %v1089_v23  ;;  %1448 = vmatprep.mubr.bf16.mxu0 %v1089_v23  ;;  %v1969_v33 = vld [vmem:[%s2314_s7 + $0x190] ss:$8 sps:$4 sm:$0xff]   ;;  %v1970_v34 = vld [vmem:[%s2314_s7 + $0x84] ss:$8 sps:$4 sm:$0xff]   ;;  %v1974_v37 = vld [vmem:[%s2314_s7 + $0x80] ss:$8 sps:$4 sm:$0xff]   ;;  %v1090_v39 = vcombine.high %v1082_v36, %v1082_v36 }
  0xbd   : > { %1427 = vmatpush1.bf16.msra.mxu0 %v1914_v50  ;;  %v1972_v35 = vld [vmem:[%s2314_s7 + $0x184] ss:$8 sps:$4 sm:$0xff]   ;;  %v1975_v38 = vld [vmem:[%s2314_s7 + $0x180] ss:$8 sps:$4 sm:$0xff]   ;;  %v1502_v40 = vsub.s32 0, %v2404_v11  ;;  %v1506_v42 = vsub.s32 1, %v2404_v11 }
  0xbe   : > { %1468 = vmatpush1.bf16.msra.mxu1 %v1915_v51  ;;  %1428 = vmatprep.subr.bf16.mxu0 %v1916_v52  ;;  %v1498_v41 = vld [vmem:[%s760_s16] sm:$0x3]  ;;  %vm1551_vm0 = vsmask.f32 256  ;;  %vm1553_vm1 = vcmask 1041409  }
  0xbf   : > { %1469 = vmatprep.subr.bf16.mxu1 %v1918_v53  ;;  %1489 = vmatprep.mubr.bf16.mxu1 %v1091_v4  ;;  %v1512_v43 = vld [vmem:[%s765_s27] sm:$0x3]  ;;  %v1503_v44 = vrot.slane %v1498_v41, %v1502_v40  ;;  %v1507_v49 = vrot.slane %v1498_v41, %v1506_v42  ;;  %vm1554_vm2 = vsmask.f32 1280  ;;  %vm1552_vm3 = vmand %vm1550_vm15, %vm1551_vm0 }
  0xc0   : > { %v1517_v48 = vrot.slane %v1512_v43, %v1502_v40  ;;  %vm1555_vm4 = vmand %vm1553_vm1, %vm1554_vm2  ;;  %v1557_v5 = vld [vmem:[%s2312_s11] sm:$0x3] }
  0xc1   : > { %1429 = vmatpush1.bf16.msra.mxu0 %v1920_v54  ;;  %v1521_v54 = vrot.slane %v1512_v43, %v1506_v42  ;;  %vm1556_vm5 = vmor %vm1555_vm4, %vm1552_vm3 }
  0xc2   : > { %1470 = vmatpush1.bf16.msra.mxu1 %v1921_v55  ;;  %1430 = vmatprep.subr.bf16.mxu0 %v1922_v56 }
  0xc3   : > { %1471 = vmatprep.subr.bf16.mxu1 %v1924_v57 }
  0xc5   : > { %1431 = vmatpush1.bf16.msra.mxu0 %v1926_v58 }
  0xc6   : > { %1472 = vmatpush1.bf16.msra.mxu1 %v1927_v59  ;;  %1432 = vmatprep.subr.bf16.mxu0 %v1928_v60 }
  0xc7   : > { %1473 = vmatprep.subr.bf16.mxu1 %v1930_v61 }
  0xc9   : > { %1433 = vmatpush2.bf16.msra.mxu0 %v1932_v62 }
  0xca   : > { %1474 = vmatpush2.bf16.msra.mxu1 %v1933_v63  ;;  %1434 = vmatprep.subr.bf16.mxu0 %v1934_v0 }
  0xcb   : > { %1475 = vmatprep.subr.bf16.mxu1 %v1936_v1 }
  0xcd   : > { %1435 = vmatpush2.bf16.msra.mxu0 %v1938_v6 }
  0xce   : > { %1476 = vmatpush2.bf16.msra.mxu1 %v1939_v7  ;;  %1436 = vmatprep.subr.bf16.mxu0 %v1940_v8 }
  0xcf   : > { %1477 = vmatprep.subr.bf16.mxu1 %v1942_v9 }
  0xd1   : > { %1437 = vmatpush2.bf16.msra.mxu0 %v1944_v12 }
  0xd2   : > { %1478 = vmatpush2.bf16.msra.mxu1 %v1945_v13  ;;  %1438 = vmatprep.subr.bf16.mxu0 %v1946_v14 }
  0xd3   : > { %1479 = vmatprep.subr.bf16.mxu1 %v1948_v15 }
  0xd5   : > { %1439 = vmatpush2.bf16.msra.mxu0 %v1950_v18 }
  0xd6   : > { %1480 = vmatpush2.bf16.msra.mxu1 %v1951_v19  ;;  %1440 = vmatprep.subr.bf16.mxu0 %v1952_v21 }
  0xd7   : > { %1481 = vmatprep.subr.bf16.mxu1 %v1954_v22 }
  0xd9   : > { %1441 = vmatpush2.bf16.msra.mxu0 %v1956_v24 }
  0xda   : > { %1482 = vmatpush2.bf16.msra.mxu1 %v1957_v25  ;;  %1442 = vmatprep.subr.bf16.mxu0 %v1958_v26 }
  0xdb   : > { %1483 = vmatprep.subr.bf16.mxu1 %v1960_v27 }
  0xdd   : > { %1443 = vmatpush2.bf16.msra.mxu0 %v1962_v28 }
  0xde   : > { %1484 = vmatpush2.bf16.msra.mxu1 %v1963_v29  ;;  %1444 = vmatprep.subr.bf16.mxu0 %v1964_v30 }
  0xdf   : > { %1485 = vmatprep.subr.bf16.mxu1 %v1966_v31 }
  0xe1   : > { %1445 = vmatpush2.bf16.msra.mxu0 %v1968_v32 }
  0xe2   : > { %1486 = vmatpush2.bf16.msra.mxu1 %v1969_v33  ;;  %1446 = vmatprep.subr.bf16.mxu0 %v1970_v34 }
  0xe3   : > { %1487 = vmatprep.subr.bf16.mxu1 %v1972_v35 }
  0xe5   : > { %1447 = vmatpush2.bf16.msra.mxu0 %v1974_v37 }
  0xe6   : > { %1488 = vmatpush2.bf16.msra.mxu1 %v1975_v38 }
  0xe8   : > { %1449 = vmatmul.mubr.bf16.vlgmr.msra.gmra.mxu0 %v1082_v36 }
  0xe9   : > { %1490 = vmatmul.mubr.bf16.vlgmr.msra.gmra.mxu1 %v1090_v39 }
 0x1a8   : > { %v1450_v45 = vpop.f32.mrf.mxu0 }
 0x1a9   : > { %v1491_v46 = vpop.f32.mrf.mxu1 }
 0x1aa   : > { %v1492_v47 = vadd.f32 %v1491_v46, %v1450_v45  ;;  %v1452_v50 = vpop.f32.mrf.mxu0 }
 0x1ab   : > { %v1493_v51 = vpop.f32.mrf.mxu1 }
 0x1ac   : > { %v1510_v52 = vmul.f32 %v1503_v44, %v1492_v47  ;;  %v1494_v53 = vadd.f32 %v1493_v51, %v1452_v50  ;;  %v1454_v55 = vpop.f32.mrf.mxu0 }
 0x1ad   : > { %v1495_v56 = vpop.f32.mrf.mxu1 }
 0x1ae   : > { %v1524_v57 = vadd.f32 %v1517_v48, %v1510_v52  ;;  %v1511_v58 = vmul.f32 %v1507_v49, %v1494_v53  ;;  %v1455_v59 = vpop.f32.mrf.mxu0 }
 0x1af   : > { %v1496_v60 = vpop.f32.mrf.mxu1 }
 0x1b0   : > { %v1526_v61 = vmax.f32 %v1524_v57, 0.0  ;;  %v1525_v62 = vadd.f32 %v1521_v54, %v1511_v58 }
 0x1b2   : > { %v1527_v63 = vmax.f32 %v1525_v62, 0.0  ;;  %v1528_v0 = vmin.f32 %v1526_v61, 6.0 }
 0x1b4   : > { %v1529_v1 = vmin.f32 %v1527_v63, 6.0 }
 0x1b6   : > { %v1800_v2 = vpack.c.bf16 %v1529_v1, %v1528_v0 }
 0x1b8   : > { %v1541_v3 = vrot.slane %v1800_v2, %v2411_v16 }
 0x1ba   : > { %v1548_v6 = vrot.slane %v1541_v3, %v2411_v16 }
 0x1bc   : > { %v1558_v7 = vsel %vm1556_vm5, %v1548_v6, %v1557_v5 }
 0x1bd   : > { %1559 = vst [vmem:[%s2312_s11] sm:$0x3] %v1558_v7 }
 0x1be PF: > { %s2503_s23 = sld [smem:[#allocation7_spill]] }
 0x1bf   : > { %s2504_s13 = sld [smem:[#allocation4_spill]] }
 0x1c0   : > { %s2505_s14 = sld [smem:[#allocation10_spill]] }
 0x1c1   : > { %s2506_s15 = sld [smem:[#allocation5_spill]] }
 0x1c2   : > { %s2507_s16 = sld [smem:[#allocation6_spill]] }
 0x1c3   : > { %s2508_s17 = sld [smem:[#allocation8_spill]] }
 0x1c4   : > { %s20_s19 = sadd.s32 1, %s2503_s23   ;;  %s2509_s18 = sld [smem:[#allocation9_spill]] }
 0x1c5   : > { %p17_p13 = scmp.ge.s32.totalorder %s20_s19, 10  }
 0x1c7   :  { %19 = sbr.rel (!%p17_p13) target bundleno = 8 (0x8), region = 155 }

// kernel: mobilenetv1_forward.28
= control target key start
LH: loop header
LB: loop body
LE: loop exit
PB: predicated region body
PF: predicated region fallthrough
CT: control target
= control target key end

     0   :  { %s3768_s0 = inlined_call_operand.vmem [shape: bf16[2,3,3,1024], index: 0, kind: input, shape index: {}]   ;;  %s3769_s1 = inlined_call_operand.vmem [shape: f32[9,1024], index: 1, kind: input, shape index: {}]   ;;  %s3770_s2 = inlined_call_operand.vmem [shape: f32[1,1024], index: 2, kind: input, shape index: {}]   ;;  %s3771_s3 = inlined_call_operand.vmem [shape: f32[1,1024], index: 3, kind: input, shape index: {}]   ;;  %s3772_s4 = inlined_call_operand.vmem [shape: bf16[1024,1024], index: 4, kind: input, shape index: {}]   ;;  %s3773_s5 = inlined_call_operand.vmem [shape: f32[1,1024], index: 5, kind: input, shape index: {}]   ;;  %s3774_s6 = inlined_call_operand.vmem [shape: f32[1,1024], index: 6, kind: input, shape index: {}]   ;;  %s3775_s7 = inlined_call_operand.vmem [shape: bf16[2,1,1024], index: 7, kind: output, shape index: {}]  }
   0x1   :  { %3778 = sst [smem:[#allocation7_spill]] %s3772_s4 }
   0x2   :  { %s3109_s24 = smov 0   ;;  %s3111_s25 = smov 0  }
   0x3   :  { %s3113_s26 = smov 0   ;;  %s3115_s27 = smov 0  }
   0x4   :  { %s3117_s28 = smov 0   ;;  %s3119_s29 = smov 0  }
   0x5   :  { %s3121_s30 = smov 0  }
   0x6 LB: > { %3779 = sst [smem:[#allocation4_spill]] %s3057_s29  ;;  %s26_s8 = sadd.s32 1, %s3053_s28  ;;  %s3061_s30 = sphi %s3121_s30, %s17_s30   ;;  %s3057_s29 = sphi %s3119_s29, %s3793_s29   ;;  %s3053_s28 = sphi %s3117_s28, %s3797_s28   ;;  %s3049_s27 = sphi %s3115_s27, %s3791_s27   ;;  %s3045_s26 = sphi %s3113_s26, %s3796_s26   ;;  %s3041_s25 = sphi %s3111_s25, %s3795_s25   ;;  %s3037_s24 = sphi %s3109_s24, %s3794_s24  }
   0x7   : > { %s29_s9 = sadd.s32 1, %s3057_s29  ;;  %p27_p0 = scmp.ge.s32.totalorder %s26_s8, 4 }
   0x8   : > { %s125_s10 = sadd.s32 1, %s3041_s25  ;;  %p132_p1 = scmp.ne.s32.totalorder %s3041_s25, %s3037_s24 }
   0x9   : > { %p133_p2 = scmp.eq.s32.totalorder %s3061_s30, 0  ;;  %s3799_s8 = smov (%p27_p0, %s26_s8), 0 }
   0xa   : > { %3780 = sst [smem:[#allocation5_spill]] %s3799_s8  ;;  %s3801_s9 = smov (!%p27_p0, %s29_s9), %s3057_s29 }
   0xb   : > { %s122_s11 = ssub.s32 %s3053_s28, %s3799_s8  ;;  %p134_p3 = por %p133_p2, %p132_p1 }
   0xc   : > { %p31_p4 = scmp.ge.s32.totalorder %s3801_s9, 2  ;;  %p123_p5 = scmp.eq.s32.totalorder %s122_s11, 0 }
   0xd   : > { %p2555_p6 = scmp.ge.s32.totalorder %s3061_s30, 8 }
   0xe   : > { %s3803_s9 = smov (%p31_p4, %s3801_s9), 0 }
   0xf   : > { %3781 = sst [smem:[#allocation6_spill]] %s3803_s9  ;;  %247 = sbr.rel (%p2555_p6) target bundleno = 158 (0x9e), region = 28 }
  0x10   : > { %s3158_s12 = scalar_select %p123_p5, %s3041_s25, %s125_s10  }
  0x14   : > { %258 = sbr.rel (!%p134_p3) target bundleno = 158 (0x9e), region = 36  ;;  %s260_s13 = sand.u32 (%p134_p3), 1, %s3041_s25  }
  0x15   : > { %s2734_s14 = sshll.u32 (%p134_p3), %s3053_s28, 3  ;;  %s2556_s15 = sshll.u32 (%p134_p3), %s260_s13, 10 }
  0x16   : > { %s3782_s4 = sld [smem:[#allocation7_spill]] (%p134_p3)  ;;  %s3171_s19 = scalar_lea.vmem (%p134_p3), [#allocation3], %s2556_s15 }
  0x1c   : > { %s3166_s18 = scalar_lea.vmem %s3782_s4, %s2734_s14 }
  0x1d   : > { %v548_v0 = vld [vmem:[%s3166_s18] sm:$0xff] }
  0x1e   : > { %v550_v1 = vld [vmem:[%s3166_s18 + $0x20] sm:$0xff]  ;;  %549 = vst [vmem:[%s3171_s19] sm:$0xff] %v548_v0 }
  0x1f   : > { %v552_v2 = vld [vmem:[%s3166_s18 + $0x40] sm:$0xff]  ;;  %551 = vst [vmem:[%s3171_s19 + $0x8] sm:$0xff] %v550_v1 }
  0x20   : > { %553 = vst [vmem:[%s3171_s19 + $0x10] sm:$0xff] %v552_v2  ;;  %v554_v3 = vld [vmem:[%s3166_s18 + $0x60] sm:$0xff] }
  0x21   : > { %v556_v4 = vld [vmem:[%s3166_s18 + $0x80] sm:$0xff]  ;;  %555 = vst [vmem:[%s3171_s19 + $0x18] sm:$0xff] %v554_v3 }
  0x22   : > { %v558_v5 = vld [vmem:[%s3166_s18 + $0xa0] sm:$0xff]  ;;  %557 = vst [vmem:[%s3171_s19 + $0x20] sm:$0xff] %v556_v4 }
  0x23   : > { %559 = vst [vmem:[%s3171_s19 + $0x28] sm:$0xff] %v558_v5  ;;  %v560_v6 = vld [vmem:[%s3166_s18 + $0xc0] sm:$0xff] }
  0x24   : > { %v562_v7 = vld [vmem:[%s3166_s18 + $0xe0] sm:$0xff]  ;;  %561 = vst [vmem:[%s3171_s19 + $0x30] sm:$0xff] %v560_v6 }
  0x25   : > { %v564_v8 = vld [vmem:[%s3166_s18 + $0x100] sm:$0xff]  ;;  %563 = vst [vmem:[%s3171_s19 + $0x38] sm:$0xff] %v562_v7 }
  0x26   : > { %565 = vst [vmem:[%s3171_s19 + $0x40] sm:$0xff] %v564_v8  ;;  %v566_v9 = vld [vmem:[%s3166_s18 + $0x120] sm:$0xff] }
  0x27   : > { %v568_v10 = vld [vmem:[%s3166_s18 + $0x140] sm:$0xff]  ;;  %567 = vst [vmem:[%s3171_s19 + $0x48] sm:$0xff] %v566_v9 }
  0x28   : > { %v570_v11 = vld [vmem:[%s3166_s18 + $0x160] sm:$0xff]  ;;  %569 = vst [vmem:[%s3171_s19 + $0x50] sm:$0xff] %v568_v10 }
  0x29   : > { %571 = vst [vmem:[%s3171_s19 + $0x58] sm:$0xff] %v570_v11  ;;  %v572_v12 = vld [vmem:[%s3166_s18 + $0x180] sm:$0xff] }
  0x2a   : > { %v574_v13 = vld [vmem:[%s3166_s18 + $0x1a0] sm:$0xff]  ;;  %573 = vst [vmem:[%s3171_s19 + $0x60] sm:$0xff] %v572_v12 }
  0x2b   : > { %v576_v14 = vld [vmem:[%s3166_s18 + $0x1c0] sm:$0xff]  ;;  %575 = vst [vmem:[%s3171_s19 + $0x68] sm:$0xff] %v574_v13 }
  0x2c   : > { %577 = vst [vmem:[%s3171_s19 + $0x70] sm:$0xff] %v576_v14  ;;  %v578_v15 = vld [vmem:[%s3166_s18 + $0x1e0] sm:$0xff] }
  0x2d   : > { %v580_v16 = vld [vmem:[%s3166_s18 + $0x200] sm:$0xff]  ;;  %579 = vst [vmem:[%s3171_s19 + $0x78] sm:$0xff] %v578_v15 }
  0x2e   : > { %v582_v17 = vld [vmem:[%s3166_s18 + $0x220] sm:$0xff]  ;;  %581 = vst [vmem:[%s3171_s19 + $0x80] sm:$0xff] %v580_v16 }
  0x2f   : > { %583 = vst [vmem:[%s3171_s19 + $0x88] sm:$0xff] %v582_v17  ;;  %v584_v18 = vld [vmem:[%s3166_s18 + $0x240] sm:$0xff] }
  0x30   : > { %v586_v19 = vld [vmem:[%s3166_s18 + $0x260] sm:$0xff]  ;;  %585 = vst [vmem:[%s3171_s19 + $0x90] sm:$0xff] %v584_v18 }
  0x31   : > { %v588_v20 = vld [vmem:[%s3166_s18 + $0x280] sm:$0xff]  ;;  %587 = vst [vmem:[%s3171_s19 + $0x98] sm:$0xff] %v586_v19 }
  0x32   : > { %589 = vst [vmem:[%s3171_s19 + $0xa0] sm:$0xff] %v588_v20  ;;  %v590_v21 = vld [vmem:[%s3166_s18 + $0x2a0] sm:$0xff] }
  0x33   : > { %v592_v22 = vld [vmem:[%s3166_s18 + $0x2c0] sm:$0xff]  ;;  %591 = vst [vmem:[%s3171_s19 + $0xa8] sm:$0xff] %v590_v21 }
  0x34   : > { %v594_v23 = vld [vmem:[%s3166_s18 + $0x2e0] sm:$0xff]  ;;  %593 = vst [vmem:[%s3171_s19 + $0xb0] sm:$0xff] %v592_v22 }
  0x35   : > { %595 = vst [vmem:[%s3171_s19 + $0xb8] sm:$0xff] %v594_v23  ;;  %v596_v24 = vld [vmem:[%s3166_s18 + $0x300] sm:$0xff] }
  0x36   : > { %v598_v25 = vld [vmem:[%s3166_s18 + $0x320] sm:$0xff]  ;;  %597 = vst [vmem:[%s3171_s19 + $0xc0] sm:$0xff] %v596_v24 }
  0x37   : > { %v600_v26 = vld [vmem:[%s3166_s18 + $0x340] sm:$0xff]  ;;  %599 = vst [vmem:[%s3171_s19 + $0xc8] sm:$0xff] %v598_v25 }
  0x38   : > { %601 = vst [vmem:[%s3171_s19 + $0xd0] sm:$0xff] %v600_v26  ;;  %v602_v27 = vld [vmem:[%s3166_s18 + $0x360] sm:$0xff] }
  0x39   : > { %v604_v28 = vld [vmem:[%s3166_s18 + $0x380] sm:$0xff]  ;;  %603 = vst [vmem:[%s3171_s19 + $0xd8] sm:$0xff] %v602_v27 }
  0x3a   : > { %v606_v29 = vld [vmem:[%s3166_s18 + $0x3a0] sm:$0xff]  ;;  %605 = vst [vmem:[%s3171_s19 + $0xe0] sm:$0xff] %v604_v28 }
  0x3b   : > { %607 = vst [vmem:[%s3171_s19 + $0xe8] sm:$0xff] %v606_v29  ;;  %v608_v30 = vld [vmem:[%s3166_s18 + $0x3c0] sm:$0xff] }
  0x3c   : > { %v610_v31 = vld [vmem:[%s3166_s18 + $0x3e0] sm:$0xff]  ;;  %609 = vst [vmem:[%s3171_s19 + $0xf0] sm:$0xff] %v608_v30 }
  0x3d   : > { %v612_v32 = vld [vmem:[%s3166_s18 + $0x400] sm:$0xff]  ;;  %611 = vst [vmem:[%s3171_s19 + $0xf8] sm:$0xff] %v610_v31 }
  0x3e   : > { %613 = vst [vmem:[%s3171_s19 + $0x100] sm:$0xff] %v612_v32  ;;  %v614_v33 = vld [vmem:[%s3166_s18 + $0x420] sm:$0xff] }
  0x3f   : > { %v616_v34 = vld [vmem:[%s3166_s18 + $0x440] sm:$0xff]  ;;  %615 = vst [vmem:[%s3171_s19 + $0x108] sm:$0xff] %v614_v33 }
  0x40   : > { %v618_v35 = vld [vmem:[%s3166_s18 + $0x460] sm:$0xff]  ;;  %617 = vst [vmem:[%s3171_s19 + $0x110] sm:$0xff] %v616_v34 }
  0x41   : > { %619 = vst [vmem:[%s3171_s19 + $0x118] sm:$0xff] %v618_v35  ;;  %v620_v36 = vld [vmem:[%s3166_s18 + $0x480] sm:$0xff] }
  0x42   : > { %v622_v37 = vld [vmem:[%s3166_s18 + $0x4a0] sm:$0xff]  ;;  %621 = vst [vmem:[%s3171_s19 + $0x120] sm:$0xff] %v620_v36 }
  0x43   : > { %v624_v38 = vld [vmem:[%s3166_s18 + $0x4c0] sm:$0xff]  ;;  %623 = vst [vmem:[%s3171_s19 + $0x128] sm:$0xff] %v622_v37 }
  0x44   : > { %625 = vst [vmem:[%s3171_s19 + $0x130] sm:$0xff] %v624_v38  ;;  %v626_v39 = vld [vmem:[%s3166_s18 + $0x4e0] sm:$0xff] }
  0x45   : > { %v628_v40 = vld [vmem:[%s3166_s18 + $0x500] sm:$0xff]  ;;  %627 = vst [vmem:[%s3171_s19 + $0x138] sm:$0xff] %v626_v39 }
  0x46   : > { %v630_v41 = vld [vmem:[%s3166_s18 + $0x520] sm:$0xff]  ;;  %629 = vst [vmem:[%s3171_s19 + $0x140] sm:$0xff] %v628_v40 }
  0x47   : > { %631 = vst [vmem:[%s3171_s19 + $0x148] sm:$0xff] %v630_v41  ;;  %v632_v42 = vld [vmem:[%s3166_s18 + $0x540] sm:$0xff] }
  0x48   : > { %v634_v43 = vld [vmem:[%s3166_s18 + $0x560] sm:$0xff]  ;;  %633 = vst [vmem:[%s3171_s19 + $0x150] sm:$0xff] %v632_v42 }
  0x49   : > { %v636_v44 = vld [vmem:[%s3166_s18 + $0x580] sm:$0xff]  ;;  %635 = vst [vmem:[%s3171_s19 + $0x158] sm:$0xff] %v634_v43 }
  0x4a   : > { %637 = vst [vmem:[%s3171_s19 + $0x160] sm:$0xff] %v636_v44  ;;  %v638_v45 = vld [vmem:[%s3166_s18 + $0x5a0] sm:$0xff] }
  0x4b   : > { %v640_v46 = vld [vmem:[%s3166_s18 + $0x5c0] sm:$0xff]  ;;  %639 = vst [vmem:[%s3171_s19 + $0x168] sm:$0xff] %v638_v45 }
  0x4c   : > { %v642_v47 = vld [vmem:[%s3166_s18 + $0x5e0] sm:$0xff]  ;;  %641 = vst [vmem:[%s3171_s19 + $0x170] sm:$0xff] %v640_v46 }
  0x4d   : > { %643 = vst [vmem:[%s3171_s19 + $0x178] sm:$0xff] %v642_v47  ;;  %v644_v48 = vld [vmem:[%s3166_s18 + $0x600] sm:$0xff] }
  0x4e   : > { %v646_v49 = vld [vmem:[%s3166_s18 + $0x620] sm:$0xff]  ;;  %645 = vst [vmem:[%s3171_s19 + $0x180] sm:$0xff] %v644_v48 }
  0x4f   : > { %v648_v50 = vld [vmem:[%s3166_s18 + $0x640] sm:$0xff]  ;;  %647 = vst [vmem:[%s3171_s19 + $0x188] sm:$0xff] %v646_v49 }
  0x50   : > { %649 = vst [vmem:[%s3171_s19 + $0x190] sm:$0xff] %v648_v50  ;;  %v650_v51 = vld [vmem:[%s3166_s18 + $0x660] sm:$0xff] }
  0x51   : > { %v652_v52 = vld [vmem:[%s3166_s18 + $0x680] sm:$0xff]  ;;  %651 = vst [vmem:[%s3171_s19 + $0x198] sm:$0xff] %v650_v51 }
  0x52   : > { %v654_v53 = vld [vmem:[%s3166_s18 + $0x6a0] sm:$0xff]  ;;  %653 = vst [vmem:[%s3171_s19 + $0x1a0] sm:$0xff] %v652_v52 }
  0x53   : > { %655 = vst [vmem:[%s3171_s19 + $0x1a8] sm:$0xff] %v654_v53  ;;  %v656_v54 = vld [vmem:[%s3166_s18 + $0x6c0] sm:$0xff] }
  0x54   : > { %v658_v55 = vld [vmem:[%s3166_s18 + $0x6e0] sm:$0xff]  ;;  %657 = vst [vmem:[%s3171_s19 + $0x1b0] sm:$0xff] %v656_v54 }
  0x55   : > { %v660_v56 = vld [vmem:[%s3166_s18 + $0x700] sm:$0xff]  ;;  %659 = vst [vmem:[%s3171_s19 + $0x1b8] sm:$0xff] %v658_v55 }
  0x56   : > { %661 = vst [vmem:[%s3171_s19 + $0x1c0] sm:$0xff] %v660_v56  ;;  %v662_v57 = vld [vmem:[%s3166_s18 + $0x720] sm:$0xff] }
  0x57   : > { %v664_v58 = vld [vmem:[%s3166_s18 + $0x740] sm:$0xff]  ;;  %663 = vst [vmem:[%s3171_s19 + $0x1c8] sm:$0xff] %v662_v57 }
  0x58   : > { %v666_v59 = vld [vmem:[%s3166_s18 + $0x760] sm:$0xff]  ;;  %665 = vst [vmem:[%s3171_s19 + $0x1d0] sm:$0xff] %v664_v58 }
  0x59   : > { %667 = vst [vmem:[%s3171_s19 + $0x1d8] sm:$0xff] %v666_v59  ;;  %v668_v60 = vld [vmem:[%s3166_s18 + $0x780] sm:$0xff] }
  0x5a   : > { %v670_v61 = vld [vmem:[%s3166_s18 + $0x7a0] sm:$0xff]  ;;  %669 = vst [vmem:[%s3171_s19 + $0x1e0] sm:$0xff] %v668_v60 }
  0x5b   : > { %v672_v62 = vld [vmem:[%s3166_s18 + $0x7c0] sm:$0xff]  ;;  %671 = vst [vmem:[%s3171_s19 + $0x1e8] sm:$0xff] %v670_v61 }
  0x5c   : > { %673 = vst [vmem:[%s3171_s19 + $0x1f0] sm:$0xff] %v672_v62  ;;  %v674_v63 = vld [vmem:[%s3166_s18 + $0x7e0] sm:$0xff] }
  0x5d   : > { %v676_v0 = vld [vmem:[%s3166_s18 + $0x800] sm:$0xff]  ;;  %675 = vst [vmem:[%s3171_s19 + $0x1f8] sm:$0xff] %v674_v63 }
  0x5e   : > { %v678_v1 = vld [vmem:[%s3166_s18 + $0x820] sm:$0xff]  ;;  %677 = vst [vmem:[%s3171_s19 + $0x200] sm:$0xff] %v676_v0 }
  0x5f   : > { %679 = vst [vmem:[%s3171_s19 + $0x208] sm:$0xff] %v678_v1  ;;  %v680_v2 = vld [vmem:[%s3166_s18 + $0x840] sm:$0xff] }
  0x60   : > { %v682_v3 = vld [vmem:[%s3166_s18 + $0x860] sm:$0xff]  ;;  %681 = vst [vmem:[%s3171_s19 + $0x210] sm:$0xff] %v680_v2 }
  0x61   : > { %v684_v4 = vld [vmem:[%s3166_s18 + $0x880] sm:$0xff]  ;;  %683 = vst [vmem:[%s3171_s19 + $0x218] sm:$0xff] %v682_v3 }
  0x62   : > { %685 = vst [vmem:[%s3171_s19 + $0x220] sm:$0xff] %v684_v4  ;;  %v686_v5 = vld [vmem:[%s3166_s18 + $0x8a0] sm:$0xff] }
  0x63   : > { %v688_v6 = vld [vmem:[%s3166_s18 + $0x8c0] sm:$0xff]  ;;  %687 = vst [vmem:[%s3171_s19 + $0x228] sm:$0xff] %v686_v5 }
  0x64   : > { %v690_v7 = vld [vmem:[%s3166_s18 + $0x8e0] sm:$0xff]  ;;  %689 = vst [vmem:[%s3171_s19 + $0x230] sm:$0xff] %v688_v6 }
  0x65   : > { %691 = vst [vmem:[%s3171_s19 + $0x238] sm:$0xff] %v690_v7  ;;  %v692_v8 = vld [vmem:[%s3166_s18 + $0x900] sm:$0xff] }
  0x66   : > { %v694_v9 = vld [vmem:[%s3166_s18 + $0x920] sm:$0xff]  ;;  %693 = vst [vmem:[%s3171_s19 + $0x240] sm:$0xff] %v692_v8 }
  0x67   : > { %v696_v10 = vld [vmem:[%s3166_s18 + $0x940] sm:$0xff]  ;;  %695 = vst [vmem:[%s3171_s19 + $0x248] sm:$0xff] %v694_v9 }
  0x68   : > { %697 = vst [vmem:[%s3171_s19 + $0x250] sm:$0xff] %v696_v10  ;;  %v698_v11 = vld [vmem:[%s3166_s18 + $0x960] sm:$0xff] }
  0x69   : > { %v700_v12 = vld [vmem:[%s3166_s18 + $0x980] sm:$0xff]  ;;  %699 = vst [vmem:[%s3171_s19 + $0x258] sm:$0xff] %v698_v11 }
  0x6a   : > { %v702_v13 = vld [vmem:[%s3166_s18 + $0x9a0] sm:$0xff]  ;;  %701 = vst [vmem:[%s3171_s19 + $0x260] sm:$0xff] %v700_v12 }
  0x6b   : > { %703 = vst [vmem:[%s3171_s19 + $0x268] sm:$0xff] %v702_v13  ;;  %v704_v14 = vld [vmem:[%s3166_s18 + $0x9c0] sm:$0xff] }
  0x6c   : > { %v706_v15 = vld [vmem:[%s3166_s18 + $0x9e0] sm:$0xff]  ;;  %705 = vst [vmem:[%s3171_s19 + $0x270] sm:$0xff] %v704_v14 }
  0x6d   : > { %v708_v16 = vld [vmem:[%s3166_s18 + $0xa00] sm:$0xff]  ;;  %707 = vst [vmem:[%s3171_s19 + $0x278] sm:$0xff] %v706_v15 }
  0x6e   : > { %709 = vst [vmem:[%s3171_s19 + $0x280] sm:$0xff] %v708_v16  ;;  %v710_v17 = vld [vmem:[%s3166_s18 + $0xa20] sm:$0xff] }
  0x6f   : > { %v712_v18 = vld [vmem:[%s3166_s18 + $0xa40] sm:$0xff]  ;;  %711 = vst [vmem:[%s3171_s19 + $0x288] sm:$0xff] %v710_v17 }
  0x70   : > { %v714_v19 = vld [vmem:[%s3166_s18 + $0xa60] sm:$0xff]  ;;  %713 = vst [vmem:[%s3171_s19 + $0x290] sm:$0xff] %v712_v18 }
  0x71   : > { %715 = vst [vmem:[%s3171_s19 + $0x298] sm:$0xff] %v714_v19  ;;  %v716_v20 = vld [vmem:[%s3166_s18 + $0xa80] sm:$0xff] }
  0x72   : > { %v718_v21 = vld [vmem:[%s3166_s18 + $0xaa0] sm:$0xff]  ;;  %717 = vst [vmem:[%s3171_s19 + $0x2a0] sm:$0xff] %v716_v20 }
  0x73   : > { %v720_v22 = vld [vmem:[%s3166_s18 + $0xac0] sm:$0xff]  ;;  %719 = vst [vmem:[%s3171_s19 + $0x2a8] sm:$0xff] %v718_v21 }
  0x74   : > { %721 = vst [vmem:[%s3171_s19 + $0x2b0] sm:$0xff] %v720_v22  ;;  %v722_v23 = vld [vmem:[%s3166_s18 + $0xae0] sm:$0xff] }
  0x75   : > { %v724_v24 = vld [vmem:[%s3166_s18 + $0xb00] sm:$0xff]  ;;  %723 = vst [vmem:[%s3171_s19 + $0x2b8] sm:$0xff] %v722_v23 }
  0x76   : > { %v726_v25 = vld [vmem:[%s3166_s18 + $0xb20] sm:$0xff]  ;;  %725 = vst [vmem:[%s3171_s19 + $0x2c0] sm:$0xff] %v724_v24 }
  0x77   : > { %727 = vst [vmem:[%s3171_s19 + $0x2c8] sm:$0xff] %v726_v25  ;;  %v728_v26 = vld [vmem:[%s3166_s18 + $0xb40] sm:$0xff] }
  0x78   : > { %v730_v27 = vld [vmem:[%s3166_s18 + $0xb60] sm:$0xff]  ;;  %729 = vst [vmem:[%s3171_s19 + $0x2d0] sm:$0xff] %v728_v26 }
  0x79   : > { %v732_v28 = vld [vmem:[%s3166_s18 + $0xb80] sm:$0xff]  ;;  %731 = vst [vmem:[%s3171_s19 + $0x2d8] sm:$0xff] %v730_v27 }
  0x7a   : > { %733 = vst [vmem:[%s3171_s19 + $0x2e0] sm:$0xff] %v732_v28  ;;  %v734_v29 = vld [vmem:[%s3166_s18 + $0xba0] sm:$0xff] }
  0x7b   : > { %v736_v30 = vld [vmem:[%s3166_s18 + $0xbc0] sm:$0xff]  ;;  %735 = vst [vmem:[%s3171_s19 + $0x2e8] sm:$0xff] %v734_v29 }
  0x7c   : > { %v738_v31 = vld [vmem:[%s3166_s18 + $0xbe0] sm:$0xff]  ;;  %737 = vst [vmem:[%s3171_s19 + $0x2f0] sm:$0xff] %v736_v30 }
  0x7d   : > { %739 = vst [vmem:[%s3171_s19 + $0x2f8] sm:$0xff] %v738_v31  ;;  %v740_v32 = vld [vmem:[%s3166_s18 + $0xc00] sm:$0xff] }
  0x7e   : > { %v742_v33 = vld [vmem:[%s3166_s18 + $0xc20] sm:$0xff]  ;;  %741 = vst [vmem:[%s3171_s19 + $0x300] sm:$0xff] %v740_v32 }
  0x7f   : > { %v744_v34 = vld [vmem:[%s3166_s18 + $0xc40] sm:$0xff]  ;;  %743 = vst [vmem:[%s3171_s19 + $0x308] sm:$0xff] %v742_v33 }
  0x80   : > { %745 = vst [vmem:[%s3171_s19 + $0x310] sm:$0xff] %v744_v34  ;;  %v746_v35 = vld [vmem:[%s3166_s18 + $0xc60] sm:$0xff] }
  0x81   : > { %v748_v36 = vld [vmem:[%s3166_s18 + $0xc80] sm:$0xff]  ;;  %747 = vst [vmem:[%s3171_s19 + $0x318] sm:$0xff] %v746_v35 }
  0x82   : > { %v750_v37 = vld [vmem:[%s3166_s18 + $0xca0] sm:$0xff]  ;;  %749 = vst [vmem:[%s3171_s19 + $0x320] sm:$0xff] %v748_v36 }
  0x83   : > { %751 = vst [vmem:[%s3171_s19 + $0x328] sm:$0xff] %v750_v37  ;;  %v752_v38 = vld [vmem:[%s3166_s18 + $0xcc0] sm:$0xff] }
  0x84   : > { %v754_v39 = vld [vmem:[%s3166_s18 + $0xce0] sm:$0xff]  ;;  %753 = vst [vmem:[%s3171_s19 + $0x330] sm:$0xff] %v752_v38 }
  0x85   : > { %v756_v40 = vld [vmem:[%s3166_s18 + $0xd00] sm:$0xff]  ;;  %755 = vst [vmem:[%s3171_s19 + $0x338] sm:$0xff] %v754_v39 }
  0x86   : > { %757 = vst [vmem:[%s3171_s19 + $0x340] sm:$0xff] %v756_v40  ;;  %v758_v41 = vld [vmem:[%s3166_s18 + $0xd20] sm:$0xff] }
  0x87   : > { %v760_v42 = vld [vmem:[%s3166_s18 + $0xd40] sm:$0xff]  ;;  %759 = vst [vmem:[%s3171_s19 + $0x348] sm:$0xff] %v758_v41 }
  0x88   : > { %v762_v43 = vld [vmem:[%s3166_s18 + $0xd60] sm:$0xff]  ;;  %761 = vst [vmem:[%s3171_s19 + $0x350] sm:$0xff] %v760_v42 }
  0x89   : > { %763 = vst [vmem:[%s3171_s19 + $0x358] sm:$0xff] %v762_v43  ;;  %v764_v44 = vld [vmem:[%s3166_s18 + $0xd80] sm:$0xff] }
  0x8a   : > { %v766_v45 = vld [vmem:[%s3166_s18 + $0xda0] sm:$0xff]  ;;  %765 = vst [vmem:[%s3171_s19 + $0x360] sm:$0xff] %v764_v44 }
  0x8b   : > { %v768_v46 = vld [vmem:[%s3166_s18 + $0xdc0] sm:$0xff]  ;;  %767 = vst [vmem:[%s3171_s19 + $0x368] sm:$0xff] %v766_v45 }
  0x8c   : > { %769 = vst [vmem:[%s3171_s19 + $0x370] sm:$0xff] %v768_v46  ;;  %v770_v47 = vld [vmem:[%s3166_s18 + $0xde0] sm:$0xff] }
  0x8d   : > { %v772_v48 = vld [vmem:[%s3166_s18 + $0xe00] sm:$0xff]  ;;  %771 = vst [vmem:[%s3171_s19 + $0x378] sm:$0xff] %v770_v47 }
  0x8e   : > { %v774_v49 = vld [vmem:[%s3166_s18 + $0xe20] sm:$0xff]  ;;  %773 = vst [vmem:[%s3171_s19 + $0x380] sm:$0xff] %v772_v48 }
  0x8f   : > { %775 = vst [vmem:[%s3171_s19 + $0x388] sm:$0xff] %v774_v49  ;;  %v776_v50 = vld [vmem:[%s3166_s18 + $0xe40] sm:$0xff] }
  0x90   : > { %v778_v51 = vld [vmem:[%s3166_s18 + $0xe60] sm:$0xff]  ;;  %777 = vst [vmem:[%s3171_s19 + $0x390] sm:$0xff] %v776_v50 }
  0x91   : > { %v780_v52 = vld [vmem:[%s3166_s18 + $0xe80] sm:$0xff]  ;;  %779 = vst [vmem:[%s3171_s19 + $0x398] sm:$0xff] %v778_v51 }
  0x92   : > { %781 = vst [vmem:[%s3171_s19 + $0x3a0] sm:$0xff] %v780_v52  ;;  %v782_v53 = vld [vmem:[%s3166_s18 + $0xea0] sm:$0xff] }
  0x93   : > { %v784_v54 = vld [vmem:[%s3166_s18 + $0xec0] sm:$0xff]  ;;  %783 = vst [vmem:[%s3171_s19 + $0x3a8] sm:$0xff] %v782_v53 }
  0x94   : > { %v786_v55 = vld [vmem:[%s3166_s18 + $0xee0] sm:$0xff]  ;;  %785 = vst [vmem:[%s3171_s19 + $0x3b0] sm:$0xff] %v784_v54 }
  0x95   : > { %787 = vst [vmem:[%s3171_s19 + $0x3b8] sm:$0xff] %v786_v55  ;;  %v788_v56 = vld [vmem:[%s3166_s18 + $0xf00] sm:$0xff] }
  0x96   : > { %v790_v57 = vld [vmem:[%s3166_s18 + $0xf20] sm:$0xff]  ;;  %789 = vst [vmem:[%s3171_s19 + $0x3c0] sm:$0xff] %v788_v56 }
  0x97   : > { %v792_v58 = vld [vmem:[%s3166_s18 + $0xf40] sm:$0xff]  ;;  %791 = vst [vmem:[%s3171_s19 + $0x3c8] sm:$0xff] %v790_v57 }
  0x98   : > { %793 = vst [vmem:[%s3171_s19 + $0x3d0] sm:$0xff] %v792_v58  ;;  %v794_v59 = vld [vmem:[%s3166_s18 + $0xf60] sm:$0xff] }
  0x99   : > { %v796_v60 = vld [vmem:[%s3166_s18 + $0xf80] sm:$0xff]  ;;  %795 = vst [vmem:[%s3171_s19 + $0x3d8] sm:$0xff] %v794_v59 }
  0x9a   : > { %v798_v61 = vld [vmem:[%s3166_s18 + $0xfa0] sm:$0xff]  ;;  %797 = vst [vmem:[%s3171_s19 + $0x3e0] sm:$0xff] %v796_v60 }
  0x9b   : > { %799 = vst [vmem:[%s3171_s19 + $0x3e8] sm:$0xff] %v798_v61  ;;  %v800_v62 = vld [vmem:[%s3166_s18 + $0xfc0] sm:$0xff] }
  0x9c   : > { %v802_v63 = vld [vmem:[%s3166_s18 + $0xfe0] sm:$0xff]  ;;  %801 = vst [vmem:[%s3171_s19 + $0x3f0] sm:$0xff] %v800_v62 }
  0x9d   : > { %803 = vst [vmem:[%s3171_s19 + $0x3f8] sm:$0xff] %v802_v63 }
  0x9e PF: > { %p2559_p7 = scmp.ge.s32.totalorder %s3061_s30, 1  ;;  %p824_p8 = scmp.lt.s32.totalorder %s3061_s30, 9 }
  0xa0   : > { %p825_p9 = pnand %p2559_p7, %p824_p8 }
  0xa1   : > { %s831_s20 = sand.u32 (!%p825_p9), 1, %s3037_s24   ;;  %p878_p10 = scmp.lt.s32.totalorder (!%p825_p9), %s3049_s27, 1 }
  0xa2   : > { %828 = sbr.rel (%p825_p9) target bundleno = 578 (0x242), region = 82  ;;  %s2560_s21 = sshll.u32 (!%p825_p9), %s831_s20, 10 }
  0xa3   : > { %s2562_s22 = sshll.u32 (!%p825_p9), %s3045_s26, 1  ;;  %s3451_s29 = scalar_lea.vmem (!%p825_p9), [#allocation3], %s2560_s21 }
  0xa4   : > { %p885_p11 = scmp.lt.s32.totalorder (!%p825_p9), %s2562_s22, 7  ;;  %p2566_p12 = scmp.ne.s32.totalorder (!%p825_p9), %s3045_s26, 0 }
  0xa7   : > { %s3805_s27 = smov (!%p878_p10, %s3049_s27), 1  ;;  %s3807_s22 = smov (!%p885_p11, %s2562_s22), 7 }
  0xa8   : > { %s2735_s23 = smul.u32 48, %s3805_s27  ;;  %s2565_s10 = sshll.u32 %s3805_s27, 3 }
  0xa9   : > { %s887_s14 = scalar_lea.vmem %s3773_s5, %s3807_s22  ;;  %s892_s24 = scalar_lea.vmem %s3774_s6, %s3807_s22 }
  0xaa   : > { %s882_s19 = scalar_lea.vmem %s3768_s0, %s2735_s23  ;;  %s900_s20 = sadd.s32 %s2565_s10, %s3807_s22 }
  0xab   : > { %s3449_s8 = scalar_lea.vmem %s3775_s7, %s900_s20  ;;  %906 = sbr.rel (%p2566_p12) target bundleno = 234 (0xea), region = 90 }
  0xb0   : > { %v1162_v0 = vlaneseq  ;;  %v907_v1 = vld [vmem:[%s882_s19] sm:$0xff]  ;;  %v908_v2 = vld [vmem:[%s882_s19 + $0x8] sm:$0xff]  ;;  %v3454_v3 = vld [vmem:[%s882_s19 + $0x10] sm:$0xff]  ;;  %v3063_v7 = vmov 286326784   ;;  %v3064_v10 = vmov 858989090  }
  0xb1   : > { %v3456_v4 = vld [vmem:[%s882_s19 + $0x18] sm:$0xff]  ;;  %v3458_v5 = vld [vmem:[%s882_s19 + $0x20] sm:$0xff]  ;;  %v3460_v6 = vld [vmem:[%s882_s19 + $0x28] sm:$0xff]  ;;  %v1160_v8 = vunpack.c.l.s4 %v3063_v7  ;;  %v1167_v11 = vunpack.c.l.s4 %v3064_v10  ;;  %v929_v12 = vunpack.c.l.bf16 %v907_v1  ;;  %v930_v13 = vunpack.c.h.bf16 %v907_v1 }
  0xb2   : > { %v3462_v9 = vshrl.u32 %v1162_v0, 7  ;;  %v931_v14 = vunpack.c.l.bf16 %v908_v2  ;;  %v932_v15 = vunpack.c.h.bf16 %v908_v2  ;;  %v993_v16 = vunpack.c.l.bf16 %v3454_v3  ;;  %v2798_v20 = vld [vmem:[%s3769_s1] ss:$8 sps:$4 sm:$0xff]   ;;  %v2800_v21 = vld [vmem:[%s3769_s1 + $0x10] ss:$8 sps:$4 sm:$0xff]  }
  0xb3   : > { %v994_v17 = vunpack.c.h.bf16 %v3454_v3  ;;  %v1161_v18 = vunpack.c.0.s8 %v1160_v8  ;;  %v1168_v19 = vunpack.c.0.s8 %v1167_v11  ;;  %v995_v22 = vunpack.c.l.bf16 %v3456_v4  ;;  %v2802_v26 = vld [vmem:[%s3769_s1 + $0x20] ss:$8 sps:$4 sm:$0xff]   ;;  %v2804_v27 = vld [vmem:[%s3769_s1 + $0x30] ss:$8 sps:$4 sm:$0xff]   ;;  %v2806_v40 = vld [vmem:[%s3769_s1 + $0x4] ss:$8 sps:$4 sm:$0xff]  }
  0xb4   : > { %v996_v23 = vunpack.c.h.bf16 %v3456_v4  ;;  %v1069_v24 = vunpack.c.l.bf16 %v3458_v5  ;;  %v1070_v25 = vunpack.c.h.bf16 %v3458_v5  ;;  %v1071_v28 = vunpack.c.l.bf16 %v3460_v6  ;;  %v2807_v41 = vld [vmem:[%s3769_s1 + $0x14] ss:$8 sps:$4 sm:$0xff]   ;;  %v2808_v46 = vld [vmem:[%s3769_s1 + $0x24] ss:$8 sps:$4 sm:$0xff]  }
  0xb5   : > { %v1072_v29 = vunpack.c.h.bf16 %v3460_v6  ;;  %v3485_v30 = vsub.s32 %v1161_v18, %v3462_v9  ;;  %v3488_v31 = vsub.s32 %v1168_v19, %v3462_v9  ;;  %v949_v32 = vmul.f32 %v2798_v20, %v929_v12  ;;  %v2809_v51 = vld [vmem:[%s3769_s1 + $0x34] ss:$8 sps:$4 sm:$0xff]  }
  0xb6   : > { %v950_v33 = vmul.f32 %v2800_v21, %v930_v13  ;;  %v2575_v34 = vrot.slane %v2798_v20, 11  ;;  %v2576_v35 = vrot.slane %v2800_v21, 11  ;;  %v951_v36 = vmul.f32 %v2802_v26, %v931_v14 }
  0xb7   : > { %v952_v37 = vmul.f32 %v2804_v27, %v932_v15  ;;  %v2577_v38 = vrot.slane %v2802_v26, 11  ;;  %v2578_v39 = vrot.slane %v2804_v27, 11  ;;  %v2567_v42 = vrot.slane %v949_v32, 9 }
  0xb8   : > { %v2568_v43 = vrot.slane %v950_v33, 9  ;;  %v2571_v44 = vrot.slane %v949_v32, 10  ;;  %v2572_v45 = vrot.slane %v950_v33, 10  ;;  %v2569_v47 = vrot.slane %v951_v36, 9 }
  0xb9   : > { %v2570_v48 = vrot.slane %v952_v37, 9  ;;  %v2573_v49 = vrot.slane %v951_v36, 10  ;;  %v2574_v50 = vrot.slane %v952_v37, 10  ;;  %v973_v52 = vadd.f32 %v2567_v42, %v949_v32 }
  0xba   : > { %v974_v53 = vadd.f32 %v2568_v43, %v950_v33  ;;  %v1009_v54 = vmul.f32 %v2575_v34, %v993_v16  ;;  %v1010_v55 = vmul.f32 %v2576_v35, %v994_v17  ;;  %v975_v56 = vadd.f32 %v2569_v47, %v951_v36  ;;  %v2810_v43 = vld [vmem:[%s3769_s1 + $0x40] ss:$8 sps:$4 sm:$0x11]  }
  0xbb   : > { %v976_v57 = vadd.f32 %v2570_v48, %v952_v37  ;;  %v1011_v58 = vmul.f32 %v2577_v38, %v995_v22  ;;  %v1012_v59 = vmul.f32 %v2578_v39, %v996_v23  ;;  %v989_v60 = vadd.f32 %v2571_v44, %v973_v52  ;;  %v2812_v47 = vld [vmem:[%s3769_s1 + $0x60] ss:$8 sps:$4 sm:$0x11]   ;;  %v2813_v48 = vld [vmem:[%s3769_s1 + $0x70] ss:$8 sps:$4 sm:$0x11]  }
  0xbc   : > { %v990_v61 = vadd.f32 %v2572_v45, %v974_v53  ;;  %v1021_v62 = vrot.slane %v2806_v40, 7  ;;  %v1022_v63 = vrot.slane %v2807_v41, 7  ;;  %v991_v0 = vadd.f32 %v2573_v49, %v975_v56 }
  0xbd   : > { %v992_v1 = vadd.f32 %v2574_v50, %v976_v57  ;;  %v1023_v2 = vrot.slane %v2808_v46, 7  ;;  %v1024_v3 = vrot.slane %v2809_v51, 7  ;;  %v1013_v4 = vadd.f32 %v1009_v54, %v989_v60  ;;  %v1157_v57 = vld [vmem:[%s3770_s2] sm:$0xff] }
  0xbe   : > { %v1014_v7 = vadd.f32 %v1010_v55, %v990_v61  ;;  %v1029_v8 = vmul.f32 %v1021_v62, %v993_v16  ;;  %v1030_v10 = vmul.f32 %v1022_v63, %v994_v17  ;;  %v1015_v11 = vadd.f32 %v1011_v58, %v991_v0 }
  0xbf   : > { %v1016_v12 = vadd.f32 %v1012_v59, %v992_v1  ;;  %v1031_v13 = vmul.f32 %v1023_v2, %v995_v22  ;;  %v1032_v14 = vmul.f32 %v1024_v3, %v996_v23  ;;  %v2587_v35 = vrot.slane %v2806_v40, 10  ;;  %v2811_v40 = vld [vmem:[%s3769_s1 + $0x50] ss:$8 sps:$4 sm:$0x11]  }
  0xc0   : > { %v2579_v15 = vrot.slane %v1029_v8, 9  ;;  %v2580_v18 = vrot.slane %v1030_v10, 9  ;;  %v2583_v19 = vrot.slane %v1029_v8, 10  ;;  %v2584_v20 = vrot.slane %v1030_v10, 10  ;;  %v1195_v8 = vld [vmem:[%s3771_s3] sm:$0xff] }
  0xc1   : > { %v2581_v21 = vrot.slane %v1031_v13, 9  ;;  %v2582_v26 = vrot.slane %v1032_v14, 9  ;;  %v2585_v27 = vrot.slane %v1031_v13, 10  ;;  %v2586_v32 = vrot.slane %v1032_v14, 10 }
  0xc2   : > { %v1049_v33 = vadd.f32 %v2579_v15, %v1013_v4  ;;  %v1050_v34 = vadd.f32 %v2580_v18, %v1014_v7  ;;  %v2588_v36 = vrot.slane %v2807_v41, 10  ;;  %v2589_v16 = vrot.slane %v2808_v46, 10 }
  0xc3   : > { %v1051_v37 = vadd.f32 %v2581_v21, %v1015_v11  ;;  %v1052_v38 = vadd.f32 %v2582_v26, %v1016_v12  ;;  %v2590_v17 = vrot.slane %v2809_v51, 10  ;;  %v1085_v22 = vmul.f32 %v2587_v35, %v1069_v24 }
  0xc4   : > { %v1065_v39 = vadd.f32 %v2583_v19, %v1049_v33  ;;  %v1066_v42 = vadd.f32 %v2584_v20, %v1050_v34  ;;  %v1086_v23 = vmul.f32 %v2588_v36, %v1070_v25  ;;  %v1087_v45 = vmul.f32 %v2589_v16, %v1071_v28 }
  0xc5   : > { %v1067_v41 = vadd.f32 %v2585_v27, %v1051_v37  ;;  %v1068_v44 = vadd.f32 %v2586_v32, %v1052_v38  ;;  %v1088_v46 = vmul.f32 %v2590_v17, %v1072_v29  ;;  %v2591_v51 = vrot.slane %v1085_v22, 9 }
  0xc6   : > { %v1089_v49 = vadd.f32 %v1085_v22, %v1065_v39  ;;  %v1090_v50 = vadd.f32 %v1086_v23, %v1066_v42  ;;  %v2592_v52 = vrot.slane %v1086_v23, 9  ;;  %v2593_v55 = vrot.slane %v1087_v45, 9 }
  0xc7   : > { %v1091_v53 = vadd.f32 %v1087_v45, %v1067_v41  ;;  %v1092_v54 = vadd.f32 %v1088_v46, %v1068_v44  ;;  %v2594_v56 = vrot.slane %v1088_v46, 9  ;;  %vm1351_vm0 = vcmask 1040384  }
  0xc8   : > { %v1109_v58 = vadd.f32 %v2591_v51, %v1089_v49  ;;  %v1110_v59 = vadd.f32 %v2592_v52, %v1090_v50  ;;  %v1125_v60 = vrot.slane %v2810_v43, 6  ;;  %v1126_v61 = vrot.slane %v2811_v40, 6 }
  0xc9   : > { %v1111_v62 = vadd.f32 %v2593_v55, %v1091_v53  ;;  %v1112_v63 = vadd.f32 %v2594_v56, %v1092_v54  ;;  %v1127_v0 = vrot.slane %v2812_v47, 6  ;;  %v1128_v1 = vrot.slane %v2813_v48, 6 }
  0xca   : > { %v1133_v2 = vmul.f32 %v1125_v60, %v1069_v24  ;;  %v1134_v3 = vmul.f32 %v1126_v61, %v1070_v25  ;;  %v1165_v4 = vrot.slane %v1157_v57, %v3485_v30  ;;  %v1172_v7 = vrot.slane %v1157_v57, %v3488_v31 }
  0xcb   : > { %v1135_v10 = vmul.f32 %v1127_v0, %v1071_v28  ;;  %v1136_v11 = vmul.f32 %v1128_v1, %v1072_v29  ;;  %v3065_v24 = vmov 1431651396   ;;  %v3066_v5 = vmov 2004313702  }
  0xcc   : > { %v2595_v12 = vrot.slane %v1133_v2, 10  ;;  %v2596_v13 = vrot.slane %v1134_v3, 10  ;;  %v1174_v14 = vunpack.c.l.s4 %v3065_v24  ;;  %v1181_v25 = vunpack.c.l.s4 %v3066_v5  ;;  %v1382_v5 = vld [vmem:[#allocation2] sm:$0xff] }
  0xcd   : > { %v2597_v15 = vrot.slane %v1135_v10, 10  ;;  %v2598_v18 = vrot.slane %v1136_v11, 10  ;;  %v1203_v19 = vrot.slane %v1195_v8, %v3485_v30  ;;  %v1210_v20 = vrot.slane %v1195_v8, %v3488_v31 }
  0xce   : > { %v1153_v21 = vadd.f32 %v2595_v12, %v1109_v58  ;;  %v1154_v26 = vadd.f32 %v2596_v13, %v1110_v59  ;;  %v1175_v27 = vunpack.c.0.s8 %v1174_v14  ;;  %v1182_v32 = vunpack.c.0.s8 %v1181_v25 }
  0xcf   : > { %v1155_v28 = vadd.f32 %v2597_v15, %v1111_v62  ;;  %v1156_v33 = vadd.f32 %v2598_v18, %v1112_v63  ;;  %v3541_v6 = vsub.s32 0, %v3462_v9  ;;  %v3544_v29 = vsub.s32 4, %v3462_v9 }
  0xd0   : > { %v1178_v34 = vsub.s32 %v1175_v27, %v3462_v9  ;;  %v1185_v35 = vsub.s32 %v1182_v32, %v3462_v9  ;;  %v1191_v36 = vmul.f32 %v1165_v4, %v1153_v21  ;;  %v1192_v30 = vmul.f32 %v1172_v7, %v1154_v26 }
  0xd1   : > { %vm1352_vm1 = vsmask.f32 256  ;;  %vm1354_vm2 = vcmask 1041409   ;;  %vm1358_vm3 = vcmask 1042434   ;;  %v3067_v22 = vmov 1966171168  }
  0xd2   : > { %v1179_v31 = vrot.slane %v1157_v57, %v1178_v34  ;;  %v1186_v37 = vrot.slane %v1157_v57, %v1185_v35  ;;  %v1217_v38 = vrot.slane %v1195_v8, %v1178_v34  ;;  %v1224_v16 = vrot.slane %v1195_v8, %v1185_v35  ;;  %vm3549_vm4 = vmand %vm1351_vm0, %vm1352_vm1 }
  0xd3   : > { %v1229_v39 = vadd.f32 %v1203_v19, %v1191_v36  ;;  %v1230_v42 = vadd.f32 %v1210_v20, %v1192_v30  ;;  %v1306_v23 = vunpack.c.l.s4 %v3067_v22  ;;  %vm1355_vm5 = vsmask.f32 1280 }
  0xd4   : > { %v1193_v43 = vmul.f32 %v1179_v31, %v1155_v28  ;;  %v1194_v40 = vmul.f32 %v1186_v37, %v1156_v33  ;;  %vm3553_vm6 = vmand %vm1354_vm2, %vm1355_vm5  ;;  %vm1359_vm7 = vsmask.f32 2304  ;;  %vm1362_vm8 = vcmask 1043459  }
  0xd5   : > { %v1233_v44 = vmax.f32 %v1229_v39, 0.0  ;;  %v1234_v45 = vmax.f32 %v1230_v42, 0.0  ;;  %v1307_v46 = vunpack.c.0.s8 %v1306_v23  ;;  %vm1357_vm9 = vmor %vm3553_vm6, %vm3549_vm4  ;;  %vm1363_vm10 = vsmask.f32 3328 }
  0xd6   : > { %v1231_v47 = vadd.f32 %v1217_v38, %v1193_v43  ;;  %v1232_v48 = vadd.f32 %v1224_v16, %v1194_v40  ;;  %vm1360_vm11 = vmand %vm1358_vm3, %vm1359_vm7  ;;  %vm1366_vm12 = vcmask 1044484   ;;  %vm1367_vm14 = vsmask.f32 4352 }
  0xd7   : > { %v1237_v49 = vmin.f32 %v1233_v44, 6.0  ;;  %v1238_v50 = vmin.f32 %v1234_v45, 6.0  ;;  %v1310_v51 = vsub.s32 %v1307_v46, %v3462_v9  ;;  %vm3563_vm13 = vmor %vm1360_vm11, %vm1357_vm9  ;;  %vm1370_vm0 = vcmask 1045509  }
  0xd8   : > { %v1235_v53 = vmax.f32 %v1231_v47, 0.0  ;;  %v1236_v54 = vmax.f32 %v1232_v48, 0.0  ;;  %vm1364_vm15 = vmand %vm1362_vm8, %vm1363_vm10  ;;  %vm1371_vm1 = vsmask.f32 5376  ;;  %vm1374_vm5 = vcmask 1046534  }
  0xd9   : > { %v1248_v55 = vrot.slane %v1237_v49, %v3541_v6  ;;  %v1252_v56 = vrot.slane %v1237_v49, %v3544_v29  ;;  %v1256_v57 = vrot.slane %v1238_v50, %v3541_v6  ;;  %v1260_v58 = vrot.slane %v1238_v50, %v3544_v29  ;;  %vm1365_vm2 = vmor %vm1364_vm15, %vm3563_vm13 }
  0xda   : > { %v1239_v9 = vmin.f32 %v1235_v53, 6.0  ;;  %v1240_v59 = vmin.f32 %v1236_v54, 6.0  ;;  %vm1368_vm3 = vmand %vm1366_vm12, %vm1367_vm14  ;;  %vm1375_vm6 = vsmask.f32 6400  ;;  %vm1378_vm10 = vcmask 1047559  }
  0xdb   : > { %v2599_v60 = vpack.c.bf16 %v1252_v56, %v1248_v55  ;;  %v2600_v61 = vpack.c.bf16 %v1260_v58, %v1256_v57  ;;  %vm3575_vm4 = vmor %vm1368_vm3, %vm1365_vm2  ;;  %vm1379_vm11 = vsmask.f32 7424 }
  0xdc   : > { %v1264_v63 = vrot.slane %v1239_v9, %v3541_v6  ;;  %v1268_v0 = vrot.slane %v1239_v9, %v3544_v29  ;;  %v1272_v1 = vrot.slane %v1240_v59, %v3541_v6  ;;  %v1276_v2 = vrot.slane %v1240_v59, %v3544_v29  ;;  %vm1372_vm7 = vmand %vm1370_vm0, %vm1371_vm1 }
  0xdd   : > { %v1311_v3 = vrot.slane %v2599_v60, %v1310_v51  ;;  %v1318_v4 = vrot.slane %v2600_v61, %v1310_v51  ;;  %vm1373_vm8 = vmor %vm1372_vm7, %vm3575_vm4 }
  0xde   : > { %v2601_v7 = vpack.c.bf16 %v1268_v0, %v1264_v63  ;;  %v2602_v8 = vpack.c.bf16 %v1276_v2, %v1272_v1  ;;  %vm1376_vm9 = vmand %vm1374_vm5, %vm1375_vm6 }
  0xdf   : > { %v1333_v10 = vcombine.low %v1311_v3, %v1318_v4  ;;  %vm1377_vm12 = vmor %vm1376_vm9, %vm1373_vm8 }
  0xe0   : > { %v1325_v11 = vrot.slane %v2601_v7, %v1310_v51  ;;  %v1332_v12 = vrot.slane %v2602_v8, %v1310_v51  ;;  %vm1380_vm13 = vmand %vm1378_vm10, %vm1379_vm11 }
  0xe1   : > { %v1341_v24 = vrot.slane %v1333_v10, %v1310_v51  ;;  %vm1381_vm14 = vmor %vm1380_vm13, %vm1377_vm12 }
  0xe2   : > { %v1334_v13 = vcombine.low %v1325_v11, %v1332_v12 }
  0xe4   : > { %v1348_v14 = vrot.slane %v1334_v13, %v1310_v51 }
  0xe6   : > { %v1349_v25 = vcombine.low %v1341_v24, %v1348_v14 }
  0xe8   : > { %v1383_v15 = vsel %vm1381_vm14, %v1349_v25, %v1382_v5 }
  0xe9   : > { %1384 = vst [vmem:[#allocation2] sm:$0xff] %v1383_v15 }
  0xea PF: > { %v2814_v18 = vld [vmem:[%s3451_s29 + $0x74] ss:$8 sps:$4 sm:$0xff]   ;;  %v2818_v20 = vld [vmem:[%s3451_s29 + $0x70] ss:$8 sps:$4 sm:$0xff]   ;;  %v2820_v26 = vld [vmem:[%s3451_s29 + $0x64] ss:$8 sps:$4 sm:$0xff]   ;;  %v1519_v55 = vlaneseq }
  0xeb   : > { %v2816_v19 = vld [vmem:[%s3451_s29 + $0x174] ss:$8 sps:$4 sm:$0xff]   ;;  %2212 = vmatprep.subr.bf16.mxu0 %v2814_v18  ;;  %v2819_v21 = vld [vmem:[%s3451_s29 + $0x170] ss:$8 sps:$4 sm:$0xff]   ;;  %v2822_v27 = vld [vmem:[%s3451_s29 + $0x164] ss:$8 sps:$4 sm:$0xff]  }
  0xec   : > { %2253 = vmatprep.subr.bf16.mxu1 %v2816_v19  ;;  %2213 = vmatpush1.bf16.msra.mxu0 %v2818_v20  ;;  %v2824_v32 = vld [vmem:[%s3451_s29 + $0x60] ss:$8 sps:$4 sm:$0xff]   ;;  %v2826_v33 = vld [vmem:[%s3451_s29 + $0x54] ss:$8 sps:$4 sm:$0xff]   ;;  %v2830_v29 = vld [vmem:[%s3451_s29 + $0x50] ss:$8 sps:$4 sm:$0xff]  }
  0xed   : > { %2254 = vmatpush1.bf16.msra.mxu1 %v2819_v21  ;;  %2214 = vmatprep.subr.bf16.mxu0 %v2820_v26  ;;  %v2825_v28 = vld [vmem:[%s3451_s29 + $0x160] ss:$8 sps:$4 sm:$0xff]   ;;  %v2828_v6 = vld [vmem:[%s3451_s29 + $0x154] ss:$8 sps:$4 sm:$0xff]   ;;  %v2831_v34 = vld [vmem:[%s3451_s29 + $0x150] ss:$8 sps:$4 sm:$0xff]  }
  0xee   : > { %2255 = vmatprep.subr.bf16.mxu1 %v2822_v27  ;;  %v2832_v35 = vld [vmem:[%s3451_s29 + $0x44] ss:$8 sps:$4 sm:$0xff]   ;;  %v2836_v30 = vld [vmem:[%s3451_s29 + $0x40] ss:$8 sps:$4 sm:$0xff]   ;;  %v2838_v37 = vld [vmem:[%s3451_s29 + $0x34] ss:$8 sps:$4 sm:$0xff]  }
  0xef   : > { %v2834_v36 = vld [vmem:[%s3451_s29 + $0x144] ss:$8 sps:$4 sm:$0xff]   ;;  %v2837_v31 = vld [vmem:[%s3451_s29 + $0x140] ss:$8 sps:$4 sm:$0xff]   ;;  %v2840_v38 = vld [vmem:[%s3451_s29 + $0x134] ss:$8 sps:$4 sm:$0xff]  }
  0xf0   : > { %2215 = vmatpush1.bf16.msra.mxu0 %v2824_v32  ;;  %v2842_v16 = vld [vmem:[%s3451_s29 + $0x30] ss:$8 sps:$4 sm:$0xff]   ;;  %v2844_v39 = vld [vmem:[%s3451_s29 + $0x24] ss:$8 sps:$4 sm:$0xff]   ;;  %v2848_v22 = vld [vmem:[%s3451_s29 + $0x20] ss:$8 sps:$4 sm:$0xff]  }
  0xf1   : > { %2256 = vmatpush1.bf16.msra.mxu1 %v2825_v28  ;;  %2216 = vmatprep.subr.bf16.mxu0 %v2826_v33  ;;  %v2843_v17 = vld [vmem:[%s3451_s29 + $0x130] ss:$8 sps:$4 sm:$0xff]   ;;  %v2846_v42 = vld [vmem:[%s3451_s29 + $0x124] ss:$8 sps:$4 sm:$0xff]   ;;  %v2849_v23 = vld [vmem:[%s3451_s29 + $0x120] ss:$8 sps:$4 sm:$0xff]  }
  0xf2   : > { %2257 = vmatprep.subr.bf16.mxu1 %v2828_v6  ;;  %v2850_v43 = vld [vmem:[%s3451_s29 + $0x14] ss:$8 sps:$4 sm:$0xff]   ;;  %v2854_v41 = vld [vmem:[%s3451_s29 + $0x10] ss:$8 sps:$4 sm:$0xff]   ;;  %v2856_v45 = vld [vmem:[%s3451_s29 + $0x4] ss:$8 sps:$4 sm:$0xff]  }
  0xf3   : > { %v2852_v40 = vld [vmem:[%s3451_s29 + $0x114] ss:$8 sps:$4 sm:$0xff]   ;;  %v2855_v44 = vld [vmem:[%s3451_s29 + $0x110] ss:$8 sps:$4 sm:$0xff]   ;;  %v2858_v46 = vld [vmem:[%s3451_s29 + $0x104] ss:$8 sps:$4 sm:$0xff]  }
  0xf4   : > { %2217 = vmatpush1.bf16.msra.mxu0 %v2830_v29  ;;  %v2860_v47 = vld [vmem:[%s3451_s29] ss:$8 sps:$4 sm:$0xff]   ;;  %v2862_v49 = vld [vmem:[%s3451_s29 + $0xf4] ss:$8 sps:$4 sm:$0xff]   ;;  %v2866_v51 = vld [vmem:[%s3451_s29 + $0xf0] ss:$8 sps:$4 sm:$0xff]  }
  0xf5   : > { %2258 = vmatpush1.bf16.msra.mxu1 %v2831_v34  ;;  %2218 = vmatprep.subr.bf16.mxu0 %v2832_v35  ;;  %v2861_v48 = vld [vmem:[%s3451_s29 + $0x100] ss:$8 sps:$4 sm:$0xff]   ;;  %v2864_v50 = vld [vmem:[%s3451_s29 + $0x1f4] ss:$8 sps:$4 sm:$0xff]   ;;  %v2867_v52 = vld [vmem:[%s3451_s29 + $0x1f0] ss:$8 sps:$4 sm:$0xff]  }
  0xf6   : > { %2259 = vmatprep.subr.bf16.mxu1 %v2834_v36  ;;  %v3068_v53 = vmov 1966171168   ;;  %v2868_v56 = vld [vmem:[%s3451_s29 + $0xe4] ss:$8 sps:$4 sm:$0xff]   ;;  %v2872_v58 = vld [vmem:[%s3451_s29 + $0xe0] ss:$8 sps:$4 sm:$0xff]  }
  0xf7   : > { %v1517_v54 = vunpack.c.l.s4 %v3068_v53  ;;  %v2870_v57 = vld [vmem:[%s3451_s29 + $0x1e4] ss:$8 sps:$4 sm:$0xff]   ;;  %v3626_v59 = vshrl.u32 %v1519_v55, 7  ;;  %v2873_v60 = vld [vmem:[%s3451_s29 + $0x1e0] ss:$8 sps:$4 sm:$0xff]   ;;  %v1385_v4 = vld [vmem:[#allocation2] sm:$0xff] }
  0xf8   : > { %2219 = vmatpush1.bf16.msra.mxu0 %v2836_v30  ;;  %v2874_v61 = vld [vmem:[%s3451_s29 + $0xd4] ss:$8 sps:$4 sm:$0xff]   ;;  %v2878_v63 = vld [vmem:[%s3451_s29 + $0xd0] ss:$8 sps:$4 sm:$0xff]   ;;  %v2880_v2 = vld [vmem:[%s3451_s29 + $0xc4] ss:$8 sps:$4 sm:$0xff]   ;;  %v1515_v19 = vcombine.high %v1385_v4, %v1385_v4 }
  0xf9   : > { %2260 = vmatpush1.bf16.msra.mxu1 %v2837_v31  ;;  %2220 = vmatprep.subr.bf16.mxu0 %v2838_v37  ;;  %v1518_v9 = vunpack.c.0.s8 %v1517_v54  ;;  %v2876_v62 = vld [vmem:[%s3451_s29 + $0x1d4] ss:$8 sps:$4 sm:$0xff]   ;;  %v2879_v0 = vld [vmem:[%s3451_s29 + $0x1d0] ss:$8 sps:$4 sm:$0xff]   ;;  %v2882_v3 = vld [vmem:[%s3451_s29 + $0x1c4] ss:$8 sps:$4 sm:$0xff]  }
  0xfa   : > { %2261 = vmatprep.subr.bf16.mxu1 %v2840_v38  ;;  %v2884_v7 = vld [vmem:[%s3451_s29 + $0xc0] ss:$8 sps:$4 sm:$0xff]   ;;  %v2886_v11 = vld [vmem:[%s3451_s29 + $0xb4] ss:$8 sps:$4 sm:$0xff]   ;;  %v2890_v24 = vld [vmem:[%s3451_s29 + $0xb0] ss:$8 sps:$4 sm:$0xff]  }
  0xfb   : > { %v3634_v1 = vsub.s32 %v1518_v9, %v3626_v59  ;;  %v2885_v10 = vld [vmem:[%s3451_s29 + $0x1c0] ss:$8 sps:$4 sm:$0xff]   ;;  %v2888_v12 = vld [vmem:[%s3451_s29 + $0x1b4] ss:$8 sps:$4 sm:$0xff]   ;;  %v2891_v5 = vld [vmem:[%s3451_s29 + $0x1b0] ss:$8 sps:$4 sm:$0xff]  }
  0xfc   : > { %2221 = vmatpush1.bf16.msra.mxu0 %v2842_v16  ;;  %v2892_v25 = vld [vmem:[%s3451_s29 + $0xa4] ss:$8 sps:$4 sm:$0xff]   ;;  %v2896_v20 = vld [vmem:[%s3451_s29 + $0xa0] ss:$8 sps:$4 sm:$0xff]   ;;  %v2898_v26 = vld [vmem:[%s3451_s29 + $0x94] ss:$8 sps:$4 sm:$0xff]  }
  0xfd   : > { %2262 = vmatpush1.bf16.msra.mxu1 %v2843_v17  ;;  %2222 = vmatprep.subr.bf16.mxu0 %v2844_v39  ;;  %v1522_v8 = vrot.slane %v1385_v4, %v3634_v1  ;;  %v2894_v15 = vld [vmem:[%s3451_s29 + $0x1a4] ss:$8 sps:$4 sm:$0xff]   ;;  %v2897_v21 = vld [vmem:[%s3451_s29 + $0x1a0] ss:$8 sps:$4 sm:$0xff]   ;;  %v2900_v27 = vld [vmem:[%s3451_s29 + $0x194] ss:$8 sps:$4 sm:$0xff]   ;;  %v3653_v32 = vrot.slane %v1515_v19, %v3634_v1 }
  0xfe   : > { %2263 = vmatprep.subr.bf16.mxu1 %v2846_v42  ;;  %v2902_v28 = vld [vmem:[%s3451_s29 + $0x90] ss:$8 sps:$4 sm:$0xff]   ;;  %v2904_v6 = vld [vmem:[%s3451_s29 + $0x84] ss:$8 sps:$4 sm:$0xff]   ;;  %v2908_v35 = vld [vmem:[%s3451_s29 + $0x80] ss:$8 sps:$4 sm:$0xff]  }
  0xff   : > { %v1530_v13 = vcombine.high %v1522_v8, %v1522_v8  ;;  %v2903_v33 = vld [vmem:[%s3451_s29 + $0x190] ss:$8 sps:$4 sm:$0xff]   ;;  %v2906_v29 = vld [vmem:[%s3451_s29 + $0x184] ss:$8 sps:$4 sm:$0xff]   ;;  %v1531_v34 = vcombine.high %v3653_v32, %v3653_v32  ;;  %v1538_v36 = vrot.slane %v1522_v8, %v3634_v1  ;;  %v2909_v30 = vld [vmem:[%s3451_s29 + $0x180] ss:$8 sps:$4 sm:$0xff]  }
 0x100   : > { %2223 = vmatpush1.bf16.msra.mxu0 %v2848_v22  ;;  %v2913_v31 = vld [vmem:[%s3451_s29 + $0x274] ss:$8 sps:$4 sm:$0xff]   ;;  %v2911_v17 = vld [vmem:[%s3451_s29 + $0x270] ss:$8 sps:$4 sm:$0xff]   ;;  %v2919_v42 = vld [vmem:[%s3451_s29 + $0x264] ss:$8 sps:$4 sm:$0xff]  }
 0x101   : > { %2264 = vmatpush1.bf16.msra.mxu1 %v2849_v23  ;;  %2224 = vmatprep.subr.bf16.mxu0 %v2850_v43  ;;  %v1552_v14 = vrot.slane %v1530_v13, %v3634_v1  ;;  %v2916_v37 = vld [vmem:[%s3451_s29 + $0x374] ss:$8 sps:$4 sm:$0xff]   ;;  %v1559_v38 = vrot.slane %v1531_v34, %v3634_v1  ;;  %v1560_v16 = vcombine.high %v1538_v36, %v1538_v36  ;;  %v2914_v39 = vld [vmem:[%s3451_s29 + $0x370] ss:$8 sps:$4 sm:$0xff]   ;;  %v2922_v22 = vld [vmem:[%s3451_s29 + $0x364] ss:$8 sps:$4 sm:$0xff]  }
 0x102   : > { %2265 = vmatprep.subr.bf16.mxu1 %v2852_v40  ;;  %v2917_v43 = vld [vmem:[%s3451_s29 + $0x260] ss:$8 sps:$4 sm:$0xff]   ;;  %v2935_v53 = vld [vmem:[%s3451_s29 + $0x230] ss:$8 sps:$4 sm:$0xff]   ;;  %v2943_v55 = vld [vmem:[%s3451_s29 + $0x224] ss:$8 sps:$4 sm:$0xff]  }
 0x103   : > { %v1562_v18 = vcombine.high %v1552_v14, %v1552_v14  ;;  %2244 = vmatprep.mubr.bf16.mxu0 %v1552_v14  ;;  %v1563_v23 = vcombine.high %v1559_v38, %v1559_v38  ;;  %v2920_v40 = vld [vmem:[%s3451_s29 + $0x360] ss:$8 sps:$4 sm:$0xff]   ;;  %v2938_v54 = vld [vmem:[%s3451_s29 + $0x330] ss:$8 sps:$4 sm:$0xff]   ;;  %v2949_v9 = vld [vmem:[%s3451_s29 + $0x214] ss:$8 sps:$4 sm:$0xff]  }
 0x104   : > { %2225 = vmatpush1.bf16.msra.mxu0 %v2854_v41  ;;  %v2925_v41 = vld [vmem:[%s3451_s29 + $0x254] ss:$8 sps:$4 sm:$0xff]   ;;  %v2959_v8 = vld [vmem:[%s3451_s29 + $0x2f0] ss:$8 sps:$4 sm:$0xff]   ;;  %v2965_v13 = vld [vmem:[%s3451_s29 + $0x2e0] ss:$8 sps:$4 sm:$0xff]  }
 0x105   : > { %2266 = vmatpush1.bf16.msra.mxu1 %v2855_v44  ;;  %2226 = vmatprep.subr.bf16.mxu0 %v2856_v45  ;;  %v2928_v44 = vld [vmem:[%s3451_s29 + $0x354] ss:$8 sps:$4 sm:$0xff]   ;;  %v2923_v45 = vld [vmem:[%s3451_s29 + $0x250] ss:$8 sps:$4 sm:$0xff]   ;;  %v2982_v19 = vld [vmem:[%s3451_s29 + $0x3c4] ss:$8 sps:$4 sm:$0xff]  }
 0x106   : > { %2267 = vmatprep.subr.bf16.mxu1 %v2858_v46  ;;  %2285 = vmatprep.mubr.bf16.mxu1 %v1562_v18  ;;  %v2926_v46 = vld [vmem:[%s3451_s29 + $0x350] ss:$8 sps:$4 sm:$0xff]   ;;  %v2961_v4 = vld [vmem:[%s3451_s29 + $0x2f4] ss:$8 sps:$4 sm:$0xff]   ;;  %v2979_v18 = vld [vmem:[%s3451_s29 + $0x2c4] ss:$8 sps:$4 sm:$0xff]  }
 0x107   : > { %v2973_v14 = vld [vmem:[%s3451_s29 + $0x2d4] ss:$8 sps:$4 sm:$0xff]   ;;  %v2989_v34 = vld [vmem:[%s3451_s29 + $0x2a0] ss:$8 sps:$4 sm:$0xff]   ;;  %vm2428_vm15 = vcmask 1040384   ;;  %vm2431_vm1 = vcmask 1041409  }
 0x108   : > { %2227 = vmatpush1.bf16.msra.mxu0 %v2860_v47  ;;  %v2931_v47 = vld [vmem:[%s3451_s29 + $0x244] ss:$8 sps:$4 sm:$0xff]   ;;  %vm2429_vm0 = vsmask.f32 256  ;;  %vm2432_vm2 = vsmask.f32 1280 }
 0x109   : > { %2268 = vmatpush1.bf16.msra.mxu1 %v2861_v48  ;;  %2228 = vmatprep.subr.bf16.mxu0 %v2862_v49  ;;  %v2934_v48 = vld [vmem:[%s3451_s29 + $0x344] ss:$8 sps:$4 sm:$0xff]   ;;  %v2929_v49 = vld [vmem:[%s3451_s29 + $0x240] ss:$8 sps:$4 sm:$0xff]   ;;  %vm2430_vm3 = vmand %vm2428_vm15, %vm2429_vm0 }
 0x10a   : > { %2269 = vmatprep.subr.bf16.mxu1 %v2864_v50  ;;  %v2932_v50 = vld [vmem:[%s3451_s29 + $0x340] ss:$8 sps:$4 sm:$0xff]   ;;  %vm2433_vm4 = vmand %vm2431_vm1, %vm2432_vm2 }
 0x10b   : > { %vm2434_vm5 = vmor %vm2433_vm4, %vm2430_vm3 }
 0x10c   : > { %2229 = vmatpush2.bf16.msra.mxu0 %v2866_v51  ;;  %v2937_v51 = vld [vmem:[%s3451_s29 + $0x234] ss:$8 sps:$4 sm:$0xff]  }
 0x10d   : > { %2270 = vmatpush2.bf16.msra.mxu1 %v2867_v52  ;;  %2230 = vmatprep.subr.bf16.mxu0 %v2868_v56  ;;  %v2940_v52 = vld [vmem:[%s3451_s29 + $0x334] ss:$8 sps:$4 sm:$0xff]   ;;  %v2946_v56 = vld [vmem:[%s3451_s29 + $0x324] ss:$8 sps:$4 sm:$0xff]  }
 0x10e   : > { %2271 = vmatprep.subr.bf16.mxu1 %v2870_v57  ;;  %v2941_v57 = vld [vmem:[%s3451_s29 + $0x220] ss:$8 sps:$4 sm:$0xff]  }
 0x110   : > { %2231 = vmatpush2.bf16.msra.mxu0 %v2872_v58  ;;  %v2944_v58 = vld [vmem:[%s3451_s29 + $0x320] ss:$8 sps:$4 sm:$0xff]  }
 0x111   : > { %2272 = vmatpush2.bf16.msra.mxu1 %v2873_v60  ;;  %2232 = vmatprep.subr.bf16.mxu0 %v2874_v61  ;;  %v2952_v60 = vld [vmem:[%s3451_s29 + $0x314] ss:$8 sps:$4 sm:$0xff]   ;;  %v2947_v61 = vld [vmem:[%s3451_s29 + $0x210] ss:$8 sps:$4 sm:$0xff]  }
 0x112   : > { %2273 = vmatprep.subr.bf16.mxu1 %v2876_v62  ;;  %v2950_v62 = vld [vmem:[%s3451_s29 + $0x310] ss:$8 sps:$4 sm:$0xff]  }
 0x114   : > { %2233 = vmatpush2.bf16.msra.mxu0 %v2878_v63  ;;  %v2955_v63 = vld [vmem:[%s3451_s29 + $0x204] ss:$8 sps:$4 sm:$0xff]  }
 0x115   : > { %2274 = vmatpush2.bf16.msra.mxu1 %v2879_v0  ;;  %2234 = vmatprep.subr.bf16.mxu0 %v2880_v2  ;;  %v2958_v0 = vld [vmem:[%s3451_s29 + $0x304] ss:$8 sps:$4 sm:$0xff]   ;;  %v2953_v2 = vld [vmem:[%s3451_s29 + $0x200] ss:$8 sps:$4 sm:$0xff]  }
 0x116   : > { %2275 = vmatprep.subr.bf16.mxu1 %v2882_v3  ;;  %v2956_v3 = vld [vmem:[%s3451_s29 + $0x300] ss:$8 sps:$4 sm:$0xff]  }
 0x118   : > { %2235 = vmatpush2.bf16.msra.mxu0 %v2884_v7  ;;  %v2964_v7 = vld [vmem:[%s3451_s29 + $0x3f4] ss:$8 sps:$4 sm:$0xff]  }
 0x119   : > { %2276 = vmatpush2.bf16.msra.mxu1 %v2885_v10  ;;  %2236 = vmatprep.subr.bf16.mxu0 %v2886_v11  ;;  %v2962_v10 = vld [vmem:[%s3451_s29 + $0x3f0] ss:$8 sps:$4 sm:$0xff]   ;;  %v2967_v11 = vld [vmem:[%s3451_s29 + $0x2e4] ss:$8 sps:$4 sm:$0xff]  }
 0x11a   : > { %2277 = vmatprep.subr.bf16.mxu1 %v2888_v12  ;;  %v2970_v12 = vld [vmem:[%s3451_s29 + $0x3e4] ss:$8 sps:$4 sm:$0xff]  }
 0x11c   : > { %2237 = vmatpush2.bf16.msra.mxu0 %v2890_v24  ;;  %v2968_v24 = vld [vmem:[%s3451_s29 + $0x3e0] ss:$8 sps:$4 sm:$0xff]  }
 0x11d   : > { %2278 = vmatpush2.bf16.msra.mxu1 %v2891_v5  ;;  %2238 = vmatprep.subr.bf16.mxu0 %v2892_v25  ;;  %v2976_v5 = vld [vmem:[%s3451_s29 + $0x3d4] ss:$8 sps:$4 sm:$0xff]   ;;  %v2971_v25 = vld [vmem:[%s3451_s29 + $0x2d0] ss:$8 sps:$4 sm:$0xff]  }
 0x11e   : > { %2279 = vmatprep.subr.bf16.mxu1 %v2894_v15  ;;  %v2974_v15 = vld [vmem:[%s3451_s29 + $0x3d0] ss:$8 sps:$4 sm:$0xff]  }
 0x120   : > { %2239 = vmatpush2.bf16.msra.mxu0 %v2896_v20  ;;  %v2977_v20 = vld [vmem:[%s3451_s29 + $0x2c0] ss:$8 sps:$4 sm:$0xff]  }
 0x121   : > { %2280 = vmatpush2.bf16.msra.mxu1 %v2897_v21  ;;  %2240 = vmatprep.subr.bf16.mxu0 %v2898_v26  ;;  %v2980_v21 = vld [vmem:[%s3451_s29 + $0x3c0] ss:$8 sps:$4 sm:$0xff]   ;;  %v2985_v26 = vld [vmem:[%s3451_s29 + $0x2b4] ss:$8 sps:$4 sm:$0xff]  }
 0x122   : > { %2281 = vmatprep.subr.bf16.mxu1 %v2900_v27  ;;  %v2988_v27 = vld [vmem:[%s3451_s29 + $0x3b4] ss:$8 sps:$4 sm:$0xff]  }
 0x124   : > { %2241 = vmatpush2.bf16.msra.mxu0 %v2902_v28  ;;  %v2983_v28 = vld [vmem:[%s3451_s29 + $0x2b0] ss:$8 sps:$4 sm:$0xff]  }
 0x125   : > { %2282 = vmatpush2.bf16.msra.mxu1 %v2903_v33  ;;  %2242 = vmatprep.subr.bf16.mxu0 %v2904_v6  ;;  %v2986_v33 = vld [vmem:[%s3451_s29 + $0x3b0] ss:$8 sps:$4 sm:$0xff]   ;;  %v2991_v6 = vld [vmem:[%s3451_s29 + $0x2a4] ss:$8 sps:$4 sm:$0xff]  }
 0x126   : > { %2283 = vmatprep.subr.bf16.mxu1 %v2906_v29  ;;  %v2994_v29 = vld [vmem:[%s3451_s29 + $0x3a4] ss:$8 sps:$4 sm:$0xff]  }
 0x128   : > { %2243 = vmatpush2.bf16.msra.mxu0 %v2908_v35  ;;  %v2992_v35 = vld [vmem:[%s3451_s29 + $0x3a0] ss:$8 sps:$4 sm:$0xff]  }
 0x129   : > { %2284 = vmatpush2.bf16.msra.mxu1 %v2909_v30  ;;  %2294 = vmatprep.subr.bf16.mxu0 %v2913_v31  ;;  %v3000_v30 = vld [vmem:[%s3451_s29 + $0x394] ss:$8 sps:$4 sm:$0xff]   ;;  %v2995_v31 = vld [vmem:[%s3451_s29 + $0x290] ss:$8 sps:$4 sm:$0xff]  }
 0x12a   : > { %2335 = vmatprep.subr.bf16.mxu1 %v2916_v37  ;;  %v2998_v37 = vld [vmem:[%s3451_s29 + $0x390] ss:$8 sps:$4 sm:$0xff]  }
 0x12b   : > { %2245 = vmatmul.mubr.bf16.vlgmr.msra.gmra.mxu0 %v1538_v36  ;;  %v2997_v36 = vld [vmem:[%s3451_s29 + $0x294] ss:$8 sps:$4 sm:$0xff]  }
 0x12c   : > { %2286 = vmatmul.mubr.bf16.vlgmr.msra.gmra.mxu1 %v1560_v16  ;;  %2295 = vmatpush1.bf16.msra.mxu0 %v2911_v17  ;;  %v3006_v16 = vld [vmem:[%s3451_s29 + $0x384] ss:$8 sps:$4 sm:$0xff]   ;;  %v1545_v17 = vrot.slane %v3653_v32, %v3634_v1 }
 0x12d   : > { %2336 = vmatpush1.bf16.msra.mxu1 %v2914_v39  ;;  %2296 = vmatprep.subr.bf16.mxu0 %v2919_v42  ;;  %v3001_v39 = vld [vmem:[%s3451_s29 + $0x280] ss:$8 sps:$4 sm:$0xff]  }
 0x12e   : > { %2337 = vmatprep.subr.bf16.mxu1 %v2922_v22  ;;  %2326 = vmatprep.mubr.bf16.mxu0 %v1559_v38  ;;  %v3003_v38 = vld [vmem:[%s3451_s29 + $0x284] ss:$8 sps:$4 sm:$0xff]   ;;  %v3004_v42 = vld [vmem:[%s3451_s29 + $0x380] ss:$8 sps:$4 sm:$0xff]   ;;  %v1561_v22 = vcombine.high %v1545_v17, %v1545_v17 }
 0x12f   : > { %2367 = vmatprep.mubr.bf16.mxu1 %v1563_v23 }
 0x130   : > { %2297 = vmatpush1.bf16.msra.mxu0 %v2917_v43 }
 0x131   : > { %2338 = vmatpush1.bf16.msra.mxu1 %v2920_v40  ;;  %2298 = vmatprep.subr.bf16.mxu0 %v2925_v41 }
 0x132   : > { %2339 = vmatprep.subr.bf16.mxu1 %v2928_v44 }
 0x134   : > { %2299 = vmatpush1.bf16.msra.mxu0 %v2923_v45 }
 0x135   : > { %2340 = vmatpush1.bf16.msra.mxu1 %v2926_v46  ;;  %2300 = vmatprep.subr.bf16.mxu0 %v2931_v47 }
 0x136   : > { %2341 = vmatprep.subr.bf16.mxu1 %v2934_v48  ;;  %v2380_v48 = vsub.s32 0, %v3626_v59 }
 0x138   : > { %2301 = vmatpush1.bf16.msra.mxu0 %v2929_v49  ;;  %v2376_v49 = vld [vmem:[%s887_s14] sm:$0x3] }
 0x139   : > { %2342 = vmatpush1.bf16.msra.mxu1 %v2932_v50  ;;  %2302 = vmatprep.subr.bf16.mxu0 %v2937_v51  ;;  %v2384_v50 = vsub.s32 1, %v3626_v59 }
 0x13a   : > { %2343 = vmatprep.subr.bf16.mxu1 %v2940_v52 }
 0x13c   : > { %2303 = vmatpush1.bf16.msra.mxu0 %v2935_v53  ;;  %v2390_v53 = vld [vmem:[%s892_s24] sm:$0x3] }
 0x13d   : > { %2344 = vmatpush1.bf16.msra.mxu1 %v2938_v54  ;;  %2304 = vmatprep.subr.bf16.mxu0 %v2943_v55 }
 0x13e   : > { %2345 = vmatprep.subr.bf16.mxu1 %v2946_v56  ;;  %v2381_v56 = vrot.slane %v2376_v49, %v2380_v48 }
 0x140   : > { %2305 = vmatpush1.bf16.msra.mxu0 %v2941_v57 }
 0x141   : > { %2346 = vmatpush1.bf16.msra.mxu1 %v2944_v58  ;;  %2306 = vmatprep.subr.bf16.mxu0 %v2949_v9 }
 0x142   : > { %2347 = vmatprep.subr.bf16.mxu1 %v2952_v60  ;;  %v2395_v60 = vrot.slane %v2390_v53, %v2380_v48 }
 0x144   : > { %2307 = vmatpush1.bf16.msra.mxu0 %v2947_v61 }
 0x145   : > { %2348 = vmatpush1.bf16.msra.mxu1 %v2950_v62  ;;  %2308 = vmatprep.subr.bf16.mxu0 %v2955_v63  ;;  %v2385_v62 = vrot.slane %v2376_v49, %v2384_v50 }
 0x146   : > { %2349 = vmatprep.subr.bf16.mxu1 %v2958_v0 }
 0x148   : > { %2309 = vmatpush1.bf16.msra.mxu0 %v2953_v2 }
 0x149   : > { %2350 = vmatpush1.bf16.msra.mxu1 %v2956_v3  ;;  %2310 = vmatprep.subr.bf16.mxu0 %v2961_v4  ;;  %v2399_v3 = vrot.slane %v2390_v53, %v2384_v50 }
 0x14a   : > { %2351 = vmatprep.subr.bf16.mxu1 %v2964_v7 }
 0x14c   : > { %2311 = vmatpush2.bf16.msra.mxu0 %v2959_v8 }
 0x14d   : > { %2352 = vmatpush2.bf16.msra.mxu1 %v2962_v10  ;;  %2312 = vmatprep.subr.bf16.mxu0 %v2967_v11 }
 0x14e   : > { %2353 = vmatprep.subr.bf16.mxu1 %v2970_v12 }
 0x150   : > { %2313 = vmatpush2.bf16.msra.mxu0 %v2965_v13 }
 0x151   : > { %2354 = vmatpush2.bf16.msra.mxu1 %v2968_v24  ;;  %2314 = vmatprep.subr.bf16.mxu0 %v2973_v14 }
 0x152   : > { %2355 = vmatprep.subr.bf16.mxu1 %v2976_v5 }
 0x154   : > { %2315 = vmatpush2.bf16.msra.mxu0 %v2971_v25 }
 0x155   : > { %2356 = vmatpush2.bf16.msra.mxu1 %v2974_v15  ;;  %2316 = vmatprep.subr.bf16.mxu0 %v2979_v18  ;;  %v2435_v15 = vld [vmem:[%s3449_s8] sm:$0x3] }
 0x156   : > { %2357 = vmatprep.subr.bf16.mxu1 %v2982_v19 }
 0x158   : > { %2317 = vmatpush2.bf16.msra.mxu0 %v2977_v20 }
 0x159   : > { %2358 = vmatpush2.bf16.msra.mxu1 %v2980_v21  ;;  %2318 = vmatprep.subr.bf16.mxu0 %v2985_v26 }
 0x15a   : > { %2359 = vmatprep.subr.bf16.mxu1 %v2988_v27 }
 0x15c   : > { %2319 = vmatpush2.bf16.msra.mxu0 %v2983_v28 }
 0x15d   : > { %2360 = vmatpush2.bf16.msra.mxu1 %v2986_v33  ;;  %2320 = vmatprep.subr.bf16.mxu0 %v2991_v6 }
 0x15e   : > { %2361 = vmatprep.subr.bf16.mxu1 %v2994_v29 }
 0x160   : > { %2321 = vmatpush2.bf16.msra.mxu0 %v2989_v34 }
 0x161   : > { %2362 = vmatpush2.bf16.msra.mxu1 %v2992_v35  ;;  %2322 = vmatprep.subr.bf16.mxu0 %v2997_v36 }
 0x162   : > { %2363 = vmatprep.subr.bf16.mxu1 %v3000_v30 }
 0x164   : > { %2323 = vmatpush2.bf16.msra.mxu0 %v2995_v31 }
 0x165   : > { %2364 = vmatpush2.bf16.msra.mxu1 %v2998_v37  ;;  %2324 = vmatprep.subr.bf16.mxu0 %v3003_v38 }
 0x166   : > { %2365 = vmatprep.subr.bf16.mxu1 %v3006_v16 }
 0x168   : > { %2325 = vmatpush2.bf16.msra.mxu0 %v3001_v39 }
 0x169   : > { %2366 = vmatpush2.bf16.msra.mxu1 %v3004_v42 }
 0x16b   : > { %2327 = vmatmul.mubr.bf16.vlgmr.msra.gmra.mxu0 %v1545_v17 }
 0x16c   : > { %2368 = vmatmul.mubr.bf16.vlgmr.msra.gmra.mxu1 %v1561_v22 }
 0x1eb   : > { %v2246_v23 = vpop.f32.mrf.mxu0 }
 0x1ec   : > { %v2287_v43 = vpop.f32.mrf.mxu1 }
 0x1ed   : > { %v2288_v40 = vadd.f32 %v2287_v43, %v2246_v23  ;;  %v2248_v41 = vpop.f32.mrf.mxu0 }
 0x1ee   : > { %v2289_v44 = vpop.f32.mrf.mxu1 }
 0x1ef   : > { %v2250_v45 = vpop.f32.mrf.mxu0  ;;  %v2290_v54 = vadd.f32 %v2289_v44, %v2248_v41 }
 0x1f0   : > { %v2291_v32 = vpop.f32.mrf.mxu1 }
 0x1f1   : > { %v2251_v46 = vpop.f32.mrf.mxu0 }
 0x1f2   : > { %v2292_v47 = vpop.f32.mrf.mxu1 }
 0x22b   : > { %v2328_v51 = vpop.f32.mrf.mxu0 }
 0x22c   : > { %v2369_v52 = vpop.f32.mrf.mxu1  ;;  %v2329_v55 = vadd.f32 %v2328_v51, %v2288_v40 }
 0x22d   : > { %v2330_v57 = vpop.f32.mrf.mxu0 }
 0x22e   : > { %v2371_v58 = vpop.f32.mrf.mxu1  ;;  %v2370_v9 = vadd.f32 %v2369_v52, %v2329_v55  ;;  %v2331_v61 = vadd.f32 %v2330_v57, %v2290_v54 }
 0x22f   : > { %v2332_v63 = vpop.f32.mrf.mxu0 }
 0x230   : > { %v2373_v0 = vpop.f32.mrf.mxu1  ;;  %v2388_v2 = vmul.f32 %v2381_v56, %v2370_v9  ;;  %v2372_v59 = vadd.f32 %v2371_v58, %v2331_v61 }
 0x231   : > { %v2333_v4 = vpop.f32.mrf.mxu0 }
 0x232   : > { %v2374_v7 = vpop.f32.mrf.mxu1  ;;  %v2402_v8 = vadd.f32 %v2395_v60, %v2388_v2  ;;  %v2389_v10 = vmul.f32 %v2385_v62, %v2372_v59 }
 0x234   : > { %v2404_v11 = vmax.f32 %v2402_v8, 0.0  ;;  %v2403_v12 = vadd.f32 %v2399_v3, %v2389_v10 }
 0x236   : > { %v2405_v13 = vmax.f32 %v2403_v12, 0.0  ;;  %v2406_v24 = vmin.f32 %v2404_v11, 6.0 }
 0x238   : > { %v2407_v14 = vmin.f32 %v2405_v13, 6.0 }
 0x23a   : > { %v2731_v5 = vpack.c.bf16 %v2407_v14, %v2406_v24 }
 0x23c   : > { %v2419_v25 = vrot.slane %v2731_v5, %v3634_v1 }
 0x23e   : > { %v2426_v18 = vrot.slane %v2419_v25, %v3634_v1 }
 0x240   : > { %v2436_v19 = vsel %vm2434_vm5, %v2426_v18, %v2435_v15 }
 0x241   : > { %2437 = vst [vmem:[%s3449_s8] sm:$0x3] %v2436_v19 }
 0x242 PF: > { %s17_s30 = sadd.s32 1, %s3061_s30   ;;  %s3791_s27 = sld [smem:[#allocation4_spill]] }
 0x243   : > { %p14_p13 = scmp.ge.s32.totalorder %s17_s30, 10   ;;  %s3792_s22 = sld [smem:[#allocation5_spill]] }
 0x244   : > { %s3793_s29 = sld [smem:[#allocation6_spill]]  ;;  %s3794_s24 = smov %s3041_s25 }
 0x245   : > { %s3795_s25 = smov %s3158_s12  ;;  %s3796_s26 = smov %s3053_s28 }
 0x246   :  { %16 = sbr.rel (!%p14_p13) target bundleno = 6 (0x6), region = 134 }
 0x249   : > { %s3797_s28 = smov %s3792_s22 }

// kernel: mobilenetv1_forward.29
= control target key start
LH: loop header
LB: loop body
LE: loop exit
PB: predicated region body
PF: predicated region fallthrough
CT: control target
= control target key end

     0   :  { %s1215_s1 = inlined_call_operand.vmem [shape: bf16[1024,128], index: 1, kind: input, shape index: {}]   ;;  %s1216_s0 = inlined_call_operand.vmem [shape: bf16[8,1024], index: 0, kind: input, shape index: {}]   ;;  %s1217_s2 = inlined_call_operand.vmem [shape: f32[1,128], index: 2, kind: input, shape index: {}]   ;;  %s1218_s3 = inlined_call_operand.vmem [shape: f32[1,128], index: 3, kind: input, shape index: {}]   ;;  %s1219_s4 = inlined_call_operand.vmem [shape: f32[8,128], index: 4, kind: output, shape index: {}]  }
   0x1   :  { %v905_v0 = vld [vmem:[%s1215_s1 + $0x78] sm:$0xff]   ;;  %v909_v4 = vld [vmem:[%s1215_s1 + $0x70] sm:$0xff]   ;;  %v913_v8 = vld [vmem:[%s1215_s1 + $0x68] sm:$0xff]  }
   0x2   :  { %v906_v1 = vld [vmem:[%s1215_s1 + $0xf8] sm:$0xff]   ;;  %817 = vmatprep.subr.bf16.mxu0 %v905_v0  ;;  %v910_v5 = vld [vmem:[%s1215_s1 + $0xf0] sm:$0xff]   ;;  %v914_v9 = vld [vmem:[%s1215_s1 + $0xe8] sm:$0xff]  }
   0x3   :  { %v907_v2 = vld [vmem:[%s1215_s1 + $0x38] sm:$0xff]   ;;  %839 = vmatprep.subr.bf16.mxu1 %v906_v1  ;;  %v911_v6 = vld [vmem:[%s1215_s1 + $0x30] sm:$0xff]   ;;  %v915_v10 = vld [vmem:[%s1215_s1 + $0x28] sm:$0xff]  }
   0x4   :  { %v908_v3 = vld [vmem:[%s1215_s1 + $0xb8] sm:$0xff]   ;;  %818 = vmatpush3.bf16.msra.mxu0 %v907_v2  ;;  %v912_v7 = vld [vmem:[%s1215_s1 + $0xb0] sm:$0xff]   ;;  %v916_v11 = vld [vmem:[%s1215_s1 + $0xa8] sm:$0xff]  }
   0x5   :  { %840 = vmatpush3.bf16.msra.mxu1 %v908_v3  ;;  %819 = vmatprep.subr.bf16.mxu0 %v909_v4  ;;  %v917_v12 = vld [vmem:[%s1215_s1 + $0x60] sm:$0xff]   ;;  %v921_v16 = vld [vmem:[%s1215_s1 + $0x58] sm:$0xff]   ;;  %v925_v20 = vld [vmem:[%s1215_s1 + $0x50] sm:$0xff]  }
   0x6   :  { %841 = vmatprep.subr.bf16.mxu1 %v910_v5  ;;  %v918_v13 = vld [vmem:[%s1215_s1 + $0xe0] sm:$0xff]   ;;  %v922_v17 = vld [vmem:[%s1215_s1 + $0xd8] sm:$0xff]   ;;  %v926_v21 = vld [vmem:[%s1215_s1 + $0xd0] sm:$0xff]  }
   0x7   :  { %v919_v14 = vld [vmem:[%s1215_s1 + $0x20] sm:$0xff]   ;;  %v923_v18 = vld [vmem:[%s1215_s1 + $0x18] sm:$0xff]   ;;  %v927_v22 = vld [vmem:[%s1215_s1 + $0x10] sm:$0xff]  }
   0x8   :  { %820 = vmatpush3.bf16.msra.mxu0 %v911_v6  ;;  %v920_v15 = vld [vmem:[%s1215_s1 + $0xa0] sm:$0xff]   ;;  %v924_v19 = vld [vmem:[%s1215_s1 + $0x98] sm:$0xff]   ;;  %v928_v23 = vld [vmem:[%s1215_s1 + $0x90] sm:$0xff]  }
   0x9   :  { %842 = vmatpush3.bf16.msra.mxu1 %v912_v7  ;;  %821 = vmatprep.subr.bf16.mxu0 %v913_v8  ;;  %v929_v24 = vld [vmem:[%s1215_s1 + $0x48] sm:$0xff]   ;;  %v933_v28 = vld [vmem:[%s1215_s1 + $0x40] sm:$0xff]   ;;  %v941_v38 = vld [vmem:[%s1215_s1 + $0x178] sm:$0xff]  }
   0xa   :  { %843 = vmatprep.subr.bf16.mxu1 %v914_v9  ;;  %v930_v25 = vld [vmem:[%s1215_s1 + $0xc8] sm:$0xff]   ;;  %v934_v29 = vld [vmem:[%s1215_s1 + $0xc0] sm:$0xff]   ;;  %v942_v39 = vld [vmem:[%s1215_s1 + $0x1f8] sm:$0xff]  }
   0xb   :  { %v931_v26 = vld [vmem:[%s1215_s1 + $0x8] sm:$0xff]   ;;  %v935_v30 = vld [vmem:[%s1215_s1] sm:$0xff]   ;;  %v943_v40 = vld [vmem:[%s1215_s1 + $0x138] sm:$0xff]  }
   0xc   :  { %822 = vmatpush3.bf16.msra.mxu0 %v915_v10  ;;  %v932_v27 = vld [vmem:[%s1215_s1 + $0x88] sm:$0xff]   ;;  %v936_v31 = vld [vmem:[%s1215_s1 + $0x80] sm:$0xff]   ;;  %v944_v41 = vld [vmem:[%s1215_s1 + $0x1b8] sm:$0xff]  }
   0xd   :  { %844 = vmatpush3.bf16.msra.mxu1 %v916_v11  ;;  %823 = vmatprep.subr.bf16.mxu0 %v917_v12  ;;  %v18_v32 = vld [vmem:[%s1216_s0] sm:$0xff]  ;;  %v19_v33 = vld [vmem:[%s1216_s0 + $0x8] sm:$0xff]  ;;  %v945_v42 = vld [vmem:[%s1215_s1 + $0x170] sm:$0xff]  }
   0xe   :  { %845 = vmatprep.subr.bf16.mxu1 %v918_v13  ;;  %v743_v34 = vcombine.low %v18_v32, %v18_v32  ;;  %v744_v35 = vcombine.high %v18_v32, %v18_v32  ;;  %v745_v36 = vcombine.low %v19_v33, %v19_v33  ;;  %v746_v37 = vcombine.high %v19_v33, %v19_v33  ;;  %v946_v43 = vld [vmem:[%s1215_s1 + $0x1f0] sm:$0xff]   ;;  %v949_v46 = vld [vmem:[%s1215_s1 + $0x168] sm:$0xff]   ;;  %v953_v50 = vld [vmem:[%s1215_s1 + $0x160] sm:$0xff]  }
   0xf   :  { %v947_v44 = vld [vmem:[%s1215_s1 + $0x130] sm:$0xff]   ;;  %v950_v47 = vld [vmem:[%s1215_s1 + $0x1e8] sm:$0xff]   ;;  %v954_v51 = vld [vmem:[%s1215_s1 + $0x1e0] sm:$0xff]  }
  0x10   :  { %824 = vmatpush3.bf16.msra.mxu0 %v919_v14  ;;  %594 = vmatprep.mubr.bf16.mxu0 %v744_v35  ;;  %v948_v45 = vld [vmem:[%s1215_s1 + $0x1b0] sm:$0xff]   ;;  %v951_v48 = vld [vmem:[%s1215_s1 + $0x128] sm:$0xff]   ;;  %v955_v52 = vld [vmem:[%s1215_s1 + $0x120] sm:$0xff]  }
  0x11   :  { %846 = vmatpush3.bf16.msra.mxu1 %v920_v15  ;;  %825 = vmatprep.subr.bf16.mxu0 %v921_v16  ;;  %v952_v49 = vld [vmem:[%s1215_s1 + $0x1a8] sm:$0xff]   ;;  %v956_v53 = vld [vmem:[%s1215_s1 + $0x1a0] sm:$0xff]   ;;  %v957_v54 = vld [vmem:[%s1215_s1 + $0x158] sm:$0xff]  }
  0x12   :  { %847 = vmatprep.subr.bf16.mxu1 %v922_v17  ;;  %634 = vmatprep.mubr.bf16.mxu1 %v746_v37  ;;  %v958_v55 = vld [vmem:[%s1215_s1 + $0x1d8] sm:$0xff]   ;;  %v961_v58 = vld [vmem:[%s1215_s1 + $0x150] sm:$0xff]   ;;  %v965_v62 = vld [vmem:[%s1215_s1 + $0x148] sm:$0xff]  }
  0x13   :  { %v959_v56 = vld [vmem:[%s1215_s1 + $0x118] sm:$0xff]   ;;  %v962_v59 = vld [vmem:[%s1215_s1 + $0x1d0] sm:$0xff]   ;;  %v966_v63 = vld [vmem:[%s1215_s1 + $0x1c8] sm:$0xff]  }
  0x14   :  { %826 = vmatpush3.bf16.msra.mxu0 %v923_v18  ;;  %v960_v57 = vld [vmem:[%s1215_s1 + $0x198] sm:$0xff]   ;;  %v963_v60 = vld [vmem:[%s1215_s1 + $0x110] sm:$0xff]   ;;  %v967_v0 = vld [vmem:[%s1215_s1 + $0x108] sm:$0xff]  }
  0x15   :  { %848 = vmatpush3.bf16.msra.mxu1 %v924_v19  ;;  %827 = vmatprep.subr.bf16.mxu0 %v925_v20  ;;  %v964_v61 = vld [vmem:[%s1215_s1 + $0x190] sm:$0xff]   ;;  %v968_v1 = vld [vmem:[%s1215_s1 + $0x188] sm:$0xff]   ;;  %v969_v2 = vld [vmem:[%s1215_s1 + $0x140] sm:$0xff]  }
  0x16   :  { %849 = vmatprep.subr.bf16.mxu1 %v926_v21  ;;  %v970_v3 = vld [vmem:[%s1215_s1 + $0x1c0] sm:$0xff]   ;;  %v20_v6 = vld [vmem:[%s1216_s0 + $0x10] sm:$0xff]  ;;  %v21_v9 = vld [vmem:[%s1216_s0 + $0x18] sm:$0xff] }
  0x17   :  { %v971_v4 = vld [vmem:[%s1215_s1 + $0x100] sm:$0xff]   ;;  %v747_v7 = vcombine.low %v20_v6, %v20_v6  ;;  %v748_v8 = vcombine.high %v20_v6, %v20_v6  ;;  %v749_v10 = vcombine.low %v21_v9, %v21_v9  ;;  %v750_v11 = vcombine.high %v21_v9, %v21_v9 }
  0x18   :  { %828 = vmatpush3.bf16.msra.mxu0 %v927_v22  ;;  %v972_v5 = vld [vmem:[%s1215_s1 + $0x180] sm:$0xff]  }
  0x19   :  { %850 = vmatpush3.bf16.msra.mxu1 %v928_v23  ;;  %829 = vmatprep.subr.bf16.mxu0 %v929_v24  ;;  %v815_v32 = vld [vmem:[%s1217_s2] ss:$0 sm:$0xff] }
  0x1a   :  { %851 = vmatprep.subr.bf16.mxu1 %v930_v25 }
  0x1c   :  { %830 = vmatpush3.bf16.msra.mxu0 %v931_v26 }
  0x1d   :  { %852 = vmatpush3.bf16.msra.mxu1 %v932_v27  ;;  %831 = vmatprep.subr.bf16.mxu0 %v933_v28 }
  0x1e   :  { %853 = vmatprep.subr.bf16.mxu1 %v934_v29 }
  0x20   :  { %832 = vmatpush3.bf16.msra.mxu0 %v935_v30 }
  0x21   :  { %854 = vmatpush3.bf16.msra.mxu1 %v936_v31  ;;  %861 = vmatprep.subr.bf16.mxu0 %v941_v38 }
  0x22   :  { %883 = vmatprep.subr.bf16.mxu1 %v942_v39 }
  0x23   :  { %595 = vmatmul.mubr.bf16.vlgmr.msra.gmra.mxu0 %v743_v34 }
  0x24   :  { %635 = vmatmul.mubr.bf16.vlgmr.msra.gmra.mxu1 %v745_v36  ;;  %862 = vmatpush3.bf16.msra.mxu0 %v943_v40  ;;  %v816_v36 = vld [vmem:[%s1218_s3] ss:$0 sm:$0xff] }
  0x25   :  { %884 = vmatpush3.bf16.msra.mxu1 %v944_v41  ;;  %863 = vmatprep.subr.bf16.mxu0 %v945_v42 }
  0x26   :  { %885 = vmatprep.subr.bf16.mxu1 %v946_v43  ;;  %674 = vmatprep.mubr.bf16.mxu0 %v748_v8 }
  0x27   :  { %714 = vmatprep.mubr.bf16.mxu1 %v750_v11 }
  0x28   :  { %864 = vmatpush3.bf16.msra.mxu0 %v947_v44 }
  0x29   :  { %886 = vmatpush3.bf16.msra.mxu1 %v948_v45  ;;  %865 = vmatprep.subr.bf16.mxu0 %v949_v46 }
  0x2a   :  { %887 = vmatprep.subr.bf16.mxu1 %v950_v47 }
  0x2c   :  { %866 = vmatpush3.bf16.msra.mxu0 %v951_v48 }
  0x2d   :  { %888 = vmatpush3.bf16.msra.mxu1 %v952_v49  ;;  %867 = vmatprep.subr.bf16.mxu0 %v953_v50 }
  0x2e   :  { %889 = vmatprep.subr.bf16.mxu1 %v954_v51 }
  0x30   :  { %868 = vmatpush3.bf16.msra.mxu0 %v955_v52 }
  0x31   :  { %890 = vmatpush3.bf16.msra.mxu1 %v956_v53  ;;  %869 = vmatprep.subr.bf16.mxu0 %v957_v54 }
  0x32   :  { %891 = vmatprep.subr.bf16.mxu1 %v958_v55 }
  0x34   :  { %870 = vmatpush3.bf16.msra.mxu0 %v959_v56 }
  0x35   :  { %892 = vmatpush3.bf16.msra.mxu1 %v960_v57  ;;  %871 = vmatprep.subr.bf16.mxu0 %v961_v58 }
  0x36   :  { %893 = vmatprep.subr.bf16.mxu1 %v962_v59 }
  0x38   :  { %872 = vmatpush3.bf16.msra.mxu0 %v963_v60 }
  0x39   :  { %894 = vmatpush3.bf16.msra.mxu1 %v964_v61  ;;  %873 = vmatprep.subr.bf16.mxu0 %v965_v62 }
  0x3a   :  { %895 = vmatprep.subr.bf16.mxu1 %v966_v63 }
  0x3c   :  { %874 = vmatpush3.bf16.msra.mxu0 %v967_v0 }
  0x3d   :  { %896 = vmatpush3.bf16.msra.mxu1 %v968_v1  ;;  %875 = vmatprep.subr.bf16.mxu0 %v969_v2 }
  0x3e   :  { %897 = vmatprep.subr.bf16.mxu1 %v970_v3 }
  0x40   :  { %876 = vmatpush3.bf16.msra.mxu0 %v971_v4 }
  0x41   :  { %898 = vmatpush3.bf16.msra.mxu1 %v972_v5 }
  0x43   :  { %675 = vmatmul.mubr.bf16.vlgmr.msra.gmra.mxu0 %v747_v7 }
  0x44   :  { %715 = vmatmul.mubr.bf16.vlgmr.msra.gmra.mxu1 %v749_v10 }
  0xe3   :  { %v833_v12 = vpop.f32.mrf.mxu0 }
  0xe4   :  { %v855_v13 = vpop.f32.mrf.mxu1 }
  0xe5   :  { %v834_v14 = vpop.f32.mrf.mxu0 }
  0xe6   :  { %v856_v15 = vpop.f32.mrf.mxu1  ;;  %v835_v20 = vadd.f32 %v834_v14, %v833_v12 }
  0xe7   :  { %v836_v16 = vpop.f32.mrf.mxu0  ;;  %v857_v21 = vadd.f32 %v856_v15, %v855_v13 }
  0xe8   :  { %v858_v17 = vpop.f32.mrf.mxu1 }
  0xe9   :  { %v837_v18 = vpop.f32.mrf.mxu0  ;;  %v637_v26 = vadd.f32 %v857_v21, %v835_v20 }
  0xea   :  { %v859_v19 = vpop.f32.mrf.mxu1 }
 0x103   :  { %v877_v22 = vpop.f32.mrf.mxu0 }
 0x104   :  { %v899_v23 = vpop.f32.mrf.mxu1 }
 0x105   :  { %v878_v24 = vpop.f32.mrf.mxu0 }
 0x106   :  { %v900_v25 = vpop.f32.mrf.mxu1  ;;  %v879_v27 = vadd.f32 %v878_v24, %v877_v22 }
 0x107   :  { %v880_v28 = vpop.f32.mrf.mxu0  ;;  %v901_v31 = vadd.f32 %v900_v25, %v899_v23 }
 0x108   :  { %v902_v29 = vpop.f32.mrf.mxu1  ;;  %v677_v30 = vadd.f32 %v879_v27, %v637_v26 }
 0x109   :  { %v881_v33 = vpop.f32.mrf.mxu0 }
 0x10a   :  { %v903_v34 = vpop.f32.mrf.mxu1  ;;  %v717_v35 = vadd.f32 %v901_v31, %v677_v30 }
 0x10c   :  { %v729_v37 = vmul.f32 %v815_v32, %v717_v35 }
 0x10e   :  { %v737_v38 = vadd.f32 %v816_v36, %v729_v37 }
 0x110   :  { %738 = vst [vmem:[%s1219_s4] sm:$0xff] %v737_v38 }

</bundles_post_ra>
